<compile_context>
chip_gen: v7x
topology: tpu7x:2x2x1
jax: 0.10.0
libtpu: 0.0.40
codegen_flags: <defaults>
</compile_context>

<pallas_src>
import functools

import jax
import jax.numpy as jnp
from jax import lax
from jax.experimental import pallas as pl
from jax.experimental.pallas import tpu as pltpu


def _round_up(x, m):
    return -(-x // m) * m


def _cdiv(a, b):
    return -(-a // b)


def _tpu_kind():
    try:
        return jax.devices()[0].device_kind.lower()
    except Exception:
        return ""


def _rmse_partial_kernel(yhat_ref, y_ref, o_ref, *, d, row_tile, groups,
                         t_inner, valid_rows, num_blocks, needs_mask):
    """Grid = (core_split, reduction_step).

    o_ref is an (8, d) f32 block resident across the inner (reduction) axis —
    one independent accumulator per core-split.  The inner work is pure VPU
    (sub, mul, vreg adds) on (16, d) slabs; no XLU reduce, no scalar RMW, so
    compute stays hidden under the HBM DMA.
    """
    c = pl.program_id(0)
    i = pl.program_id(1)

    @pl.when(i == 0)
    def _init():
        o_ref[...] = jnp.zeros_like(o_ref)

    intended = c * t_inner + i            # flat block index this step wants
    block_row0 = intended * row_tile      # first global row of that block

    def accumulate(row_mask_iota):
        acc = jnp.zeros((8, d), jnp.float32)
        for g in range(groups):           # static slices, trace-time unrolled
            r0 = g * 16
            yh = yhat_ref[pl.ds(r0, 16), :].astype(jnp.float32)
            yy = y_ref[pl.ds(r0, 16), :].astype(jnp.float32)
            dg = yh - yy
            sq = dg * dg
            if row_mask_iota is not None:
                ridx = block_row0 + r0 + row_mask_iota
                sq = jnp.where(ridx < valid_rows, sq, 0.0)
            # Fold the 16-row slab onto the (8, d) accumulator: splitting the
            # sublane axis at 8 is tile-aligned -> plain vector adds.
            acc = acc + sq[:8, :] + sq[8:, :]
        o_ref[...] += acc

    if needs_mask:
        last_full = valid_rows // row_tile    # blocks before this are full

        @pl.when(intended < last_full)
        def _full():
            accumulate(None)

        @pl.when(jnp.logical_and(intended >= last_full, intended < num_blocks))
        def _partial():
            accumulate(lax.broadcasted_iota(jnp.int32, (16, d), 0))
        # intended >= num_blocks: clamped duplicate block (core-split overhang)
        # — contributes nothing.
    else:
        accumulate(None)


def rmse_loss(yhat, y, eps=1e-6, *, lane_width=512, max_row_tile=None,
              core_splits=None, small_threshold=1 << 18):
    assert yhat.shape == y.shape, "yhat and y must have the same shape"
    total = int(yhat.size)
    assert total > 0

    # ---------------- Small-input fast path --------------------------------
    # At this scale the pallas_call launch + per-step overhead dwarfs the work.
    if total < small_threshold:
        diff = yhat.astype(jnp.float32) - y.astype(jnp.float32)
        return jnp.sqrt(jnp.mean(diff * diff) + jnp.float32(eps))

    # ---------------- Generation-aware defaults ----------------------------
    kind = _tpu_kind()
    is_v7 = ("v7" in kind) or ("7x" in kind)
    if core_splits is None:
        core_splits = 2 if is_v7 else 1           # v5e/v6e: single TensorCore
    if max_row_tile is None:
        max_row_tile = 2048 if is_v7 else (1024 if "v6" in kind else 512)

    d = lane_width

    # ---------------- Lane-remainder pad only (< d zeros) ------------------
    # Zero pads on BOTH operands contribute 0 to the sum; divisor is the TRUE
    # element count.
    # TODO(synk): XLA still materializes a copy when this tiny pad fires; a
    # fully copy-free path would reduce the <d-element tail in the epilogue.
    yhat_flat = yhat.reshape(-1)
    y_flat = y.reshape(-1)
    lane_pad = (-total) % d
    if lane_pad:
        yhat_flat = jnp.pad(yhat_flat, (0, lane_pad))
        y_flat = jnp.pad(y_flat, (0, lane_pad))
    rows = (total + lane_pad) // d
    yhat2 = yhat_flat.reshape(rows, d)
    y2 = y_flat.reshape(rows, d)

    # ---------------- Tiling ------------------------------------------------
    core_splits = max(1, min(core_splits, _cdiv(rows, 16)))
    rows_per_split = _cdiv(rows, core_splits)
    row_tile = max(16, min(max_row_tile, _round_up(rows_per_split, 16)))
    groups = row_tile // 16
    num_blocks = _cdiv(rows, row_tile)        # blocks whose start is in-bounds
    t = _cdiv(num_blocks, core_splits)        # reduction steps per core-split
    # Row raggedness is handled fully in-kernel (no row padding): the last real
    # block may be partial (row mask) and overhang steps are clamped + skipped.
    needs_mask = (num_blocks * row_tile != rows) or (core_splits * t != num_blocks)

    kernel = functools.partial(
        _rmse_partial_kernel, d=d, row_tile=row_tile, groups=groups,
        t_inner=t, valid_rows=rows, num_blocks=num_blocks,
        needs_mask=needs_mask)

    if core_splits * t == num_blocks:
        def in_map(c, i):
            return (c * t + i, 0)
    else:
        def in_map(c, i):
            # Clamp so every DMA starts in-bounds; the kernel skips the clamped
            # duplicate steps (intended block index >= num_blocks).
            return (jnp.minimum(c * t + i, num_blocks - 1), 0)

    # 2 inputs x 2 pipeline buffers x block, plus output blocks and headroom.
    in_block_bytes = row_tile * d * (yhat2.dtype.itemsize + y2.dtype.itemsize)
    out_bytes = core_splits * 8 * d * 4
    vmem_limit = int(min(max(2 * in_block_bytes + 2 * out_bytes + (4 << 20),
                             16 << 20), 40 << 20))

    grid_spec = pltpu.PrefetchScalarGridSpec(
        num_scalar_prefetch=0,
        grid=(core_splits, t),
        in_specs=[pl.BlockSpec((row_tile, d), in_map),
                  pl.BlockSpec((row_tile, d), in_map)],
        # One resident (8, d) f32 accumulator block per core-split; the inner
        # grid axis is the reduction axis.
        out_specs=pl.BlockSpec((None, 8, d), lambda c, i: (c, 0, 0)),
    )

    def run(dim_sem):
        return pl.pallas_call(
            kernel,
            out_shape=jax.ShapeDtypeStruct((core_splits, 8, d), jnp.float32),
            grid_spec=grid_spec,
            compiler_params=pltpu.CompilerParams(
                dimension_semantics=dim_sem,
                vmem_limit_bytes=vmem_limit),
        )(yhat2, y2)

    # On v7x the leading split axis must be genuinely core-parallel to use both
    # TensorCores; plain "parallel" barely changes codegen.
    fallback = ("parallel", "arbitrary")
    if core_splits > 1 and hasattr(pltpu, "CORE_PARALLEL"):
        preferred = (pltpu.CORE_PARALLEL, pltpu.ARBITRARY)
    else:
        preferred = fallback

    if preferred is fallback:
        partials = run(fallback)
    else:
        try:
            partials = run(preferred)
        except Exception:   # conservative fallback if CORE_PARALLEL rejects
            partials = run(fallback)

    # Tiny epilogue in JAX: cross-lane sum over (core_splits, 8, d), then sqrt.
    # Note: pure f32 accumulation (per-lane running sums + one tree-sum); fine
    # for loss-scale tolerances, expect minor drift only for >~1e8 elements.
    sum_sq = jnp.sum(partials, dtype=jnp.float32)
    mse = sum_sq / jnp.float32(total)
    return jnp.sqrt(mse + jnp.float32(eps))


if __name__ == "__main__":
    key = jax.random.PRNGKey(0)
    k1, k2, k3, k4, k5, k6, k7, k8 = jax.random.split(key, 8)

    def ref_rmse(a, b, eps=1e-6):
        diff = a.astype(jnp.float32) - b.astype(jnp.float32)
        return jnp.sqrt(jnp.mean(diff * diff) + jnp.float32(eps))

    # 1) Small regression-head-like shape, f32 (fast path).
    a = jax.random.normal(k1, (16, 128), dtype=jnp.float32)
    b = jax.random.normal(k2, (16, 128), dtype=jnp.float32)
    out = jax.block_until_ready(rmse_loss(a, b, eps=1e-6))
    assert jnp.allclose(out, ref_rmse(a, b), rtol=1e-5, atol=1e-6), (out, ref_rmse(a, b))

    # 2) Ragged small bf16 shape (fast path).
    a = jax.random.normal(k3, (7, 33), dtype=jnp.bfloat16)
    b = jax.random.normal(k4, (7, 33), dtype=jnp.bfloat16)
    out = jax.block_until_ready(rmse_loss(a, b, eps=1e-6))
    assert jnp.allclose(out, ref_rmse(a, b), rtol=1e-5, atol=1e-6), (out, ref_rmse(a, b))

    # 3) Lane-aligned f32 (Pallas kernel path; exercises the in-kernel row-tail
    #    mask when row_tile does not divide the row count).
    a = jax.random.normal(k5, (384, 1024), dtype=jnp.float32)
    b = jax.random.normal(k6, (384, 1024), dtype=jnp.float32)
    out = jax.block_until_ready(rmse_loss(a, b, eps=1e-6))
    assert jnp.allclose(out, ref_rmse(a, b), rtol=1e-4, atol=1e-6), (out, ref_rmse(a, b))

    # 4) Ragged bf16 (kernel path + <512-element lane pad + in-kernel row mask,
    #    native-dtype streaming with in-vreg f32 cast).
    a = jax.random.normal(k7, (773, 519), dtype=jnp.bfloat16)
    b = jax.random.normal(k8, (773, 519), dtype=jnp.bfloat16)
    out = jax.block_until_ready(rmse_loss(a, b, eps=1e-6))
    assert jnp.allclose(out, ref_rmse(a, b), rtol=1e-4, atol=1e-6), (out, ref_rmse(a, b))

    print("KERNEL_OK")
</pallas_src>

<mosaic_0001>
module attributes {stable_mosaic.version = 11 : i64} {
  func.func @_rmse_partial_kernel(%arg0: i32, %arg1: i32, %arg2: memref<512x512xf32, #tpu.memory_space<vmem>>, %arg3: memref<512x512xf32, #tpu.memory_space<vmem>>, %arg4: memref<1x8x512xf32, #tpu.memory_space<vmem>>) attributes {dimension_semantics = [#tpu.dimension_semantics<parallel>, #tpu.dimension_semantics<arbitrary>], iteration_bounds = array<i64: 1, 2>, scalar_prefetch = 0 : i64, scratch_operands = 0 : i64, tpu.core_type = #tpu.core_type<tc>, window_params = [{transform_indices = @transform_0, window_bounds = array<i64: 512, 512>}, {transform_indices = @transform_1, window_bounds = array<i64: 512, 512>}, {transform_indices = @transform_2, window_bounds = array<i64: 1, 8, 512>}]} {
    %c0_i32 = arith.constant 0 : i32
    %0 = arith.cmpi eq, %arg1, %c0_i32 : i32
    %1 = arith.extui %0 : i1 to i32
    %c0_i32_0 = arith.constant 0 : i32
    %2 = arith.cmpi ne, %1, %c0_i32_0 : i32
    scf.if %2 {
      %cst = arith.constant 0.000000e+00 : f32
      %14 = vector.broadcast %cst : f32 to vector<8x512xf32>
      %c0 = arith.constant 0 : index
      %c0_5 = arith.constant 0 : index
      %c0_6 = arith.constant 0 : index
      %15 = vector.load %arg4[%c0, %c0_5, %c0_6] : memref<1x8x512xf32, #tpu.memory_space<vmem>>, vector<1x8x512xf32>
      %16 = vector.shape_cast %15 : vector<1x8x512xf32> to vector<8x512xf32>
      %17 = vector.shape_cast %14 : vector<8x512xf32> to vector<1x8x512xf32>
      tpu.vector_store %arg4[%c0, %c0_5, %c0_6], %17 {strides = array<i32>} : memref<1x8x512xf32, #tpu.memory_space<vmem>>, vector<1x8x512xf32>,
    } else {
    }
    %c2_i32 = arith.constant 2 : i32
    %3 = arith.muli %arg0, %c2_i32 : i32
    %4 = arith.addi %3, %arg1 : i32
    %c512_i32 = arith.constant 512 : i32
    %5 = arith.muli %4, %c512_i32 : i32
    %c1_i32 = arith.constant 1 : i32
    %6 = arith.cmpi slt, %4, %c1_i32 : i32
    %7 = arith.extui %6 : i1 to i32
    %c0_i32_1 = arith.constant 0 : i32
    %8 = arith.cmpi ne, %7, %c0_i32_1 : i32
    scf.if %8 {
      %cst = arith.constant 0.000000e+00 : f32
      %14 = vector.broadcast %cst : f32 to vector<8x512xf32>
      %c0 = arith.constant 0 : index
      %c0_5 = arith.constant 0 : index
      %15 = vector.load %arg2[%c0, %c0_5] : memref<512x512xf32, #tpu.memory_space<vmem>>, vector<16x512xf32>
      %c0_6 = arith.constant 0 : index
      %c0_7 = arith.constant 0 : index
      %16 = vector.load %arg3[%c0_6, %c0_7] : memref<512x512xf32, #tpu.memory_space<vmem>>, vector<16x512xf32>
      %17 = arith.subf %15, %16 : vector<16x512xf32>
      %18 = arith.mulf %17, %17 : vector<16x512xf32>
      %19 = vector.extract_strided_slice %18 {offsets = [0, 0], sizes = [8, 512], strides = [1, 1]} : vector<16x512xf32> to vector<8x512xf32>
      %20 = arith.addf %14, %19 : vector<8x512xf32>
      %21 = vector.extract_strided_slice %18 {offsets = [8, 0], sizes = [8, 512], strides = [1, 1]} : vector<16x512xf32> to vector<8x512xf32>
      %22 = arith.addf %20, %21 : vector<8x512xf32>
      %c16 = arith.constant 16 : index
      %c0_8 = arith.constant 0 : index
      %23 = vector.load %arg2[%c16, %c0_8] : memref<512x512xf32, #tpu.memory_space<vmem>>, vector<16x512xf32>
      %c16_9 = arith.constant 16 : index
      %c0_10 = arith.constant 0 : index
      %24 = vector.load %arg3[%c16_9, %c0_10] : memref<512x512xf32, #tpu.memory_space<vmem>>, vector<16x512xf32>
      %25 = arith.subf %23, %24 : vector<16x512xf32>
      %26 = arith.mulf %25, %25 : vector<16x512xf32>
      %27 = vector.extract_strided_slice %26 {offsets = [0, 0], sizes = [8, 512], strides = [1, 1]} : vector<16x512xf32> to vector<8x512xf32>
      %28 = arith.addf %22, %27 : vector<8x512xf32>
      %29 = vector.extract_strided_slice %26 {offsets = [8, 0], sizes = [8, 512], strides = [1, 1]} : vector<16x512xf32> to vector<8x512xf32>
      %30 = arith.addf %28, %29 : vector<8x512xf32>
      %c32 = arith.constant 32 : index
      %c0_11 = arith.constant 0 : index
      %31 = vector.load %arg2[%c32, %c0_11] : memref<512x512xf32, #tpu.memory_space<vmem>>, vector<16x512xf32>
      %c32_12 = arith.constant 32 : index
      %c0_13 = arith.constant 0 : index
      %32 = vector.load %arg3[%c32_12, %c0_13] : memref<512x512xf32, #tpu.memory_space<vmem>>, vector<16x512xf32>
      %33 = arith.subf %31, %32 : vector<16x512xf32>
      %34 = arith.mulf %33, %33 : vector<16x512xf32>
      %35 = vector.extract_strided_slice %34 {offsets = [0, 0], sizes = [8, 512], strides = [1, 1]} : vector<16x512xf32> to vector<8x512xf32>
      %36 = arith.addf %30, %35 : vector<8x512xf32>
      %37 = vector.extract_strided_slice %34 {offsets = [8, 0], sizes = [8, 512], strides = [1, 1]} : vector<16x512xf32> to vector<8x512xf32>
      %38 = arith.addf %36, %37 : vector<8x512xf32>
      %c48 = arith.constant 48 : index
      %c0_14 = arith.constant 0 : index
      %39 = vector.load %arg2[%c48, %c0_14] : memref<512x512xf32, #tpu.memory_space<vmem>>, vector<16x512xf32>
      %c48_15 = arith.constant 48 : index
      %c0_16 = arith.constant 0 : index
      %40 = vector.load %arg3[%c48_15, %c0_16] : memref<512x512xf32, #tpu.memory_space<vmem>>, vector<16x512xf32>
      %41 = arith.subf %39, %40 : vector<16x512xf32>
      %42 = arith.mulf %41, %41 : vector<16x512xf32>
      %43 = vector.extract_strided_slice %42 {offsets = [0, 0], sizes = [8, 512], strides = [1, 1]} : vector<16x512xf32> to vector<8x512xf32>
      %44 = arith.addf %38, %43 : vector<8x512xf32>
      %45 = vector.extract_strided_slice %42 {offsets = [8, 0], sizes = [8, 512], strides = [1, 1]} : vector<16x512xf32> to vector<8x512xf32>
      %46 = arith.addf %44, %45 : vector<8x512xf32>
      %c64 = arith.constant 64 : index
      %c0_17 = arith.constant 0 : index
      %47 = vector.load %arg2[%c64, %c0_17] : memref<512x512xf32, #tpu.memory_space<vmem>>, vector<16x512xf32>
      %c64_18 = arith.constant 64 : index
      %c0_19 = arith.constant 0 : index
      %48 = vector.load %arg3[%c64_18, %c0_19] : memref<512x512xf32, #tpu.memory_space<vmem>>, vector<16x512xf32>
      %49 = arith.subf %47, %48 : vector<16x512xf32>
      %50 = arith.mulf %49, %49 : vector<16x512xf32>
      %51 = vector.extract_strided_slice %50 {offsets = [0, 0], sizes = [8, 512], strides = [1, 1]} : vector<16x512xf32> to vector<8x512xf32>
      %52 = arith.addf %46, %51 : vector<8x512xf32>
      %53 = vector.extract_strided_slice %50 {offsets = [8, 0], sizes = [8, 512], strides = [1, 1]} : vector<16x512xf32> to vector<8x512xf32>
      %54 = arith.addf %52, %53 : vector<8x512xf32>
      %c80 = arith.constant 80 : index
      %c0_20 = arith.constant 0 : index
      %55 = vector.load %arg2[%c80, %c0_20] : memref<512x512xf32, #tpu.memory_space<vmem>>, vector<16x512xf32>
      %c80_21 = arith.constant 80 : index
      %c0_22 = arith.constant 0 : index
      %56 = vector.load %arg3[%c80_21, %c0_22] : memref<512x512xf32, #tpu.memory_space<vmem>>, vector<16x512xf32>
      %57 = arith.subf %55, %56 : vector<16x512xf32>
      %58 = arith.mulf %57, %57 : vector<16x512xf32>
      %59 = vector.extract_strided_slice %58 {offsets = [0, 0], sizes = [8, 512], strides = [1, 1]} : vector<16x512xf32> to vector<8x512xf32>
      %60 = arith.addf %54, %59 : vector<8x512xf32>
      %61 = vector.extract_strided_slice %58 {offsets = [8, 0], sizes = [8, 512], strides = [1, 1]} : vector<16x512xf32> to vector<8x512xf32>
      %62 = arith.addf %60, %61 : vector<8x512xf32>
      %c96 = arith.constant 96 : index
      %c0_23 = arith.constant 0 : index
      %63 = vector.load %arg2[%c96, %c0_23] : memref<512x512xf32, #tpu.memory_space<vmem>>, vector<16x512xf32>
      %c96_24 = arith.constant 96 : index
      %c0_25 = arith.constant 0 : index
      %64 = vector.load %arg3[%c96_24, %c0_25] : memref<512x512xf32, #tpu.memory_space<vmem>>, vector<16x512xf32>
      %65 = arith.subf %63, %64 : vector<16x512xf32>
      %66 = arith.mulf %65, %65 : vector<16x512xf32>
      %67 = vector.extract_strided_slice %66 {offsets = [0, 0], sizes = [8, 512], strides = [1, 1]} : vector<16x512xf32> to vector<8x512xf32>
      %68 = arith.addf %62, %67 : vector<8x512xf32>
      %69 = vector.extract_strided_slice %66 {offsets = [8, 0], sizes = [8, 512], strides = [1, 1]} : vector<16x512xf32> to vector<8x512xf32>
      %70 = arith.addf %68, %69 : vector<8x512xf32>
      %c112 = arith.constant 112 : index
      %c0_26 = arith.constant 0 : index
      %71 = vector.load %arg2[%c112, %c0_26] : memref<512x512xf32, #tpu.memory_space<vmem>>, vector<16x512xf32>
      %c112_27 = arith.constant 112 : index
      %c0_28 = arith.constant 0 : index
      %72 = vector.load %arg3[%c112_27, %c0_28] : memref<512x512xf32, #tpu.memory_space<vmem>>, vector<16x512xf32>
      %73 = arith.subf %71, %72 : vector<16x512xf32>
      %74 = arith.mulf %73, %73 : vector<16x512xf32>
      %75 = vector.extract_strided_slice %74 {offsets = [0, 0], sizes = [8, 512], strides = [1, 1]} : vector<16x512xf32> to vector<8x512xf32>
      %76 = arith.addf %70, %75 : vector<8x512xf32>
      %77 = vector.extract_strided_slice %74 {offsets = [8, 0], sizes = [8, 512], strides = [1, 1]} : vector<16x512xf32> to vector<8x512xf32>
      %78 = arith.addf %76, %77 : vector<8x512xf32>
      %c128 = arith.constant 128 : index
      %c0_29 = arith.constant 0 : index
      %79 = vector.load %arg2[%c128, %c0_29] : memref<512x512xf32, #tpu.memory_space<vmem>>, vector<16x512xf32>
      %c128_30 = arith.constant 128 : index
      %c0_31 = arith.constant 0 : index
      %80 = vector.load %arg3[%c128_30, %c0_31] : memref<512x512xf32, #tpu.memory_space<vmem>>, vector<16x512xf32>
      %81 = arith.subf %79, %80 : vector<16x512xf32>
      %82 = arith.mulf %81, %81 : vector<16x512xf32>
      %83 = vector.extract_strided_slice %82 {offsets = [0, 0], sizes = [8, 512], strides = [1, 1]} : vector<16x512xf32> to vector<8x512xf32>
      %84 = arith.addf %78, %83 : vector<8x512xf32>
      %85 = vector.extract_strided_slice %82 {offsets = [8, 0], sizes = [8, 512], strides = [1, 1]} : vector<16x512xf32> to vector<8x512xf32>
      %86 = arith.addf %84, %85 : vector<8x512xf32>
      %c144 = arith.constant 144 : index
      %c0_32 = arith.constant 0 : index
      %87 = vector.load %arg2[%c144, %c0_32] : memref<512x512xf32, #tpu.memory_space<vmem>>, vector<16x512xf32>
      %c144_33 = arith.constant 144 : index
      %c0_34 = arith.constant 0 : index
      %88 = vector.load %arg3[%c144_33, %c0_34] : memref<512x512xf32, #tpu.memory_space<vmem>>, vector<16x512xf32>
      %89 = arith.subf %87, %88 : vector<16x512xf32>
      %90 = arith.mulf %89, %89 : vector<16x512xf32>
      %91 = vector.extract_strided_slice %90 {offsets = [0, 0], sizes = [8, 512], strides = [1, 1]} : vector<16x512xf32> to vector<8x512xf32>
      %92 = arith.addf %86, %91 : vector<8x512xf32>
      %93 = vector.extract_strided_slice %90 {offsets = [8, 0], sizes = [8, 512], strides = [1, 1]} : vector<16x512xf32> to vector<8x512xf32>
      %94 = arith.addf %92, %93 : vector<8x512xf32>
      %c160 = arith.constant 160 : index
      %c0_35 = arith.constant 0 : index
      %95 = vector.load %arg2[%c160, %c0_35] : memref<512x512xf32, #tpu.memory_space<vmem>>, vector<16x512xf32>
      %c160_36 = arith.constant 160 : index
      %c0_37 = arith.constant 0 : index
      %96 = vector.load %arg3[%c160_36, %c0_37] : memref<512x512xf32, #tpu.memory_space<vmem>>, vector<16x512xf32>
      %97 = arith.subf %95, %96 : vector<16x512xf32>
      %98 = arith.mulf %97, %97 : vector<16x512xf32>
      %99 = vector.extract_strided_slice %98 {offsets = [0, 0], sizes = [8, 512], strides = [1, 1]} : vector<16x512xf32> to vector<8x512xf32>
      %100 = arith.addf %94, %99 : vector<8x512xf32>
      %101 = vector.extract_strided_slice %98 {offsets = [8, 0], sizes = [8, 512], strides = [1, 1]} : vector<16x512xf32> to vector<8x512xf32>
      %102 = arith.addf %100, %101 : vector<8x512xf32>
      %c176 = arith.constant 176 : index
      %c0_38 = arith.constant 0 : index
      %103 = vector.load %arg2[%c176, %c0_38] : memref<512x512xf32, #tpu.memory_space<vmem>>, vector<16x512xf32>
      %c176_39 = arith.constant 176 : index
      %c0_40 = arith.constant 0 : index
      %104 = vector.load %arg3[%c176_39, %c0_40] : memref<512x512xf32, #tpu.memory_space<vmem>>, vector<16x512xf32>
      %105 = arith.subf %103, %104 : vector<16x512xf32>
      %106 = arith.mulf %105, %105 : vector<16x512xf32>
      %107 = vector.extract_strided_slice %106 {offsets = [0, 0], sizes = [8, 512], strides = [1, 1]} : vector<16x512xf32> to vector<8x512xf32>
      %108 = arith.addf %102, %107 : vector<8x512xf32>
      %109 = vector.extract_strided_slice %106 {offsets = [8, 0], sizes = [8, 512], strides = [1, 1]} : vector<16x512xf32> to vector<8x512xf32>
      %110 = arith.addf %108, %109 : vector<8x512xf32>
      %c192 = arith.constant 192 : index
      %c0_41 = arith.constant 0 : index
      %111 = vector.load %arg2[%c192, %c0_41] : memref<512x512xf32, #tpu.memory_space<vmem>>, vector<16x512xf32>
      %c192_42 = arith.constant 192 : index
      %c0_43 = arith.constant 0 : index
      %112 = vector.load %arg3[%c192_42, %c0_43] : memref<512x512xf32, #tpu.memory_space<vmem>>, vector<16x512xf32>
      %113 = arith.subf %111, %112 : vector<16x512xf32>
      %114 = arith.mulf %113, %113 : vector<16x512xf32>
      %115 = vector.extract_strided_slice %114 {offsets = [0, 0], sizes = [8, 512], strides = [1, 1]} : vector<16x512xf32> to vector<8x512xf32>
      %116 = arith.addf %110, %115 : vector<8x512xf32>
      %117 = vector.extract_strided_slice %114 {offsets = [8, 0], sizes = [8, 512], strides = [1, 1]} : vector<16x512xf32> to vector<8x512xf32>
      %118 = arith.addf %116, %117 : vector<8x512xf32>
      %c208 = arith.constant 208 : index
      %c0_44 = arith.constant 0 : index
      %119 = vector.load %arg2[%c208, %c0_44] : memref<512x512xf32, #tpu.memory_space<vmem>>, vector<16x512xf32>
      %c208_45 = arith.constant 208 : index
      %c0_46 = arith.constant 0 : index
      %120 = vector.load %arg3[%c208_45, %c0_46] : memref<512x512xf32, #tpu.memory_space<vmem>>, vector<16x512xf32>
      %121 = arith.subf %119, %120 : vector<16x512xf32>
      %122 = arith.mulf %121, %121 : vector<16x512xf32>
      %123 = vector.extract_strided_slice %122 {offsets = [0, 0], sizes = [8, 512], strides = [1, 1]} : vector<16x512xf32> to vector<8x512xf32>
      %124 = arith.addf %118, %123 : vector<8x512xf32>
      %125 = vector.extract_strided_slice %122 {offsets = [8, 0], sizes = [8, 512], strides = [1, 1]} : vector<16x512xf32> to vector<8x512xf32>
      %126 = arith.addf %124, %125 : vector<8x512xf32>
      %c224 = arith.constant 224 : index
      %c0_47 = arith.constant 0 : index
      %127 = vector.load %arg2[%c224, %c0_47] : memref<512x512xf32, #tpu.memory_space<vmem>>, vector<16x512xf32>
      %c224_48 = arith.constant 224 : index
      %c0_49 = arith.constant 0 : index
      %128 = vector.load %arg3[%c224_48, %c0_49] : memref<512x512xf32, #tpu.memory_space<vmem>>, vector<16x512xf32>
      %129 = arith.subf %127, %128 : vector<16x512xf32>
      %130 = arith.mulf %129, %129 : vector<16x512xf32>
      %131 = vector.extract_strided_slice %130 {offsets = [0, 0], sizes = [8, 512], strides = [1, 1]} : vector<16x512xf32> to vector<8x512xf32>
      %132 = arith.addf %126, %131 : vector<8x512xf32>
      %133 = vector.extract_strided_slice %130 {offsets = [8, 0], sizes = [8, 512], strides = [1, 1]} : vector<16x512xf32> to vector<8x512xf32>
      %134 = arith.addf %132, %133 : vector<8x512xf32>
      %c240 = arith.constant 240 : index
      %c0_50 = arith.constant 0 : index
      %135 = vector.load %arg2[%c240, %c0_50] : memref<512x512xf32, #tpu.memory_space<vmem>>, vector<16x512xf32>
      %c240_51 = arith.constant 240 : index
      %c0_52 = arith.constant 0 : index
      %136 = vector.load %arg3[%c240_51, %c0_52] : memref<512x512xf32, #tpu.memory_space<vmem>>, vector<16x512xf32>
      %137 = arith.subf %135, %136 : vector<16x512xf32>
      %138 = arith.mulf %137, %137 : vector<16x512xf32>
      %139 = vector.extract_strided_slice %138 {offsets = [0, 0], sizes = [8, 512], strides = [1, 1]} : vector<16x512xf32> to vector<8x512xf32>
      %140 = arith.addf %134, %139 : vector<8x512xf32>
      %141 = vector.extract_strided_slice %138 {offsets = [8, 0], sizes = [8, 512], strides = [1, 1]} : vector<16x512xf32> to vector<8x512xf32>
      %142 = arith.addf %140, %141 : vector<8x512xf32>
      %c256 = arith.constant 256 : index
      %c0_53 = arith.constant 0 : index
      %143 = vector.load %arg2[%c256, %c0_53] : memref<512x512xf32, #tpu.memory_space<vmem>>, vector<16x512xf32>
      %c256_54 = arith.constant 256 : index
      %c0_55 = arith.constant 0 : index
      %144 = vector.load %arg3[%c256_54, %c0_55] : memref<512x512xf32, #tpu.memory_space<vmem>>, vector<16x512xf32>
      %145 = arith.subf %143, %144 : vector<16x512xf32>
      %146 = arith.mulf %145, %145 : vector<16x512xf32>
      %147 = vector.extract_strided_slice %146 {offsets = [0, 0], sizes = [8, 512], strides = [1, 1]} : vector<16x512xf32> to vector<8x512xf32>
      %148 = arith.addf %142, %147 : vector<8x512xf32>
      %149 = vector.extract_strided_slice %146 {offsets = [8, 0], sizes = [8, 512], strides = [1, 1]} : vector<16x512xf32> to vector<8x512xf32>
      %150 = arith.addf %148, %149 : vector<8x512xf32>
      %c272 = arith.constant 272 : index
      %c0_56 = arith.constant 0 : index
      %151 = vector.load %arg2[%c272, %c0_56] : memref<512x512xf32, #tpu.memory_space<vmem>>, vector<16x512xf32>
      %c272_57 = arith.constant 272 : index
      %c0_58 = arith.constant 0 : index
      %152 = vector.load %arg3[%c272_57, %c0_58] : memref<512x512xf32, #tpu.memory_space<vmem>>, vector<16x512xf32>
      %153 = arith.subf %151, %152 : vector<16x512xf32>
      %154 = arith.mulf %153, %153 : vector<16x512xf32>
      %155 = vector.extract_strided_slice %154 {offsets = [0, 0], sizes = [8, 512], strides = [1, 1]} : vector<16x512xf32> to vector<8x512xf32>
      %156 = arith.addf %150, %155 : vector<8x512xf32>
      %157 = vector.extract_strided_slice %154 {offsets = [8, 0], sizes = [8, 512], strides = [1, 1]} : vector<16x512xf32> to vector<8x512xf32>
      %158 = arith.addf %156, %157 : vector<8x512xf32>
      %c288 = arith.constant 288 : index
      %c0_59 = arith.constant 0 : index
      %159 = vector.load %arg2[%c288, %c0_59] : memref<512x512xf32, #tpu.memory_space<vmem>>, vector<16x512xf32>
      %c288_60 = arith.constant 288 : index
      %c0_61 = arith.constant 0 : index
      %160 = vector.load %arg3[%c288_60, %c0_61] : memref<512x512xf32, #tpu.memory_space<vmem>>, vector<16x512xf32>
      %161 = arith.subf %159, %160 : vector<16x512xf32>
      %162 = arith.mulf %161, %161 : vector<16x512xf32>
      %163 = vector.extract_strided_slice %162 {offsets = [0, 0], sizes = [8, 512], strides = [1, 1]} : vector<16x512xf32> to vector<8x512xf32>
      %164 = arith.addf %158, %163 : vector<8x512xf32>
      %165 = vector.extract_strided_slice %162 {offsets = [8, 0], sizes = [8, 512], strides = [1, 1]} : vector<16x512xf32> to vector<8x512xf32>
      %166 = arith.addf %164, %165 : vector<8x512xf32>
      %c304 = arith.constant 304 : index
      %c0_62 = arith.constant 0 : index
      %167 = vector.load %arg2[%c304, %c0_62] : memref<512x512xf32, #tpu.memory_space<vmem>>, vector<16x512xf32>
      %c304_63 = arith.constant 304 : index
      %c0_64 = arith.constant 0 : index
      %168 = vector.load %arg3[%c304_63, %c0_64] : memref<512x512xf32, #tpu.memory_space<vmem>>, vector<16x512xf32>
      %169 = arith.subf %167, %168 : vector<16x512xf32>
      %170 = arith.mulf %169, %169 : vector<16x512xf32>
      %171 = vector.extract_strided_slice %170 {offsets = [0, 0], sizes = [8, 512], strides = [1, 1]} : vector<16x512xf32> to vector<8x512xf32>
      %172 = arith.addf %166, %171 : vector<8x512xf32>
      %173 = vector.extract_strided_slice %170 {offsets = [8, 0], sizes = [8, 512], strides = [1, 1]} : vector<16x512xf32> to vector<8x512xf32>
      %174 = arith.addf %172, %173 : vector<8x512xf32>
      %c320 = arith.constant 320 : index
      %c0_65 = arith.constant 0 : index
      %175 = vector.load %arg2[%c320, %c0_65] : memref<512x512xf32, #tpu.memory_space<vmem>>, vector<16x512xf32>
      %c320_66 = arith.constant 320 : index
      %c0_67 = arith.constant 0 : index
      %176 = vector.load %arg3[%c320_66, %c0_67] : memref<512x512xf32, #tpu.memory_space<vmem>>, vector<16x512xf32>
      %177 = arith.subf %175, %176 : vector<16x512xf32>
      %178 = arith.mulf %177, %177 : vector<16x512xf32>
      %179 = vector.extract_strided_slice %178 {offsets = [0, 0], sizes = [8, 512], strides = [1, 1]} : vector<16x512xf32> to vector<8x512xf32>
      %180 = arith.addf %174, %179 : vector<8x512xf32>
      %181 = vector.extract_strided_slice %178 {offsets = [8, 0], sizes = [8, 512], strides = [1, 1]} : vector<16x512xf32> to vector<8x512xf32>
      %182 = arith.addf %180, %181 : vector<8x512xf32>
      %c336 = arith.constant 336 : index
      %c0_68 = arith.constant 0 : index
      %183 = vector.load %arg2[%c336, %c0_68] : memref<512x512xf32, #tpu.memory_space<vmem>>, vector<16x512xf32>
      %c336_69 = arith.constant 336 : index
      %c0_70 = arith.constant 0 : index
      %184 = vector.load %arg3[%c336_69, %c0_70] : memref<512x512xf32, #tpu.memory_space<vmem>>, vector<16x512xf32>
      %185 = arith.subf %183, %184 : vector<16x512xf32>
      %186 = arith.mulf %185, %185 : vector<16x512xf32>
      %187 = vector.extract_strided_slice %186 {offsets = [0, 0], sizes = [8, 512], strides = [1, 1]} : vector<16x512xf32> to vector<8x512xf32>
      %188 = arith.addf %182, %187 : vector<8x512xf32>
      %189 = vector.extract_strided_slice %186 {offsets = [8, 0], sizes = [8, 512], strides = [1, 1]} : vector<16x512xf32> to vector<8x512xf32>
      %190 = arith.addf %188, %189 : vector<8x512xf32>
      %c352 = arith.constant 352 : index
      %c0_71 = arith.constant 0 : index
      %191 = vector.load %arg2[%c352, %c0_71] : memref<512x512xf32, #tpu.memory_space<vmem>>, vector<16x512xf32>
      %c352_72 = arith.constant 352 : index
      %c0_73 = arith.constant 0 : index
      %192 = vector.load %arg3[%c352_72, %c0_73] : memref<512x512xf32, #tpu.memory_space<vmem>>, vector<16x512xf32>
      %193 = arith.subf %191, %192 : vector<16x512xf32>
      %194 = arith.mulf %193, %193 : vector<16x512xf32>
      %195 = vector.extract_strided_slice %194 {offsets = [0, 0], sizes = [8, 512], strides = [1, 1]} : vector<16x512xf32> to vector<8x512xf32>
      %196 = arith.addf %190, %195 : vector<8x512xf32>
      %197 = vector.extract_strided_slice %194 {offsets = [8, 0], sizes = [8, 512], strides = [1, 1]} : vector<16x512xf32> to vector<8x512xf32>
      %198 = arith.addf %196, %197 : vector<8x512xf32>
      %c368 = arith.constant 368 : index
      %c0_74 = arith.constant 0 : index
      %199 = vector.load %arg2[%c368, %c0_74] : memref<512x512xf32, #tpu.memory_space<vmem>>, vector<16x512xf32>
      %c368_75 = arith.constant 368 : index
      %c0_76 = arith.constant 0 : index
      %200 = vector.load %arg3[%c368_75, %c0_76] : memref<512x512xf32, #tpu.memory_space<vmem>>, vector<16x512xf32>
      %201 = arith.subf %199, %200 : vector<16x512xf32>
      %202 = arith.mulf %201, %201 : vector<16x512xf32>
      %203 = vector.extract_strided_slice %202 {offsets = [0, 0], sizes = [8, 512], strides = [1, 1]} : vector<16x512xf32> to vector<8x512xf32>
      %204 = arith.addf %198, %203 : vector<8x512xf32>
      %205 = vector.extract_strided_slice %202 {offsets = [8, 0], sizes = [8, 512], strides = [1, 1]} : vector<16x512xf32> to vector<8x512xf32>
      %206 = arith.addf %204, %205 : vector<8x512xf32>
      %c384 = arith.constant 384 : index
      %c0_77 = arith.constant 0 : index
      %207 = vector.load %arg2[%c384, %c0_77] : memref<512x512xf32, #tpu.memory_space<vmem>>, vector<16x512xf32>
      %c384_78 = arith.constant 384 : index
      %c0_79 = arith.constant 0 : index
      %208 = vector.load %arg3[%c384_78, %c0_79] : memref<512x512xf32, #tpu.memory_space<vmem>>, vector<16x512xf32>
      %209 = arith.subf %207, %208 : vector<16x512xf32>
      %210 = arith.mulf %209, %209 : vector<16x512xf32>
      %211 = vector.extract_strided_slice %210 {offsets = [0, 0], sizes = [8, 512], strides = [1, 1]} : vector<16x512xf32> to vector<8x512xf32>
      %212 = arith.addf %206, %211 : vector<8x512xf32>
      %213 = vector.extract_strided_slice %210 {offsets = [8, 0], sizes = [8, 512], strides = [1, 1]} : vector<16x512xf32> to vector<8x512xf32>
      %214 = arith.addf %212, %213 : vector<8x512xf32>
      %c400 = arith.constant 400 : index
      %c0_80 = arith.constant 0 : index
      %215 = vector.load %arg2[%c400, %c0_80] : memref<512x512xf32, #tpu.memory_space<vmem>>, vector<16x512xf32>
      %c400_81 = arith.constant 400 : index
      %c0_82 = arith.constant 0 : index
      %216 = vector.load %arg3[%c400_81, %c0_82] : memref<512x512xf32, #tpu.memory_space<vmem>>, vector<16x512xf32>
      %217 = arith.subf %215, %216 : vector<16x512xf32>
      %218 = arith.mulf %217, %217 : vector<16x512xf32>
      %219 = vector.extract_strided_slice %218 {offsets = [0, 0], sizes = [8, 512], strides = [1, 1]} : vector<16x512xf32> to vector<8x512xf32>
      %220 = arith.addf %214, %219 : vector<8x512xf32>
      %221 = vector.extract_strided_slice %218 {offsets = [8, 0], sizes = [8, 512], strides = [1, 1]} : vector<16x512xf32> to vector<8x512xf32>
      %222 = arith.addf %220, %221 : vector<8x512xf32>
      %c416 = arith.constant 416 : index
      %c0_83 = arith.constant 0 : index
      %223 = vector.load %arg2[%c416, %c0_83] : memref<512x512xf32, #tpu.memory_space<vmem>>, vector<16x512xf32>
      %c416_84 = arith.constant 416 : index
      %c0_85 = arith.constant 0 : index
      %224 = vector.load %arg3[%c416_84, %c0_85] : memref<512x512xf32, #tpu.memory_space<vmem>>, vector<16x512xf32>
      %225 = arith.subf %223, %224 : vector<16x512xf32>
      %226 = arith.mulf %225, %225 : vector<16x512xf32>
      %227 = vector.extract_strided_slice %226 {offsets = [0, 0], sizes = [8, 512], strides = [1, 1]} : vector<16x512xf32> to vector<8x512xf32>
      %228 = arith.addf %222, %227 : vector<8x512xf32>
      %229 = vector.extract_strided_slice %226 {offsets = [8, 0], sizes = [8, 512], strides = [1, 1]} : vector<16x512xf32> to vector<8x512xf32>
      %230 = arith.addf %228, %229 : vector<8x512xf32>
      %c432 = arith.constant 432 : index
      %c0_86 = arith.constant 0 : index
      %231 = vector.load %arg2[%c432, %c0_86] : memref<512x512xf32, #tpu.memory_space<vmem>>, vector<16x512xf32>
      %c432_87 = arith.constant 432 : index
      %c0_88 = arith.constant 0 : index
      %232 = vector.load %arg3[%c432_87, %c0_88] : memref<512x512xf32, #tpu.memory_space<vmem>>, vector<16x512xf32>
      %233 = arith.subf %231, %232 : vector<16x512xf32>
      %234 = arith.mulf %233, %233 : vector<16x512xf32>
      %235 = vector.extract_strided_slice %234 {offsets = [0, 0], sizes = [8, 512], strides = [1, 1]} : vector<16x512xf32> to vector<8x512xf32>
      %236 = arith.addf %230, %235 : vector<8x512xf32>
      %237 = vector.extract_strided_slice %234 {offsets = [8, 0], sizes = [8, 512], strides = [1, 1]} : vector<16x512xf32> to vector<8x512xf32>
      %238 = arith.addf %236, %237 : vector<8x512xf32>
      %c448 = arith.constant 448 : index
      %c0_89 = arith.constant 0 : index
      %239 = vector.load %arg2[%c448, %c0_89] : memref<512x512xf32, #tpu.memory_space<vmem>>, vector<16x512xf32>
      %c448_90 = arith.constant 448 : index
      %c0_91 = arith.constant 0 : index
      %240 = vector.load %arg3[%c448_90, %c0_91] : memref<512x512xf32, #tpu.memory_space<vmem>>, vector<16x512xf32>
      %241 = arith.subf %239, %240 : vector<16x512xf32>
      %242 = arith.mulf %241, %241 : vector<16x512xf32>
      %243 = vector.extract_strided_slice %242 {offsets = [0, 0], sizes = [8, 512], strides = [1, 1]} : vector<16x512xf32> to vector<8x512xf32>
      %244 = arith.addf %238, %243 : vector<8x512xf32>
      %245 = vector.extract_strided_slice %242 {offsets = [8, 0], sizes = [8, 512], strides = [1, 1]} : vector<16x512xf32> to vector<8x512xf32>
      %246 = arith.addf %244, %245 : vector<8x512xf32>
      %c464 = arith.constant 464 : index
      %c0_92 = arith.constant 0 : index
      %247 = vector.load %arg2[%c464, %c0_92] : memref<512x512xf32, #tpu.memory_space<vmem>>, vector<16x512xf32>
      %c464_93 = arith.constant 464 : index
      %c0_94 = arith.constant 0 : index
      %248 = vector.load %arg3[%c464_93, %c0_94] : memref<512x512xf32, #tpu.memory_space<vmem>>, vector<16x512xf32>
      %249 = arith.subf %247, %248 : vector<16x512xf32>
      %250 = arith.mulf %249, %249 : vector<16x512xf32>
      %251 = vector.extract_strided_slice %250 {offsets = [0, 0], sizes = [8, 512], strides = [1, 1]} : vector<16x512xf32> to vector<8x512xf32>
      %252 = arith.addf %246, %251 : vector<8x512xf32>
      %253 = vector.extract_strided_slice %250 {offsets = [8, 0], sizes = [8, 512], strides = [1, 1]} : vector<16x512xf32> to vector<8x512xf32>
      %254 = arith.addf %252, %253 : vector<8x512xf32>
      %c480 = arith.constant 480 : index
      %c0_95 = arith.constant 0 : index
      %255 = vector.load %arg2[%c480, %c0_95] : memref<512x512xf32, #tpu.memory_space<vmem>>, vector<16x512xf32>
      %c480_96 = arith.constant 480 : index
      %c0_97 = arith.constant 0 : index
      %256 = vector.load %arg3[%c480_96, %c0_97] : memref<512x512xf32, #tpu.memory_space<vmem>>, vector<16x512xf32>
      %257 = arith.subf %255, %256 : vector<16x512xf32>
      %258 = arith.mulf %257, %257 : vector<16x512xf32>
      %259 = vector.extract_strided_slice %258 {offsets = [0, 0], sizes = [8, 512], strides = [1, 1]} : vector<16x512xf32> to vector<8x512xf32>
      %260 = arith.addf %254, %259 : vector<8x512xf32>
      %261 = vector.extract_strided_slice %258 {offsets = [8, 0], sizes = [8, 512], strides = [1, 1]} : vector<16x512xf32> to vector<8x512xf32>
      %262 = arith.addf %260, %261 : vector<8x512xf32>
      %c496 = arith.constant 496 : index
      %c0_98 = arith.constant 0 : index
      %263 = vector.load %arg2[%c496, %c0_98] : memref<512x512xf32, #tpu.memory_space<vmem>>, vector<16x512xf32>
      %c496_99 = arith.constant 496 : index
      %c0_100 = arith.constant 0 : index
      %264 = vector.load %arg3[%c496_99, %c0_100] : memref<512x512xf32, #tpu.memory_space<vmem>>, vector<16x512xf32>
      %265 = arith.subf %263, %264 : vector<16x512xf32>
      %266 = arith.mulf %265, %265 : vector<16x512xf32>
      %267 = vector.extract_strided_slice %266 {offsets = [0, 0], sizes = [8, 512], strides = [1, 1]} : vector<16x512xf32> to vector<8x512xf32>
      %268 = arith.addf %262, %267 : vector<8x512xf32>
      %269 = vector.extract_strided_slice %266 {offsets = [8, 0], sizes = [8, 512], strides = [1, 1]} : vector<16x512xf32> to vector<8x512xf32>
      %270 = arith.addf %268, %269 : vector<8x512xf32>
      %c0_101 = arith.constant 0 : index
      %c0_102 = arith.constant 0 : index
      %c0_103 = arith.constant 0 : index
      %271 = vector.load %arg4[%c0_101, %c0_102, %c0_103] : memref<1x8x512xf32, #tpu.memory_space<vmem>>, vector<1x8x512xf32>
      %272 = vector.shape_cast %271 : vector<1x8x512xf32> to vector<8x512xf32>
      %273 = arith.addf %272, %270 : vector<8x512xf32>
      %c0_104 = arith.constant 0 : index
      %c0_105 = arith.constant 0 : index
      %c0_106 = arith.constant 0 : index
      %274 = vector.load %arg4[%c0_104, %c0_105, %c0_106] : memref<1x8x512xf32, #tpu.memory_space<vmem>>, vector<1x8x512xf32>
      %275 = vector.shape_cast %274 : vector<1x8x512xf32> to vector<8x512xf32>
      %276 = vector.shape_cast %273 : vector<8x512xf32> to vector<1x8x512xf32>
      tpu.vector_store %arg4[%c0_104, %c0_105, %c0_106], %276 {strides = array<i32>} : memref<1x8x512xf32, #tpu.memory_space<vmem>>, vector<1x8x512xf32>,
    } else {
    }
    %c1_i32_2 = arith.constant 1 : i32
    %9 = arith.cmpi sge, %4, %c1_i32_2 : i32
    %c2_i32_3 = arith.constant 2 : i32
    %10 = arith.cmpi slt, %4, %c2_i32_3 : i32
    %11 = arith.andi %9, %10 : i1
    %12 = arith.extui %11 : i1 to i32
    %c0_i32_4 = arith.constant 0 : i32
    %13 = arith.cmpi ne, %12, %c0_i32_4 : i32
    scf.if %13 {
      %14 = tpu.iota {dimensions = array<i32: 0>} : vector<16x512xi32>
      %cst = arith.constant 0.000000e+00 : f32
      %15 = vector.broadcast %cst : f32 to vector<8x512xf32>
      %c0 = arith.constant 0 : index
      %c0_5 = arith.constant 0 : index
      %16 = vector.load %arg2[%c0, %c0_5] : memref<512x512xf32, #tpu.memory_space<vmem>>, vector<16x512xf32>
      %c0_6 = arith.constant 0 : index
      %c0_7 = arith.constant 0 : index
      %17 = vector.load %arg3[%c0_6, %c0_7] : memref<512x512xf32, #tpu.memory_space<vmem>>, vector<16x512xf32>
      %18 = arith.subf %16, %17 : vector<16x512xf32>
      %19 = arith.mulf %18, %18 : vector<16x512xf32>
      %c0_i32_8 = arith.constant 0 : i32
      %20 = arith.addi %5, %c0_i32_8 : i32
      %21 = vector.broadcast %20 : i32 to vector<16x512xi32>
      %22 = arith.addi %21, %14 : vector<16x512xi32>
      %c768_i32 = arith.constant 768 : i32
      %23 = vector.broadcast %c768_i32 : i32 to vector<16x512xi32>
      %24 = arith.cmpi slt, %22, %23 : vector<16x512xi32>
      %cst_9 = arith.constant 0.000000e+00 : f32
      %25 = vector.broadcast %cst_9 : f32 to vector<16x512xf32>
      %26 = arith.select %24, %19, %25 : vector<16x512xi1>, vector<16x512xf32>
      %27 = vector.extract_strided_slice %26 {offsets = [0, 0], sizes = [8, 512], strides = [1, 1]} : vector<16x512xf32> to vector<8x512xf32>
      %28 = arith.addf %15, %27 : vector<8x512xf32>
      %29 = vector.extract_strided_slice %26 {offsets = [8, 0], sizes = [8, 512], strides = [1, 1]} : vector<16x512xf32> to vector<8x512xf32>
      %30 = arith.addf %28, %29 : vector<8x512xf32>
      %c16 = arith.constant 16 : index
      %c0_10 = arith.constant 0 : index
      %31 = vector.load %arg2[%c16, %c0_10] : memref<512x512xf32, #tpu.memory_space<vmem>>, vector<16x512xf32>
      %c16_11 = arith.constant 16 : index
      %c0_12 = arith.constant 0 : index
      %32 = vector.load %arg3[%c16_11, %c0_12] : memref<512x512xf32, #tpu.memory_space<vmem>>, vector<16x512xf32>
      %33 = arith.subf %31, %32 : vector<16x512xf32>
      %34 = arith.mulf %33, %33 : vector<16x512xf32>
      %c16_i32 = arith.constant 16 : i32
      %35 = arith.addi %5, %c16_i32 : i32
      %36 = vector.broadcast %35 : i32 to vector<16x512xi32>
      %37 = arith.addi %36, %14 : vector<16x512xi32>
      %c768_i32_13 = arith.constant 768 : i32
      %38 = vector.broadcast %c768_i32_13 : i32 to vector<16x512xi32>
      %39 = arith.cmpi slt, %37, %38 : vector<16x512xi32>
      %cst_14 = arith.constant 0.000000e+00 : f32
      %40 = vector.broadcast %cst_14 : f32 to vector<16x512xf32>
      %41 = arith.select %39, %34, %40 : vector<16x512xi1>, vector<16x512xf32>
      %42 = vector.extract_strided_slice %41 {offsets = [0, 0], sizes = [8, 512], strides = [1, 1]} : vector<16x512xf32> to vector<8x512xf32>
      %43 = arith.addf %30, %42 : vector<8x512xf32>
      %44 = vector.extract_strided_slice %41 {offsets = [8, 0], sizes = [8, 512], strides = [1, 1]} : vector<16x512xf32> to vector<8x512xf32>
      %45 = arith.addf %43, %44 : vector<8x512xf32>
      %c32 = arith.constant 32 : index
      %c0_15 = arith.constant 0 : index
      %46 = vector.load %arg2[%c32, %c0_15] : memref<512x512xf32, #tpu.memory_space<vmem>>, vector<16x512xf32>
      %c32_16 = arith.constant 32 : index
      %c0_17 = arith.constant 0 : index
      %47 = vector.load %arg3[%c32_16, %c0_17] : memref<512x512xf32, #tpu.memory_space<vmem>>, vector<16x512xf32>
      %48 = arith.subf %46, %47 : vector<16x512xf32>
      %49 = arith.mulf %48, %48 : vector<16x512xf32>
      %c32_i32 = arith.constant 32 : i32
      %50 = arith.addi %5, %c32_i32 : i32
      %51 = vector.broadcast %50 : i32 to vector<16x512xi32>
      %52 = arith.addi %51, %14 : vector<16x512xi32>
      %c768_i32_18 = arith.constant 768 : i32
      %53 = vector.broadcast %c768_i32_18 : i32 to vector<16x512xi32>
      %54 = arith.cmpi slt, %52, %53 : vector<16x512xi32>
      %cst_19 = arith.constant 0.000000e+00 : f32
      %55 = vector.broadcast %cst_19 : f32 to vector<16x512xf32>
      %56 = arith.select %54, %49, %55 : vector<16x512xi1>, vector<16x512xf32>
      %57 = vector.extract_strided_slice %56 {offsets = [0, 0], sizes = [8, 512], strides = [1, 1]} : vector<16x512xf32> to vector<8x512xf32>
      %58 = arith.addf %45, %57 : vector<8x512xf32>
      %59 = vector.extract_strided_slice %56 {offsets = [8, 0], sizes = [8, 512], strides = [1, 1]} : vector<16x512xf32> to vector<8x512xf32>
      %60 = arith.addf %58, %59 : vector<8x512xf32>
      %c48 = arith.constant 48 : index
      %c0_20 = arith.constant 0 : index
      %61 = vector.load %arg2[%c48, %c0_20] : memref<512x512xf32, #tpu.memory_space<vmem>>, vector<16x512xf32>
      %c48_21 = arith.constant 48 : index
      %c0_22 = arith.constant 0 : index
      %62 = vector.load %arg3[%c48_21, %c0_22] : memref<512x512xf32, #tpu.memory_space<vmem>>, vector<16x512xf32>
      %63 = arith.subf %61, %62 : vector<16x512xf32>
      %64 = arith.mulf %63, %63 : vector<16x512xf32>
      %c48_i32 = arith.constant 48 : i32
      %65 = arith.addi %5, %c48_i32 : i32
      %66 = vector.broadcast %65 : i32 to vector<16x512xi32>
      %67 = arith.addi %66, %14 : vector<16x512xi32>
      %c768_i32_23 = arith.constant 768 : i32
      %68 = vector.broadcast %c768_i32_23 : i32 to vector<16x512xi32>
      %69 = arith.cmpi slt, %67, %68 : vector<16x512xi32>
      %cst_24 = arith.constant 0.000000e+00 : f32
      %70 = vector.broadcast %cst_24 : f32 to vector<16x512xf32>
      %71 = arith.select %69, %64, %70 : vector<16x512xi1>, vector<16x512xf32>
      %72 = vector.extract_strided_slice %71 {offsets = [0, 0], sizes = [8, 512], strides = [1, 1]} : vector<16x512xf32> to vector<8x512xf32>
      %73 = arith.addf %60, %72 : vector<8x512xf32>
      %74 = vector.extract_strided_slice %71 {offsets = [8, 0], sizes = [8, 512], strides = [1, 1]} : vector<16x512xf32> to vector<8x512xf32>
      %75 = arith.addf %73, %74 : vector<8x512xf32>
      %c64 = arith.constant 64 : index
      %c0_25 = arith.constant 0 : index
      %76 = vector.load %arg2[%c64, %c0_25] : memref<512x512xf32, #tpu.memory_space<vmem>>, vector<16x512xf32>
      %c64_26 = arith.constant 64 : index
      %c0_27 = arith.constant 0 : index
      %77 = vector.load %arg3[%c64_26, %c0_27] : memref<512x512xf32, #tpu.memory_space<vmem>>, vector<16x512xf32>
      %78 = arith.subf %76, %77 : vector<16x512xf32>
      %79 = arith.mulf %78, %78 : vector<16x512xf32>
      %c64_i32 = arith.constant 64 : i32
      %80 = arith.addi %5, %c64_i32 : i32
      %81 = vector.broadcast %80 : i32 to vector<16x512xi32>
      %82 = arith.addi %81, %14 : vector<16x512xi32>
      %c768_i32_28 = arith.constant 768 : i32
      %83 = vector.broadcast %c768_i32_28 : i32 to vector<16x512xi32>
      %84 = arith.cmpi slt, %82, %83 : vector<16x512xi32>
      %cst_29 = arith.constant 0.000000e+00 : f32
      %85 = vector.broadcast %cst_29 : f32 to vector<16x512xf32>
      %86 = arith.select %84, %79, %85 : vector<16x512xi1>, vector<16x512xf32>
      %87 = vector.extract_strided_slice %86 {offsets = [0, 0], sizes = [8, 512], strides = [1, 1]} : vector<16x512xf32> to vector<8x512xf32>
      %88 = arith.addf %75, %87 : vector<8x512xf32>
      %89 = vector.extract_strided_slice %86 {offsets = [8, 0], sizes = [8, 512], strides = [1, 1]} : vector<16x512xf32> to vector<8x512xf32>
      %90 = arith.addf %88, %89 : vector<8x512xf32>
      %c80 = arith.constant 80 : index
      %c0_30 = arith.constant 0 : index
      %91 = vector.load %arg2[%c80, %c0_30] : memref<512x512xf32, #tpu.memory_space<vmem>>, vector<16x512xf32>
      %c80_31 = arith.constant 80 : index
      %c0_32 = arith.constant 0 : index
      %92 = vector.load %arg3[%c80_31, %c0_32] : memref<512x512xf32, #tpu.memory_space<vmem>>, vector<16x512xf32>
      %93 = arith.subf %91, %92 : vector<16x512xf32>
      %94 = arith.mulf %93, %93 : vector<16x512xf32>
      %c80_i32 = arith.constant 80 : i32
      %95 = arith.addi %5, %c80_i32 : i32
      %96 = vector.broadcast %95 : i32 to vector<16x512xi32>
      %97 = arith.addi %96, %14 : vector<16x512xi32>
      %c768_i32_33 = arith.constant 768 : i32
      %98 = vector.broadcast %c768_i32_33 : i32 to vector<16x512xi32>
      %99 = arith.cmpi slt, %97, %98 : vector<16x512xi32>
      %cst_34 = arith.constant 0.000000e+00 : f32
      %100 = vector.broadcast %cst_34 : f32 to vector<16x512xf32>
      %101 = arith.select %99, %94, %100 : vector<16x512xi1>, vector<16x512xf32>
      %102 = vector.extract_strided_slice %101 {offsets = [0, 0], sizes = [8, 512], strides = [1, 1]} : vector<16x512xf32> to vector<8x512xf32>
      %103 = arith.addf %90, %102 : vector<8x512xf32>
      %104 = vector.extract_strided_slice %101 {offsets = [8, 0], sizes = [8, 512], strides = [1, 1]} : vector<16x512xf32> to vector<8x512xf32>
      %105 = arith.addf %103, %104 : vector<8x512xf32>
      %c96 = arith.constant 96 : index
      %c0_35 = arith.constant 0 : index
      %106 = vector.load %arg2[%c96, %c0_35] : memref<512x512xf32, #tpu.memory_space<vmem>>, vector<16x512xf32>
      %c96_36 = arith.constant 96 : index
      %c0_37 = arith.constant 0 : index
      %107 = vector.load %arg3[%c96_36, %c0_37] : memref<512x512xf32, #tpu.memory_space<vmem>>, vector<16x512xf32>
      %108 = arith.subf %106, %107 : vector<16x512xf32>
      %109 = arith.mulf %108, %108 : vector<16x512xf32>
      %c96_i32 = arith.constant 96 : i32
      %110 = arith.addi %5, %c96_i32 : i32
      %111 = vector.broadcast %110 : i32 to vector<16x512xi32>
      %112 = arith.addi %111, %14 : vector<16x512xi32>
      %c768_i32_38 = arith.constant 768 : i32
      %113 = vector.broadcast %c768_i32_38 : i32 to vector<16x512xi32>
      %114 = arith.cmpi slt, %112, %113 : vector<16x512xi32>
      %cst_39 = arith.constant 0.000000e+00 : f32
      %115 = vector.broadcast %cst_39 : f32 to vector<16x512xf32>
      %116 = arith.select %114, %109, %115 : vector<16x512xi1>, vector<16x512xf32>
      %117 = vector.extract_strided_slice %116 {offsets = [0, 0], sizes = [8, 512], strides = [1, 1]} : vector<16x512xf32> to vector<8x512xf32>
      %118 = arith.addf %105, %117 : vector<8x512xf32>
      %119 = vector.extract_strided_slice %116 {offsets = [8, 0], sizes = [8, 512], strides = [1, 1]} : vector<16x512xf32> to vector<8x512xf32>
      %120 = arith.addf %118, %119 : vector<8x512xf32>
      %c112 = arith.constant 112 : index
      %c0_40 = arith.constant 0 : index
      %121 = vector.load %arg2[%c112, %c0_40] : memref<512x512xf32, #tpu.memory_space<vmem>>, vector<16x512xf32>
      %c112_41 = arith.constant 112 : index
      %c0_42 = arith.constant 0 : index
      %122 = vector.load %arg3[%c112_41, %c0_42] : memref<512x512xf32, #tpu.memory_space<vmem>>, vector<16x512xf32>
      %123 = arith.subf %121, %122 : vector<16x512xf32>
      %124 = arith.mulf %123, %123 : vector<16x512xf32>
      %c112_i32 = arith.constant 112 : i32
      %125 = arith.addi %5, %c112_i32 : i32
      %126 = vector.broadcast %125 : i32 to vector<16x512xi32>
      %127 = arith.addi %126, %14 : vector<16x512xi32>
      %c768_i32_43 = arith.constant 768 : i32
      %128 = vector.broadcast %c768_i32_43 : i32 to vector<16x512xi32>
      %129 = arith.cmpi slt, %127, %128 : vector<16x512xi32>
      %cst_44 = arith.constant 0.000000e+00 : f32
      %130 = vector.broadcast %cst_44 : f32 to vector<16x512xf32>
      %131 = arith.select %129, %124, %130 : vector<16x512xi1>, vector<16x512xf32>
      %132 = vector.extract_strided_slice %131 {offsets = [0, 0], sizes = [8, 512], strides = [1, 1]} : vector<16x512xf32> to vector<8x512xf32>
      %133 = arith.addf %120, %132 : vector<8x512xf32>
      %134 = vector.extract_strided_slice %131 {offsets = [8, 0], sizes = [8, 512], strides = [1, 1]} : vector<16x512xf32> to vector<8x512xf32>
      %135 = arith.addf %133, %134 : vector<8x512xf32>
      %c128 = arith.constant 128 : index
      %c0_45 = arith.constant 0 : index
      %136 = vector.load %arg2[%c128, %c0_45] : memref<512x512xf32, #tpu.memory_space<vmem>>, vector<16x512xf32>
      %c128_46 = arith.constant 128 : index
      %c0_47 = arith.constant 0 : index
      %137 = vector.load %arg3[%c128_46, %c0_47] : memref<512x512xf32, #tpu.memory_space<vmem>>, vector<16x512xf32>
      %138 = arith.subf %136, %137 : vector<16x512xf32>
      %139 = arith.mulf %138, %138 : vector<16x512xf32>
      %c128_i32 = arith.constant 128 : i32
      %140 = arith.addi %5, %c128_i32 : i32
      %141 = vector.broadcast %140 : i32 to vector<16x512xi32>
      %142 = arith.addi %141, %14 : vector<16x512xi32>
      %c768_i32_48 = arith.constant 768 : i32
      %143 = vector.broadcast %c768_i32_48 : i32 to vector<16x512xi32>
      %144 = arith.cmpi slt, %142, %143 : vector<16x512xi32>
      %cst_49 = arith.constant 0.000000e+00 : f32
      %145 = vector.broadcast %cst_49 : f32 to vector<16x512xf32>
      %146 = arith.select %144, %139, %145 : vector<16x512xi1>, vector<16x512xf32>
      %147 = vector.extract_strided_slice %146 {offsets = [0, 0], sizes = [8, 512], strides = [1, 1]} : vector<16x512xf32> to vector<8x512xf32>
      %148 = arith.addf %135, %147 : vector<8x512xf32>
      %149 = vector.extract_strided_slice %146 {offsets = [8, 0], sizes = [8, 512], strides = [1, 1]} : vector<16x512xf32> to vector<8x512xf32>
      %150 = arith.addf %148, %149 : vector<8x512xf32>
      %c144 = arith.constant 144 : index
      %c0_50 = arith.constant 0 : index
      %151 = vector.load %arg2[%c144, %c0_50] : memref<512x512xf32, #tpu.memory_space<vmem>>, vector<16x512xf32>
      %c144_51 = arith.constant 144 : index
      %c0_52 = arith.constant 0 : index
      %152 = vector.load %arg3[%c144_51, %c0_52] : memref<512x512xf32, #tpu.memory_space<vmem>>, vector<16x512xf32>
      %153 = arith.subf %151, %152 : vector<16x512xf32>
      %154 = arith.mulf %153, %153 : vector<16x512xf32>
      %c144_i32 = arith.constant 144 : i32
      %155 = arith.addi %5, %c144_i32 : i32
      %156 = vector.broadcast %155 : i32 to vector<16x512xi32>
      %157 = arith.addi %156, %14 : vector<16x512xi32>
      %c768_i32_53 = arith.constant 768 : i32
      %158 = vector.broadcast %c768_i32_53 : i32 to vector<16x512xi32>
      %159 = arith.cmpi slt, %157, %158 : vector<16x512xi32>
      %cst_54 = arith.constant 0.000000e+00 : f32
      %160 = vector.broadcast %cst_54 : f32 to vector<16x512xf32>
      %161 = arith.select %159, %154, %160 : vector<16x512xi1>, vector<16x512xf32>
      %162 = vector.extract_strided_slice %161 {offsets = [0, 0], sizes = [8, 512], strides = [1, 1]} : vector<16x512xf32> to vector<8x512xf32>
      %163 = arith.addf %150, %162 : vector<8x512xf32>
      %164 = vector.extract_strided_slice %161 {offsets = [8, 0], sizes = [8, 512], strides = [1, 1]} : vector<16x512xf32> to vector<8x512xf32>
      %165 = arith.addf %163, %164 : vector<8x512xf32>
      %c160 = arith.constant 160 : index
      %c0_55 = arith.constant 0 : index
      %166 = vector.load %arg2[%c160, %c0_55] : memref<512x512xf32, #tpu.memory_space<vmem>>, vector<16x512xf32>
      %c160_56 = arith.constant 160 : index
      %c0_57 = arith.constant 0 : index
      %167 = vector.load %arg3[%c160_56, %c0_57] : memref<512x512xf32, #tpu.memory_space<vmem>>, vector<16x512xf32>
      %168 = arith.subf %166, %167 : vector<16x512xf32>
      %169 = arith.mulf %168, %168 : vector<16x512xf32>
      %c160_i32 = arith.constant 160 : i32
      %170 = arith.addi %5, %c160_i32 : i32
      %171 = vector.broadcast %170 : i32 to vector<16x512xi32>
      %172 = arith.addi %171, %14 : vector<16x512xi32>
      %c768_i32_58 = arith.constant 768 : i32
      %173 = vector.broadcast %c768_i32_58 : i32 to vector<16x512xi32>
      %174 = arith.cmpi slt, %172, %173 : vector<16x512xi32>
      %cst_59 = arith.constant 0.000000e+00 : f32
      %175 = vector.broadcast %cst_59 : f32 to vector<16x512xf32>
      %176 = arith.select %174, %169, %175 : vector<16x512xi1>, vector<16x512xf32>
      %177 = vector.extract_strided_slice %176 {offsets = [0, 0], sizes = [8, 512], strides = [1, 1]} : vector<16x512xf32> to vector<8x512xf32>
      %178 = arith.addf %165, %177 : vector<8x512xf32>
      %179 = vector.extract_strided_slice %176 {offsets = [8, 0], sizes = [8, 512], strides = [1, 1]} : vector<16x512xf32> to vector<8x512xf32>
      %180 = arith.addf %178, %179 : vector<8x512xf32>
      %c176 = arith.constant 176 : index
      %c0_60 = arith.constant 0 : index
      %181 = vector.load %arg2[%c176, %c0_60] : memref<512x512xf32, #tpu.memory_space<vmem>>, vector<16x512xf32>
      %c176_61 = arith.constant 176 : index
      %c0_62 = arith.constant 0 : index
      %182 = vector.load %arg3[%c176_61, %c0_62] : memref<512x512xf32, #tpu.memory_space<vmem>>, vector<16x512xf32>
      %183 = arith.subf %181, %182 : vector<16x512xf32>
      %184 = arith.mulf %183, %183 : vector<16x512xf32>
      %c176_i32 = arith.constant 176 : i32
      %185 = arith.addi %5, %c176_i32 : i32
      %186 = vector.broadcast %185 : i32 to vector<16x512xi32>
      %187 = arith.addi %186, %14 : vector<16x512xi32>
      %c768_i32_63 = arith.constant 768 : i32
      %188 = vector.broadcast %c768_i32_63 : i32 to vector<16x512xi32>
      %189 = arith.cmpi slt, %187, %188 : vector<16x512xi32>
      %cst_64 = arith.constant 0.000000e+00 : f32
      %190 = vector.broadcast %cst_64 : f32 to vector<16x512xf32>
      %191 = arith.select %189, %184, %190 : vector<16x512xi1>, vector<16x512xf32>
      %192 = vector.extract_strided_slice %191 {offsets = [0, 0], sizes = [8, 512], strides = [1, 1]} : vector<16x512xf32> to vector<8x512xf32>
      %193 = arith.addf %180, %192 : vector<8x512xf32>
      %194 = vector.extract_strided_slice %191 {offsets = [8, 0], sizes = [8, 512], strides = [1, 1]} : vector<16x512xf32> to vector<8x512xf32>
      %195 = arith.addf %193, %194 : vector<8x512xf32>
      %c192 = arith.constant 192 : index
      %c0_65 = arith.constant 0 : index
      %196 = vector.load %arg2[%c192, %c0_65] : memref<512x512xf32, #tpu.memory_space<vmem>>, vector<16x512xf32>
      %c192_66 = arith.constant 192 : index
      %c0_67 = arith.constant 0 : index
      %197 = vector.load %arg3[%c192_66, %c0_67] : memref<512x512xf32, #tpu.memory_space<vmem>>, vector<16x512xf32>
      %198 = arith.subf %196, %197 : vector<16x512xf32>
      %199 = arith.mulf %198, %198 : vector<16x512xf32>
      %c192_i32 = arith.constant 192 : i32
      %200 = arith.addi %5, %c192_i32 : i32
      %201 = vector.broadcast %200 : i32 to vector<16x512xi32>
      %202 = arith.addi %201, %14 : vector<16x512xi32>
      %c768_i32_68 = arith.constant 768 : i32
      %203 = vector.broadcast %c768_i32_68 : i32 to vector<16x512xi32>
      %204 = arith.cmpi slt, %202, %203 : vector<16x512xi32>
      %cst_69 = arith.constant 0.000000e+00 : f32
      %205 = vector.broadcast %cst_69 : f32 to vector<16x512xf32>
      %206 = arith.select %204, %199, %205 : vector<16x512xi1>, vector<16x512xf32>
      %207 = vector.extract_strided_slice %206 {offsets = [0, 0], sizes = [8, 512], strides = [1, 1]} : vector<16x512xf32> to vector<8x512xf32>
      %208 = arith.addf %195, %207 : vector<8x512xf32>
      %209 = vector.extract_strided_slice %206 {offsets = [8, 0], sizes = [8, 512], strides = [1, 1]} : vector<16x512xf32> to vector<8x512xf32>
      %210 = arith.addf %208, %209 : vector<8x512xf32>
      %c208 = arith.constant 208 : index
      %c0_70 = arith.constant 0 : index
      %211 = vector.load %arg2[%c208, %c0_70] : memref<512x512xf32, #tpu.memory_space<vmem>>, vector<16x512xf32>
      %c208_71 = arith.constant 208 : index
      %c0_72 = arith.constant 0 : index
      %212 = vector.load %arg3[%c208_71, %c0_72] : memref<512x512xf32, #tpu.memory_space<vmem>>, vector<16x512xf32>
      %213 = arith.subf %211, %212 : vector<16x512xf32>
      %214 = arith.mulf %213, %213 : vector<16x512xf32>
      %c208_i32 = arith.constant 208 : i32
      %215 = arith.addi %5, %c208_i32 : i32
      %216 = vector.broadcast %215 : i32 to vector<16x512xi32>
      %217 = arith.addi %216, %14 : vector<16x512xi32>
      %c768_i32_73 = arith.constant 768 : i32
      %218 = vector.broadcast %c768_i32_73 : i32 to vector<16x512xi32>
      %219 = arith.cmpi slt, %217, %218 : vector<16x512xi32>
      %cst_74 = arith.constant 0.000000e+00 : f32
      %220 = vector.broadcast %cst_74 : f32 to vector<16x512xf32>
      %221 = arith.select %219, %214, %220 : vector<16x512xi1>, vector<16x512xf32>
      %222 = vector.extract_strided_slice %221 {offsets = [0, 0], sizes = [8, 512], strides = [1, 1]} : vector<16x512xf32> to vector<8x512xf32>
      %223 = arith.addf %210, %222 : vector<8x512xf32>
      %224 = vector.extract_strided_slice %221 {offsets = [8, 0], sizes = [8, 512], strides = [1, 1]} : vector<16x512xf32> to vector<8x512xf32>
      %225 = arith.addf %223, %224 : vector<8x512xf32>
      %c224 = arith.constant 224 : index
      %c0_75 = arith.constant 0 : index
      %226 = vector.load %arg2[%c224, %c0_75] : memref<512x512xf32, #tpu.memory_space<vmem>>, vector<16x512xf32>
      %c224_76 = arith.constant 224 : index
      %c0_77 = arith.constant 0 : index
      %227 = vector.load %arg3[%c224_76, %c0_77] : memref<512x512xf32, #tpu.memory_space<vmem>>, vector<16x512xf32>
      %228 = arith.subf %226, %227 : vector<16x512xf32>
      %229 = arith.mulf %228, %228 : vector<16x512xf32>
      %c224_i32 = arith.constant 224 : i32
      %230 = arith.addi %5, %c224_i32 : i32
      %231 = vector.broadcast %230 : i32 to vector<16x512xi32>
      %232 = arith.addi %231, %14 : vector<16x512xi32>
      %c768_i32_78 = arith.constant 768 : i32
      %233 = vector.broadcast %c768_i32_78 : i32 to vector<16x512xi32>
      %234 = arith.cmpi slt, %232, %233 : vector<16x512xi32>
      %cst_79 = arith.constant 0.000000e+00 : f32
      %235 = vector.broadcast %cst_79 : f32 to vector<16x512xf32>
      %236 = arith.select %234, %229, %235 : vector<16x512xi1>, vector<16x512xf32>
      %237 = vector.extract_strided_slice %236 {offsets = [0, 0], sizes = [8, 512], strides = [1, 1]} : vector<16x512xf32> to vector<8x512xf32>
      %238 = arith.addf %225, %237 : vector<8x512xf32>
      %239 = vector.extract_strided_slice %236 {offsets = [8, 0], sizes = [8, 512], strides = [1, 1]} : vector<16x512xf32> to vector<8x512xf32>
      %240 = arith.addf %238, %239 : vector<8x512xf32>
      %c240 = arith.constant 240 : index
      %c0_80 = arith.constant 0 : index
      %241 = vector.load %arg2[%c240, %c0_80] : memref<512x512xf32, #tpu.memory_space<vmem>>, vector<16x512xf32>
      %c240_81 = arith.constant 240 : index
      %c0_82 = arith.constant 0 : index
      %242 = vector.load %arg3[%c240_81, %c0_82] : memref<512x512xf32, #tpu.memory_space<vmem>>, vector<16x512xf32>
      %243 = arith.subf %241, %242 : vector<16x512xf32>
      %244 = arith.mulf %243, %243 : vector<16x512xf32>
      %c240_i32 = arith.constant 240 : i32
      %245 = arith.addi %5, %c240_i32 : i32
      %246 = vector.broadcast %245 : i32 to vector<16x512xi32>
      %247 = arith.addi %246, %14 : vector<16x512xi32>
      %c768_i32_83 = arith.constant 768 : i32
      %248 = vector.broadcast %c768_i32_83 : i32 to vector<16x512xi32>
      %249 = arith.cmpi slt, %247, %248 : vector<16x512xi32>
      %cst_84 = arith.constant 0.000000e+00 : f32
      %250 = vector.broadcast %cst_84 : f32 to vector<16x512xf32>
      %251 = arith.select %249, %244, %250 : vector<16x512xi1>, vector<16x512xf32>
      %252 = vector.extract_strided_slice %251 {offsets = [0, 0], sizes = [8, 512], strides = [1, 1]} : vector<16x512xf32> to vector<8x512xf32>
      %253 = arith.addf %240, %252 : vector<8x512xf32>
      %254 = vector.extract_strided_slice %251 {offsets = [8, 0], sizes = [8, 512], strides = [1, 1]} : vector<16x512xf32> to vector<8x512xf32>
      %255 = arith.addf %253, %254 : vector<8x512xf32>
      %c256 = arith.constant 256 : index
      %c0_85 = arith.constant 0 : index
      %256 = vector.load %arg2[%c256, %c0_85] : memref<512x512xf32, #tpu.memory_space<vmem>>, vector<16x512xf32>
      %c256_86 = arith.constant 256 : index
      %c0_87 = arith.constant 0 : index
      %257 = vector.load %arg3[%c256_86, %c0_87] : memref<512x512xf32, #tpu.memory_space<vmem>>, vector<16x512xf32>
      %258 = arith.subf %256, %257 : vector<16x512xf32>
      %259 = arith.mulf %258, %258 : vector<16x512xf32>
      %c256_i32 = arith.constant 256 : i32
      %260 = arith.addi %5, %c256_i32 : i32
      %261 = vector.broadcast %260 : i32 to vector<16x512xi32>
      %262 = arith.addi %261, %14 : vector<16x512xi32>
      %c768_i32_88 = arith.constant 768 : i32
      %263 = vector.broadcast %c768_i32_88 : i32 to vector<16x512xi32>
      %264 = arith.cmpi slt, %262, %263 : vector<16x512xi32>
      %cst_89 = arith.constant 0.000000e+00 : f32
      %265 = vector.broadcast %cst_89 : f32 to vector<16x512xf32>
      %266 = arith.select %264, %259, %265 : vector<16x512xi1>, vector<16x512xf32>
      %267 = vector.extract_strided_slice %266 {offsets = [0, 0], sizes = [8, 512], strides = [1, 1]} : vector<16x512xf32> to vector<8x512xf32>
      %268 = arith.addf %255, %267 : vector<8x512xf32>
      %269 = vector.extract_strided_slice %266 {offsets = [8, 0], sizes = [8, 512], strides = [1, 1]} : vector<16x512xf32> to vector<8x512xf32>
      %270 = arith.addf %268, %269 : vector<8x512xf32>
      %c272 = arith.constant 272 : index
      %c0_90 = arith.constant 0 : index
      %271 = vector.load %arg2[%c272, %c0_90] : memref<512x512xf32, #tpu.memory_space<vmem>>, vector<16x512xf32>
      %c272_91 = arith.constant 272 : index
      %c0_92 = arith.constant 0 : index
      %272 = vector.load %arg3[%c272_91, %c0_92] : memref<512x512xf32, #tpu.memory_space<vmem>>, vector<16x512xf32>
      %273 = arith.subf %271, %272 : vector<16x512xf32>
      %274 = arith.mulf %273, %273 : vector<16x512xf32>
      %c272_i32 = arith.constant 272 : i32
      %275 = arith.addi %5, %c272_i32 : i32
      %276 = vector.broadcast %275 : i32 to vector<16x512xi32>
      %277 = arith.addi %276, %14 : vector<16x512xi32>
      %c768_i32_93 = arith.constant 768 : i32
      %278 = vector.broadcast %c768_i32_93 : i32 to vector<16x512xi32>
      %279 = arith.cmpi slt, %277, %278 : vector<16x512xi32>
      %cst_94 = arith.constant 0.000000e+00 : f32
      %280 = vector.broadcast %cst_94 : f32 to vector<16x512xf32>
      %281 = arith.select %279, %274, %280 : vector<16x512xi1>, vector<16x512xf32>
      %282 = vector.extract_strided_slice %281 {offsets = [0, 0], sizes = [8, 512], strides = [1, 1]} : vector<16x512xf32> to vector<8x512xf32>
      %283 = arith.addf %270, %282 : vector<8x512xf32>
      %284 = vector.extract_strided_slice %281 {offsets = [8, 0], sizes = [8, 512], strides = [1, 1]} : vector<16x512xf32> to vector<8x512xf32>
      %285 = arith.addf %283, %284 : vector<8x512xf32>
      %c288 = arith.constant 288 : index
      %c0_95 = arith.constant 0 : index
      %286 = vector.load %arg2[%c288, %c0_95] : memref<512x512xf32, #tpu.memory_space<vmem>>, vector<16x512xf32>
      %c288_96 = arith.constant 288 : index
      %c0_97 = arith.constant 0 : index
      %287 = vector.load %arg3[%c288_96, %c0_97] : memref<512x512xf32, #tpu.memory_space<vmem>>, vector<16x512xf32>
      %288 = arith.subf %286, %287 : vector<16x512xf32>
      %289 = arith.mulf %288, %288 : vector<16x512xf32>
      %c288_i32 = arith.constant 288 : i32
      %290 = arith.addi %5, %c288_i32 : i32
      %291 = vector.broadcast %290 : i32 to vector<16x512xi32>
      %292 = arith.addi %291, %14 : vector<16x512xi32>
      %c768_i32_98 = arith.constant 768 : i32
      %293 = vector.broadcast %c768_i32_98 : i32 to vector<16x512xi32>
      %294 = arith.cmpi slt, %292, %293 : vector<16x512xi32>
      %cst_99 = arith.constant 0.000000e+00 : f32
      %295 = vector.broadcast %cst_99 : f32 to vector<16x512xf32>
      %296 = arith.select %294, %289, %295 : vector<16x512xi1>, vector<16x512xf32>
      %297 = vector.extract_strided_slice %296 {offsets = [0, 0], sizes = [8, 512], strides = [1, 1]} : vector<16x512xf32> to vector<8x512xf32>
      %298 = arith.addf %285, %297 : vector<8x512xf32>
      %299 = vector.extract_strided_slice %296 {offsets = [8, 0], sizes = [8, 512], strides = [1, 1]} : vector<16x512xf32> to vector<8x512xf32>
      %300 = arith.addf %298, %299 : vector<8x512xf32>
      %c304 = arith.constant 304 : index
      %c0_100 = arith.constant 0 : index
      %301 = vector.load %arg2[%c304, %c0_100] : memref<512x512xf32, #tpu.memory_space<vmem>>, vector<16x512xf32>
      %c304_101 = arith.constant 304 : index
      %c0_102 = arith.constant 0 : index
      %302 = vector.load %arg3[%c304_101, %c0_102] : memref<512x512xf32, #tpu.memory_space<vmem>>, vector<16x512xf32>
      %303 = arith.subf %301, %302 : vector<16x512xf32>
      %304 = arith.mulf %303, %303 : vector<16x512xf32>
      %c304_i32 = arith.constant 304 : i32
      %305 = arith.addi %5, %c304_i32 : i32
      %306 = vector.broadcast %305 : i32 to vector<16x512xi32>
      %307 = arith.addi %306, %14 : vector<16x512xi32>
      %c768_i32_103 = arith.constant 768 : i32
      %308 = vector.broadcast %c768_i32_103 : i32 to vector<16x512xi32>
      %309 = arith.cmpi slt, %307, %308 : vector<16x512xi32>
      %cst_104 = arith.constant 0.000000e+00 : f32
      %310 = vector.broadcast %cst_104 : f32 to vector<16x512xf32>
      %311 = arith.select %309, %304, %310 : vector<16x512xi1>, vector<16x512xf32>
      %312 = vector.extract_strided_slice %311 {offsets = [0, 0], sizes = [8, 512], strides = [1, 1]} : vector<16x512xf32> to vector<8x512xf32>
      %313 = arith.addf %300, %312 : vector<8x512xf32>
      %314 = vector.extract_strided_slice %311 {offsets = [8, 0], sizes = [8, 512], strides = [1, 1]} : vector<16x512xf32> to vector<8x512xf32>
      %315 = arith.addf %313, %314 : vector<8x512xf32>
      %c320 = arith.constant 320 : index
      %c0_105 = arith.constant 0 : index
      %316 = vector.load %arg2[%c320, %c0_105] : memref<512x512xf32, #tpu.memory_space<vmem>>, vector<16x512xf32>
      %c320_106 = arith.constant 320 : index
      %c0_107 = arith.constant 0 : index
      %317 = vector.load %arg3[%c320_106, %c0_107] : memref<512x512xf32, #tpu.memory_space<vmem>>, vector<16x512xf32>
      %318 = arith.subf %316, %317 : vector<16x512xf32>
      %319 = arith.mulf %318, %318 : vector<16x512xf32>
      %c320_i32 = arith.constant 320 : i32
      %320 = arith.addi %5, %c320_i32 : i32
      %321 = vector.broadcast %320 : i32 to vector<16x512xi32>
      %322 = arith.addi %321, %14 : vector<16x512xi32>
      %c768_i32_108 = arith.constant 768 : i32
      %323 = vector.broadcast %c768_i32_108 : i32 to vector<16x512xi32>
      %324 = arith.cmpi slt, %322, %323 : vector<16x512xi32>
      %cst_109 = arith.constant 0.000000e+00 : f32
      %325 = vector.broadcast %cst_109 : f32 to vector<16x512xf32>
      %326 = arith.select %324, %319, %325 : vector<16x512xi1>, vector<16x512xf32>
      %327 = vector.extract_strided_slice %326 {offsets = [0, 0], sizes = [8, 512], strides = [1, 1]} : vector<16x512xf32> to vector<8x512xf32>
      %328 = arith.addf %315, %327 : vector<8x512xf32>
      %329 = vector.extract_strided_slice %326 {offsets = [8, 0], sizes = [8, 512], strides = [1, 1]} : vector<16x512xf32> to vector<8x512xf32>
      %330 = arith.addf %328, %329 : vector<8x512xf32>
      %c336 = arith.constant 336 : index
      %c0_110 = arith.constant 0 : index
      %331 = vector.load %arg2[%c336, %c0_110] : memref<512x512xf32, #tpu.memory_space<vmem>>, vector<16x512xf32>
      %c336_111 = arith.constant 336 : index
      %c0_112 = arith.constant 0 : index
      %332 = vector.load %arg3[%c336_111, %c0_112] : memref<512x512xf32, #tpu.memory_space<vmem>>, vector<16x512xf32>
      %333 = arith.subf %331, %332 : vector<16x512xf32>
      %334 = arith.mulf %333, %333 : vector<16x512xf32>
      %c336_i32 = arith.constant 336 : i32
      %335 = arith.addi %5, %c336_i32 : i32
      %336 = vector.broadcast %335 : i32 to vector<16x512xi32>
      %337 = arith.addi %336, %14 : vector<16x512xi32>
      %c768_i32_113 = arith.constant 768 : i32
      %338 = vector.broadcast %c768_i32_113 : i32 to vector<16x512xi32>
      %339 = arith.cmpi slt, %337, %338 : vector<16x512xi32>
      %cst_114 = arith.constant 0.000000e+00 : f32
      %340 = vector.broadcast %cst_114 : f32 to vector<16x512xf32>
      %341 = arith.select %339, %334, %340 : vector<16x512xi1>, vector<16x512xf32>
      %342 = vector.extract_strided_slice %341 {offsets = [0, 0], sizes = [8, 512], strides = [1, 1]} : vector<16x512xf32> to vector<8x512xf32>
      %343 = arith.addf %330, %342 : vector<8x512xf32>
      %344 = vector.extract_strided_slice %341 {offsets = [8, 0], sizes = [8, 512], strides = [1, 1]} : vector<16x512xf32> to vector<8x512xf32>
      %345 = arith.addf %343, %344 : vector<8x512xf32>
      %c352 = arith.constant 352 : index
      %c0_115 = arith.constant 0 : index
      %346 = vector.load %arg2[%c352, %c0_115] : memref<512x512xf32, #tpu.memory_space<vmem>>, vector<16x512xf32>
      %c352_116 = arith.constant 352 : index
      %c0_117 = arith.constant 0 : index
      %347 = vector.load %arg3[%c352_116, %c0_117] : memref<512x512xf32, #tpu.memory_space<vmem>>, vector<16x512xf32>
      %348 = arith.subf %346, %347 : vector<16x512xf32>
      %349 = arith.mulf %348, %348 : vector<16x512xf32>
      %c352_i32 = arith.constant 352 : i32
      %350 = arith.addi %5, %c352_i32 : i32
      %351 = vector.broadcast %350 : i32 to vector<16x512xi32>
      %352 = arith.addi %351, %14 : vector<16x512xi32>
      %c768_i32_118 = arith.constant 768 : i32
      %353 = vector.broadcast %c768_i32_118 : i32 to vector<16x512xi32>
      %354 = arith.cmpi slt, %352, %353 : vector<16x512xi32>
      %cst_119 = arith.constant 0.000000e+00 : f32
      %355 = vector.broadcast %cst_119 : f32 to vector<16x512xf32>
      %356 = arith.select %354, %349, %355 : vector<16x512xi1>, vector<16x512xf32>
      %357 = vector.extract_strided_slice %356 {offsets = [0, 0], sizes = [8, 512], strides = [1, 1]} : vector<16x512xf32> to vector<8x512xf32>
      %358 = arith.addf %345, %357 : vector<8x512xf32>
      %359 = vector.extract_strided_slice %356 {offsets = [8, 0], sizes = [8, 512], strides = [1, 1]} : vector<16x512xf32> to vector<8x512xf32>
      %360 = arith.addf %358, %359 : vector<8x512xf32>
      %c368 = arith.constant 368 : index
      %c0_120 = arith.constant 0 : index
      %361 = vector.load %arg2[%c368, %c0_120] : memref<512x512xf32, #tpu.memory_space<vmem>>, vector<16x512xf32>
      %c368_121 = arith.constant 368 : index
      %c0_122 = arith.constant 0 : index
      %362 = vector.load %arg3[%c368_121, %c0_122] : memref<512x512xf32, #tpu.memory_space<vmem>>, vector<16x512xf32>
      %363 = arith.subf %361, %362 : vector<16x512xf32>
      %364 = arith.mulf %363, %363 : vector<16x512xf32>
      %c368_i32 = arith.constant 368 : i32
      %365 = arith.addi %5, %c368_i32 : i32
      %366 = vector.broadcast %365 : i32 to vector<16x512xi32>
      %367 = arith.addi %366, %14 : vector<16x512xi32>
      %c768_i32_123 = arith.constant 768 : i32
      %368 = vector.broadcast %c768_i32_123 : i32 to vector<16x512xi32>
      %369 = arith.cmpi slt, %367, %368 : vector<16x512xi32>
      %cst_124 = arith.constant 0.000000e+00 : f32
      %370 = vector.broadcast %cst_124 : f32 to vector<16x512xf32>
      %371 = arith.select %369, %364, %370 : vector<16x512xi1>, vector<16x512xf32>
      %372 = vector.extract_strided_slice %371 {offsets = [0, 0], sizes = [8, 512], strides = [1, 1]} : vector<16x512xf32> to vector<8x512xf32>
      %373 = arith.addf %360, %372 : vector<8x512xf32>
      %374 = vector.extract_strided_slice %371 {offsets = [8, 0], sizes = [8, 512], strides = [1, 1]} : vector<16x512xf32> to vector<8x512xf32>
      %375 = arith.addf %373, %374 : vector<8x512xf32>
      %c384 = arith.constant 384 : index
      %c0_125 = arith.constant 0 : index
      %376 = vector.load %arg2[%c384, %c0_125] : memref<512x512xf32, #tpu.memory_space<vmem>>, vector<16x512xf32>
      %c384_126 = arith.constant 384 : index
      %c0_127 = arith.constant 0 : index
      %377 = vector.load %arg3[%c384_126, %c0_127] : memref<512x512xf32, #tpu.memory_space<vmem>>, vector<16x512xf32>
      %378 = arith.subf %376, %377 : vector<16x512xf32>
      %379 = arith.mulf %378, %378 : vector<16x512xf32>
      %c384_i32 = arith.constant 384 : i32
      %380 = arith.addi %5, %c384_i32 : i32
      %381 = vector.broadcast %380 : i32 to vector<16x512xi32>
      %382 = arith.addi %381, %14 : vector<16x512xi32>
      %c768_i32_128 = arith.constant 768 : i32
      %383 = vector.broadcast %c768_i32_128 : i32 to vector<16x512xi32>
      %384 = arith.cmpi slt, %382, %383 : vector<16x512xi32>
      %cst_129 = arith.constant 0.000000e+00 : f32
      %385 = vector.broadcast %cst_129 : f32 to vector<16x512xf32>
      %386 = arith.select %384, %379, %385 : vector<16x512xi1>, vector<16x512xf32>
      %387 = vector.extract_strided_slice %386 {offsets = [0, 0], sizes = [8, 512], strides = [1, 1]} : vector<16x512xf32> to vector<8x512xf32>
      %388 = arith.addf %375, %387 : vector<8x512xf32>
      %389 = vector.extract_strided_slice %386 {offsets = [8, 0], sizes = [8, 512], strides = [1, 1]} : vector<16x512xf32> to vector<8x512xf32>
      %390 = arith.addf %388, %389 : vector<8x512xf32>
      %c400 = arith.constant 400 : index
      %c0_130 = arith.constant 0 : index
      %391 = vector.load %arg2[%c400, %c0_130] : memref<512x512xf32, #tpu.memory_space<vmem>>, vector<16x512xf32>
      %c400_131 = arith.constant 400 : index
      %c0_132 = arith.constant 0 : index
      %392 = vector.load %arg3[%c400_131, %c0_132] : memref<512x512xf32, #tpu.memory_space<vmem>>, vector<16x512xf32>
      %393 = arith.subf %391, %392 : vector<16x512xf32>
      %394 = arith.mulf %393, %393 : vector<16x512xf32>
      %c400_i32 = arith.constant 400 : i32
      %395 = arith.addi %5, %c400_i32 : i32
      %396 = vector.broadcast %395 : i32 to vector<16x512xi32>
      %397 = arith.addi %396, %14 : vector<16x512xi32>
      %c768_i32_133 = arith.constant 768 : i32
      %398 = vector.broadcast %c768_i32_133 : i32 to vector<16x512xi32>
      %399 = arith.cmpi slt, %397, %398 : vector<16x512xi32>
      %cst_134 = arith.constant 0.000000e+00 : f32
      %400 = vector.broadcast %cst_134 : f32 to vector<16x512xf32>
      %401 = arith.select %399, %394, %400 : vector<16x512xi1>, vector<16x512xf32>
      %402 = vector.extract_strided_slice %401 {offsets = [0, 0], sizes = [8, 512], strides = [1, 1]} : vector<16x512xf32> to vector<8x512xf32>
      %403 = arith.addf %390, %402 : vector<8x512xf32>
      %404 = vector.extract_strided_slice %401 {offsets = [8, 0], sizes = [8, 512], strides = [1, 1]} : vector<16x512xf32> to vector<8x512xf32>
      %405 = arith.addf %403, %404 : vector<8x512xf32>
      %c416 = arith.constant 416 : index
      %c0_135 = arith.constant 0 : index
      %406 = vector.load %arg2[%c416, %c0_135] : memref<512x512xf32, #tpu.memory_space<vmem>>, vector<16x512xf32>
      %c416_136 = arith.constant 416 : index
      %c0_137 = arith.constant 0 : index
      %407 = vector.load %arg3[%c416_136, %c0_137] : memref<512x512xf32, #tpu.memory_space<vmem>>, vector<16x512xf32>
      %408 = arith.subf %406, %407 : vector<16x512xf32>
      %409 = arith.mulf %408, %408 : vector<16x512xf32>
      %c416_i32 = arith.constant 416 : i32
      %410 = arith.addi %5, %c416_i32 : i32
      %411 = vector.broadcast %410 : i32 to vector<16x512xi32>
      %412 = arith.addi %411, %14 : vector<16x512xi32>
      %c768_i32_138 = arith.constant 768 : i32
      %413 = vector.broadcast %c768_i32_138 : i32 to vector<16x512xi32>
      %414 = arith.cmpi slt, %412, %413 : vector<16x512xi32>
      %cst_139 = arith.constant 0.000000e+00 : f32
      %415 = vector.broadcast %cst_139 : f32 to vector<16x512xf32>
      %416 = arith.select %414, %409, %415 : vector<16x512xi1>, vector<16x512xf32>
      %417 = vector.extract_strided_slice %416 {offsets = [0, 0], sizes = [8, 512], strides = [1, 1]} : vector<16x512xf32> to vector<8x512xf32>
      %418 = arith.addf %405, %417 : vector<8x512xf32>
      %419 = vector.extract_strided_slice %416 {offsets = [8, 0], sizes = [8, 512], strides = [1, 1]} : vector<16x512xf32> to vector<8x512xf32>
      %420 = arith.addf %418, %419 : vector<8x512xf32>
      %c432 = arith.constant 432 : index
      %c0_140 = arith.constant 0 : index
      %421 = vector.load %arg2[%c432, %c0_140] : memref<512x512xf32, #tpu.memory_space<vmem>>, vector<16x512xf32>
      %c432_141 = arith.constant 432 : index
      %c0_142 = arith.constant 0 : index
      %422 = vector.load %arg3[%c432_141, %c0_142] : memref<512x512xf32, #tpu.memory_space<vmem>>, vector<16x512xf32>
      %423 = arith.subf %421, %422 : vector<16x512xf32>
      %424 = arith.mulf %423, %423 : vector<16x512xf32>
      %c432_i32 = arith.constant 432 : i32
      %425 = arith.addi %5, %c432_i32 : i32
      %426 = vector.broadcast %425 : i32 to vector<16x512xi32>
      %427 = arith.addi %426, %14 : vector<16x512xi32>
      %c768_i32_143 = arith.constant 768 : i32
      %428 = vector.broadcast %c768_i32_143 : i32 to vector<16x512xi32>
      %429 = arith.cmpi slt, %427, %428 : vector<16x512xi32>
      %cst_144 = arith.constant 0.000000e+00 : f32
      %430 = vector.broadcast %cst_144 : f32 to vector<16x512xf32>
      %431 = arith.select %429, %424, %430 : vector<16x512xi1>, vector<16x512xf32>
      %432 = vector.extract_strided_slice %431 {offsets = [0, 0], sizes = [8, 512], strides = [1, 1]} : vector<16x512xf32> to vector<8x512xf32>
      %433 = arith.addf %420, %432 : vector<8x512xf32>
      %434 = vector.extract_strided_slice %431 {offsets = [8, 0], sizes = [8, 512], strides = [1, 1]} : vector<16x512xf32> to vector<8x512xf32>
      %435 = arith.addf %433, %434 : vector<8x512xf32>
      %c448 = arith.constant 448 : index
      %c0_145 = arith.constant 0 : index
      %436 = vector.load %arg2[%c448, %c0_145] : memref<512x512xf32, #tpu.memory_space<vmem>>, vector<16x512xf32>
      %c448_146 = arith.constant 448 : index
      %c0_147 = arith.constant 0 : index
      %437 = vector.load %arg3[%c448_146, %c0_147] : memref<512x512xf32, #tpu.memory_space<vmem>>, vector<16x512xf32>
      %438 = arith.subf %436, %437 : vector<16x512xf32>
      %439 = arith.mulf %438, %438 : vector<16x512xf32>
      %c448_i32 = arith.constant 448 : i32
      %440 = arith.addi %5, %c448_i32 : i32
      %441 = vector.broadcast %440 : i32 to vector<16x512xi32>
      %442 = arith.addi %441, %14 : vector<16x512xi32>
      %c768_i32_148 = arith.constant 768 : i32
      %443 = vector.broadcast %c768_i32_148 : i32 to vector<16x512xi32>
      %444 = arith.cmpi slt, %442, %443 : vector<16x512xi32>
      %cst_149 = arith.constant 0.000000e+00 : f32
      %445 = vector.broadcast %cst_149 : f32 to vector<16x512xf32>
      %446 = arith.select %444, %439, %445 : vector<16x512xi1>, vector<16x512xf32>
      %447 = vector.extract_strided_slice %446 {offsets = [0, 0], sizes = [8, 512], strides = [1, 1]} : vector<16x512xf32> to vector<8x512xf32>
      %448 = arith.addf %435, %447 : vector<8x512xf32>
      %449 = vector.extract_strided_slice %446 {offsets = [8, 0], sizes = [8, 512], strides = [1, 1]} : vector<16x512xf32> to vector<8x512xf32>
      %450 = arith.addf %448, %449 : vector<8x512xf32>
      %c464 = arith.constant 464 : index
      %c0_150 = arith.constant 0 : index
      %451 = vector.load %arg2[%c464, %c0_150] : memref<512x512xf32, #tpu.memory_space<vmem>>, vector<16x512xf32>
      %c464_151 = arith.constant 464 : index
      %c0_152 = arith.constant 0 : index
      %452 = vector.load %arg3[%c464_151, %c0_152] : memref<512x512xf32, #tpu.memory_space<vmem>>, vector<16x512xf32>
      %453 = arith.subf %451, %452 : vector<16x512xf32>
      %454 = arith.mulf %453, %453 : vector<16x512xf32>
      %c464_i32 = arith.constant 464 : i32
      %455 = arith.addi %5, %c464_i32 : i32
      %456 = vector.broadcast %455 : i32 to vector<16x512xi32>
      %457 = arith.addi %456, %14 : vector<16x512xi32>
      %c768_i32_153 = arith.constant 768 : i32
      %458 = vector.broadcast %c768_i32_153 : i32 to vector<16x512xi32>
      %459 = arith.cmpi slt, %457, %458 : vector<16x512xi32>
      %cst_154 = arith.constant 0.000000e+00 : f32
      %460 = vector.broadcast %cst_154 : f32 to vector<16x512xf32>
      %461 = arith.select %459, %454, %460 : vector<16x512xi1>, vector<16x512xf32>
      %462 = vector.extract_strided_slice %461 {offsets = [0, 0], sizes = [8, 512], strides = [1, 1]} : vector<16x512xf32> to vector<8x512xf32>
      %463 = arith.addf %450, %462 : vector<8x512xf32>
      %464 = vector.extract_strided_slice %461 {offsets = [8, 0], sizes = [8, 512], strides = [1, 1]} : vector<16x512xf32> to vector<8x512xf32>
      %465 = arith.addf %463, %464 : vector<8x512xf32>
      %c480 = arith.constant 480 : index
      %c0_155 = arith.constant 0 : index
      %466 = vector.load %arg2[%c480, %c0_155] : memref<512x512xf32, #tpu.memory_space<vmem>>, vector<16x512xf32>
      %c480_156 = arith.constant 480 : index
      %c0_157 = arith.constant 0 : index
      %467 = vector.load %arg3[%c480_156, %c0_157] : memref<512x512xf32, #tpu.memory_space<vmem>>, vector<16x512xf32>
      %468 = arith.subf %466, %467 : vector<16x512xf32>
      %469 = arith.mulf %468, %468 : vector<16x512xf32>
      %c480_i32 = arith.constant 480 : i32
      %470 = arith.addi %5, %c480_i32 : i32
      %471 = vector.broadcast %470 : i32 to vector<16x512xi32>
      %472 = arith.addi %471, %14 : vector<16x512xi32>
      %c768_i32_158 = arith.constant 768 : i32
      %473 = vector.broadcast %c768_i32_158 : i32 to vector<16x512xi32>
      %474 = arith.cmpi slt, %472, %473 : vector<16x512xi32>
      %cst_159 = arith.constant 0.000000e+00 : f32
      %475 = vector.broadcast %cst_159 : f32 to vector<16x512xf32>
      %476 = arith.select %474, %469, %475 : vector<16x512xi1>, vector<16x512xf32>
      %477 = vector.extract_strided_slice %476 {offsets = [0, 0], sizes = [8, 512], strides = [1, 1]} : vector<16x512xf32> to vector<8x512xf32>
      %478 = arith.addf %465, %477 : vector<8x512xf32>
      %479 = vector.extract_strided_slice %476 {offsets = [8, 0], sizes = [8, 512], strides = [1, 1]} : vector<16x512xf32> to vector<8x512xf32>
      %480 = arith.addf %478, %479 : vector<8x512xf32>
      %c496 = arith.constant 496 : index
      %c0_160 = arith.constant 0 : index
      %481 = vector.load %arg2[%c496, %c0_160] : memref<512x512xf32, #tpu.memory_space<vmem>>, vector<16x512xf32>
      %c496_161 = arith.constant 496 : index
      %c0_162 = arith.constant 0 : index
      %482 = vector.load %arg3[%c496_161, %c0_162] : memref<512x512xf32, #tpu.memory_space<vmem>>, vector<16x512xf32>
      %483 = arith.subf %481, %482 : vector<16x512xf32>
      %484 = arith.mulf %483, %483 : vector<16x512xf32>
      %c496_i32 = arith.constant 496 : i32
      %485 = arith.addi %5, %c496_i32 : i32
      %486 = vector.broadcast %485 : i32 to vector<16x512xi32>
      %487 = arith.addi %486, %14 : vector<16x512xi32>
      %c768_i32_163 = arith.constant 768 : i32
      %488 = vector.broadcast %c768_i32_163 : i32 to vector<16x512xi32>
      %489 = arith.cmpi slt, %487, %488 : vector<16x512xi32>
      %cst_164 = arith.constant 0.000000e+00 : f32
      %490 = vector.broadcast %cst_164 : f32 to vector<16x512xf32>
      %491 = arith.select %489, %484, %490 : vector<16x512xi1>, vector<16x512xf32>
      %492 = vector.extract_strided_slice %491 {offsets = [0, 0], sizes = [8, 512], strides = [1, 1]} : vector<16x512xf32> to vector<8x512xf32>
      %493 = arith.addf %480, %492 : vector<8x512xf32>
      %494 = vector.extract_strided_slice %491 {offsets = [8, 0], sizes = [8, 512], strides = [1, 1]} : vector<16x512xf32> to vector<8x512xf32>
      %495 = arith.addf %493, %494 : vector<8x512xf32>
      %c0_165 = arith.constant 0 : index
      %c0_166 = arith.constant 0 : index
      %c0_167 = arith.constant 0 : index
      %496 = vector.load %arg4[%c0_165, %c0_166, %c0_167] : memref<1x8x512xf32, #tpu.memory_space<vmem>>, vector<1x8x512xf32>
      %497 = vector.shape_cast %496 : vector<1x8x512xf32> to vector<8x512xf32>
      %498 = arith.addf %497, %495 : vector<8x512xf32>
      %c0_168 = arith.constant 0 : index
      %c0_169 = arith.constant 0 : index
      %c0_170 = arith.constant 0 : index
      %499 = vector.load %arg4[%c0_168, %c0_169, %c0_170] : memref<1x8x512xf32, #tpu.memory_space<vmem>>, vector<1x8x512xf32>
      %500 = vector.shape_cast %499 : vector<1x8x512xf32> to vector<8x512xf32>
      %501 = vector.shape_cast %498 : vector<8x512xf32> to vector<1x8x512xf32>
      tpu.vector_store %arg4[%c0_168, %c0_169, %c0_170], %501 {strides = array<i32>} : memref<1x8x512xf32, #tpu.memory_space<vmem>>, vector<1x8x512xf32>,
    } else {
    }
    return
  }
  func.func @transform_0(%arg0: i32, %arg1: i32) -> (i32, i32) {
    %c2_i32 = arith.constant 2 : i32
    %0 = arith.muli %arg0, %c2_i32 : i32
    %1 = arith.addi %0, %arg1 : i32
    %c0_i32 = arith.constant 0 : i32
    %c0_i32_0 = arith.constant 0 : i32
    return %1, %c0_i32 : i32, i32
  }
  func.func @transform_1(%arg0: i32, %arg1: i32) -> (i32, i32) {
    %c2_i32 = arith.constant 2 : i32
    %0 = arith.muli %arg0, %c2_i32 : i32
    %1 = arith.addi %0, %arg1 : i32
    %c0_i32 = arith.constant 0 : i32
    %c0_i32_0 = arith.constant 0 : i32
    return %1, %c0_i32 : i32, i32
  }
  func.func @transform_2(%arg0: i32, %arg1: i32) -> (i32, i32, i32) {
    %c0_i32 = arith.constant 0 : i32
    %c0_i32_0 = arith.constant 0 : i32
    %c0_i32_1 = arith.constant 0 : i32
    return %arg0, %c0_i32, %c0_i32_0 : i32, i32, i32
  }
}

</mosaic_0001>

<bundles_post_ra>
// kernel: tpu_custom_call.1
= control target key start
LH: loop header
LB: loop body
LE: loop exit
PB: predicated region body
PF: predicated region fallthrough
CT: control target
= control target key end

     0   :  { %7 = vsyncpa [#allocation3], 0  ;;  %s5049_s0 = inlined_call_operand.hbm [shape: f32[768,512], index: 0, kind: input, shape index: {}]   ;;  %s5050_s1 = inlined_call_operand.hbm [shape: f32[768,512], index: 1, kind: input, shape index: {}]   ;;  %s5051_s2 = inlined_call_operand.hbm [shape: f32[1,8,512], index: 2, kind: output, shape index: {}]  }
   0x1   :  { %9 = vsyncpa [#allocation3 + $0x1], 0 }
   0x2   :  { %10 = vsyncpa [#allocation6], 0 }
   0x3   :  { %12 = vsyncpa [#allocation6 + $0x1], 0 }
   0x4   :  { %13 = vsyncpa [#allocation4], 0  ;;  %s3668_s9 = smov 0   ;;  %s3670_s10 = smov 0  }
   0x5   :  { %s3672_s11 = smov 0   ;;  %s3674_s12 = smov 0  }
   0x6   :  { %s3676_s13 = smov 0   ;;  %s3678_s14 = smov 0  }
   0x7 LB: > { %s3404_s15 = sadd.s32 4294967295, %s3643_s14   ;;  %s28_s16 = sadd.s32 1, %s3639_s13  ;;  %s3643_s14 = sphi %s3678_s14, %s19_s14   ;;  %s3639_s13 = sphi %s3676_s13, %s5059_s13   ;;  %s3635_s12 = sphi %s3674_s12, %s5058_s12   ;;  %s3631_s11 = sphi %s3672_s11, %s5057_s11   ;;  %s3627_s10 = sphi %s3670_s10, %s5056_s10   ;;  %s3623_s9 = sphi %s3668_s9, %s5055_s9  }
   0x8   : > { %p29_p0 = scmp.ge.s32.totalorder %s28_s16, 2  ;;  %s42_s17 = sadd.s32 1, %s3631_s11 }
   0x9   : > { %p49_p1 = scmp.ne.s32.totalorder %s3631_s11, %s3627_s10  ;;  %p50_p2 = scmp.eq.s32.totalorder %s3643_s14, 0 }
   0xa   : > { %s5061_s16 = smov (%p29_p0, %s28_s16), 0  ;;  %p55_p4 = scmp.ne.s32.totalorder %s3627_s10, %s3623_s9 }
   0xb   : > { %p3704_p3 = por %p50_p2, %p49_p1  ;;  %s39_s19 = ssub.s32 %s3639_s13, %s5061_s16 }
   0xc   : > { %p56_p5 = scmp.eq.s32.totalorder %s3404_s15, 0  ;;  %p40_p6 = scmp.eq.s32.totalorder %s39_s19, 0 }
   0xd   : > { %p3406_p8 = scmp.ge.s32.totalorder %s3643_s14, 2 }
   0xe   : > { %p3713_p7 = por %p56_p5, %p55_p4 }
   0xf   : > { %s3718_s21 = scalar_select %p40_p6, %s3631_s11, %s42_s17  }
  0x10   : > { %131 = sbr.rel (%p3406_p8) target bundleno = 93 (0x5d), region = 16 }
  0x17   : > { %134 = sbr.rel (!%p3704_p3) target bundleno = 58 (0x3a), region = 20  ;;  %s135_s22 = sand.u32 (%p3704_p3), 1, %s3631_s11  }
  0x18   : > { %s3408_s23 = sshll.u32 (%p3704_p3), %s3639_s13, 6  ;;  %s3407_s24 = sshll.u32 (%p3704_p3), %s135_s22, 11 }
  0x19   : > { %s143_s25 = ssub.s32 (%p3704_p3), 96, %s3408_s23  ;;  %s3728_s28 = scalar_lea.sflag (%p3704_p3), [#allocation3], %s135_s22 }
  0x1a   : > { %p144_p9 = scmp.lt.s32.totalorder (%p3704_p3), %s143_s25, 64  ;;  %s139_s29 = scalar_lea.vmem (%p3704_p3), [#allocation2], %s3407_s24 }
  0x1e   : > { %s5063_s25 = smov (!%p144_p9, %s143_s25), 64 }
  0x1f   : > { %s3725_s26 = sshll.u32 %s5063_s25, 9 }
  0x20   : > { %s149_s27 = ssub.s32 32768, %s3725_s26 }
  0x21   : > { %150 = vsyncadd %s3728_s28, %s149_s27  ;;  %p3411_p10 = scmp.ne.s32.totalorder %s3725_s26, 0  ;;  %s3437_s30 = sshll.u32 %s3639_s13, 15 }
  0x22   : > { %s3736_s5 = scalar_lea.hbm %s5049_s0, %s3437_s30  ;;  %s156_s6 = sshll.u32 %s139_s29, 4  ;;  %s3738_s6 = int_to_ptr.vmem [resolvable:$true] %s156_s6 }
  0x23   : > { %s3503_s7 = scalar_lea.hbm %s3736_s5, %s3725_s26  ;;  %s3507_s17 = scalar_lea.hbm %s5049_s0, 49152 }
  0x24   : > { %p3504_p11 = scmp.ne.s32.totalorder %s3736_s5, %s3503_s7  ;;  %p3508_p0 = scmp.lt.u32.totalorder %s3736_s5, %s5049_s0 }
  0x25   : > { %p3509_p1 = scmp.lt.u32.totalorder %s3507_s17, %s3503_s7  ;;  %p3511_p4 = scmp.lt.u32.totalorder %s3503_s7, %s3736_s5 }
  0x26   : > { %p3505_p12 = pnand %p3504_p11, %p3411_p10 }
  0x27   : > { %p3510_p2 = por %p3509_p1, %p3508_p0 }
  0x28   : > { %p3506_p13 = pneg %p3505_p12 }
  0x29   : > { %p3512_p5 = por %p3511_p4, %p3510_p2 }
  0x2b   : > { %p3513_p6 = pnand %p3512_p5, %p3506_p13 }
  0x2d   : > { %3516 = shalt.err (!%p3513_p6)
}
  0x2e   : > { %s3517_s23 = scalar_lea.vmem %s3738_s6, %s3725_s26  ;;  %s3645_s24 = smov [#allocation2]  }
  0x2f   : > { %p3518_p8 = scmp.ne.s32.totalorder %s3738_s6, %s3517_s23  ;;  %s3521_s25 = sshll.u32 %s3645_s24, 4  ;;  %s3522_s25 = int_to_ptr.vmem [resolvable:$false] %s3521_s25 }
  0x30   : > { %s3523_s27 = scalar_lea.vmem %s3522_s25, 65536  ;;  %p3524_p12 = scmp.lt.s32.totalorder %s3738_s6, %s3522_s25 }
  0x31   : > { %p3519_p9 = pnand %p3518_p8, %p3411_p10  ;;  %p3525_p0 = scmp.lt.s32.totalorder %s3523_s27, %s3517_s23 }
  0x33   : > { %p3520_p11 = pneg %p3519_p9  ;;  %p3526_p1 = por %p3525_p0, %p3524_p12 }
  0x35   : > { %p3527_p2 = pnand %p3526_p1, %p3520_p11 }
  0x37   : > { %3530 = shalt.err (!%p3527_p2)
}
  0x38   : > { %s3646_s29 = smov 512   ;;  %s3647_s30 = smov 32  }
  0x39   : > { %162 = dma.hbm_to_vmem [thread:$0]  (%p3411_p10), %s3736_s5, %s3725_s26, %s3738_s6, %s3728_s28, %s3646_s29, %s3646_s29, %s3647_s30  }
  0x3a PF: > { %165 = sbr.rel (!%p3704_p3) target bundleno = 93 (0x5d), region = 24  ;;  %s166_s3 = sand.u32 (%p3704_p3), 1, %s3631_s11  }
  0x3b   : > { %s3417_s4 = sshll.u32 (%p3704_p3), %s3639_s13, 6  ;;  %s3416_s7 = sshll.u32 (%p3704_p3), %s166_s3, 11 }
  0x3c   : > { %s174_s8 = ssub.s32 (%p3704_p3), 96, %s3417_s4  ;;  %s3772_s19 = scalar_lea.sflag (%p3704_p3), [#allocation6], %s166_s3 }
  0x3d   : > { %p175_p13 = scmp.lt.s32.totalorder (%p3704_p3), %s174_s8, 64  ;;  %s170_s26 = scalar_lea.vmem (%p3704_p3), [#allocation5], %s3416_s7 }
  0x41   : > { %s5065_s8 = smov (!%p175_p13, %s174_s8), 64 }
  0x42   : > { %s3769_s9 = sshll.u32 %s5065_s8, 9 }
  0x43   : > { %s180_s17 = ssub.s32 32768, %s3769_s9 }
  0x44   : > { %181 = vsyncadd %s3772_s19, %s180_s17  ;;  %p3420_p3 = scmp.ne.s32.totalorder %s3769_s9, 0  ;;  %s3440_s18 = sshll.u32 %s3639_s13, 15 }
  0x45   : > { %s3780_s6 = scalar_lea.hbm %s5050_s1, %s3440_s18  ;;  %s187_s22 = sshll.u32 %s170_s26, 4  ;;  %s3782_s22 = int_to_ptr.vmem [resolvable:$true] %s187_s22 }
  0x46   : > { %s3531_s23 = scalar_lea.hbm %s3780_s6, %s3769_s9  ;;  %s3535_s27 = scalar_lea.hbm %s5050_s1, 49152 }
  0x47   : > { %p3532_p10 = scmp.ne.s32.totalorder %s3780_s6, %s3531_s23  ;;  %p3536_p6 = scmp.lt.u32.totalorder %s3780_s6, %s5050_s1 }
  0x48   : > { %p3537_p8 = scmp.lt.u32.totalorder %s3535_s27, %s3531_s23  ;;  %p3539_p11 = scmp.lt.u32.totalorder %s3531_s23, %s3780_s6 }
  0x49   : > { %p3533_p4 = pnand %p3532_p10, %p3420_p3 }
  0x4a   : > { %p3538_p9 = por %p3537_p8, %p3536_p6 }
  0x4b   : > { %p3534_p5 = pneg %p3533_p4 }
  0x4c   : > { %p3540_p12 = por %p3539_p11, %p3538_p9 }
  0x4e   : > { %p3541_p0 = pnand %p3540_p12, %p3534_p5 }
  0x50   : > { %3544 = shalt.err (!%p3541_p0)
}
  0x51   : > { %s3545_s3 = scalar_lea.vmem %s3782_s22, %s3769_s9  ;;  %s3648_s4 = smov [#allocation5]  }
  0x52   : > { %p3546_p1 = scmp.ne.s32.totalorder %s3782_s22, %s3545_s3  ;;  %s3549_s7 = sshll.u32 %s3648_s4, 4  ;;  %s3550_s7 = int_to_ptr.vmem [resolvable:$false] %s3549_s7 }
  0x53   : > { %s3551_s8 = scalar_lea.vmem %s3550_s7, 65536  ;;  %p3552_p10 = scmp.lt.s32.totalorder %s3782_s22, %s3550_s7 }
  0x54   : > { %p3547_p2 = pnand %p3546_p1, %p3420_p3  ;;  %p3553_p4 = scmp.lt.s32.totalorder %s3551_s8, %s3545_s3 }
  0x56   : > { %p3548_p13 = pneg %p3547_p2  ;;  %p3554_p6 = por %p3553_p4, %p3552_p10 }
  0x58   : > { %p3555_p8 = pnand %p3554_p6, %p3548_p13 }
  0x5a   : > { %3558 = shalt.err (!%p3555_p8)
}
  0x5b   : > { %s3649_s17 = smov 512   ;;  %s3650_s26 = smov 32  }
  0x5c   : > { %193 = dma.hbm_to_vmem [thread:$0]  (%p3420_p3), %s3780_s6, %s3769_s9, %s3782_s22, %s3772_s19, %s3649_s17, %s3649_s17, %s3650_s26  }
  0x5d PF: > { %p3425_p5 = scmp.ge.s32.totalorder %s3643_s14, 1  ;;  %p195_p9 = scmp.lt.s32.totalorder %s3643_s14, 3 }
  0x5f   : > { %p196_p11 = pnand %p3425_p5, %p195_p9 }
  0x60   : > { %s201_s18 = sand.u32 (!%p196_p11), 1, %s3627_s10  }
  0x61   : > { %199 = sbr.rel (%p196_p11) target bundleno = 652 (0x28c), region = 28  ;;  %s3426_s28 = sshll.u32 (!%p196_p11), %s201_s18, 11 }
  0x62   : > { %s202_s5 = scalar_lea.sflag (!%p196_p11), [#allocation3], %s201_s18  ;;  %s3812_s23 = scalar_lea.vmem (!%p196_p11), [#allocation2], %s3426_s28 }
  0x68   : > { %3610 = dma.done.wait (%p3713_p7), %s202_s5, 32768  }
  0x69   : > { %3612 = vsyncadd (%p3713_p7), %s202_s5, 4294934528  ;;  %s211_s9 = scalar_lea.sflag [#allocation6], %s201_s18  ;;  %s3818_s19 = scalar_lea.vmem [#allocation5], %s3426_s28 }
  0x6a   : > { %3614 = dma.done.wait (%p3713_p7), %s211_s9, 32768  }
  0x6b   : > { %3616 = vsyncadd (%p3713_p7), %s211_s9, 4294934528  ;;  %p3428_p3 = scmp.ne.s32.totalorder %s3635_s12, 0 }
  0x6c   : > { %v3651_v0 = vmov (!%p3428_p3), 0.0  }
  0x6d   : > { %254 = sbr.rel (%p3428_p3) target bundleno = 116 (0x74), region = 40  ;;  %255 = vst [vmem:[#allocation7] sm:$0xff] (!%p3428_p3), %v3651_v0  ;;  %256 = vst [vmem:[#allocation7 + $0x8] sm:$0xff] (!%p3428_p3), %v3651_v0 }
  0x6e   : > { %257 = vst [vmem:[#allocation7 + $0x10] sm:$0xff] (!%p3428_p3), %v3651_v0  ;;  %258 = vst [vmem:[#allocation7 + $0x18] sm:$0xff] (!%p3428_p3), %v3651_v0 }
  0x74 PF: > { %s3826_s6 = sshll.u32 %s3635_s12, 9  ;;  %p3430_p12 = scmp.ge.s32.totalorder %s3635_s12, 1 }
  0x75   : > { %v266_v1 = vld [vmem:[%s3812_s23] sm:$0xff] (!%p3430_p12)  ;;  %v267_v2 = vld [vmem:[%s3812_s23 + $0x8] sm:$0xff] (!%p3430_p12)  ;;  %v268_v3 = vld [vmem:[%s3812_s23 + $0x10] sm:$0xff] (!%p3430_p12) }
  0x76   : > { %265 = sbr.rel (%p3430_p12) target bundleno = 319 (0x13f), region = 44  ;;  %v269_v4 = vld [vmem:[%s3812_s23 + $0x18] sm:$0xff] (!%p3430_p12)  ;;  %v270_v5 = vld [vmem:[%s3812_s23 + $0x20] sm:$0xff] (!%p3430_p12)  ;;  %v271_v6 = vld [vmem:[%s3812_s23 + $0x28] sm:$0xff] (!%p3430_p12) }
  0x77   : > { %v272_v7 = vld [vmem:[%s3812_s23 + $0x30] sm:$0xff] (!%p3430_p12)  ;;  %v273_v8 = vld [vmem:[%s3812_s23 + $0x38] sm:$0xff] (!%p3430_p12)  ;;  %v274_v9 = vld [vmem:[%s3818_s19] sm:$0xff] (!%p3430_p12) }
  0x78   : > { %v275_v10 = vld [vmem:[%s3818_s19 + $0x8] sm:$0xff] (!%p3430_p12)  ;;  %v276_v11 = vld [vmem:[%s3818_s19 + $0x10] sm:$0xff] (!%p3430_p12)  ;;  %v277_v12 = vld [vmem:[%s3818_s19 + $0x18] sm:$0xff] (!%p3430_p12)  ;;  %v282_v13 = vsub.f32 (!%p3430_p12), %v266_v1, %v274_v9 }
  0x79   : > { %v278_v14 = vld [vmem:[%s3818_s19 + $0x20] sm:$0xff] (!%p3430_p12)  ;;  %v279_v15 = vld [vmem:[%s3818_s19 + $0x28] sm:$0xff] (!%p3430_p12)  ;;  %v280_v16 = vld [vmem:[%s3818_s19 + $0x30] sm:$0xff] (!%p3430_p12)  ;;  %v283_v17 = vsub.f32 (!%p3430_p12), %v267_v2, %v275_v10  ;;  %v284_v18 = vsub.f32 (!%p3430_p12), %v268_v3, %v276_v11  ;;  %v285_v19 = vsub.f32 (!%p3430_p12), %v269_v4, %v277_v12 }
  0x7a   : > { %v281_v20 = vld [vmem:[%s3818_s19 + $0x38] sm:$0xff] (!%p3430_p12)  ;;  %v286_v21 = vsub.f32 (!%p3430_p12), %v270_v5, %v278_v14  ;;  %v287_v22 = vsub.f32 (!%p3430_p12), %v271_v6, %v279_v15  ;;  %v288_v23 = vsub.f32 (!%p3430_p12), %v272_v7, %v280_v16  ;;  %v290_v24 = vmul.f32 (!%p3430_p12), %v282_v13, %v282_v13  ;;  %v306_v25 = vld [vmem:[%s3812_s23 + $0x40] sm:$0xff] (!%p3430_p12)  ;;  %v307_v26 = vld [vmem:[%s3812_s23 + $0x48] sm:$0xff] (!%p3430_p12) }
  0x7b   : > { %v289_v27 = vsub.f32 (!%p3430_p12), %v273_v8, %v281_v20  ;;  %v291_v28 = vmul.f32 (!%p3430_p12), %v283_v17, %v283_v17  ;;  %v292_v29 = vmul.f32 (!%p3430_p12), %v284_v18, %v284_v18  ;;  %v293_v30 = vmul.f32 (!%p3430_p12), %v285_v19, %v285_v19  ;;  %v308_v31 = vld [vmem:[%s3812_s23 + $0x50] sm:$0xff] (!%p3430_p12)  ;;  %v309_v32 = vld [vmem:[%s3812_s23 + $0x58] sm:$0xff] (!%p3430_p12)  ;;  %v310_v33 = vld [vmem:[%s3812_s23 + $0x60] sm:$0xff] (!%p3430_p12) }
  0x7c   : > { %v294_v34 = vmul.f32 (!%p3430_p12), %v286_v21, %v286_v21  ;;  %v295_v35 = vmul.f32 (!%p3430_p12), %v287_v22, %v287_v22  ;;  %v296_v36 = vmul.f32 (!%p3430_p12), %v288_v23, %v288_v23  ;;  %v311_v37 = vld [vmem:[%s3812_s23 + $0x68] sm:$0xff] (!%p3430_p12)  ;;  %v312_v38 = vld [vmem:[%s3812_s23 + $0x70] sm:$0xff] (!%p3430_p12)  ;;  %v313_v39 = vld [vmem:[%s3812_s23 + $0x78] sm:$0xff] (!%p3430_p12) }
  0x7d   : > { %v297_v40 = vmul.f32 %v289_v27, %v289_v27  ;;  %v314_v41 = vld [vmem:[%s3818_s19 + $0x40] sm:$0xff]  ;;  %v315_v42 = vld [vmem:[%s3818_s19 + $0x48] sm:$0xff]  ;;  %v316_v43 = vld [vmem:[%s3818_s19 + $0x50] sm:$0xff] }
  0x7e   : > { %v302_v44 = vadd.f32 %v294_v34, %v290_v24  ;;  %v303_v45 = vadd.f32 %v295_v35, %v291_v28  ;;  %v304_v46 = vadd.f32 %v296_v36, %v292_v29  ;;  %v317_v47 = vld [vmem:[%s3818_s19 + $0x58] sm:$0xff]  ;;  %v318_v48 = vld [vmem:[%s3818_s19 + $0x60] sm:$0xff]  ;;  %v319_v49 = vld [vmem:[%s3818_s19 + $0x68] sm:$0xff]  ;;  %v322_v50 = vsub.f32 %v306_v25, %v314_v41 }
  0x7f   : > { %v305_v51 = vadd.f32 %v297_v40, %v293_v30  ;;  %v320_v52 = vld [vmem:[%s3818_s19 + $0x70] sm:$0xff]  ;;  %v321_v53 = vld [vmem:[%s3818_s19 + $0x78] sm:$0xff]  ;;  %v323_v54 = vsub.f32 %v307_v26, %v315_v42  ;;  %v324_v55 = vsub.f32 %v308_v31, %v316_v43  ;;  %v325_v56 = vsub.f32 %v309_v32, %v317_v47  ;;  %v346_v57 = vld [vmem:[%s3812_s23 + $0x80] sm:$0xff] }
  0x80   : > { %v326_v58 = vsub.f32 %v310_v33, %v318_v48  ;;  %v327_v59 = vsub.f32 %v311_v37, %v319_v49  ;;  %v328_v60 = vsub.f32 %v312_v38, %v320_v52  ;;  %v329_v61 = vsub.f32 %v313_v39, %v321_v53  ;;  %v347_v62 = vld [vmem:[%s3812_s23 + $0x88] sm:$0xff]  ;;  %v348_v63 = vld [vmem:[%s3812_s23 + $0x90] sm:$0xff]  ;;  %v349_v0 = vld [vmem:[%s3812_s23 + $0x98] sm:$0xff] }
  0x81   : > { %v330_v1 = vmul.f32 %v322_v50, %v322_v50  ;;  %v331_v2 = vmul.f32 %v323_v54, %v323_v54  ;;  %v332_v3 = vmul.f32 %v324_v55, %v324_v55  ;;  %v333_v4 = vmul.f32 %v325_v56, %v325_v56  ;;  %v350_v5 = vld [vmem:[%s3812_s23 + $0xa0] sm:$0xff]  ;;  %v351_v6 = vld [vmem:[%s3812_s23 + $0xa8] sm:$0xff]  ;;  %v352_v7 = vld [vmem:[%s3812_s23 + $0xb0] sm:$0xff] }
  0x82   : > { %v334_v8 = vmul.f32 %v326_v58, %v326_v58  ;;  %v335_v9 = vmul.f32 %v327_v59, %v327_v59  ;;  %v336_v10 = vmul.f32 %v328_v60, %v328_v60  ;;  %v337_v11 = vmul.f32 %v329_v61, %v329_v61  ;;  %v353_v12 = vld [vmem:[%s3812_s23 + $0xb8] sm:$0xff]  ;;  %v354_v13 = vld [vmem:[%s3818_s19 + $0x80] sm:$0xff]  ;;  %v355_v14 = vld [vmem:[%s3818_s19 + $0x88] sm:$0xff] }
  0x83   : > { %v338_v15 = vadd.f32 %v330_v1, %v302_v44  ;;  %v339_v16 = vadd.f32 %v331_v2, %v303_v45  ;;  %v340_v17 = vadd.f32 %v332_v3, %v304_v46  ;;  %v341_v18 = vadd.f32 %v333_v4, %v305_v51  ;;  %v356_v19 = vld [vmem:[%s3818_s19 + $0x90] sm:$0xff]  ;;  %v357_v20 = vld [vmem:[%s3818_s19 + $0x98] sm:$0xff]  ;;  %v358_v21 = vld [vmem:[%s3818_s19 + $0xa0] sm:$0xff] }
  0x84   : > { %v359_v22 = vld [vmem:[%s3818_s19 + $0xa8] sm:$0xff]  ;;  %v360_v23 = vld [vmem:[%s3818_s19 + $0xb0] sm:$0xff]  ;;  %v361_v24 = vld [vmem:[%s3818_s19 + $0xb8] sm:$0xff]  ;;  %v362_v25 = vsub.f32 %v346_v57, %v354_v13  ;;  %v363_v26 = vsub.f32 %v347_v62, %v355_v14  ;;  %v364_v27 = vsub.f32 %v348_v63, %v356_v19  ;;  %v365_v28 = vsub.f32 %v349_v0, %v357_v20 }
  0x85   : > { %v342_v29 = vadd.f32 %v338_v15, %v334_v8  ;;  %v343_v30 = vadd.f32 %v339_v16, %v335_v9  ;;  %v344_v31 = vadd.f32 %v340_v17, %v336_v10  ;;  %v345_v32 = vadd.f32 %v341_v18, %v337_v11  ;;  %v386_v33 = vld [vmem:[%s3812_s23 + $0xc0] sm:$0xff]  ;;  %v387_v38 = vld [vmem:[%s3812_s23 + $0xc8] sm:$0xff]  ;;  %v388_v39 = vld [vmem:[%s3812_s23 + $0xd0] sm:$0xff] }
  0x86   : > { %v366_v34 = vsub.f32 %v350_v5, %v358_v21  ;;  %v367_v35 = vsub.f32 %v351_v6, %v359_v22  ;;  %v368_v36 = vsub.f32 %v352_v7, %v360_v23  ;;  %v369_v37 = vsub.f32 %v353_v12, %v361_v24  ;;  %v389_v40 = vld [vmem:[%s3812_s23 + $0xd8] sm:$0xff]  ;;  %v390_v45 = vld [vmem:[%s3812_s23 + $0xe0] sm:$0xff]  ;;  %v391_v46 = vld [vmem:[%s3812_s23 + $0xe8] sm:$0xff] }
  0x87   : > { %v370_v41 = vmul.f32 %v362_v25, %v362_v25  ;;  %v371_v42 = vmul.f32 %v363_v26, %v363_v26  ;;  %v372_v43 = vmul.f32 %v364_v27, %v364_v27  ;;  %v373_v44 = vmul.f32 %v365_v28, %v365_v28  ;;  %v392_v47 = vld [vmem:[%s3812_s23 + $0xf0] sm:$0xff]  ;;  %v393_v48 = vld [vmem:[%s3812_s23 + $0xf8] sm:$0xff]  ;;  %v394_v49 = vld [vmem:[%s3818_s19 + $0xc0] sm:$0xff] }
  0x88   : > { %v374_v50 = vmul.f32 %v366_v34, %v366_v34  ;;  %v375_v51 = vmul.f32 %v367_v35, %v367_v35  ;;  %v376_v52 = vmul.f32 %v368_v36, %v368_v36  ;;  %v377_v53 = vmul.f32 %v369_v37, %v369_v37  ;;  %v395_v54 = vld [vmem:[%s3818_s19 + $0xc8] sm:$0xff]  ;;  %v396_v55 = vld [vmem:[%s3818_s19 + $0xd0] sm:$0xff]  ;;  %v397_v56 = vld [vmem:[%s3818_s19 + $0xd8] sm:$0xff] }
  0x89   : > { %v378_v57 = vadd.f32 %v370_v41, %v342_v29  ;;  %v379_v58 = vadd.f32 %v371_v42, %v343_v30  ;;  %v380_v59 = vadd.f32 %v372_v43, %v344_v31  ;;  %v381_v60 = vadd.f32 %v373_v44, %v345_v32  ;;  %v398_v61 = vld [vmem:[%s3818_s19 + $0xe0] sm:$0xff]  ;;  %v399_v62 = vld [vmem:[%s3818_s19 + $0xe8] sm:$0xff]  ;;  %v400_v63 = vld [vmem:[%s3818_s19 + $0xf0] sm:$0xff] }
  0x8a   : > { %v401_v0 = vld [vmem:[%s3818_s19 + $0xf8] sm:$0xff]  ;;  %v402_v1 = vsub.f32 %v386_v33, %v394_v49  ;;  %v403_v2 = vsub.f32 %v387_v38, %v395_v54  ;;  %v404_v3 = vsub.f32 %v388_v39, %v396_v55  ;;  %v405_v4 = vsub.f32 %v389_v40, %v397_v56  ;;  %v426_v9 = vld [vmem:[%s3812_s23 + $0x100] sm:$0xff]  ;;  %v427_v14 = vld [vmem:[%s3812_s23 + $0x108] sm:$0xff] }
  0x8b   : > { %v382_v5 = vadd.f32 %v378_v57, %v374_v50  ;;  %v383_v6 = vadd.f32 %v379_v58, %v375_v51  ;;  %v384_v7 = vadd.f32 %v380_v59, %v376_v52  ;;  %v385_v8 = vadd.f32 %v381_v60, %v377_v53  ;;  %v428_v15 = vld [vmem:[%s3812_s23 + $0x110] sm:$0xff]  ;;  %v429_v16 = vld [vmem:[%s3812_s23 + $0x118] sm:$0xff]  ;;  %v430_v21 = vld [vmem:[%s3812_s23 + $0x120] sm:$0xff] }
  0x8c   : > { %v406_v10 = vsub.f32 %v390_v45, %v398_v61  ;;  %v407_v11 = vsub.f32 %v391_v46, %v399_v62  ;;  %v408_v12 = vsub.f32 %v392_v47, %v400_v63  ;;  %v409_v13 = vsub.f32 %v393_v48, %v401_v0  ;;  %v431_v22 = vld [vmem:[%s3812_s23 + $0x128] sm:$0xff]  ;;  %v432_v23 = vld [vmem:[%s3812_s23 + $0x130] sm:$0xff]  ;;  %v434_v24 = vld [vmem:[%s3818_s19 + $0x100] sm:$0xff] }
  0x8d   : > { %v410_v17 = vmul.f32 %v402_v1, %v402_v1  ;;  %v411_v18 = vmul.f32 %v403_v2, %v403_v2  ;;  %v412_v19 = vmul.f32 %v404_v3, %v404_v3  ;;  %v413_v20 = vmul.f32 %v405_v4, %v405_v4  ;;  %v435_v25 = vld [vmem:[%s3818_s19 + $0x108] sm:$0xff]  ;;  %v436_v26 = vld [vmem:[%s3818_s19 + $0x110] sm:$0xff]  ;;  %v433_v31 = vld [vmem:[%s3812_s23 + $0x138] sm:$0xff] }
  0x8e   : > { %v414_v27 = vmul.f32 %v406_v10, %v406_v10  ;;  %v415_v28 = vmul.f32 %v407_v11, %v407_v11  ;;  %v416_v29 = vmul.f32 %v408_v12, %v408_v12  ;;  %v417_v30 = vmul.f32 %v409_v13, %v409_v13  ;;  %v437_v32 = vld [vmem:[%s3818_s19 + $0x118] sm:$0xff]  ;;  %v438_v33 = vld [vmem:[%s3818_s19 + $0x120] sm:$0xff]  ;;  %v439_v38 = vld [vmem:[%s3818_s19 + $0x128] sm:$0xff] }
  0x8f   : > { %v418_v34 = vadd.f32 %v410_v17, %v382_v5  ;;  %v419_v35 = vadd.f32 %v411_v18, %v383_v6  ;;  %v420_v36 = vadd.f32 %v412_v19, %v384_v7  ;;  %v421_v37 = vadd.f32 %v413_v20, %v385_v8  ;;  %v440_v39 = vld [vmem:[%s3818_s19 + $0x130] sm:$0xff]  ;;  %v441_v40 = vld [vmem:[%s3818_s19 + $0x138] sm:$0xff]  ;;  %v466_v49 = vld [vmem:[%s3812_s23 + $0x140] sm:$0xff] }
  0x90   : > { %v442_v41 = vsub.f32 %v426_v9, %v434_v24  ;;  %v443_v42 = vsub.f32 %v427_v14, %v435_v25  ;;  %v444_v43 = vsub.f32 %v428_v15, %v436_v26  ;;  %v445_v44 = vsub.f32 %v429_v16, %v437_v32  ;;  %v467_v50 = vld [vmem:[%s3812_s23 + $0x148] sm:$0xff]  ;;  %v468_v55 = vld [vmem:[%s3812_s23 + $0x150] sm:$0xff]  ;;  %v469_v56 = vld [vmem:[%s3812_s23 + $0x158] sm:$0xff] }
  0x91   : > { %v422_v45 = vadd.f32 %v418_v34, %v414_v27  ;;  %v423_v46 = vadd.f32 %v419_v35, %v415_v28  ;;  %v424_v47 = vadd.f32 %v420_v36, %v416_v29  ;;  %v425_v48 = vadd.f32 %v421_v37, %v417_v30  ;;  %v474_v57 = vld [vmem:[%s3818_s19 + $0x140] sm:$0xff]  ;;  %v471_v63 = vld [vmem:[%s3812_s23 + $0x168] sm:$0xff]  ;;  %v476_v1 = vld [vmem:[%s3818_s19 + $0x150] sm:$0xff] }
  0x92   : > { %v446_v51 = vsub.f32 %v430_v21, %v438_v33  ;;  %v447_v52 = vsub.f32 %v431_v22, %v439_v38  ;;  %v448_v53 = vsub.f32 %v432_v23, %v440_v39  ;;  %v449_v54 = vsub.f32 %v433_v31, %v441_v40  ;;  %v470_v62 = vld [vmem:[%s3812_s23 + $0x160] sm:$0xff]  ;;  %v475_v0 = vld [vmem:[%s3818_s19 + $0x148] sm:$0xff]  ;;  %v477_v2 = vld [vmem:[%s3818_s19 + $0x158] sm:$0xff] }
  0x93   : > { %v450_v58 = vmul.f32 %v442_v41, %v442_v41  ;;  %v451_v59 = vmul.f32 %v443_v42, %v443_v42  ;;  %v452_v60 = vmul.f32 %v444_v43, %v444_v43  ;;  %v453_v61 = vmul.f32 %v445_v44, %v445_v44  ;;  %v472_v7 = vld [vmem:[%s3812_s23 + $0x170] sm:$0xff]  ;;  %v473_v8 = vld [vmem:[%s3812_s23 + $0x178] sm:$0xff]  ;;  %v478_v9 = vld [vmem:[%s3818_s19 + $0x160] sm:$0xff] }
  0x94   : > { %v454_v3 = vmul.f32 %v446_v51, %v446_v51  ;;  %v455_v4 = vmul.f32 %v447_v52, %v447_v52  ;;  %v456_v5 = vmul.f32 %v448_v53, %v448_v53  ;;  %v457_v6 = vmul.f32 %v449_v54, %v449_v54  ;;  %v479_v14 = vld [vmem:[%s3818_s19 + $0x168] sm:$0xff]  ;;  %v480_v15 = vld [vmem:[%s3818_s19 + $0x170] sm:$0xff]  ;;  %v481_v16 = vld [vmem:[%s3818_s19 + $0x178] sm:$0xff] }
  0x95   : > { %v458_v10 = vadd.f32 %v450_v58, %v422_v45  ;;  %v459_v11 = vadd.f32 %v451_v59, %v423_v46  ;;  %v460_v12 = vadd.f32 %v452_v60, %v424_v47  ;;  %v461_v13 = vadd.f32 %v453_v61, %v425_v48  ;;  %v506_v25 = vld [vmem:[%s3812_s23 + $0x180] sm:$0xff]  ;;  %v507_v26 = vld [vmem:[%s3812_s23 + $0x188] sm:$0xff]  ;;  %v508_v31 = vld [vmem:[%s3812_s23 + $0x190] sm:$0xff] }
  0x96   : > { %v482_v17 = vsub.f32 %v466_v49, %v474_v57  ;;  %v483_v18 = vsub.f32 %v467_v50, %v475_v0  ;;  %v484_v19 = vsub.f32 %v468_v55, %v476_v1  ;;  %v485_v20 = vsub.f32 %v469_v56, %v477_v2  ;;  %v509_v32 = vld [vmem:[%s3812_s23 + $0x198] sm:$0xff]  ;;  %v514_v33 = vld [vmem:[%s3818_s19 + $0x180] sm:$0xff]  ;;  %v511_v39 = vld [vmem:[%s3812_s23 + $0x1a8] sm:$0xff] }
  0x97   : > { %v462_v21 = vadd.f32 %v458_v10, %v454_v3  ;;  %v463_v22 = vadd.f32 %v459_v11, %v455_v4  ;;  %v464_v23 = vadd.f32 %v460_v12, %v456_v5  ;;  %v465_v24 = vadd.f32 %v461_v13, %v457_v6  ;;  %v510_v38 = vld [vmem:[%s3812_s23 + $0x1a0] sm:$0xff]  ;;  %v515_v40 = vld [vmem:[%s3818_s19 + $0x188] sm:$0xff]  ;;  %v516_v41 = vld [vmem:[%s3818_s19 + $0x190] sm:$0xff] }
  0x98   : > { %v486_v27 = vsub.f32 %v470_v62, %v478_v9  ;;  %v487_v28 = vsub.f32 %v471_v63, %v479_v14  ;;  %v488_v29 = vsub.f32 %v472_v7, %v480_v15  ;;  %v489_v30 = vsub.f32 %v473_v8, %v481_v16  ;;  %v517_v42 = vld [vmem:[%s3818_s19 + $0x198] sm:$0xff]  ;;  %v512_v47 = vld [vmem:[%s3812_s23 + $0x1b0] sm:$0xff]  ;;  %v518_v49 = vld [vmem:[%s3818_s19 + $0x1a0] sm:$0xff] }
  0x99   : > { %v490_v34 = vmul.f32 %v482_v17, %v482_v17  ;;  %v491_v35 = vmul.f32 %v483_v18, %v483_v18  ;;  %v492_v36 = vmul.f32 %v484_v19, %v484_v19  ;;  %v493_v37 = vmul.f32 %v485_v20, %v485_v20  ;;  %v513_v48 = vld [vmem:[%s3812_s23 + $0x1b8] sm:$0xff]  ;;  %v519_v54 = vld [vmem:[%s3818_s19 + $0x1a8] sm:$0xff]  ;;  %v520_v55 = vld [vmem:[%s3818_s19 + $0x1b0] sm:$0xff] }
  0x9a   : > { %v494_v43 = vmul.f32 %v486_v27, %v486_v27  ;;  %v495_v44 = vmul.f32 %v487_v28, %v487_v28  ;;  %v496_v45 = vmul.f32 %v488_v29, %v488_v29  ;;  %v497_v46 = vmul.f32 %v489_v30, %v489_v30  ;;  %v521_v56 = vld [vmem:[%s3818_s19 + $0x1b8] sm:$0xff]  ;;  %v546_v1 = vld [vmem:[%s3812_s23 + $0x1c0] sm:$0xff]  ;;  %v547_v2 = vld [vmem:[%s3812_s23 + $0x1c8] sm:$0xff] }
  0x9b   : > { %v498_v50 = vadd.f32 %v490_v34, %v462_v21  ;;  %v499_v51 = vadd.f32 %v491_v35, %v463_v22  ;;  %v500_v52 = vadd.f32 %v492_v36, %v464_v23  ;;  %v501_v53 = vadd.f32 %v493_v37, %v465_v24  ;;  %v548_v7 = vld [vmem:[%s3812_s23 + $0x1d0] sm:$0xff]  ;;  %v549_v8 = vld [vmem:[%s3812_s23 + $0x1d8] sm:$0xff]  ;;  %v554_v9 = vld [vmem:[%s3818_s19 + $0x1c0] sm:$0xff] }
  0x9c   : > { %v522_v57 = vsub.f32 %v506_v25, %v514_v33  ;;  %v523_v58 = vsub.f32 %v507_v26, %v515_v40  ;;  %v524_v59 = vsub.f32 %v508_v31, %v516_v41  ;;  %v525_v60 = vsub.f32 %v509_v32, %v517_v42  ;;  %v550_v14 = vld [vmem:[%s3812_s23 + $0x1e0] sm:$0xff]  ;;  %v551_v15 = vld [vmem:[%s3812_s23 + $0x1e8] sm:$0xff]  ;;  %v556_v17 = vld [vmem:[%s3818_s19 + $0x1d0] sm:$0xff] }
  0x9d   : > { %v502_v61 = vadd.f32 %v498_v50, %v494_v43  ;;  %v503_v62 = vadd.f32 %v499_v51, %v495_v44  ;;  %v504_v63 = vadd.f32 %v500_v52, %v496_v45  ;;  %v505_v0 = vadd.f32 %v501_v53, %v497_v46  ;;  %v555_v16 = vld [vmem:[%s3818_s19 + $0x1c8] sm:$0xff]  ;;  %v557_v18 = vld [vmem:[%s3818_s19 + $0x1d8] sm:$0xff]  ;;  %v552_v23 = vld [vmem:[%s3812_s23 + $0x1f0] sm:$0xff] }
  0x9e   : > { %v526_v3 = vsub.f32 %v510_v38, %v518_v49  ;;  %v527_v4 = vsub.f32 %v511_v39, %v519_v54  ;;  %v528_v5 = vsub.f32 %v512_v47, %v520_v55  ;;  %v529_v6 = vsub.f32 %v513_v48, %v521_v56  ;;  %v553_v24 = vld [vmem:[%s3812_s23 + $0x1f8] sm:$0xff]  ;;  %v558_v25 = vld [vmem:[%s3818_s19 + $0x1e0] sm:$0xff]  ;;  %v559_v30 = vld [vmem:[%s3818_s19 + $0x1e8] sm:$0xff] }
  0x9f   : > { %v530_v10 = vmul.f32 %v522_v57, %v522_v57  ;;  %v531_v11 = vmul.f32 %v523_v58, %v523_v58  ;;  %v532_v12 = vmul.f32 %v524_v59, %v524_v59  ;;  %v533_v13 = vmul.f32 %v525_v60, %v525_v60  ;;  %v560_v31 = vld [vmem:[%s3818_s19 + $0x1f0] sm:$0xff]  ;;  %v561_v32 = vld [vmem:[%s3818_s19 + $0x1f8] sm:$0xff]  ;;  %v586_v41 = vld [vmem:[%s3812_s23 + $0x200] sm:$0xff] }
  0xa0   : > { %v534_v19 = vmul.f32 %v526_v3, %v526_v3  ;;  %v535_v20 = vmul.f32 %v527_v4, %v527_v4  ;;  %v536_v21 = vmul.f32 %v528_v5, %v528_v5  ;;  %v537_v22 = vmul.f32 %v529_v6, %v529_v6  ;;  %v587_v42 = vld [vmem:[%s3812_s23 + $0x208] sm:$0xff]  ;;  %v588_v47 = vld [vmem:[%s3812_s23 + $0x210] sm:$0xff]  ;;  %v589_v48 = vld [vmem:[%s3812_s23 + $0x218] sm:$0xff] }
  0xa1   : > { %v538_v26 = vadd.f32 %v530_v10, %v502_v61  ;;  %v539_v27 = vadd.f32 %v531_v11, %v503_v62  ;;  %v540_v28 = vadd.f32 %v532_v12, %v504_v63  ;;  %v541_v29 = vadd.f32 %v533_v13, %v505_v0  ;;  %v594_v49 = vld [vmem:[%s3818_s19 + $0x200] sm:$0xff]  ;;  %v591_v55 = vld [vmem:[%s3812_s23 + $0x228] sm:$0xff]  ;;  %v596_v57 = vld [vmem:[%s3818_s19 + $0x210] sm:$0xff] }
  0xa2   : > { %v562_v33 = vsub.f32 %v546_v1, %v554_v9  ;;  %v563_v34 = vsub.f32 %v547_v2, %v555_v16  ;;  %v564_v35 = vsub.f32 %v548_v7, %v556_v17  ;;  %v565_v36 = vsub.f32 %v549_v8, %v557_v18  ;;  %v590_v54 = vld [vmem:[%s3812_s23 + $0x220] sm:$0xff]  ;;  %v595_v56 = vld [vmem:[%s3818_s19 + $0x208] sm:$0xff]  ;;  %v597_v58 = vld [vmem:[%s3818_s19 + $0x218] sm:$0xff] }
  0xa3   : > { %v542_v37 = vadd.f32 %v538_v26, %v534_v19  ;;  %v543_v38 = vadd.f32 %v539_v27, %v535_v20  ;;  %v544_v39 = vadd.f32 %v540_v28, %v536_v21  ;;  %v545_v40 = vadd.f32 %v541_v29, %v537_v22  ;;  %v592_v63 = vld [vmem:[%s3812_s23 + $0x230] sm:$0xff]  ;;  %v593_v0 = vld [vmem:[%s3812_s23 + $0x238] sm:$0xff]  ;;  %v598_v1 = vld [vmem:[%s3818_s19 + $0x220] sm:$0xff] }
  0xa4   : > { %v566_v43 = vsub.f32 %v550_v14, %v558_v25  ;;  %v567_v44 = vsub.f32 %v551_v15, %v559_v30  ;;  %v568_v45 = vsub.f32 %v552_v23, %v560_v31  ;;  %v569_v46 = vsub.f32 %v553_v24, %v561_v32  ;;  %v599_v6 = vld [vmem:[%s3818_s19 + $0x228] sm:$0xff]  ;;  %v600_v7 = vld [vmem:[%s3818_s19 + $0x230] sm:$0xff]  ;;  %v601_v8 = vld [vmem:[%s3818_s19 + $0x238] sm:$0xff] }
  0xa5   : > { %v570_v50 = vmul.f32 %v562_v33, %v562_v33  ;;  %v571_v51 = vmul.f32 %v563_v34, %v563_v34  ;;  %v572_v52 = vmul.f32 %v564_v35, %v564_v35  ;;  %v573_v53 = vmul.f32 %v565_v36, %v565_v36  ;;  %v626_v17 = vld [vmem:[%s3812_s23 + $0x240] sm:$0xff]  ;;  %v627_v18 = vld [vmem:[%s3812_s23 + $0x248] sm:$0xff]  ;;  %v628_v23 = vld [vmem:[%s3812_s23 + $0x250] sm:$0xff] }
  0xa6   : > { %v574_v59 = vmul.f32 %v566_v43, %v566_v43  ;;  %v575_v60 = vmul.f32 %v567_v44, %v567_v44  ;;  %v576_v61 = vmul.f32 %v568_v45, %v568_v45  ;;  %v577_v62 = vmul.f32 %v569_v46, %v569_v46  ;;  %v629_v24 = vld [vmem:[%s3812_s23 + $0x258] sm:$0xff]  ;;  %v634_v25 = vld [vmem:[%s3818_s19 + $0x240] sm:$0xff]  ;;  %v631_v31 = vld [vmem:[%s3812_s23 + $0x268] sm:$0xff] }
  0xa7   : > { %v578_v2 = vadd.f32 %v570_v50, %v542_v37  ;;  %v579_v3 = vadd.f32 %v571_v51, %v543_v38  ;;  %v580_v4 = vadd.f32 %v572_v52, %v544_v39  ;;  %v581_v5 = vadd.f32 %v573_v53, %v545_v40  ;;  %v630_v30 = vld [vmem:[%s3812_s23 + $0x260] sm:$0xff]  ;;  %v635_v32 = vld [vmem:[%s3818_s19 + $0x248] sm:$0xff]  ;;  %v636_v33 = vld [vmem:[%s3818_s19 + $0x250] sm:$0xff] }
  0xa8   : > { %v602_v9 = vsub.f32 %v586_v41, %v594_v49  ;;  %v603_v10 = vsub.f32 %v587_v42, %v595_v56  ;;  %v604_v11 = vsub.f32 %v588_v47, %v596_v57  ;;  %v605_v12 = vsub.f32 %v589_v48, %v597_v58  ;;  %v637_v34 = vld [vmem:[%s3818_s19 + $0x258] sm:$0xff]  ;;  %v632_v39 = vld [vmem:[%s3812_s23 + $0x270] sm:$0xff]  ;;  %v638_v41 = vld [vmem:[%s3818_s19 + $0x260] sm:$0xff] }
  0xa9   : > { %v582_v13 = vadd.f32 %v578_v2, %v574_v59  ;;  %v583_v14 = vadd.f32 %v579_v3, %v575_v60  ;;  %v584_v15 = vadd.f32 %v580_v4, %v576_v61  ;;  %v585_v16 = vadd.f32 %v581_v5, %v577_v62  ;;  %v633_v40 = vld [vmem:[%s3812_s23 + $0x278] sm:$0xff]  ;;  %v639_v46 = vld [vmem:[%s3818_s19 + $0x268] sm:$0xff]  ;;  %v640_v47 = vld [vmem:[%s3818_s19 + $0x270] sm:$0xff] }
  0xaa   : > { %v606_v19 = vsub.f32 %v590_v54, %v598_v1  ;;  %v607_v20 = vsub.f32 %v591_v55, %v599_v6  ;;  %v608_v21 = vsub.f32 %v592_v63, %v600_v7  ;;  %v609_v22 = vsub.f32 %v593_v0, %v601_v8  ;;  %v641_v48 = vld [vmem:[%s3818_s19 + $0x278] sm:$0xff]  ;;  %v666_v57 = vld [vmem:[%s3812_s23 + $0x280] sm:$0xff]  ;;  %v667_v58 = vld [vmem:[%s3812_s23 + $0x288] sm:$0xff] }
  0xab   : > { %v610_v26 = vmul.f32 %v602_v9, %v602_v9  ;;  %v611_v27 = vmul.f32 %v603_v10, %v603_v10  ;;  %v612_v28 = vmul.f32 %v604_v11, %v604_v11  ;;  %v613_v29 = vmul.f32 %v605_v12, %v605_v12  ;;  %v668_v63 = vld [vmem:[%s3812_s23 + $0x290] sm:$0xff]  ;;  %v669_v0 = vld [vmem:[%s3812_s23 + $0x298] sm:$0xff]  ;;  %v674_v1 = vld [vmem:[%s3818_s19 + $0x280] sm:$0xff] }
  0xac   : > { %v614_v35 = vmul.f32 %v606_v19, %v606_v19  ;;  %v615_v36 = vmul.f32 %v607_v20, %v607_v20  ;;  %v616_v37 = vmul.f32 %v608_v21, %v608_v21  ;;  %v617_v38 = vmul.f32 %v609_v22, %v609_v22  ;;  %v670_v6 = vld [vmem:[%s3812_s23 + $0x2a0] sm:$0xff]  ;;  %v671_v7 = vld [vmem:[%s3812_s23 + $0x2a8] sm:$0xff]  ;;  %v676_v9 = vld [vmem:[%s3818_s19 + $0x290] sm:$0xff] }
  0xad   : > { %v618_v42 = vadd.f32 %v610_v26, %v582_v13  ;;  %v619_v43 = vadd.f32 %v611_v27, %v583_v14  ;;  %v620_v44 = vadd.f32 %v612_v28, %v584_v15  ;;  %v621_v45 = vadd.f32 %v613_v29, %v585_v16  ;;  %v675_v8 = vld [vmem:[%s3818_s19 + $0x288] sm:$0xff]  ;;  %v677_v10 = vld [vmem:[%s3818_s19 + $0x298] sm:$0xff]  ;;  %v672_v15 = vld [vmem:[%s3812_s23 + $0x2b0] sm:$0xff] }
  0xae   : > { %v642_v49 = vsub.f32 %v626_v17, %v634_v25  ;;  %v643_v50 = vsub.f32 %v627_v18, %v635_v32  ;;  %v644_v51 = vsub.f32 %v628_v23, %v636_v33  ;;  %v645_v52 = vsub.f32 %v629_v24, %v637_v34  ;;  %v673_v16 = vld [vmem:[%s3812_s23 + $0x2b8] sm:$0xff]  ;;  %v678_v17 = vld [vmem:[%s3818_s19 + $0x2a0] sm:$0xff]  ;;  %v679_v22 = vld [vmem:[%s3818_s19 + $0x2a8] sm:$0xff] }
  0xaf   : > { %v622_v53 = vadd.f32 %v618_v42, %v614_v35  ;;  %v623_v54 = vadd.f32 %v619_v43, %v615_v36  ;;  %v624_v55 = vadd.f32 %v620_v44, %v616_v37  ;;  %v625_v56 = vadd.f32 %v621_v45, %v617_v38  ;;  %v680_v23 = vld [vmem:[%s3818_s19 + $0x2b0] sm:$0xff]  ;;  %v681_v24 = vld [vmem:[%s3818_s19 + $0x2b8] sm:$0xff]  ;;  %v706_v33 = vld [vmem:[%s3812_s23 + $0x2c0] sm:$0xff] }
  0xb0   : > { %v646_v59 = vsub.f32 %v630_v30, %v638_v41  ;;  %v647_v60 = vsub.f32 %v631_v31, %v639_v46  ;;  %v648_v61 = vsub.f32 %v632_v39, %v640_v47  ;;  %v649_v62 = vsub.f32 %v633_v40, %v641_v48  ;;  %v707_v34 = vld [vmem:[%s3812_s23 + $0x2c8] sm:$0xff]  ;;  %v708_v39 = vld [vmem:[%s3812_s23 + $0x2d0] sm:$0xff]  ;;  %v709_v40 = vld [vmem:[%s3812_s23 + $0x2d8] sm:$0xff] }
  0xb1   : > { %v650_v2 = vmul.f32 %v642_v49, %v642_v49  ;;  %v651_v3 = vmul.f32 %v643_v50, %v643_v50  ;;  %v652_v4 = vmul.f32 %v644_v51, %v644_v51  ;;  %v653_v5 = vmul.f32 %v645_v52, %v645_v52  ;;  %v714_v41 = vld [vmem:[%s3818_s19 + $0x2c0] sm:$0xff]  ;;  %v711_v47 = vld [vmem:[%s3812_s23 + $0x2e8] sm:$0xff]  ;;  %v716_v49 = vld [vmem:[%s3818_s19 + $0x2d0] sm:$0xff] }
  0xb2   : > { %v654_v11 = vmul.f32 %v646_v59, %v646_v59  ;;  %v655_v12 = vmul.f32 %v647_v60, %v647_v60  ;;  %v656_v13 = vmul.f32 %v648_v61, %v648_v61  ;;  %v657_v14 = vmul.f32 %v649_v62, %v649_v62  ;;  %v710_v46 = vld [vmem:[%s3812_s23 + $0x2e0] sm:$0xff]  ;;  %v715_v48 = vld [vmem:[%s3818_s19 + $0x2c8] sm:$0xff]  ;;  %v717_v50 = vld [vmem:[%s3818_s19 + $0x2d8] sm:$0xff] }
  0xb3   : > { %v658_v18 = vadd.f32 %v650_v2, %v622_v53  ;;  %v659_v19 = vadd.f32 %v651_v3, %v623_v54  ;;  %v660_v20 = vadd.f32 %v652_v4, %v624_v55  ;;  %v661_v21 = vadd.f32 %v653_v5, %v625_v56  ;;  %v712_v55 = vld [vmem:[%s3812_s23 + $0x2f0] sm:$0xff]  ;;  %v713_v56 = vld [vmem:[%s3812_s23 + $0x2f8] sm:$0xff]  ;;  %v719_v62 = vld [vmem:[%s3818_s19 + $0x2e8] sm:$0xff] }
  0xb4   : > { %v682_v25 = vsub.f32 %v666_v57, %v674_v1  ;;  %v683_v26 = vsub.f32 %v667_v58, %v675_v8  ;;  %v684_v27 = vsub.f32 %v668_v63, %v676_v9  ;;  %v685_v28 = vsub.f32 %v669_v0, %v677_v10  ;;  %v718_v57 = vld [vmem:[%s3818_s19 + $0x2e0] sm:$0xff]  ;;  %v720_v63 = vld [vmem:[%s3818_s19 + $0x2f0] sm:$0xff]  ;;  %v721_v0 = vld [vmem:[%s3818_s19 + $0x2f8] sm:$0xff] }
  0xb5   : > { %v662_v29 = vadd.f32 %v658_v18, %v654_v11  ;;  %v663_v30 = vadd.f32 %v659_v19, %v655_v12  ;;  %v664_v31 = vadd.f32 %v660_v20, %v656_v13  ;;  %v665_v32 = vadd.f32 %v661_v21, %v657_v14  ;;  %v746_v9 = vld [vmem:[%s3812_s23 + $0x300] sm:$0xff]  ;;  %v747_v10 = vld [vmem:[%s3812_s23 + $0x308] sm:$0xff] }
  0xb6   : > { %v686_v35 = vsub.f32 %v670_v6, %v678_v17  ;;  %v687_v36 = vsub.f32 %v671_v7, %v679_v22  ;;  %v688_v37 = vsub.f32 %v672_v15, %v680_v23  ;;  %v689_v38 = vsub.f32 %v673_v16, %v681_v24  ;;  %v748_v15 = vld [vmem:[%s3812_s23 + $0x310] sm:$0xff]  ;;  %v749_v16 = vld [vmem:[%s3812_s23 + $0x318] sm:$0xff]  ;;  %v754_v17 = vld [vmem:[%s3818_s19 + $0x300] sm:$0xff] }
  0xb7   : > { %v690_v42 = vmul.f32 %v682_v25, %v682_v25  ;;  %v691_v43 = vmul.f32 %v683_v26, %v683_v26  ;;  %v692_v44 = vmul.f32 %v684_v27, %v684_v27  ;;  %v693_v45 = vmul.f32 %v685_v28, %v685_v28  ;;  %v750_v22 = vld [vmem:[%s3812_s23 + $0x320] sm:$0xff]  ;;  %v751_v23 = vld [vmem:[%s3812_s23 + $0x328] sm:$0xff]  ;;  %v756_v25 = vld [vmem:[%s3818_s19 + $0x310] sm:$0xff] }
  0xb8   : > { %v694_v51 = vmul.f32 %v686_v35, %v686_v35  ;;  %v695_v52 = vmul.f32 %v687_v36, %v687_v36  ;;  %v696_v53 = vmul.f32 %v688_v37, %v688_v37  ;;  %v697_v54 = vmul.f32 %v689_v38, %v689_v38  ;;  %v755_v24 = vld [vmem:[%s3818_s19 + $0x308] sm:$0xff]  ;;  %v757_v26 = vld [vmem:[%s3818_s19 + $0x318] sm:$0xff] }
  0xb9   : > { %v698_v58 = vadd.f32 %v690_v42, %v662_v29  ;;  %v699_v59 = vadd.f32 %v691_v43, %v663_v30  ;;  %v700_v60 = vadd.f32 %v692_v44, %v664_v31  ;;  %v701_v61 = vadd.f32 %v693_v45, %v665_v32  ;;  %v752_v31 = vld [vmem:[%s3812_s23 + $0x330] sm:$0xff]  ;;  %v753_v32 = vld [vmem:[%s3812_s23 + $0x338] sm:$0xff]  ;;  %v759_v38 = vld [vmem:[%s3818_s19 + $0x328] sm:$0xff] }
  0xba   : > { %v722_v1 = vsub.f32 %v706_v33, %v714_v41  ;;  %v723_v2 = vsub.f32 %v707_v34, %v715_v48  ;;  %v724_v3 = vsub.f32 %v708_v39, %v716_v49  ;;  %v725_v4 = vsub.f32 %v709_v40, %v717_v50  ;;  %v758_v33 = vld [vmem:[%s3818_s19 + $0x320] sm:$0xff]  ;;  %v760_v39 = vld [vmem:[%s3818_s19 + $0x330] sm:$0xff]  ;;  %v761_v40 = vld [vmem:[%s3818_s19 + $0x338] sm:$0xff] }
  0xbb   : > { %v702_v5 = vadd.f32 %v698_v58, %v694_v51  ;;  %v703_v6 = vadd.f32 %v699_v59, %v695_v52  ;;  %v704_v7 = vadd.f32 %v700_v60, %v696_v53  ;;  %v705_v8 = vadd.f32 %v701_v61, %v697_v54  ;;  %v786_v49 = vld [vmem:[%s3812_s23 + $0x340] sm:$0xff]  ;;  %v787_v50 = vld [vmem:[%s3812_s23 + $0x348] sm:$0xff] }
  0xbc   : > { %v726_v11 = vsub.f32 %v710_v46, %v718_v57  ;;  %v727_v12 = vsub.f32 %v711_v47, %v719_v62  ;;  %v728_v13 = vsub.f32 %v712_v55, %v720_v63  ;;  %v729_v14 = vsub.f32 %v713_v56, %v721_v0  ;;  %v788_v55 = vld [vmem:[%s3812_s23 + $0x350] sm:$0xff]  ;;  %v789_v56 = vld [vmem:[%s3812_s23 + $0x358] sm:$0xff]  ;;  %v794_v57 = vld [vmem:[%s3818_s19 + $0x340] sm:$0xff] }
  0xbd   : > { %v730_v18 = vmul.f32 %v722_v1, %v722_v1  ;;  %v731_v19 = vmul.f32 %v723_v2, %v723_v2  ;;  %v732_v20 = vmul.f32 %v724_v3, %v724_v3  ;;  %v733_v21 = vmul.f32 %v725_v4, %v725_v4  ;;  %v790_v62 = vld [vmem:[%s3812_s23 + $0x360] sm:$0xff]  ;;  %v791_v63 = vld [vmem:[%s3812_s23 + $0x368] sm:$0xff]  ;;  %v796_v1 = vld [vmem:[%s3818_s19 + $0x350] sm:$0xff] }
  0xbe   : > { %v734_v27 = vmul.f32 %v726_v11, %v726_v11  ;;  %v735_v28 = vmul.f32 %v727_v12, %v727_v12  ;;  %v736_v29 = vmul.f32 %v728_v13, %v728_v13  ;;  %v737_v30 = vmul.f32 %v729_v14, %v729_v14  ;;  %v795_v0 = vld [vmem:[%s3818_s19 + $0x348] sm:$0xff]  ;;  %v797_v2 = vld [vmem:[%s3818_s19 + $0x358] sm:$0xff] }
  0xbf   : > { %v738_v34 = vadd.f32 %v730_v18, %v702_v5  ;;  %v739_v35 = vadd.f32 %v731_v19, %v703_v6  ;;  %v740_v36 = vadd.f32 %v732_v20, %v704_v7  ;;  %v741_v37 = vadd.f32 %v733_v21, %v705_v8  ;;  %v792_v7 = vld [vmem:[%s3812_s23 + $0x370] sm:$0xff]  ;;  %v793_v8 = vld [vmem:[%s3812_s23 + $0x378] sm:$0xff]  ;;  %v799_v14 = vld [vmem:[%s3818_s19 + $0x368] sm:$0xff] }
  0xc0   : > { %v762_v41 = vsub.f32 %v746_v9, %v754_v17  ;;  %v763_v42 = vsub.f32 %v747_v10, %v755_v24  ;;  %v764_v43 = vsub.f32 %v748_v15, %v756_v25  ;;  %v765_v44 = vsub.f32 %v749_v16, %v757_v26  ;;  %v798_v9 = vld [vmem:[%s3818_s19 + $0x360] sm:$0xff]  ;;  %v800_v15 = vld [vmem:[%s3818_s19 + $0x370] sm:$0xff]  ;;  %v801_v16 = vld [vmem:[%s3818_s19 + $0x378] sm:$0xff] }
  0xc1   : > { %v742_v45 = vadd.f32 %v738_v34, %v734_v27  ;;  %v743_v46 = vadd.f32 %v739_v35, %v735_v28  ;;  %v744_v47 = vadd.f32 %v740_v36, %v736_v29  ;;  %v745_v48 = vadd.f32 %v741_v37, %v737_v30  ;;  %v826_v25 = vld [vmem:[%s3812_s23 + $0x380] sm:$0xff]  ;;  %v827_v26 = vld [vmem:[%s3812_s23 + $0x388] sm:$0xff] }
  0xc2   : > { %v766_v51 = vsub.f32 %v750_v22, %v758_v33  ;;  %v767_v52 = vsub.f32 %v751_v23, %v759_v38  ;;  %v768_v53 = vsub.f32 %v752_v31, %v760_v39  ;;  %v769_v54 = vsub.f32 %v753_v32, %v761_v40  ;;  %v828_v31 = vld [vmem:[%s3812_s23 + $0x390] sm:$0xff]  ;;  %v829_v32 = vld [vmem:[%s3812_s23 + $0x398] sm:$0xff]  ;;  %v834_v33 = vld [vmem:[%s3818_s19 + $0x380] sm:$0xff] }
  0xc3   : > { %v770_v58 = vmul.f32 %v762_v41, %v762_v41  ;;  %v771_v59 = vmul.f32 %v763_v42, %v763_v42  ;;  %v772_v60 = vmul.f32 %v764_v43, %v764_v43  ;;  %v773_v61 = vmul.f32 %v765_v44, %v765_v44  ;;  %v830_v38 = vld [vmem:[%s3812_s23 + $0x3a0] sm:$0xff]  ;;  %v831_v39 = vld [vmem:[%s3812_s23 + $0x3a8] sm:$0xff]  ;;  %v836_v41 = vld [vmem:[%s3818_s19 + $0x390] sm:$0xff] }
  0xc4   : > { %v774_v3 = vmul.f32 %v766_v51, %v766_v51  ;;  %v775_v4 = vmul.f32 %v767_v52, %v767_v52  ;;  %v776_v5 = vmul.f32 %v768_v53, %v768_v53  ;;  %v777_v6 = vmul.f32 %v769_v54, %v769_v54  ;;  %v835_v40 = vld [vmem:[%s3818_s19 + $0x388] sm:$0xff]  ;;  %v837_v42 = vld [vmem:[%s3818_s19 + $0x398] sm:$0xff] }
  0xc5   : > { %v778_v10 = vadd.f32 %v770_v58, %v742_v45  ;;  %v779_v11 = vadd.f32 %v771_v59, %v743_v46  ;;  %v780_v12 = vadd.f32 %v772_v60, %v744_v47  ;;  %v781_v13 = vadd.f32 %v773_v61, %v745_v48  ;;  %v832_v47 = vld [vmem:[%s3812_s23 + $0x3b0] sm:$0xff]  ;;  %v833_v48 = vld [vmem:[%s3812_s23 + $0x3b8] sm:$0xff]  ;;  %v839_v54 = vld [vmem:[%s3818_s19 + $0x3a8] sm:$0xff] }
  0xc6   : > { %v802_v17 = vsub.f32 %v786_v49, %v794_v57  ;;  %v803_v18 = vsub.f32 %v787_v50, %v795_v0  ;;  %v804_v19 = vsub.f32 %v788_v55, %v796_v1  ;;  %v805_v20 = vsub.f32 %v789_v56, %v797_v2  ;;  %v838_v49 = vld [vmem:[%s3818_s19 + $0x3a0] sm:$0xff]  ;;  %v840_v55 = vld [vmem:[%s3818_s19 + $0x3b0] sm:$0xff]  ;;  %v841_v56 = vld [vmem:[%s3818_s19 + $0x3b8] sm:$0xff] }
  0xc7   : > { %v782_v21 = vadd.f32 %v778_v10, %v774_v3  ;;  %v783_v22 = vadd.f32 %v779_v11, %v775_v4  ;;  %v784_v23 = vadd.f32 %v780_v12, %v776_v5  ;;  %v785_v24 = vadd.f32 %v781_v13, %v777_v6  ;;  %v866_v1 = vld [vmem:[%s3812_s23 + $0x3c0] sm:$0xff]  ;;  %v867_v2 = vld [vmem:[%s3812_s23 + $0x3c8] sm:$0xff] }
  0xc8   : > { %v806_v27 = vsub.f32 %v790_v62, %v798_v9  ;;  %v807_v28 = vsub.f32 %v791_v63, %v799_v14  ;;  %v808_v29 = vsub.f32 %v792_v7, %v800_v15  ;;  %v809_v30 = vsub.f32 %v793_v8, %v801_v16  ;;  %v868_v7 = vld [vmem:[%s3812_s23 + $0x3d0] sm:$0xff]  ;;  %v869_v8 = vld [vmem:[%s3812_s23 + $0x3d8] sm:$0xff]  ;;  %v874_v9 = vld [vmem:[%s3818_s19 + $0x3c0] sm:$0xff] }
  0xc9   : > { %v810_v34 = vmul.f32 %v802_v17, %v802_v17  ;;  %v811_v35 = vmul.f32 %v803_v18, %v803_v18  ;;  %v812_v36 = vmul.f32 %v804_v19, %v804_v19  ;;  %v813_v37 = vmul.f32 %v805_v20, %v805_v20  ;;  %v870_v14 = vld [vmem:[%s3812_s23 + $0x3e0] sm:$0xff]  ;;  %v871_v15 = vld [vmem:[%s3812_s23 + $0x3e8] sm:$0xff]  ;;  %v876_v17 = vld [vmem:[%s3818_s19 + $0x3d0] sm:$0xff] }
  0xca   : > { %v814_v43 = vmul.f32 %v806_v27, %v806_v27  ;;  %v815_v44 = vmul.f32 %v807_v28, %v807_v28  ;;  %v816_v45 = vmul.f32 %v808_v29, %v808_v29  ;;  %v817_v46 = vmul.f32 %v809_v30, %v809_v30  ;;  %v875_v16 = vld [vmem:[%s3818_s19 + $0x3c8] sm:$0xff]  ;;  %v877_v18 = vld [vmem:[%s3818_s19 + $0x3d8] sm:$0xff] }
  0xcb   : > { %v818_v50 = vadd.f32 %v810_v34, %v782_v21  ;;  %v819_v51 = vadd.f32 %v811_v35, %v783_v22  ;;  %v820_v52 = vadd.f32 %v812_v36, %v784_v23  ;;  %v821_v53 = vadd.f32 %v813_v37, %v785_v24  ;;  %v872_v23 = vld [vmem:[%s3812_s23 + $0x3f0] sm:$0xff]  ;;  %v873_v24 = vld [vmem:[%s3812_s23 + $0x3f8] sm:$0xff]  ;;  %v879_v30 = vld [vmem:[%s3818_s19 + $0x3e8] sm:$0xff] }
  0xcc   : > { %v842_v57 = vsub.f32 %v826_v25, %v834_v33  ;;  %v843_v58 = vsub.f32 %v827_v26, %v835_v40  ;;  %v844_v59 = vsub.f32 %v828_v31, %v836_v41  ;;  %v845_v60 = vsub.f32 %v829_v32, %v837_v42  ;;  %v878_v25 = vld [vmem:[%s3818_s19 + $0x3e0] sm:$0xff]  ;;  %v880_v31 = vld [vmem:[%s3818_s19 + $0x3f0] sm:$0xff]  ;;  %v881_v32 = vld [vmem:[%s3818_s19 + $0x3f8] sm:$0xff] }
  0xcd   : > { %v822_v61 = vadd.f32 %v818_v50, %v814_v43  ;;  %v823_v62 = vadd.f32 %v819_v51, %v815_v44  ;;  %v824_v63 = vadd.f32 %v820_v52, %v816_v45  ;;  %v825_v0 = vadd.f32 %v821_v53, %v817_v46  ;;  %v906_v41 = vld [vmem:[%s3812_s23 + $0x400] sm:$0xff]  ;;  %v907_v42 = vld [vmem:[%s3812_s23 + $0x408] sm:$0xff] }
  0xce   : > { %v846_v3 = vsub.f32 %v830_v38, %v838_v49  ;;  %v847_v4 = vsub.f32 %v831_v39, %v839_v54  ;;  %v848_v5 = vsub.f32 %v832_v47, %v840_v55  ;;  %v849_v6 = vsub.f32 %v833_v48, %v841_v56  ;;  %v908_v47 = vld [vmem:[%s3812_s23 + $0x410] sm:$0xff]  ;;  %v909_v48 = vld [vmem:[%s3812_s23 + $0x418] sm:$0xff]  ;;  %v914_v49 = vld [vmem:[%s3818_s19 + $0x400] sm:$0xff] }
  0xcf   : > { %v850_v10 = vmul.f32 %v842_v57, %v842_v57  ;;  %v851_v11 = vmul.f32 %v843_v58, %v843_v58  ;;  %v852_v12 = vmul.f32 %v844_v59, %v844_v59  ;;  %v853_v13 = vmul.f32 %v845_v60, %v845_v60  ;;  %v910_v54 = vld [vmem:[%s3812_s23 + $0x420] sm:$0xff]  ;;  %v911_v55 = vld [vmem:[%s3812_s23 + $0x428] sm:$0xff]  ;;  %v916_v57 = vld [vmem:[%s3818_s19 + $0x410] sm:$0xff] }
  0xd0   : > { %v854_v19 = vmul.f32 %v846_v3, %v846_v3  ;;  %v855_v20 = vmul.f32 %v847_v4, %v847_v4  ;;  %v856_v21 = vmul.f32 %v848_v5, %v848_v5  ;;  %v857_v22 = vmul.f32 %v849_v6, %v849_v6  ;;  %v915_v56 = vld [vmem:[%s3818_s19 + $0x408] sm:$0xff]  ;;  %v917_v58 = vld [vmem:[%s3818_s19 + $0x418] sm:$0xff] }
  0xd1   : > { %v858_v26 = vadd.f32 %v850_v10, %v822_v61  ;;  %v859_v27 = vadd.f32 %v851_v11, %v823_v62  ;;  %v860_v28 = vadd.f32 %v852_v12, %v824_v63  ;;  %v861_v29 = vadd.f32 %v853_v13, %v825_v0  ;;  %v912_v63 = vld [vmem:[%s3812_s23 + $0x430] sm:$0xff]  ;;  %v913_v0 = vld [vmem:[%s3812_s23 + $0x438] sm:$0xff]  ;;  %v919_v6 = vld [vmem:[%s3818_s19 + $0x428] sm:$0xff] }
  0xd2   : > { %v882_v33 = vsub.f32 %v866_v1, %v874_v9  ;;  %v883_v34 = vsub.f32 %v867_v2, %v875_v16  ;;  %v884_v35 = vsub.f32 %v868_v7, %v876_v17  ;;  %v885_v36 = vsub.f32 %v869_v8, %v877_v18  ;;  %v918_v1 = vld [vmem:[%s3818_s19 + $0x420] sm:$0xff]  ;;  %v920_v7 = vld [vmem:[%s3818_s19 + $0x430] sm:$0xff]  ;;  %v921_v8 = vld [vmem:[%s3818_s19 + $0x438] sm:$0xff] }
  0xd3   : > { %v862_v37 = vadd.f32 %v858_v26, %v854_v19  ;;  %v863_v38 = vadd.f32 %v859_v27, %v855_v20  ;;  %v864_v39 = vadd.f32 %v860_v28, %v856_v21  ;;  %v865_v40 = vadd.f32 %v861_v29, %v857_v22  ;;  %v946_v17 = vld [vmem:[%s3812_s23 + $0x440] sm:$0xff]  ;;  %v947_v18 = vld [vmem:[%s3812_s23 + $0x448] sm:$0xff] }
  0xd4   : > { %v886_v43 = vsub.f32 %v870_v14, %v878_v25  ;;  %v887_v44 = vsub.f32 %v871_v15, %v879_v30  ;;  %v888_v45 = vsub.f32 %v872_v23, %v880_v31  ;;  %v889_v46 = vsub.f32 %v873_v24, %v881_v32  ;;  %v948_v23 = vld [vmem:[%s3812_s23 + $0x450] sm:$0xff]  ;;  %v949_v24 = vld [vmem:[%s3812_s23 + $0x458] sm:$0xff]  ;;  %v954_v25 = vld [vmem:[%s3818_s19 + $0x440] sm:$0xff] }
  0xd5   : > { %v890_v50 = vmul.f32 %v882_v33, %v882_v33  ;;  %v891_v51 = vmul.f32 %v883_v34, %v883_v34  ;;  %v892_v52 = vmul.f32 %v884_v35, %v884_v35  ;;  %v893_v53 = vmul.f32 %v885_v36, %v885_v36  ;;  %v950_v30 = vld [vmem:[%s3812_s23 + $0x460] sm:$0xff]  ;;  %v951_v31 = vld [vmem:[%s3812_s23 + $0x468] sm:$0xff]  ;;  %v956_v33 = vld [vmem:[%s3818_s19 + $0x450] sm:$0xff] }
  0xd6   : > { %v894_v59 = vmul.f32 %v886_v43, %v886_v43  ;;  %v895_v60 = vmul.f32 %v887_v44, %v887_v44  ;;  %v896_v61 = vmul.f32 %v888_v45, %v888_v45  ;;  %v897_v62 = vmul.f32 %v889_v46, %v889_v46  ;;  %v955_v32 = vld [vmem:[%s3818_s19 + $0x448] sm:$0xff]  ;;  %v957_v34 = vld [vmem:[%s3818_s19 + $0x458] sm:$0xff] }
  0xd7   : > { %v898_v2 = vadd.f32 %v890_v50, %v862_v37  ;;  %v899_v3 = vadd.f32 %v891_v51, %v863_v38  ;;  %v900_v4 = vadd.f32 %v892_v52, %v864_v39  ;;  %v901_v5 = vadd.f32 %v893_v53, %v865_v40  ;;  %v952_v39 = vld [vmem:[%s3812_s23 + $0x470] sm:$0xff]  ;;  %v953_v40 = vld [vmem:[%s3812_s23 + $0x478] sm:$0xff]  ;;  %v959_v46 = vld [vmem:[%s3818_s19 + $0x468] sm:$0xff] }
  0xd8   : > { %v922_v9 = vsub.f32 %v906_v41, %v914_v49  ;;  %v923_v10 = vsub.f32 %v907_v42, %v915_v56  ;;  %v924_v11 = vsub.f32 %v908_v47, %v916_v57  ;;  %v925_v12 = vsub.f32 %v909_v48, %v917_v58  ;;  %v958_v41 = vld [vmem:[%s3818_s19 + $0x460] sm:$0xff]  ;;  %v960_v47 = vld [vmem:[%s3818_s19 + $0x470] sm:$0xff]  ;;  %v961_v48 = vld [vmem:[%s3818_s19 + $0x478] sm:$0xff] }
  0xd9   : > { %v902_v13 = vadd.f32 %v898_v2, %v894_v59  ;;  %v903_v14 = vadd.f32 %v899_v3, %v895_v60  ;;  %v904_v15 = vadd.f32 %v900_v4, %v896_v61  ;;  %v905_v16 = vadd.f32 %v901_v5, %v897_v62  ;;  %v986_v57 = vld [vmem:[%s3812_s23 + $0x480] sm:$0xff]  ;;  %v987_v58 = vld [vmem:[%s3812_s23 + $0x488] sm:$0xff] }
  0xda   : > { %v926_v19 = vsub.f32 %v910_v54, %v918_v1  ;;  %v927_v20 = vsub.f32 %v911_v55, %v919_v6  ;;  %v928_v21 = vsub.f32 %v912_v63, %v920_v7  ;;  %v929_v22 = vsub.f32 %v913_v0, %v921_v8  ;;  %v988_v63 = vld [vmem:[%s3812_s23 + $0x490] sm:$0xff]  ;;  %v989_v0 = vld [vmem:[%s3812_s23 + $0x498] sm:$0xff]  ;;  %v994_v1 = vld [vmem:[%s3818_s19 + $0x480] sm:$0xff] }
  0xdb   : > { %v930_v26 = vmul.f32 %v922_v9, %v922_v9  ;;  %v931_v27 = vmul.f32 %v923_v10, %v923_v10  ;;  %v932_v28 = vmul.f32 %v924_v11, %v924_v11  ;;  %v933_v29 = vmul.f32 %v925_v12, %v925_v12  ;;  %v990_v6 = vld [vmem:[%s3812_s23 + $0x4a0] sm:$0xff]  ;;  %v991_v7 = vld [vmem:[%s3812_s23 + $0x4a8] sm:$0xff]  ;;  %v996_v9 = vld [vmem:[%s3818_s19 + $0x490] sm:$0xff] }
  0xdc   : > { %v934_v35 = vmul.f32 %v926_v19, %v926_v19  ;;  %v935_v36 = vmul.f32 %v927_v20, %v927_v20  ;;  %v936_v37 = vmul.f32 %v928_v21, %v928_v21  ;;  %v937_v38 = vmul.f32 %v929_v22, %v929_v22  ;;  %v995_v8 = vld [vmem:[%s3818_s19 + $0x488] sm:$0xff]  ;;  %v997_v10 = vld [vmem:[%s3818_s19 + $0x498] sm:$0xff] }
  0xdd   : > { %v938_v42 = vadd.f32 %v930_v26, %v902_v13  ;;  %v939_v43 = vadd.f32 %v931_v27, %v903_v14  ;;  %v940_v44 = vadd.f32 %v932_v28, %v904_v15  ;;  %v941_v45 = vadd.f32 %v933_v29, %v905_v16  ;;  %v992_v15 = vld [vmem:[%s3812_s23 + $0x4b0] sm:$0xff]  ;;  %v993_v16 = vld [vmem:[%s3812_s23 + $0x4b8] sm:$0xff]  ;;  %v999_v22 = vld [vmem:[%s3818_s19 + $0x4a8] sm:$0xff] }
  0xde   : > { %v962_v49 = vsub.f32 %v946_v17, %v954_v25  ;;  %v963_v50 = vsub.f32 %v947_v18, %v955_v32  ;;  %v964_v51 = vsub.f32 %v948_v23, %v956_v33  ;;  %v965_v52 = vsub.f32 %v949_v24, %v957_v34  ;;  %v998_v17 = vld [vmem:[%s3818_s19 + $0x4a0] sm:$0xff]  ;;  %v1000_v23 = vld [vmem:[%s3818_s19 + $0x4b0] sm:$0xff]  ;;  %v1001_v24 = vld [vmem:[%s3818_s19 + $0x4b8] sm:$0xff] }
  0xdf   : > { %v942_v53 = vadd.f32 %v938_v42, %v934_v35  ;;  %v943_v54 = vadd.f32 %v939_v43, %v935_v36  ;;  %v944_v55 = vadd.f32 %v940_v44, %v936_v37  ;;  %v945_v56 = vadd.f32 %v941_v45, %v937_v38  ;;  %v1026_v33 = vld [vmem:[%s3812_s23 + $0x4c0] sm:$0xff]  ;;  %v1027_v34 = vld [vmem:[%s3812_s23 + $0x4c8] sm:$0xff] }
  0xe0   : > { %v966_v59 = vsub.f32 %v950_v30, %v958_v41  ;;  %v967_v60 = vsub.f32 %v951_v31, %v959_v46  ;;  %v968_v61 = vsub.f32 %v952_v39, %v960_v47  ;;  %v969_v62 = vsub.f32 %v953_v40, %v961_v48  ;;  %v1028_v39 = vld [vmem:[%s3812_s23 + $0x4d0] sm:$0xff]  ;;  %v1029_v40 = vld [vmem:[%s3812_s23 + $0x4d8] sm:$0xff]  ;;  %v1034_v41 = vld [vmem:[%s3818_s19 + $0x4c0] sm:$0xff] }
  0xe1   : > { %v970_v2 = vmul.f32 %v962_v49, %v962_v49  ;;  %v971_v3 = vmul.f32 %v963_v50, %v963_v50  ;;  %v972_v4 = vmul.f32 %v964_v51, %v964_v51  ;;  %v973_v5 = vmul.f32 %v965_v52, %v965_v52  ;;  %v1030_v46 = vld [vmem:[%s3812_s23 + $0x4e0] sm:$0xff]  ;;  %v1031_v47 = vld [vmem:[%s3812_s23 + $0x4e8] sm:$0xff]  ;;  %v1036_v49 = vld [vmem:[%s3818_s19 + $0x4d0] sm:$0xff] }
  0xe2   : > { %v974_v11 = vmul.f32 %v966_v59, %v966_v59  ;;  %v975_v12 = vmul.f32 %v967_v60, %v967_v60  ;;  %v976_v13 = vmul.f32 %v968_v61, %v968_v61  ;;  %v977_v14 = vmul.f32 %v969_v62, %v969_v62  ;;  %v1035_v48 = vld [vmem:[%s3818_s19 + $0x4c8] sm:$0xff]  ;;  %v1037_v50 = vld [vmem:[%s3818_s19 + $0x4d8] sm:$0xff] }
  0xe3   : > { %v978_v18 = vadd.f32 %v970_v2, %v942_v53  ;;  %v979_v19 = vadd.f32 %v971_v3, %v943_v54  ;;  %v980_v20 = vadd.f32 %v972_v4, %v944_v55  ;;  %v981_v21 = vadd.f32 %v973_v5, %v945_v56  ;;  %v1032_v55 = vld [vmem:[%s3812_s23 + $0x4f0] sm:$0xff]  ;;  %v1033_v56 = vld [vmem:[%s3812_s23 + $0x4f8] sm:$0xff]  ;;  %v1039_v62 = vld [vmem:[%s3818_s19 + $0x4e8] sm:$0xff] }
  0xe4   : > { %v1002_v25 = vsub.f32 %v986_v57, %v994_v1  ;;  %v1003_v26 = vsub.f32 %v987_v58, %v995_v8  ;;  %v1004_v27 = vsub.f32 %v988_v63, %v996_v9  ;;  %v1005_v28 = vsub.f32 %v989_v0, %v997_v10  ;;  %v1038_v57 = vld [vmem:[%s3818_s19 + $0x4e0] sm:$0xff]  ;;  %v1040_v63 = vld [vmem:[%s3818_s19 + $0x4f0] sm:$0xff]  ;;  %v1041_v0 = vld [vmem:[%s3818_s19 + $0x4f8] sm:$0xff] }
  0xe5   : > { %v982_v29 = vadd.f32 %v978_v18, %v974_v11  ;;  %v983_v30 = vadd.f32 %v979_v19, %v975_v12  ;;  %v984_v31 = vadd.f32 %v980_v20, %v976_v13  ;;  %v985_v32 = vadd.f32 %v981_v21, %v977_v14  ;;  %v1066_v9 = vld [vmem:[%s3812_s23 + $0x500] sm:$0xff]  ;;  %v1067_v10 = vld [vmem:[%s3812_s23 + $0x508] sm:$0xff] }
  0xe6   : > { %v1006_v35 = vsub.f32 %v990_v6, %v998_v17  ;;  %v1007_v36 = vsub.f32 %v991_v7, %v999_v22  ;;  %v1008_v37 = vsub.f32 %v992_v15, %v1000_v23  ;;  %v1009_v38 = vsub.f32 %v993_v16, %v1001_v24  ;;  %v1068_v15 = vld [vmem:[%s3812_s23 + $0x510] sm:$0xff]  ;;  %v1069_v16 = vld [vmem:[%s3812_s23 + $0x518] sm:$0xff]  ;;  %v1074_v17 = vld [vmem:[%s3818_s19 + $0x500] sm:$0xff] }
  0xe7   : > { %v1010_v42 = vmul.f32 %v1002_v25, %v1002_v25  ;;  %v1011_v43 = vmul.f32 %v1003_v26, %v1003_v26  ;;  %v1012_v44 = vmul.f32 %v1004_v27, %v1004_v27  ;;  %v1013_v45 = vmul.f32 %v1005_v28, %v1005_v28  ;;  %v1070_v22 = vld [vmem:[%s3812_s23 + $0x520] sm:$0xff]  ;;  %v1071_v23 = vld [vmem:[%s3812_s23 + $0x528] sm:$0xff]  ;;  %v1076_v25 = vld [vmem:[%s3818_s19 + $0x510] sm:$0xff] }
  0xe8   : > { %v1014_v51 = vmul.f32 %v1006_v35, %v1006_v35  ;;  %v1015_v52 = vmul.f32 %v1007_v36, %v1007_v36  ;;  %v1016_v53 = vmul.f32 %v1008_v37, %v1008_v37  ;;  %v1017_v54 = vmul.f32 %v1009_v38, %v1009_v38  ;;  %v1075_v24 = vld [vmem:[%s3818_s19 + $0x508] sm:$0xff]  ;;  %v1077_v26 = vld [vmem:[%s3818_s19 + $0x518] sm:$0xff] }
  0xe9   : > { %v1018_v58 = vadd.f32 %v1010_v42, %v982_v29  ;;  %v1019_v59 = vadd.f32 %v1011_v43, %v983_v30  ;;  %v1020_v60 = vadd.f32 %v1012_v44, %v984_v31  ;;  %v1021_v61 = vadd.f32 %v1013_v45, %v985_v32  ;;  %v1072_v31 = vld [vmem:[%s3812_s23 + $0x530] sm:$0xff]  ;;  %v1073_v32 = vld [vmem:[%s3812_s23 + $0x538] sm:$0xff]  ;;  %v1079_v38 = vld [vmem:[%s3818_s19 + $0x528] sm:$0xff] }
  0xea   : > { %v1042_v1 = vsub.f32 %v1026_v33, %v1034_v41  ;;  %v1043_v2 = vsub.f32 %v1027_v34, %v1035_v48  ;;  %v1044_v3 = vsub.f32 %v1028_v39, %v1036_v49  ;;  %v1045_v4 = vsub.f32 %v1029_v40, %v1037_v50  ;;  %v1078_v33 = vld [vmem:[%s3818_s19 + $0x520] sm:$0xff]  ;;  %v1080_v39 = vld [vmem:[%s3818_s19 + $0x530] sm:$0xff]  ;;  %v1081_v40 = vld [vmem:[%s3818_s19 + $0x538] sm:$0xff] }
  0xeb   : > { %v1022_v5 = vadd.f32 %v1018_v58, %v1014_v51  ;;  %v1023_v6 = vadd.f32 %v1019_v59, %v1015_v52  ;;  %v1024_v7 = vadd.f32 %v1020_v60, %v1016_v53  ;;  %v1025_v8 = vadd.f32 %v1021_v61, %v1017_v54  ;;  %v1106_v49 = vld [vmem:[%s3812_s23 + $0x540] sm:$0xff]  ;;  %v1107_v50 = vld [vmem:[%s3812_s23 + $0x548] sm:$0xff] }
  0xec   : > { %v1046_v11 = vsub.f32 %v1030_v46, %v1038_v57  ;;  %v1047_v12 = vsub.f32 %v1031_v47, %v1039_v62  ;;  %v1048_v13 = vsub.f32 %v1032_v55, %v1040_v63  ;;  %v1049_v14 = vsub.f32 %v1033_v56, %v1041_v0  ;;  %v1108_v55 = vld [vmem:[%s3812_s23 + $0x550] sm:$0xff]  ;;  %v1109_v56 = vld [vmem:[%s3812_s23 + $0x558] sm:$0xff]  ;;  %v1114_v57 = vld [vmem:[%s3818_s19 + $0x540] sm:$0xff] }
  0xed   : > { %v1050_v18 = vmul.f32 %v1042_v1, %v1042_v1  ;;  %v1051_v19 = vmul.f32 %v1043_v2, %v1043_v2  ;;  %v1052_v20 = vmul.f32 %v1044_v3, %v1044_v3  ;;  %v1053_v21 = vmul.f32 %v1045_v4, %v1045_v4  ;;  %v1110_v62 = vld [vmem:[%s3812_s23 + $0x560] sm:$0xff]  ;;  %v1111_v63 = vld [vmem:[%s3812_s23 + $0x568] sm:$0xff]  ;;  %v1116_v1 = vld [vmem:[%s3818_s19 + $0x550] sm:$0xff] }
  0xee   : > { %v1054_v27 = vmul.f32 %v1046_v11, %v1046_v11  ;;  %v1055_v28 = vmul.f32 %v1047_v12, %v1047_v12  ;;  %v1056_v29 = vmul.f32 %v1048_v13, %v1048_v13  ;;  %v1057_v30 = vmul.f32 %v1049_v14, %v1049_v14  ;;  %v1115_v0 = vld [vmem:[%s3818_s19 + $0x548] sm:$0xff]  ;;  %v1117_v2 = vld [vmem:[%s3818_s19 + $0x558] sm:$0xff] }
  0xef   : > { %v1058_v34 = vadd.f32 %v1050_v18, %v1022_v5  ;;  %v1059_v35 = vadd.f32 %v1051_v19, %v1023_v6  ;;  %v1060_v36 = vadd.f32 %v1052_v20, %v1024_v7  ;;  %v1061_v37 = vadd.f32 %v1053_v21, %v1025_v8  ;;  %v1112_v7 = vld [vmem:[%s3812_s23 + $0x570] sm:$0xff]  ;;  %v1113_v8 = vld [vmem:[%s3812_s23 + $0x578] sm:$0xff]  ;;  %v1119_v14 = vld [vmem:[%s3818_s19 + $0x568] sm:$0xff] }
  0xf0   : > { %v1082_v41 = vsub.f32 %v1066_v9, %v1074_v17  ;;  %v1083_v42 = vsub.f32 %v1067_v10, %v1075_v24  ;;  %v1084_v43 = vsub.f32 %v1068_v15, %v1076_v25  ;;  %v1085_v44 = vsub.f32 %v1069_v16, %v1077_v26  ;;  %v1118_v9 = vld [vmem:[%s3818_s19 + $0x560] sm:$0xff]  ;;  %v1120_v15 = vld [vmem:[%s3818_s19 + $0x570] sm:$0xff]  ;;  %v1121_v16 = vld [vmem:[%s3818_s19 + $0x578] sm:$0xff] }
  0xf1   : > { %v1062_v45 = vadd.f32 %v1058_v34, %v1054_v27  ;;  %v1063_v46 = vadd.f32 %v1059_v35, %v1055_v28  ;;  %v1064_v47 = vadd.f32 %v1060_v36, %v1056_v29  ;;  %v1065_v48 = vadd.f32 %v1061_v37, %v1057_v30  ;;  %v1146_v25 = vld [vmem:[%s3812_s23 + $0x580] sm:$0xff]  ;;  %v1147_v26 = vld [vmem:[%s3812_s23 + $0x588] sm:$0xff] }
  0xf2   : > { %v1086_v51 = vsub.f32 %v1070_v22, %v1078_v33  ;;  %v1087_v52 = vsub.f32 %v1071_v23, %v1079_v38  ;;  %v1088_v53 = vsub.f32 %v1072_v31, %v1080_v39  ;;  %v1089_v54 = vsub.f32 %v1073_v32, %v1081_v40  ;;  %v1148_v31 = vld [vmem:[%s3812_s23 + $0x590] sm:$0xff]  ;;  %v1149_v32 = vld [vmem:[%s3812_s23 + $0x598] sm:$0xff]  ;;  %v1154_v33 = vld [vmem:[%s3818_s19 + $0x580] sm:$0xff] }
  0xf3   : > { %v1090_v58 = vmul.f32 %v1082_v41, %v1082_v41  ;;  %v1091_v59 = vmul.f32 %v1083_v42, %v1083_v42  ;;  %v1092_v60 = vmul.f32 %v1084_v43, %v1084_v43  ;;  %v1093_v61 = vmul.f32 %v1085_v44, %v1085_v44  ;;  %v1150_v38 = vld [vmem:[%s3812_s23 + $0x5a0] sm:$0xff]  ;;  %v1151_v39 = vld [vmem:[%s3812_s23 + $0x5a8] sm:$0xff]  ;;  %v1156_v41 = vld [vmem:[%s3818_s19 + $0x590] sm:$0xff] }
  0xf4   : > { %v1094_v3 = vmul.f32 %v1086_v51, %v1086_v51  ;;  %v1095_v4 = vmul.f32 %v1087_v52, %v1087_v52  ;;  %v1096_v5 = vmul.f32 %v1088_v53, %v1088_v53  ;;  %v1097_v6 = vmul.f32 %v1089_v54, %v1089_v54  ;;  %v1155_v40 = vld [vmem:[%s3818_s19 + $0x588] sm:$0xff]  ;;  %v1157_v42 = vld [vmem:[%s3818_s19 + $0x598] sm:$0xff] }
  0xf5   : > { %v1098_v10 = vadd.f32 %v1090_v58, %v1062_v45  ;;  %v1099_v11 = vadd.f32 %v1091_v59, %v1063_v46  ;;  %v1100_v12 = vadd.f32 %v1092_v60, %v1064_v47  ;;  %v1101_v13 = vadd.f32 %v1093_v61, %v1065_v48  ;;  %v1152_v47 = vld [vmem:[%s3812_s23 + $0x5b0] sm:$0xff]  ;;  %v1153_v48 = vld [vmem:[%s3812_s23 + $0x5b8] sm:$0xff]  ;;  %v1159_v54 = vld [vmem:[%s3818_s19 + $0x5a8] sm:$0xff] }
  0xf6   : > { %v1122_v17 = vsub.f32 %v1106_v49, %v1114_v57  ;;  %v1123_v18 = vsub.f32 %v1107_v50, %v1115_v0  ;;  %v1124_v19 = vsub.f32 %v1108_v55, %v1116_v1  ;;  %v1125_v20 = vsub.f32 %v1109_v56, %v1117_v2  ;;  %v1158_v49 = vld [vmem:[%s3818_s19 + $0x5a0] sm:$0xff]  ;;  %v1160_v55 = vld [vmem:[%s3818_s19 + $0x5b0] sm:$0xff]  ;;  %v1161_v56 = vld [vmem:[%s3818_s19 + $0x5b8] sm:$0xff] }
  0xf7   : > { %v1102_v21 = vadd.f32 %v1098_v10, %v1094_v3  ;;  %v1103_v22 = vadd.f32 %v1099_v11, %v1095_v4  ;;  %v1104_v23 = vadd.f32 %v1100_v12, %v1096_v5  ;;  %v1105_v24 = vadd.f32 %v1101_v13, %v1097_v6  ;;  %v1186_v1 = vld [vmem:[%s3812_s23 + $0x5c0] sm:$0xff]  ;;  %v1187_v2 = vld [vmem:[%s3812_s23 + $0x5c8] sm:$0xff] }
  0xf8   : > { %v1126_v27 = vsub.f32 %v1110_v62, %v1118_v9  ;;  %v1127_v28 = vsub.f32 %v1111_v63, %v1119_v14  ;;  %v1128_v29 = vsub.f32 %v1112_v7, %v1120_v15  ;;  %v1129_v30 = vsub.f32 %v1113_v8, %v1121_v16  ;;  %v1188_v7 = vld [vmem:[%s3812_s23 + $0x5d0] sm:$0xff]  ;;  %v1189_v8 = vld [vmem:[%s3812_s23 + $0x5d8] sm:$0xff]  ;;  %v1194_v9 = vld [vmem:[%s3818_s19 + $0x5c0] sm:$0xff] }
  0xf9   : > { %v1130_v34 = vmul.f32 %v1122_v17, %v1122_v17  ;;  %v1131_v35 = vmul.f32 %v1123_v18, %v1123_v18  ;;  %v1132_v36 = vmul.f32 %v1124_v19, %v1124_v19  ;;  %v1133_v37 = vmul.f32 %v1125_v20, %v1125_v20  ;;  %v1190_v14 = vld [vmem:[%s3812_s23 + $0x5e0] sm:$0xff]  ;;  %v1191_v15 = vld [vmem:[%s3812_s23 + $0x5e8] sm:$0xff]  ;;  %v1196_v17 = vld [vmem:[%s3818_s19 + $0x5d0] sm:$0xff] }
  0xfa   : > { %v1134_v43 = vmul.f32 %v1126_v27, %v1126_v27  ;;  %v1135_v44 = vmul.f32 %v1127_v28, %v1127_v28  ;;  %v1136_v45 = vmul.f32 %v1128_v29, %v1128_v29  ;;  %v1137_v46 = vmul.f32 %v1129_v30, %v1129_v30  ;;  %v1195_v16 = vld [vmem:[%s3818_s19 + $0x5c8] sm:$0xff]  ;;  %v1197_v18 = vld [vmem:[%s3818_s19 + $0x5d8] sm:$0xff] }
  0xfb   : > { %v1138_v50 = vadd.f32 %v1130_v34, %v1102_v21  ;;  %v1139_v51 = vadd.f32 %v1131_v35, %v1103_v22  ;;  %v1140_v52 = vadd.f32 %v1132_v36, %v1104_v23  ;;  %v1141_v53 = vadd.f32 %v1133_v37, %v1105_v24  ;;  %v1192_v23 = vld [vmem:[%s3812_s23 + $0x5f0] sm:$0xff]  ;;  %v1193_v24 = vld [vmem:[%s3812_s23 + $0x5f8] sm:$0xff]  ;;  %v1199_v30 = vld [vmem:[%s3818_s19 + $0x5e8] sm:$0xff] }
  0xfc   : > { %v1162_v57 = vsub.f32 %v1146_v25, %v1154_v33  ;;  %v1163_v58 = vsub.f32 %v1147_v26, %v1155_v40  ;;  %v1164_v59 = vsub.f32 %v1148_v31, %v1156_v41  ;;  %v1165_v60 = vsub.f32 %v1149_v32, %v1157_v42  ;;  %v1198_v25 = vld [vmem:[%s3818_s19 + $0x5e0] sm:$0xff]  ;;  %v1200_v31 = vld [vmem:[%s3818_s19 + $0x5f0] sm:$0xff]  ;;  %v1201_v32 = vld [vmem:[%s3818_s19 + $0x5f8] sm:$0xff] }
  0xfd   : > { %v1142_v61 = vadd.f32 %v1138_v50, %v1134_v43  ;;  %v1143_v62 = vadd.f32 %v1139_v51, %v1135_v44  ;;  %v1144_v63 = vadd.f32 %v1140_v52, %v1136_v45  ;;  %v1145_v0 = vadd.f32 %v1141_v53, %v1137_v46  ;;  %v1226_v41 = vld [vmem:[%s3812_s23 + $0x600] sm:$0xff]  ;;  %v1227_v42 = vld [vmem:[%s3812_s23 + $0x608] sm:$0xff] }
  0xfe   : > { %v1166_v3 = vsub.f32 %v1150_v38, %v1158_v49  ;;  %v1167_v4 = vsub.f32 %v1151_v39, %v1159_v54  ;;  %v1168_v5 = vsub.f32 %v1152_v47, %v1160_v55  ;;  %v1169_v6 = vsub.f32 %v1153_v48, %v1161_v56  ;;  %v1228_v47 = vld [vmem:[%s3812_s23 + $0x610] sm:$0xff]  ;;  %v1229_v48 = vld [vmem:[%s3812_s23 + $0x618] sm:$0xff]  ;;  %v1234_v49 = vld [vmem:[%s3818_s19 + $0x600] sm:$0xff] }
  0xff   : > { %v1170_v10 = vmul.f32 %v1162_v57, %v1162_v57  ;;  %v1171_v11 = vmul.f32 %v1163_v58, %v1163_v58  ;;  %v1172_v12 = vmul.f32 %v1164_v59, %v1164_v59  ;;  %v1173_v13 = vmul.f32 %v1165_v60, %v1165_v60  ;;  %v1230_v54 = vld [vmem:[%s3812_s23 + $0x620] sm:$0xff]  ;;  %v1231_v55 = vld [vmem:[%s3812_s23 + $0x628] sm:$0xff]  ;;  %v1236_v57 = vld [vmem:[%s3818_s19 + $0x610] sm:$0xff] }
 0x100   : > { %v1174_v19 = vmul.f32 %v1166_v3, %v1166_v3  ;;  %v1175_v20 = vmul.f32 %v1167_v4, %v1167_v4  ;;  %v1176_v21 = vmul.f32 %v1168_v5, %v1168_v5  ;;  %v1177_v22 = vmul.f32 %v1169_v6, %v1169_v6  ;;  %v1235_v56 = vld [vmem:[%s3818_s19 + $0x608] sm:$0xff]  ;;  %v1237_v58 = vld [vmem:[%s3818_s19 + $0x618] sm:$0xff] }
 0x101   : > { %v1178_v26 = vadd.f32 %v1170_v10, %v1142_v61  ;;  %v1179_v27 = vadd.f32 %v1171_v11, %v1143_v62  ;;  %v1180_v28 = vadd.f32 %v1172_v12, %v1144_v63  ;;  %v1181_v29 = vadd.f32 %v1173_v13, %v1145_v0  ;;  %v1232_v63 = vld [vmem:[%s3812_s23 + $0x630] sm:$0xff]  ;;  %v1233_v0 = vld [vmem:[%s3812_s23 + $0x638] sm:$0xff]  ;;  %v1239_v6 = vld [vmem:[%s3818_s19 + $0x628] sm:$0xff] }
 0x102   : > { %v1202_v33 = vsub.f32 %v1186_v1, %v1194_v9  ;;  %v1203_v34 = vsub.f32 %v1187_v2, %v1195_v16  ;;  %v1204_v35 = vsub.f32 %v1188_v7, %v1196_v17  ;;  %v1205_v36 = vsub.f32 %v1189_v8, %v1197_v18  ;;  %v1238_v1 = vld [vmem:[%s3818_s19 + $0x620] sm:$0xff]  ;;  %v1240_v7 = vld [vmem:[%s3818_s19 + $0x630] sm:$0xff]  ;;  %v1241_v8 = vld [vmem:[%s3818_s19 + $0x638] sm:$0xff] }
 0x103   : > { %v1182_v37 = vadd.f32 %v1178_v26, %v1174_v19  ;;  %v1183_v38 = vadd.f32 %v1179_v27, %v1175_v20  ;;  %v1184_v39 = vadd.f32 %v1180_v28, %v1176_v21  ;;  %v1185_v40 = vadd.f32 %v1181_v29, %v1177_v22  ;;  %v1266_v17 = vld [vmem:[%s3812_s23 + $0x640] sm:$0xff]  ;;  %v1267_v18 = vld [vmem:[%s3812_s23 + $0x648] sm:$0xff] }
 0x104   : > { %v1206_v43 = vsub.f32 %v1190_v14, %v1198_v25  ;;  %v1207_v44 = vsub.f32 %v1191_v15, %v1199_v30  ;;  %v1208_v45 = vsub.f32 %v1192_v23, %v1200_v31  ;;  %v1209_v46 = vsub.f32 %v1193_v24, %v1201_v32  ;;  %v1268_v23 = vld [vmem:[%s3812_s23 + $0x650] sm:$0xff]  ;;  %v1269_v24 = vld [vmem:[%s3812_s23 + $0x658] sm:$0xff]  ;;  %v1274_v25 = vld [vmem:[%s3818_s19 + $0x640] sm:$0xff] }
 0x105   : > { %v1210_v50 = vmul.f32 %v1202_v33, %v1202_v33  ;;  %v1211_v51 = vmul.f32 %v1203_v34, %v1203_v34  ;;  %v1212_v52 = vmul.f32 %v1204_v35, %v1204_v35  ;;  %v1213_v53 = vmul.f32 %v1205_v36, %v1205_v36  ;;  %v1270_v30 = vld [vmem:[%s3812_s23 + $0x660] sm:$0xff]  ;;  %v1271_v31 = vld [vmem:[%s3812_s23 + $0x668] sm:$0xff]  ;;  %v1276_v33 = vld [vmem:[%s3818_s19 + $0x650] sm:$0xff] }
 0x106   : > { %v1214_v59 = vmul.f32 %v1206_v43, %v1206_v43  ;;  %v1215_v60 = vmul.f32 %v1207_v44, %v1207_v44  ;;  %v1216_v61 = vmul.f32 %v1208_v45, %v1208_v45  ;;  %v1217_v62 = vmul.f32 %v1209_v46, %v1209_v46  ;;  %v1275_v32 = vld [vmem:[%s3818_s19 + $0x648] sm:$0xff]  ;;  %v1277_v34 = vld [vmem:[%s3818_s19 + $0x658] sm:$0xff] }
 0x107   : > { %v1218_v2 = vadd.f32 %v1210_v50, %v1182_v37  ;;  %v1219_v3 = vadd.f32 %v1211_v51, %v1183_v38  ;;  %v1220_v4 = vadd.f32 %v1212_v52, %v1184_v39  ;;  %v1221_v5 = vadd.f32 %v1213_v53, %v1185_v40  ;;  %v1272_v39 = vld [vmem:[%s3812_s23 + $0x670] sm:$0xff]  ;;  %v1273_v40 = vld [vmem:[%s3812_s23 + $0x678] sm:$0xff]  ;;  %v1279_v46 = vld [vmem:[%s3818_s19 + $0x668] sm:$0xff] }
 0x108   : > { %v1242_v9 = vsub.f32 %v1226_v41, %v1234_v49  ;;  %v1243_v10 = vsub.f32 %v1227_v42, %v1235_v56  ;;  %v1244_v11 = vsub.f32 %v1228_v47, %v1236_v57  ;;  %v1245_v12 = vsub.f32 %v1229_v48, %v1237_v58  ;;  %v1278_v41 = vld [vmem:[%s3818_s19 + $0x660] sm:$0xff]  ;;  %v1280_v47 = vld [vmem:[%s3818_s19 + $0x670] sm:$0xff]  ;;  %v1281_v48 = vld [vmem:[%s3818_s19 + $0x678] sm:$0xff] }
 0x109   : > { %v1222_v13 = vadd.f32 %v1218_v2, %v1214_v59  ;;  %v1223_v14 = vadd.f32 %v1219_v3, %v1215_v60  ;;  %v1224_v15 = vadd.f32 %v1220_v4, %v1216_v61  ;;  %v1225_v16 = vadd.f32 %v1221_v5, %v1217_v62  ;;  %v1306_v57 = vld [vmem:[%s3812_s23 + $0x680] sm:$0xff]  ;;  %v1307_v58 = vld [vmem:[%s3812_s23 + $0x688] sm:$0xff] }
 0x10a   : > { %v1246_v19 = vsub.f32 %v1230_v54, %v1238_v1  ;;  %v1247_v20 = vsub.f32 %v1231_v55, %v1239_v6  ;;  %v1248_v21 = vsub.f32 %v1232_v63, %v1240_v7  ;;  %v1249_v22 = vsub.f32 %v1233_v0, %v1241_v8  ;;  %v1308_v63 = vld [vmem:[%s3812_s23 + $0x690] sm:$0xff]  ;;  %v1309_v0 = vld [vmem:[%s3812_s23 + $0x698] sm:$0xff]  ;;  %v1314_v1 = vld [vmem:[%s3818_s19 + $0x680] sm:$0xff] }
 0x10b   : > { %v1250_v26 = vmul.f32 %v1242_v9, %v1242_v9  ;;  %v1251_v27 = vmul.f32 %v1243_v10, %v1243_v10  ;;  %v1252_v28 = vmul.f32 %v1244_v11, %v1244_v11  ;;  %v1253_v29 = vmul.f32 %v1245_v12, %v1245_v12  ;;  %v1310_v6 = vld [vmem:[%s3812_s23 + $0x6a0] sm:$0xff]  ;;  %v1311_v7 = vld [vmem:[%s3812_s23 + $0x6a8] sm:$0xff]  ;;  %v1316_v9 = vld [vmem:[%s3818_s19 + $0x690] sm:$0xff] }
 0x10c   : > { %v1254_v35 = vmul.f32 %v1246_v19, %v1246_v19  ;;  %v1255_v36 = vmul.f32 %v1247_v20, %v1247_v20  ;;  %v1256_v37 = vmul.f32 %v1248_v21, %v1248_v21  ;;  %v1257_v38 = vmul.f32 %v1249_v22, %v1249_v22  ;;  %v1315_v8 = vld [vmem:[%s3818_s19 + $0x688] sm:$0xff]  ;;  %v1317_v10 = vld [vmem:[%s3818_s19 + $0x698] sm:$0xff] }
 0x10d   : > { %v1258_v42 = vadd.f32 %v1250_v26, %v1222_v13  ;;  %v1259_v43 = vadd.f32 %v1251_v27, %v1223_v14  ;;  %v1260_v44 = vadd.f32 %v1252_v28, %v1224_v15  ;;  %v1261_v45 = vadd.f32 %v1253_v29, %v1225_v16  ;;  %v1312_v15 = vld [vmem:[%s3812_s23 + $0x6b0] sm:$0xff]  ;;  %v1313_v16 = vld [vmem:[%s3812_s23 + $0x6b8] sm:$0xff]  ;;  %v1319_v22 = vld [vmem:[%s3818_s19 + $0x6a8] sm:$0xff] }
 0x10e   : > { %v1282_v49 = vsub.f32 %v1266_v17, %v1274_v25  ;;  %v1283_v50 = vsub.f32 %v1267_v18, %v1275_v32  ;;  %v1284_v51 = vsub.f32 %v1268_v23, %v1276_v33  ;;  %v1285_v52 = vsub.f32 %v1269_v24, %v1277_v34  ;;  %v1318_v17 = vld [vmem:[%s3818_s19 + $0x6a0] sm:$0xff]  ;;  %v1320_v23 = vld [vmem:[%s3818_s19 + $0x6b0] sm:$0xff]  ;;  %v1321_v24 = vld [vmem:[%s3818_s19 + $0x6b8] sm:$0xff] }
 0x10f   : > { %v1262_v53 = vadd.f32 %v1258_v42, %v1254_v35  ;;  %v1263_v54 = vadd.f32 %v1259_v43, %v1255_v36  ;;  %v1264_v55 = vadd.f32 %v1260_v44, %v1256_v37  ;;  %v1265_v56 = vadd.f32 %v1261_v45, %v1257_v38  ;;  %v1346_v33 = vld [vmem:[%s3812_s23 + $0x6c0] sm:$0xff]  ;;  %v1347_v34 = vld [vmem:[%s3812_s23 + $0x6c8] sm:$0xff] }
 0x110   : > { %v1286_v59 = vsub.f32 %v1270_v30, %v1278_v41  ;;  %v1287_v60 = vsub.f32 %v1271_v31, %v1279_v46  ;;  %v1288_v61 = vsub.f32 %v1272_v39, %v1280_v47  ;;  %v1289_v62 = vsub.f32 %v1273_v40, %v1281_v48  ;;  %v1348_v39 = vld [vmem:[%s3812_s23 + $0x6d0] sm:$0xff]  ;;  %v1349_v40 = vld [vmem:[%s3812_s23 + $0x6d8] sm:$0xff]  ;;  %v1354_v41 = vld [vmem:[%s3818_s19 + $0x6c0] sm:$0xff] }
 0x111   : > { %v1290_v2 = vmul.f32 %v1282_v49, %v1282_v49  ;;  %v1291_v3 = vmul.f32 %v1283_v50, %v1283_v50  ;;  %v1292_v4 = vmul.f32 %v1284_v51, %v1284_v51  ;;  %v1293_v5 = vmul.f32 %v1285_v52, %v1285_v52  ;;  %v1350_v46 = vld [vmem:[%s3812_s23 + $0x6e0] sm:$0xff]  ;;  %v1351_v47 = vld [vmem:[%s3812_s23 + $0x6e8] sm:$0xff]  ;;  %v1356_v49 = vld [vmem:[%s3818_s19 + $0x6d0] sm:$0xff] }
 0x112   : > { %v1294_v11 = vmul.f32 %v1286_v59, %v1286_v59  ;;  %v1295_v12 = vmul.f32 %v1287_v60, %v1287_v60  ;;  %v1296_v13 = vmul.f32 %v1288_v61, %v1288_v61  ;;  %v1297_v14 = vmul.f32 %v1289_v62, %v1289_v62  ;;  %v1355_v48 = vld [vmem:[%s3818_s19 + $0x6c8] sm:$0xff]  ;;  %v1357_v50 = vld [vmem:[%s3818_s19 + $0x6d8] sm:$0xff] }
 0x113   : > { %v1298_v18 = vadd.f32 %v1290_v2, %v1262_v53  ;;  %v1299_v19 = vadd.f32 %v1291_v3, %v1263_v54  ;;  %v1300_v20 = vadd.f32 %v1292_v4, %v1264_v55  ;;  %v1301_v21 = vadd.f32 %v1293_v5, %v1265_v56  ;;  %v1352_v55 = vld [vmem:[%s3812_s23 + $0x6f0] sm:$0xff]  ;;  %v1353_v56 = vld [vmem:[%s3812_s23 + $0x6f8] sm:$0xff]  ;;  %v1359_v62 = vld [vmem:[%s3818_s19 + $0x6e8] sm:$0xff] }
 0x114   : > { %v1322_v25 = vsub.f32 %v1306_v57, %v1314_v1  ;;  %v1323_v26 = vsub.f32 %v1307_v58, %v1315_v8  ;;  %v1324_v27 = vsub.f32 %v1308_v63, %v1316_v9  ;;  %v1325_v28 = vsub.f32 %v1309_v0, %v1317_v10  ;;  %v1358_v57 = vld [vmem:[%s3818_s19 + $0x6e0] sm:$0xff]  ;;  %v1360_v63 = vld [vmem:[%s3818_s19 + $0x6f0] sm:$0xff]  ;;  %v1361_v0 = vld [vmem:[%s3818_s19 + $0x6f8] sm:$0xff] }
 0x115   : > { %v1302_v29 = vadd.f32 %v1298_v18, %v1294_v11  ;;  %v1303_v30 = vadd.f32 %v1299_v19, %v1295_v12  ;;  %v1304_v31 = vadd.f32 %v1300_v20, %v1296_v13  ;;  %v1305_v32 = vadd.f32 %v1301_v21, %v1297_v14  ;;  %v1386_v9 = vld [vmem:[%s3812_s23 + $0x700] sm:$0xff]  ;;  %v1387_v10 = vld [vmem:[%s3812_s23 + $0x708] sm:$0xff] }
 0x116   : > { %v1326_v35 = vsub.f32 %v1310_v6, %v1318_v17  ;;  %v1327_v36 = vsub.f32 %v1311_v7, %v1319_v22  ;;  %v1328_v37 = vsub.f32 %v1312_v15, %v1320_v23  ;;  %v1329_v38 = vsub.f32 %v1313_v16, %v1321_v24  ;;  %v1388_v15 = vld [vmem:[%s3812_s23 + $0x710] sm:$0xff]  ;;  %v1389_v16 = vld [vmem:[%s3812_s23 + $0x718] sm:$0xff]  ;;  %v1394_v17 = vld [vmem:[%s3818_s19 + $0x700] sm:$0xff] }
 0x117   : > { %v1330_v42 = vmul.f32 %v1322_v25, %v1322_v25  ;;  %v1331_v43 = vmul.f32 %v1323_v26, %v1323_v26  ;;  %v1332_v44 = vmul.f32 %v1324_v27, %v1324_v27  ;;  %v1333_v45 = vmul.f32 %v1325_v28, %v1325_v28  ;;  %v1390_v22 = vld [vmem:[%s3812_s23 + $0x720] sm:$0xff]  ;;  %v1391_v23 = vld [vmem:[%s3812_s23 + $0x728] sm:$0xff]  ;;  %v1396_v25 = vld [vmem:[%s3818_s19 + $0x710] sm:$0xff] }
 0x118   : > { %v1334_v51 = vmul.f32 %v1326_v35, %v1326_v35  ;;  %v1335_v52 = vmul.f32 %v1327_v36, %v1327_v36  ;;  %v1336_v53 = vmul.f32 %v1328_v37, %v1328_v37  ;;  %v1337_v54 = vmul.f32 %v1329_v38, %v1329_v38  ;;  %v1395_v24 = vld [vmem:[%s3818_s19 + $0x708] sm:$0xff]  ;;  %v1397_v26 = vld [vmem:[%s3818_s19 + $0x718] sm:$0xff] }
 0x119   : > { %v1338_v58 = vadd.f32 %v1330_v42, %v1302_v29  ;;  %v1339_v59 = vadd.f32 %v1331_v43, %v1303_v30  ;;  %v1340_v60 = vadd.f32 %v1332_v44, %v1304_v31  ;;  %v1341_v61 = vadd.f32 %v1333_v45, %v1305_v32  ;;  %v1392_v31 = vld [vmem:[%s3812_s23 + $0x730] sm:$0xff]  ;;  %v1393_v32 = vld [vmem:[%s3812_s23 + $0x738] sm:$0xff]  ;;  %v1399_v38 = vld [vmem:[%s3818_s19 + $0x728] sm:$0xff] }
 0x11a   : > { %v1362_v1 = vsub.f32 %v1346_v33, %v1354_v41  ;;  %v1363_v2 = vsub.f32 %v1347_v34, %v1355_v48  ;;  %v1364_v3 = vsub.f32 %v1348_v39, %v1356_v49  ;;  %v1365_v4 = vsub.f32 %v1349_v40, %v1357_v50  ;;  %v1398_v33 = vld [vmem:[%s3818_s19 + $0x720] sm:$0xff]  ;;  %v1400_v39 = vld [vmem:[%s3818_s19 + $0x730] sm:$0xff]  ;;  %v1401_v40 = vld [vmem:[%s3818_s19 + $0x738] sm:$0xff] }
 0x11b   : > { %v1342_v5 = vadd.f32 %v1338_v58, %v1334_v51  ;;  %v1343_v6 = vadd.f32 %v1339_v59, %v1335_v52  ;;  %v1344_v7 = vadd.f32 %v1340_v60, %v1336_v53  ;;  %v1345_v8 = vadd.f32 %v1341_v61, %v1337_v54  ;;  %v1426_v49 = vld [vmem:[%s3812_s23 + $0x740] sm:$0xff]  ;;  %v1427_v50 = vld [vmem:[%s3812_s23 + $0x748] sm:$0xff] }
 0x11c   : > { %v1366_v11 = vsub.f32 %v1350_v46, %v1358_v57  ;;  %v1367_v12 = vsub.f32 %v1351_v47, %v1359_v62  ;;  %v1368_v13 = vsub.f32 %v1352_v55, %v1360_v63  ;;  %v1369_v14 = vsub.f32 %v1353_v56, %v1361_v0  ;;  %v1428_v55 = vld [vmem:[%s3812_s23 + $0x750] sm:$0xff]  ;;  %v1429_v56 = vld [vmem:[%s3812_s23 + $0x758] sm:$0xff]  ;;  %v1434_v57 = vld [vmem:[%s3818_s19 + $0x740] sm:$0xff] }
 0x11d   : > { %v1370_v18 = vmul.f32 %v1362_v1, %v1362_v1  ;;  %v1371_v19 = vmul.f32 %v1363_v2, %v1363_v2  ;;  %v1372_v20 = vmul.f32 %v1364_v3, %v1364_v3  ;;  %v1373_v21 = vmul.f32 %v1365_v4, %v1365_v4  ;;  %v1430_v62 = vld [vmem:[%s3812_s23 + $0x760] sm:$0xff]  ;;  %v1431_v63 = vld [vmem:[%s3812_s23 + $0x768] sm:$0xff]  ;;  %v1436_v1 = vld [vmem:[%s3818_s19 + $0x750] sm:$0xff] }
 0x11e   : > { %v1374_v27 = vmul.f32 %v1366_v11, %v1366_v11  ;;  %v1375_v28 = vmul.f32 %v1367_v12, %v1367_v12  ;;  %v1376_v29 = vmul.f32 %v1368_v13, %v1368_v13  ;;  %v1377_v30 = vmul.f32 %v1369_v14, %v1369_v14  ;;  %v1435_v0 = vld [vmem:[%s3818_s19 + $0x748] sm:$0xff]  ;;  %v1437_v2 = vld [vmem:[%s3818_s19 + $0x758] sm:$0xff] }
 0x11f   : > { %v1378_v34 = vadd.f32 %v1370_v18, %v1342_v5  ;;  %v1379_v35 = vadd.f32 %v1371_v19, %v1343_v6  ;;  %v1380_v36 = vadd.f32 %v1372_v20, %v1344_v7  ;;  %v1381_v37 = vadd.f32 %v1373_v21, %v1345_v8  ;;  %v1432_v7 = vld [vmem:[%s3812_s23 + $0x770] sm:$0xff]  ;;  %v1433_v8 = vld [vmem:[%s3812_s23 + $0x778] sm:$0xff]  ;;  %v1439_v14 = vld [vmem:[%s3818_s19 + $0x768] sm:$0xff] }
 0x120   : > { %v1402_v41 = vsub.f32 %v1386_v9, %v1394_v17  ;;  %v1403_v42 = vsub.f32 %v1387_v10, %v1395_v24  ;;  %v1404_v43 = vsub.f32 %v1388_v15, %v1396_v25  ;;  %v1405_v44 = vsub.f32 %v1389_v16, %v1397_v26  ;;  %v1438_v9 = vld [vmem:[%s3818_s19 + $0x760] sm:$0xff]  ;;  %v1440_v15 = vld [vmem:[%s3818_s19 + $0x770] sm:$0xff]  ;;  %v1441_v16 = vld [vmem:[%s3818_s19 + $0x778] sm:$0xff] }
 0x121   : > { %v1382_v45 = vadd.f32 %v1378_v34, %v1374_v27  ;;  %v1383_v46 = vadd.f32 %v1379_v35, %v1375_v28  ;;  %v1384_v47 = vadd.f32 %v1380_v36, %v1376_v29  ;;  %v1385_v48 = vadd.f32 %v1381_v37, %v1377_v30  ;;  %v1466_v25 = vld [vmem:[%s3812_s23 + $0x780] sm:$0xff]  ;;  %v1467_v26 = vld [vmem:[%s3812_s23 + $0x788] sm:$0xff] }
 0x122   : > { %v1406_v51 = vsub.f32 %v1390_v22, %v1398_v33  ;;  %v1407_v52 = vsub.f32 %v1391_v23, %v1399_v38  ;;  %v1408_v53 = vsub.f32 %v1392_v31, %v1400_v39  ;;  %v1409_v54 = vsub.f32 %v1393_v32, %v1401_v40  ;;  %v1468_v31 = vld [vmem:[%s3812_s23 + $0x790] sm:$0xff]  ;;  %v1469_v32 = vld [vmem:[%s3812_s23 + $0x798] sm:$0xff]  ;;  %v1474_v33 = vld [vmem:[%s3818_s19 + $0x780] sm:$0xff] }
 0x123   : > { %v1410_v58 = vmul.f32 %v1402_v41, %v1402_v41  ;;  %v1411_v59 = vmul.f32 %v1403_v42, %v1403_v42  ;;  %v1412_v60 = vmul.f32 %v1404_v43, %v1404_v43  ;;  %v1413_v61 = vmul.f32 %v1405_v44, %v1405_v44  ;;  %v1470_v38 = vld [vmem:[%s3812_s23 + $0x7a0] sm:$0xff]  ;;  %v1471_v39 = vld [vmem:[%s3812_s23 + $0x7a8] sm:$0xff]  ;;  %v1476_v41 = vld [vmem:[%s3818_s19 + $0x790] sm:$0xff] }
 0x124   : > { %v1414_v3 = vmul.f32 %v1406_v51, %v1406_v51  ;;  %v1415_v4 = vmul.f32 %v1407_v52, %v1407_v52  ;;  %v1416_v5 = vmul.f32 %v1408_v53, %v1408_v53  ;;  %v1417_v6 = vmul.f32 %v1409_v54, %v1409_v54  ;;  %v1475_v40 = vld [vmem:[%s3818_s19 + $0x788] sm:$0xff]  ;;  %v1477_v42 = vld [vmem:[%s3818_s19 + $0x798] sm:$0xff] }
 0x125   : > { %v1418_v10 = vadd.f32 %v1410_v58, %v1382_v45  ;;  %v1419_v11 = vadd.f32 %v1411_v59, %v1383_v46  ;;  %v1420_v12 = vadd.f32 %v1412_v60, %v1384_v47  ;;  %v1421_v13 = vadd.f32 %v1413_v61, %v1385_v48  ;;  %v1472_v47 = vld [vmem:[%s3812_s23 + $0x7b0] sm:$0xff]  ;;  %v1473_v48 = vld [vmem:[%s3812_s23 + $0x7b8] sm:$0xff]  ;;  %v1479_v54 = vld [vmem:[%s3818_s19 + $0x7a8] sm:$0xff] }
 0x126   : > { %v1442_v17 = vsub.f32 %v1426_v49, %v1434_v57  ;;  %v1443_v18 = vsub.f32 %v1427_v50, %v1435_v0  ;;  %v1444_v19 = vsub.f32 %v1428_v55, %v1436_v1  ;;  %v1445_v20 = vsub.f32 %v1429_v56, %v1437_v2  ;;  %v1478_v49 = vld [vmem:[%s3818_s19 + $0x7a0] sm:$0xff]  ;;  %v1480_v55 = vld [vmem:[%s3818_s19 + $0x7b0] sm:$0xff]  ;;  %v1481_v56 = vld [vmem:[%s3818_s19 + $0x7b8] sm:$0xff] }
 0x127   : > { %v1422_v21 = vadd.f32 %v1418_v10, %v1414_v3  ;;  %v1423_v22 = vadd.f32 %v1419_v11, %v1415_v4  ;;  %v1424_v23 = vadd.f32 %v1420_v12, %v1416_v5  ;;  %v1425_v24 = vadd.f32 %v1421_v13, %v1417_v6  ;;  %v1506_v1 = vld [vmem:[%s3812_s23 + $0x7c0] sm:$0xff]  ;;  %v1507_v2 = vld [vmem:[%s3812_s23 + $0x7c8] sm:$0xff] }
 0x128   : > { %v1446_v27 = vsub.f32 %v1430_v62, %v1438_v9  ;;  %v1447_v28 = vsub.f32 %v1431_v63, %v1439_v14  ;;  %v1448_v29 = vsub.f32 %v1432_v7, %v1440_v15  ;;  %v1449_v30 = vsub.f32 %v1433_v8, %v1441_v16  ;;  %v1508_v7 = vld [vmem:[%s3812_s23 + $0x7d0] sm:$0xff]  ;;  %v1509_v8 = vld [vmem:[%s3812_s23 + $0x7d8] sm:$0xff]  ;;  %v1514_v9 = vld [vmem:[%s3818_s19 + $0x7c0] sm:$0xff] }
 0x129   : > { %v1450_v34 = vmul.f32 %v1442_v17, %v1442_v17  ;;  %v1451_v35 = vmul.f32 %v1443_v18, %v1443_v18  ;;  %v1452_v36 = vmul.f32 %v1444_v19, %v1444_v19  ;;  %v1453_v37 = vmul.f32 %v1445_v20, %v1445_v20  ;;  %v1510_v14 = vld [vmem:[%s3812_s23 + $0x7e0] sm:$0xff]  ;;  %v1511_v15 = vld [vmem:[%s3812_s23 + $0x7e8] sm:$0xff]  ;;  %v1516_v17 = vld [vmem:[%s3818_s19 + $0x7d0] sm:$0xff] }
 0x12a   : > { %v1454_v43 = vmul.f32 %v1446_v27, %v1446_v27  ;;  %v1455_v44 = vmul.f32 %v1447_v28, %v1447_v28  ;;  %v1456_v45 = vmul.f32 %v1448_v29, %v1448_v29  ;;  %v1457_v46 = vmul.f32 %v1449_v30, %v1449_v30  ;;  %v1515_v16 = vld [vmem:[%s3818_s19 + $0x7c8] sm:$0xff]  ;;  %v1517_v18 = vld [vmem:[%s3818_s19 + $0x7d8] sm:$0xff] }
 0x12b   : > { %v1458_v50 = vadd.f32 %v1450_v34, %v1422_v21  ;;  %v1459_v51 = vadd.f32 %v1451_v35, %v1423_v22  ;;  %v1460_v52 = vadd.f32 %v1452_v36, %v1424_v23  ;;  %v1461_v53 = vadd.f32 %v1453_v37, %v1425_v24  ;;  %v1512_v23 = vld [vmem:[%s3812_s23 + $0x7f0] sm:$0xff]  ;;  %v1513_v24 = vld [vmem:[%s3812_s23 + $0x7f8] sm:$0xff]  ;;  %v1519_v30 = vld [vmem:[%s3818_s19 + $0x7e8] sm:$0xff] }
 0x12c   : > { %v1482_v57 = vsub.f32 %v1466_v25, %v1474_v33  ;;  %v1483_v58 = vsub.f32 %v1467_v26, %v1475_v40  ;;  %v1484_v59 = vsub.f32 %v1468_v31, %v1476_v41  ;;  %v1485_v60 = vsub.f32 %v1469_v32, %v1477_v42  ;;  %v1518_v25 = vld [vmem:[%s3818_s19 + $0x7e0] sm:$0xff]  ;;  %v1520_v31 = vld [vmem:[%s3818_s19 + $0x7f0] sm:$0xff]  ;;  %v1521_v32 = vld [vmem:[%s3818_s19 + $0x7f8] sm:$0xff] }
 0x12d   : > { %v1462_v61 = vadd.f32 %v1458_v50, %v1454_v43  ;;  %v1463_v62 = vadd.f32 %v1459_v51, %v1455_v44  ;;  %v1464_v63 = vadd.f32 %v1460_v52, %v1456_v45  ;;  %v1465_v0 = vadd.f32 %v1461_v53, %v1457_v46 }
 0x12e   : > { %v1486_v3 = vsub.f32 %v1470_v38, %v1478_v49  ;;  %v1487_v4 = vsub.f32 %v1471_v39, %v1479_v54  ;;  %v1488_v5 = vsub.f32 %v1472_v47, %v1480_v55  ;;  %v1489_v6 = vsub.f32 %v1473_v48, %v1481_v56 }
 0x12f   : > { %v1490_v10 = vmul.f32 %v1482_v57, %v1482_v57  ;;  %v1491_v11 = vmul.f32 %v1483_v58, %v1483_v58  ;;  %v1492_v12 = vmul.f32 %v1484_v59, %v1484_v59  ;;  %v1493_v13 = vmul.f32 %v1485_v60, %v1485_v60  ;;  %v1546_v57 = vld [vmem:[#allocation7] sm:$0xff]  ;;  %v1547_v58 = vld [vmem:[#allocation7 + $0x8] sm:$0xff]  ;;  %v1548_v59 = vld [vmem:[#allocation7 + $0x10] sm:$0xff] }
 0x130   : > { %v1494_v19 = vmul.f32 %v1486_v3, %v1486_v3  ;;  %v1495_v20 = vmul.f32 %v1487_v4, %v1487_v4  ;;  %v1496_v21 = vmul.f32 %v1488_v5, %v1488_v5  ;;  %v1497_v22 = vmul.f32 %v1489_v6, %v1489_v6  ;;  %v1549_v60 = vld [vmem:[#allocation7 + $0x18] sm:$0xff] }
 0x131   : > { %v1498_v26 = vadd.f32 %v1490_v10, %v1462_v61  ;;  %v1499_v27 = vadd.f32 %v1491_v11, %v1463_v62  ;;  %v1500_v28 = vadd.f32 %v1492_v12, %v1464_v63  ;;  %v1501_v29 = vadd.f32 %v1493_v13, %v1465_v0 }
 0x132   : > { %v1522_v33 = vsub.f32 %v1506_v1, %v1514_v9  ;;  %v1523_v34 = vsub.f32 %v1507_v2, %v1515_v16  ;;  %v1524_v35 = vsub.f32 %v1508_v7, %v1516_v17  ;;  %v1525_v36 = vsub.f32 %v1509_v8, %v1517_v18 }
 0x133   : > { %v1502_v37 = vadd.f32 %v1498_v26, %v1494_v19  ;;  %v1503_v38 = vadd.f32 %v1499_v27, %v1495_v20  ;;  %v1504_v39 = vadd.f32 %v1500_v28, %v1496_v21  ;;  %v1505_v40 = vadd.f32 %v1501_v29, %v1497_v22 }
 0x134   : > { %v1526_v41 = vsub.f32 %v1510_v14, %v1518_v25  ;;  %v1527_v42 = vsub.f32 %v1511_v15, %v1519_v30  ;;  %v1528_v43 = vsub.f32 %v1512_v23, %v1520_v31  ;;  %v1529_v44 = vsub.f32 %v1513_v24, %v1521_v32 }
 0x135   : > { %v1530_v45 = vmul.f32 %v1522_v33, %v1522_v33  ;;  %v1531_v46 = vmul.f32 %v1523_v34, %v1523_v34  ;;  %v1532_v47 = vmul.f32 %v1524_v35, %v1524_v35  ;;  %v1533_v48 = vmul.f32 %v1525_v36, %v1525_v36 }
 0x136   : > { %v1534_v49 = vmul.f32 %v1526_v41, %v1526_v41  ;;  %v1535_v50 = vmul.f32 %v1527_v42, %v1527_v42  ;;  %v1536_v51 = vmul.f32 %v1528_v43, %v1528_v43  ;;  %v1537_v52 = vmul.f32 %v1529_v44, %v1529_v44 }
 0x137   : > { %v1538_v53 = vadd.f32 %v1530_v45, %v1502_v37  ;;  %v1539_v54 = vadd.f32 %v1531_v46, %v1503_v38  ;;  %v1540_v55 = vadd.f32 %v1532_v47, %v1504_v39  ;;  %v1541_v56 = vadd.f32 %v1533_v48, %v1505_v40 }
 0x139   : > { %v1542_v61 = vadd.f32 %v1538_v53, %v1534_v49  ;;  %v1543_v62 = vadd.f32 %v1539_v54, %v1535_v50  ;;  %v1544_v63 = vadd.f32 %v1540_v55, %v1536_v51  ;;  %v1545_v0 = vadd.f32 %v1541_v56, %v1537_v52 }
 0x13b   : > { %v1550_v1 = vadd.f32 %v1546_v57, %v1542_v61  ;;  %v1551_v2 = vadd.f32 %v1547_v58, %v1543_v62  ;;  %v1552_v3 = vadd.f32 %v1548_v59, %v1544_v63  ;;  %v1553_v4 = vadd.f32 %v1549_v60, %v1545_v0 }
 0x13d   : > { %1554 = vst [vmem:[#allocation7] sm:$0xff] %v1550_v1  ;;  %1555 = vst [vmem:[#allocation7 + $0x8] sm:$0xff] %v1551_v2 }
 0x13e   : > { %1556 = vst [vmem:[#allocation7 + $0x10] sm:$0xff] %v1552_v3  ;;  %1557 = vst [vmem:[#allocation7 + $0x18] sm:$0xff] %v1553_v4 }
 0x13f PF: > { %p1559_p7 = scmp.lt.s32.totalorder %s3635_s12, 2 }
 0x141   : > { %p1560_p0 = pnand %p3430_p12, %p1559_p7 }
 0x142   : > { %v1564_v5 = vlaneseq (!%p1560_p0)  ;;  %v1567_v6 = vld [vmem:[%s3812_s23] sm:$0xff] (!%p1560_p0)  ;;  %v1568_v7 = vld [vmem:[%s3812_s23 + $0x8] sm:$0xff] (!%p1560_p0)  ;;  %v1569_v8 = vld [vmem:[%s3812_s23 + $0x10] sm:$0xff] (!%p1560_p0)  ;;  %v1599_v9 = vstv (!%p1560_p0), %s3826_s6  ;;  %s1652_s12 = sadd.s32 (!%p1560_p0), 16, %s3826_s6  ;;  %s1706_s20 = sadd.s32 (!%p1560_p0), 32, %s3826_s6 }
 0x143   : > { %1563 = sbr.rel (%p1560_p0) target bundleno = 627 (0x273), region = 48  ;;  %v1570_v10 = vld [vmem:[%s3812_s23 + $0x18] sm:$0xff] (!%p1560_p0)  ;;  %v1571_v11 = vld [vmem:[%s3812_s23 + $0x20] sm:$0xff] (!%p1560_p0)  ;;  %v1572_v12 = vld [vmem:[%s3812_s23 + $0x28] sm:$0xff] (!%p1560_p0)  ;;  %v1653_v13 = vstv (!%p1560_p0), %s1652_s12  ;;  %s1760_s22 = sadd.s32 (!%p1560_p0), 48, %s3826_s6 }
 0x144   : > { %v4356_v14 = vshrl.u32 (!%p1560_p0), %v1564_v5, 7  ;;  %v1573_v15 = vld [vmem:[%s3812_s23 + $0x30] sm:$0xff] (!%p1560_p0)  ;;  %v1574_v16 = vld [vmem:[%s3812_s23 + $0x38] sm:$0xff] (!%p1560_p0)  ;;  %v1575_v17 = vld [vmem:[%s3818_s19] sm:$0xff] (!%p1560_p0)  ;;  %v4361_v18 = vstv (!%p1560_p0), %s1706_s20  ;;  %s1814_s24 = sadd.s32 (!%p1560_p0), 64, %s3826_s6  ;;  %s1868_s25 = sadd.s32 (!%p1560_p0), 80, %s3826_s6 }
 0x145   : > { %v1576_v19 = vld [vmem:[%s3818_s19 + $0x8] sm:$0xff] (!%p1560_p0)  ;;  %v1577_v20 = vld [vmem:[%s3818_s19 + $0x10] sm:$0xff] (!%p1560_p0)  ;;  %v1578_v21 = vld [vmem:[%s3818_s19 + $0x18] sm:$0xff] (!%p1560_p0)  ;;  %v1583_v22 = vsub.f32 (!%p1560_p0), %v1567_v6, %v1575_v17  ;;  %v4366_v23 = vstv (!%p1560_p0), %s1760_s22  ;;  %s1922_s27 = sadd.s32 (!%p1560_p0), 96, %s3826_s6  ;;  %s1976_s29 = sadd.s32 (!%p1560_p0), 112, %s3826_s6 }
 0x146   : > { %v4369_v24 = vadd.s32 (!%p1560_p0), 8, %v4356_v14  ;;  %v1579_v25 = vld [vmem:[%s3818_s19 + $0x20] sm:$0xff] (!%p1560_p0)  ;;  %v1580_v26 = vld [vmem:[%s3818_s19 + $0x28] sm:$0xff] (!%p1560_p0)  ;;  %v1581_v27 = vld [vmem:[%s3818_s19 + $0x30] sm:$0xff] (!%p1560_p0)  ;;  %v1584_v28 = vsub.f32 (!%p1560_p0), %v1568_v7, %v1576_v19  ;;  %v1585_v29 = vsub.f32 (!%p1560_p0), %v1569_v8, %v1577_v20  ;;  %v1586_v30 = vsub.f32 (!%p1560_p0), %v1570_v10, %v1578_v21  ;;  %s2030_s30 = sadd.s32 (!%p1560_p0), 128, %s3826_s6  ;;  %s2084_s3 = sadd.s32 (!%p1560_p0), 144, %s3826_s6 }
 0x147   : > { %v1582_v31 = vld [vmem:[%s3818_s19 + $0x38] sm:$0xff] (!%p1560_p0)  ;;  %v1587_v32 = vsub.f32 (!%p1560_p0), %v1571_v11, %v1579_v25  ;;  %v1588_v33 = vsub.f32 (!%p1560_p0), %v1572_v12, %v1580_v26  ;;  %v1589_v34 = vsub.f32 (!%p1560_p0), %v1573_v15, %v1581_v27  ;;  %v1591_v35 = vmul.f32 (!%p1560_p0), %v1583_v22, %v1583_v22  ;;  %v1620_v40 = vld [vmem:[%s3812_s23 + $0x40] sm:$0xff] (!%p1560_p0)  ;;  %v1621_v41 = vld [vmem:[%s3812_s23 + $0x48] sm:$0xff] (!%p1560_p0)  ;;  %s2138_s4 = sadd.s32 (!%p1560_p0), 160, %s3826_s6  ;;  %s2192_s7 = sadd.s32 (!%p1560_p0), 176, %s3826_s6 }
 0x148   : > { %v1590_v36 = vsub.f32 (!%p1560_p0), %v1574_v16, %v1582_v31  ;;  %v1592_v37 = vmul.f32 (!%p1560_p0), %v1584_v28, %v1584_v28  ;;  %v1593_v38 = vmul.f32 (!%p1560_p0), %v1585_v29, %v1585_v29  ;;  %v1594_v39 = vmul.f32 (!%p1560_p0), %v1586_v30, %v1586_v30  ;;  %v1622_v42 = vld [vmem:[%s3812_s23 + $0x50] sm:$0xff] (!%p1560_p0)  ;;  %v1623_v49 = vld [vmem:[%s3812_s23 + $0x58] sm:$0xff] (!%p1560_p0)  ;;  %v1624_v50 = vld [vmem:[%s3812_s23 + $0x60] sm:$0xff] (!%p1560_p0)  ;;  %s2246_s8 = sadd.s32 (!%p1560_p0), 192, %s3826_s6  ;;  %s2300_s17 = sadd.s32 (!%p1560_p0), 208, %s3826_s6 }
 0x149   : > { %v1595_v43 = vmul.f32 (!%p1560_p0), %v1587_v32, %v1587_v32  ;;  %v1596_v44 = vmul.f32 (!%p1560_p0), %v1588_v33, %v1588_v33  ;;  %v1597_v45 = vmul.f32 (!%p1560_p0), %v1589_v34, %v1589_v34  ;;  %v1600_v46 = vadd.s32 (!%p1560_p0), %v1599_v9, %v4356_v14  ;;  %v1625_v51 = vld [vmem:[%s3812_s23 + $0x68] sm:$0xff] (!%p1560_p0)  ;;  %v1628_v52 = vld [vmem:[%s3818_s19 + $0x40] sm:$0xff] (!%p1560_p0)  ;;  %v1630_v54 = vld [vmem:[%s3818_s19 + $0x50] sm:$0xff] (!%p1560_p0)  ;;  %s2354_s26 = sadd.s32 (!%p1560_p0), 224, %s3826_s6  ;;  %s2408_s18 = sadd.s32 (!%p1560_p0), 240, %s3826_s6 }
 0x14a   : > { %v1598_v47 = vmul.f32 %v1590_v36, %v1590_v36  ;;  %v1601_v48 = vadd.s32 %v1599_v9, %v4369_v24  ;;  %v1629_v53 = vld [vmem:[%s3818_s19 + $0x48] sm:$0xff]  ;;  %v1654_v55 = vadd.s32 %v1653_v13, %v4356_v14  ;;  %v1655_v56 = vadd.s32 %v1653_v13, %v4369_v24  ;;  %v1626_v57 = vld [vmem:[%s3812_s23 + $0x70] sm:$0xff]  ;;  %v1627_v58 = vld [vmem:[%s3812_s23 + $0x78] sm:$0xff]  ;;  %s2462_s28 = sadd.s32 256, %s3826_s6  ;;  %s2516_s5 = sadd.s32 272, %s3826_s6 }
 0x14b   : > { %vm1602_vm0 = vcmp.lt.s32.totalorder %v1600_v46, 768  ;;  %v1631_v59 = vld [vmem:[%s3818_s19 + $0x58] sm:$0xff]  ;;  %v1636_v60 = vsub.f32 %v1620_v40, %v1628_v52  ;;  %v1637_v61 = vsub.f32 %v1621_v41, %v1629_v53  ;;  %v1638_v62 = vsub.f32 %v1622_v42, %v1630_v54  ;;  %v1632_v2 = vld [vmem:[%s3818_s19 + $0x60] sm:$0xff]  ;;  %v1633_v3 = vld [vmem:[%s3818_s19 + $0x68] sm:$0xff]  ;;  %s2570_s9 = sadd.s32 288, %s3826_s6  ;;  %s2624_s12 = sadd.s32 304, %s3826_s6 }
 0x14c   : > { %vm1603_vm1 = vcmp.lt.s32.totalorder %v1601_v48, 768  ;;  %v1604_v63 = vsel %vm1602_vm0, %v1591_v35, 0.0  ;;  %v1605_v0 = vsel %vm1602_vm0, %v1592_v37, 0.0  ;;  %v1606_v1 = vsel %vm1602_vm0, %v1593_v38, 0.0  ;;  %v1634_v8 = vld [vmem:[%s3818_s19 + $0x70] sm:$0xff]  ;;  %v1635_v9 = vld [vmem:[%s3818_s19 + $0x78] sm:$0xff] }
 0x14d   : > { %v1607_v4 = vsel %vm1602_vm0, %v1594_v39, 0.0  ;;  %v1608_v5 = vsel %vm1603_vm1, %v1595_v43, 0.0  ;;  %v1609_v6 = vsel %vm1603_vm1, %v1596_v44, 0.0  ;;  %v1610_v7 = vsel %vm1603_vm1, %v1597_v45, 0.0  ;;  %v1674_v30 = vld [vmem:[%s3812_s23 + $0x80] sm:$0xff]  ;;  %v1675_v31 = vld [vmem:[%s3812_s23 + $0x88] sm:$0xff] }
 0x14e   : > { %v1611_v10 = vsel %vm1603_vm1, %v1598_v47, 0.0  ;;  %v1616_v11 = vadd.f32 %v1608_v5, %v1604_v63  ;;  %v1617_v12 = vadd.f32 %v1609_v6, %v1605_v0  ;;  %v1618_v13 = vadd.f32 %v1610_v7, %v1606_v1  ;;  %v1676_v32 = vld [vmem:[%s3812_s23 + $0x90] sm:$0xff]  ;;  %v1677_v35 = vld [vmem:[%s3812_s23 + $0x98] sm:$0xff]  ;;  %v1682_v36 = vld [vmem:[%s3818_s19 + $0x80] sm:$0xff]  ;;  %s2678_s20 = sadd.s32 320, %s3826_s6  ;;  %s2732_s22 = sadd.s32 336, %s3826_s6 }
 0x14f   : > { %v1619_v15 = vadd.f32 %v1611_v10, %v1607_v4  ;;  %v1639_v16 = vsub.f32 %v1623_v49, %v1631_v59  ;;  %v1640_v17 = vsub.f32 %v1624_v50, %v1632_v2  ;;  %v1641_v19 = vsub.f32 %v1625_v51, %v1633_v3  ;;  %v1683_v37 = vld [vmem:[%s3818_s19 + $0x88] sm:$0xff]  ;;  %v1678_v42 = vld [vmem:[%s3812_s23 + $0xa0] sm:$0xff]  ;;  %v1680_v44 = vld [vmem:[%s3812_s23 + $0xb0] sm:$0xff] }
 0x150   : > { %v1642_v20 = vsub.f32 %v1626_v57, %v1634_v8  ;;  %v1643_v21 = vsub.f32 %v1627_v58, %v1635_v9  ;;  %v1644_v22 = vmul.f32 %v1636_v60, %v1636_v60  ;;  %v1645_v25 = vmul.f32 %v1637_v61, %v1637_v61  ;;  %v1679_v43 = vld [vmem:[%s3812_s23 + $0xa8] sm:$0xff]  ;;  %v1684_v45 = vld [vmem:[%s3818_s19 + $0x90] sm:$0xff]  ;;  %v1685_v46 = vld [vmem:[%s3818_s19 + $0x98] sm:$0xff] }
 0x151   : > { %v1646_v26 = vmul.f32 %v1638_v62, %v1638_v62  ;;  %v1647_v27 = vmul.f32 %v1639_v16, %v1639_v16  ;;  %v1648_v28 = vmul.f32 %v1640_v17, %v1640_v17  ;;  %v1649_v29 = vmul.f32 %v1641_v19, %v1641_v19  ;;  %v1681_v51 = vld [vmem:[%s3812_s23 + $0xb8] sm:$0xff]  ;;  %v1686_v52 = vld [vmem:[%s3818_s19 + $0xa0] sm:$0xff]  ;;  %v1687_v58 = vld [vmem:[%s3818_s19 + $0xa8] sm:$0xff] }
 0x152   : > { %v1650_v33 = vmul.f32 %v1642_v20, %v1642_v20  ;;  %v1651_v34 = vmul.f32 %v1643_v21, %v1643_v21  ;;  %vm1656_vm2 = vcmp.lt.s32.totalorder %v1654_v55, 768  ;;  %vm1657_vm3 = vcmp.lt.s32.totalorder %v1655_v56, 768  ;;  %v1688_v59 = vld [vmem:[%s3818_s19 + $0xb0] sm:$0xff]  ;;  %v1689_v60 = vld [vmem:[%s3818_s19 + $0xb8] sm:$0xff]  ;;  %v1728_v0 = vld [vmem:[%s3812_s23 + $0xc0] sm:$0xff] }
 0x153   : > { %v1658_v38 = vsel %vm1656_vm2, %v1644_v22, 0.0  ;;  %v1659_v39 = vsel %vm1656_vm2, %v1645_v25, 0.0  ;;  %v1660_v40 = vsel %vm1656_vm2, %v1646_v26, 0.0  ;;  %v1661_v41 = vsel %vm1656_vm2, %v1647_v27, 0.0  ;;  %v1729_v1 = vld [vmem:[%s3812_s23 + $0xc8] sm:$0xff]  ;;  %v1730_v6 = vld [vmem:[%s3812_s23 + $0xd0] sm:$0xff] }
 0x154   : > { %v1662_v47 = vsel %vm1657_vm3, %v1648_v28, 0.0  ;;  %v1663_v48 = vsel %vm1657_vm3, %v1649_v29, 0.0  ;;  %v1664_v49 = vsel %vm1657_vm3, %v1650_v33, 0.0  ;;  %v1665_v50 = vsel %vm1657_vm3, %v1651_v34, 0.0  ;;  %v1731_v7 = vld [vmem:[%s3812_s23 + $0xd8] sm:$0xff]  ;;  %v1732_v8 = vld [vmem:[%s3812_s23 + $0xe0] sm:$0xff] }
 0x155   : > { %v1666_v53 = vadd.f32 %v1658_v38, %v1616_v11  ;;  %v1667_v54 = vadd.f32 %v1659_v39, %v1617_v12  ;;  %v1668_v55 = vadd.f32 %v1660_v40, %v1618_v13  ;;  %v1669_v57 = vadd.f32 %v1661_v41, %v1619_v15  ;;  %v1733_v9 = vld [vmem:[%s3812_s23 + $0xe8] sm:$0xff]  ;;  %v1734_v15 = vld [vmem:[%s3812_s23 + $0xf0] sm:$0xff]  ;;  %v1736_v16 = vld [vmem:[%s3818_s19 + $0xc0] sm:$0xff] }
 0x156   : > { %v1690_v61 = vsub.f32 %v1674_v30, %v1682_v36  ;;  %v1691_v62 = vsub.f32 %v1675_v31, %v1683_v37  ;;  %v1692_v63 = vsub.f32 %v1676_v32, %v1684_v45  ;;  %v1693_v56 = vsub.f32 %v1677_v35, %v1685_v46  ;;  %v1737_v17 = vld [vmem:[%s3818_s19 + $0xc8] sm:$0xff]  ;;  %v1738_v19 = vld [vmem:[%s3818_s19 + $0xd0] sm:$0xff]  ;;  %v1739_v26 = vld [vmem:[%s3818_s19 + $0xd8] sm:$0xff] }
 0x157   : > { %v1670_v2 = vadd.f32 %v1666_v53, %v1662_v47  ;;  %v1671_v3 = vadd.f32 %v1667_v54, %v1663_v48  ;;  %v1672_v4 = vadd.f32 %v1668_v55, %v1664_v49  ;;  %v1673_v5 = vadd.f32 %v1669_v57, %v1665_v50  ;;  %v1740_v27 = vld [vmem:[%s3818_s19 + $0xe0] sm:$0xff]  ;;  %v1741_v28 = vld [vmem:[%s3818_s19 + $0xe8] sm:$0xff]  ;;  %v1735_v33 = vld [vmem:[%s3812_s23 + $0xf8] sm:$0xff] }
 0x158   : > { %v1694_v10 = vsub.f32 %v1678_v42, %v1686_v52  ;;  %v1695_v11 = vsub.f32 %v1679_v43, %v1687_v58  ;;  %v1696_v12 = vsub.f32 %v1680_v44, %v1688_v59  ;;  %v1697_v13 = vsub.f32 %v1681_v51, %v1689_v60  ;;  %v1742_v34 = vld [vmem:[%s3818_s19 + $0xf0] sm:$0xff]  ;;  %v1743_v35 = vld [vmem:[%s3818_s19 + $0xf8] sm:$0xff]  ;;  %v1782_v53 = vld [vmem:[%s3812_s23 + $0x100] sm:$0xff] }
 0x159   : > { %v1698_v20 = vmul.f32 %v1690_v61, %v1690_v61  ;;  %v1699_v21 = vmul.f32 %v1691_v62, %v1691_v62  ;;  %v1700_v22 = vmul.f32 %v1692_v63, %v1692_v63  ;;  %v1701_v25 = vmul.f32 %v1693_v56, %v1693_v56  ;;  %v1783_v54 = vld [vmem:[%s3812_s23 + $0x108] sm:$0xff]  ;;  %v1784_v60 = vld [vmem:[%s3812_s23 + $0x110] sm:$0xff]  ;;  %v1785_v61 = vld [vmem:[%s3812_s23 + $0x118] sm:$0xff] }
 0x15a   : > { %v1702_v29 = vmul.f32 %v1694_v10, %v1694_v10  ;;  %v1703_v30 = vmul.f32 %v1695_v11, %v1695_v11  ;;  %v1704_v31 = vmul.f32 %v1696_v12, %v1696_v12  ;;  %v1705_v32 = vmul.f32 %v1697_v13, %v1697_v13  ;;  %v1786_v62 = vld [vmem:[%s3812_s23 + $0x120] sm:$0xff]  ;;  %v1787_v63 = vld [vmem:[%s3812_s23 + $0x128] sm:$0xff]  ;;  %v1793_v11 = vld [vmem:[%s3818_s19 + $0x118] sm:$0xff] }
 0x15b   : > { %v1708_v36 = vadd.s32 %v4361_v18, %v4356_v14  ;;  %v1709_v37 = vadd.s32 %v4361_v18, %v4369_v24  ;;  %v1744_v38 = vsub.f32 %v1728_v0, %v1736_v16  ;;  %v1745_v39 = vsub.f32 %v1729_v1, %v1737_v17  ;;  %v1794_v12 = vld [vmem:[%s3818_s19 + $0x120] sm:$0xff]  ;;  %v1795_v13 = vld [vmem:[%s3818_s19 + $0x128] sm:$0xff] }
 0x15c   : > { %v1746_v40 = vsub.f32 %v1730_v6, %v1738_v19  ;;  %v1747_v41 = vsub.f32 %v1731_v7, %v1739_v26  ;;  %v1748_v42 = vsub.f32 %v1732_v8, %v1740_v27  ;;  %v1749_v43 = vsub.f32 %v1733_v9, %v1741_v28  ;;  %v1788_v7 = vld [vmem:[%s3812_s23 + $0x130] sm:$0xff]  ;;  %v1790_v8 = vld [vmem:[%s3818_s19 + $0x100] sm:$0xff] }
 0x15d   : > { %vm1710_vm4 = vcmp.lt.s32.totalorder %v1708_v36, 768  ;;  %vm1711_vm5 = vcmp.lt.s32.totalorder %v1709_v37, 768  ;;  %v1750_v44 = vsub.f32 %v1734_v15, %v1742_v34  ;;  %v1751_v45 = vsub.f32 %v1735_v33, %v1743_v35 }
 0x15e   : > { %v1712_v46 = vsel %vm1710_vm4, %v1698_v20, 0.0  ;;  %v1713_v47 = vsel %vm1710_vm4, %v1699_v21, 0.0  ;;  %v1714_v48 = vsel %vm1710_vm4, %v1700_v22, 0.0  ;;  %v1715_v18 = vsel %vm1710_vm4, %v1701_v25, 0.0  ;;  %v1789_v20 = vld [vmem:[%s3812_s23 + $0x138] sm:$0xff]  ;;  %v1796_v21 = vld [vmem:[%s3818_s19 + $0x130] sm:$0xff] }
 0x15f   : > { %v1716_v49 = vsel %vm1711_vm5, %v1702_v29, 0.0  ;;  %v1717_v50 = vsel %vm1711_vm5, %v1703_v30, 0.0  ;;  %v1718_v51 = vsel %vm1711_vm5, %v1704_v31, 0.0  ;;  %v1719_v52 = vsel %vm1711_vm5, %v1705_v32, 0.0  ;;  %v1797_v22 = vld [vmem:[%s3818_s19 + $0x138] sm:$0xff] }
 0x160   : > { %v1720_v55 = vadd.f32 %v1712_v46, %v1670_v2  ;;  %v1721_v57 = vadd.f32 %v1713_v47, %v1671_v3  ;;  %v1722_v58 = vadd.f32 %v1714_v48, %v1672_v4  ;;  %v1723_v59 = vadd.f32 %v1715_v18, %v1673_v5  ;;  %v1791_v2 = vld [vmem:[%s3818_s19 + $0x108] sm:$0xff]  ;;  %v1792_v3 = vld [vmem:[%s3818_s19 + $0x110] sm:$0xff]  ;;  %v1839_v18 = vld [vmem:[%s3812_s23 + $0x158] sm:$0xff] }
 0x161   : > { %v1752_v56 = vmul.f32 %v1744_v38, %v1744_v38  ;;  %v1753_v0 = vmul.f32 %v1745_v39, %v1745_v39  ;;  %v1754_v1 = vmul.f32 %v1746_v40, %v1746_v40  ;;  %v1755_v6 = vmul.f32 %v1747_v41, %v1747_v41  ;;  %v1838_v48 = vld [vmem:[%s3812_s23 + $0x150] sm:$0xff] }
 0x162   : > { %v1724_v4 = vadd.f32 %v1720_v55, %v1716_v49  ;;  %v1725_v5 = vadd.f32 %v1721_v57, %v1717_v50  ;;  %v1726_v9 = vadd.f32 %v1722_v58, %v1718_v51  ;;  %v1727_v10 = vadd.f32 %v1723_v59, %v1719_v52  ;;  %v1840_v49 = vld [vmem:[%s3812_s23 + $0x160] sm:$0xff]  ;;  %v1842_v55 = vld [vmem:[%s3812_s23 + $0x170] sm:$0xff]  ;;  %v1845_v58 = vld [vmem:[%s3818_s19 + $0x148] sm:$0xff] }
 0x163   : > { %v1756_v15 = vmul.f32 %v1748_v42, %v1748_v42  ;;  %v1757_v16 = vmul.f32 %v1749_v43, %v1749_v43  ;;  %v1758_v17 = vmul.f32 %v1750_v44, %v1750_v44  ;;  %v1759_v19 = vmul.f32 %v1751_v45, %v1751_v45  ;;  %v1836_v42 = vld [vmem:[%s3812_s23 + $0x140] sm:$0xff]  ;;  %v1837_v43 = vld [vmem:[%s3812_s23 + $0x148] sm:$0xff]  ;;  %v1846_v59 = vld [vmem:[%s3818_s19 + $0x150] sm:$0xff] }
 0x164   : > { %v1762_v25 = vadd.s32 %v4366_v23, %v4356_v14  ;;  %v1763_v26 = vadd.s32 %v4366_v23, %v4369_v24  ;;  %v1798_v27 = vsub.f32 %v1782_v53, %v1790_v8  ;;  %v1799_v28 = vsub.f32 %v1783_v54, %v1791_v2  ;;  %v1841_v54 = vld [vmem:[%s3812_s23 + $0x168] sm:$0xff]  ;;  %v1844_v57 = vld [vmem:[%s3818_s19 + $0x140] sm:$0xff] }
 0x165   : > { %v1800_v29 = vsub.f32 %v1784_v60, %v1792_v3  ;;  %v1801_v30 = vsub.f32 %v1785_v61, %v1793_v11  ;;  %v1802_v31 = vsub.f32 %v1786_v62, %v1794_v12  ;;  %v1803_v32 = vsub.f32 %v1787_v63, %v1795_v13  ;;  %v1849_v3 = vld [vmem:[%s3818_s19 + $0x168] sm:$0xff] }
 0x166   : > { %vm1764_vm6 = vcmp.lt.s32.totalorder %v1762_v25, 768  ;;  %vm1765_vm7 = vcmp.lt.s32.totalorder %v1763_v26, 768  ;;  %v1804_v33 = vsub.f32 %v1788_v7, %v1796_v21  ;;  %v1805_v34 = vsub.f32 %v1789_v20, %v1797_v22 }
 0x167   : > { %v1766_v35 = vsel %vm1764_vm6, %v1752_v56, 0.0  ;;  %v1767_v36 = vsel %vm1764_vm6, %v1753_v0, 0.0  ;;  %v1768_v37 = vsel %vm1764_vm6, %v1754_v1, 0.0  ;;  %v1769_v38 = vsel %vm1764_vm6, %v1755_v6, 0.0  ;;  %v1843_v56 = vld [vmem:[%s3812_s23 + $0x178] sm:$0xff]  ;;  %v1848_v1 = vld [vmem:[%s3818_s19 + $0x160] sm:$0xff] }
 0x168   : > { %v1770_v23 = vsel %vm1765_vm7, %v1756_v15, 0.0  ;;  %v1771_v39 = vsel %vm1765_vm7, %v1757_v16, 0.0  ;;  %v1772_v40 = vsel %vm1765_vm7, %v1758_v17, 0.0  ;;  %v1773_v41 = vsel %vm1765_vm7, %v1759_v19, 0.0  ;;  %v1847_v0 = vld [vmem:[%s3818_s19 + $0x158] sm:$0xff] }
 0x169   : > { %v1774_v44 = vadd.f32 %v1766_v35, %v1724_v4  ;;  %v1775_v45 = vadd.f32 %v1767_v36, %v1725_v5  ;;  %v1776_v46 = vadd.f32 %v1768_v37, %v1726_v9  ;;  %v1777_v47 = vadd.f32 %v1769_v38, %v1727_v10  ;;  %v1850_v4 = vld [vmem:[%s3818_s19 + $0x170] sm:$0xff]  ;;  %v1851_v5 = vld [vmem:[%s3818_s19 + $0x178] sm:$0xff] }
 0x16a   : > { %v1806_v50 = vmul.f32 %v1798_v27, %v1798_v27  ;;  %v1807_v51 = vmul.f32 %v1799_v28, %v1799_v28  ;;  %v1808_v52 = vmul.f32 %v1800_v29, %v1800_v29  ;;  %v1809_v53 = vmul.f32 %v1801_v30, %v1801_v30  ;;  %v1892_v37 = vld [vmem:[%s3812_s23 + $0x190] sm:$0xff]  ;;  %v1893_v38 = vld [vmem:[%s3812_s23 + $0x198] sm:$0xff] }
 0x16b   : > { %v1778_v60 = vadd.f32 %v1774_v44, %v1770_v23  ;;  %v1779_v61 = vadd.f32 %v1775_v45, %v1771_v39  ;;  %v1780_v62 = vadd.f32 %v1776_v46, %v1772_v40  ;;  %v1781_v63 = vadd.f32 %v1777_v47, %v1773_v41  ;;  %v1896_v44 = vld [vmem:[%s3812_s23 + $0x1b0] sm:$0xff]  ;;  %v1897_v45 = vld [vmem:[%s3812_s23 + $0x1b8] sm:$0xff]  ;;  %v1898_v46 = vld [vmem:[%s3818_s19 + $0x180] sm:$0xff] }
 0x16c   : > { %v1810_v6 = vmul.f32 %v1802_v31, %v1802_v31  ;;  %v1811_v7 = vmul.f32 %v1803_v32, %v1803_v32  ;;  %v1812_v8 = vmul.f32 %v1804_v33, %v1804_v33  ;;  %v1813_v2 = vmul.f32 %v1805_v34, %v1805_v34  ;;  %v1890_v31 = vld [vmem:[%s3812_s23 + $0x180] sm:$0xff]  ;;  %v1891_v32 = vld [vmem:[%s3812_s23 + $0x188] sm:$0xff] }
 0x16d   : > { %v1815_v9 = vstv %s1814_s24  ;;  %v1852_v10 = vsub.f32 %v1836_v42, %v1844_v57  ;;  %v1853_v11 = vsub.f32 %v1837_v43, %v1845_v58  ;;  %v1854_v12 = vsub.f32 %v1838_v48, %v1846_v59  ;;  %v1894_v42 = vld [vmem:[%s3812_s23 + $0x1a0] sm:$0xff]  ;;  %v1895_v43 = vld [vmem:[%s3812_s23 + $0x1a8] sm:$0xff]  ;;  %s2786_s24 = sadd.s32 352, %s3826_s6 }
 0x16e   : > { %v1816_v13 = vadd.s32 %v1815_v9, %v4356_v14  ;;  %v1817_v15 = vadd.s32 %v1815_v9, %v4369_v24  ;;  %v1855_v16 = vsub.f32 %v1839_v18, %v1847_v0  ;;  %v1856_v17 = vsub.f32 %v1840_v49, %v1848_v1  ;;  %v1899_v47 = vld [vmem:[%s3818_s19 + $0x188] sm:$0xff] }
 0x16f   : > { %v1857_v19 = vsub.f32 %v1841_v54, %v1849_v3  ;;  %v1858_v20 = vsub.f32 %v1842_v55, %v1850_v4  ;;  %v1859_v21 = vsub.f32 %v1843_v56, %v1851_v5  ;;  %v1860_v22 = vmul.f32 %v1852_v10, %v1852_v10  ;;  %v1903_v59 = vld [vmem:[%s3818_s19 + $0x1a8] sm:$0xff] }
 0x170   : > { %vm1818_vm8 = vcmp.lt.s32.totalorder %v1816_v13, 768  ;;  %vm1819_vm9 = vcmp.lt.s32.totalorder %v1817_v15, 768  ;;  %v1861_v25 = vmul.f32 %v1853_v11, %v1853_v11  ;;  %v1862_v26 = vmul.f32 %v1854_v12, %v1854_v12 }
 0x171   : > { %v1820_v27 = vsel %vm1818_vm8, %v1806_v50, 0.0  ;;  %v1821_v28 = vsel %vm1818_vm8, %v1807_v51, 0.0  ;;  %v1822_v29 = vsel %vm1818_vm8, %v1808_v52, 0.0  ;;  %v1823_v30 = vsel %vm1818_vm8, %v1809_v53, 0.0  ;;  %v1900_v51 = vld [vmem:[%s3818_s19 + $0x190] sm:$0xff]  ;;  %v1901_v52 = vld [vmem:[%s3818_s19 + $0x198] sm:$0xff] }
 0x172   : > { %v1824_v33 = vsel %vm1819_vm9, %v1810_v6, 0.0  ;;  %v1825_v34 = vsel %vm1819_vm9, %v1811_v7, 0.0  ;;  %v1826_v35 = vsel %vm1819_vm9, %v1812_v8, 0.0  ;;  %v1827_v36 = vsel %vm1819_vm9, %v1813_v2, 0.0  ;;  %v1902_v53 = vld [vmem:[%s3818_s19 + $0x1a0] sm:$0xff] }
 0x173   : > { %v1828_v23 = vadd.f32 %v1820_v27, %v1778_v60  ;;  %v1829_v39 = vadd.f32 %v1821_v28, %v1779_v61  ;;  %v1830_v40 = vadd.f32 %v1822_v29, %v1780_v62  ;;  %v1831_v41 = vadd.f32 %v1823_v30, %v1781_v63  ;;  %v1904_v60 = vld [vmem:[%s3818_s19 + $0x1b0] sm:$0xff]  ;;  %v1905_v61 = vld [vmem:[%s3818_s19 + $0x1b8] sm:$0xff]  ;;  %v1945_v27 = vld [vmem:[%s3812_s23 + $0x1c8] sm:$0xff] }
 0x174   : > { %v1863_v48 = vmul.f32 %v1855_v16, %v1855_v16  ;;  %v1864_v18 = vmul.f32 %v1856_v17, %v1856_v17  ;;  %v1865_v49 = vmul.f32 %v1857_v19, %v1857_v19  ;;  %v1866_v50 = vmul.f32 %v1858_v20, %v1858_v20  ;;  %v1944_v16 = vld [vmem:[%s3812_s23 + $0x1c0] sm:$0xff]  ;;  %v1946_v28 = vld [vmem:[%s3812_s23 + $0x1d0] sm:$0xff] }
 0x175   : > { %v1832_v54 = vadd.f32 %v1828_v23, %v1824_v33  ;;  %v1833_v55 = vadd.f32 %v1829_v39, %v1825_v34  ;;  %v1834_v57 = vadd.f32 %v1830_v40, %v1826_v35  ;;  %v1835_v58 = vadd.f32 %v1831_v41, %v1827_v36  ;;  %v1950_v33 = vld [vmem:[%s3812_s23 + $0x1f0] sm:$0xff]  ;;  %v1952_v34 = vld [vmem:[%s3818_s19 + $0x1c0] sm:$0xff]  ;;  %v1953_v23 = vld [vmem:[%s3818_s19 + $0x1c8] sm:$0xff] }
 0x176   : > { %v1867_v62 = vmul.f32 %v1859_v21, %v1859_v21  ;;  %v1869_v63 = vstv %s1868_s25  ;;  %v1906_v56 = vsub.f32 %v1890_v31, %v1898_v46  ;;  %v1907_v0 = vsub.f32 %v1891_v32, %v1899_v47  ;;  %v1948_v31 = vld [vmem:[%s3812_s23 + $0x1e0] sm:$0xff]  ;;  %v1949_v32 = vld [vmem:[%s3812_s23 + $0x1e8] sm:$0xff]  ;;  %v1954_v39 = vld [vmem:[%s3818_s19 + $0x1d0] sm:$0xff]  ;;  %s2840_s25 = sadd.s32 368, %s3826_s6 }
 0x177   : > { %v1870_v1 = vadd.s32 %v1869_v63, %v4356_v14  ;;  %v1871_v6 = vadd.s32 %v1869_v63, %v4369_v24  ;;  %v1908_v7 = vsub.f32 %v1892_v37, %v1900_v51  ;;  %v1909_v8 = vsub.f32 %v1893_v38, %v1901_v52  ;;  %v1955_v40 = vld [vmem:[%s3818_s19 + $0x1d8] sm:$0xff]  ;;  %v1957_v46 = vld [vmem:[%s3818_s19 + $0x1e8] sm:$0xff]  ;;  %v1958_v47 = vld [vmem:[%s3818_s19 + $0x1f0] sm:$0xff] }
 0x178   : > { %v1910_v2 = vsub.f32 %v1894_v42, %v1902_v53  ;;  %v1911_v3 = vsub.f32 %v1895_v43, %v1903_v59  ;;  %v1912_v4 = vsub.f32 %v1896_v44, %v1904_v60  ;;  %v1913_v5 = vsub.f32 %v1897_v45, %v1905_v61  ;;  %v1956_v45 = vld [vmem:[%s3818_s19 + $0x1e0] sm:$0xff]  ;;  %v1959_v51 = vld [vmem:[%s3818_s19 + $0x1f8] sm:$0xff] }
 0x179   : > { %vm1872_vm10 = vcmp.lt.s32.totalorder %v1870_v1, 768  ;;  %vm1873_vm11 = vcmp.lt.s32.totalorder %v1871_v6, 768  ;;  %v1914_v9 = vmul.f32 %v1906_v56, %v1906_v56  ;;  %v1915_v10 = vmul.f32 %v1907_v0, %v1907_v0 }
 0x17a   : > { %v1874_v11 = vsel %vm1872_vm10, %v1860_v22, 0.0  ;;  %v1875_v12 = vsel %vm1872_vm10, %v1861_v25, 0.0  ;;  %v1876_v13 = vsel %vm1872_vm10, %v1862_v26, 0.0  ;;  %v1877_v15 = vsel %vm1872_vm10, %v1863_v48, 0.0  ;;  %v1947_v26 = vld [vmem:[%s3812_s23 + $0x1d8] sm:$0xff] }
 0x17b   : > { %v1878_v17 = vsel %vm1873_vm11, %v1864_v18, 0.0  ;;  %v1879_v19 = vsel %vm1873_vm11, %v1865_v49, 0.0  ;;  %v1880_v20 = vsel %vm1873_vm11, %v1866_v50, 0.0  ;;  %v1881_v21 = vsel %vm1873_vm11, %v1867_v62, 0.0  ;;  %v1951_v50 = vld [vmem:[%s3812_s23 + $0x1f8] sm:$0xff] }
 0x17c   : > { %v1882_v29 = vadd.f32 %v1874_v11, %v1832_v54  ;;  %v1883_v22 = vadd.f32 %v1875_v12, %v1833_v55  ;;  %v1884_v30 = vadd.f32 %v1876_v13, %v1834_v57  ;;  %v1885_v25 = vadd.f32 %v1877_v15, %v1835_v58  ;;  %v2001_v15 = vld [vmem:[%s3812_s23 + $0x218] sm:$0xff] }
 0x17d   : > { %v1916_v35 = vmul.f32 %v1908_v7, %v1908_v7  ;;  %v1917_v36 = vmul.f32 %v1909_v8, %v1909_v8  ;;  %v1918_v37 = vmul.f32 %v1910_v2, %v1910_v2  ;;  %v1919_v38 = vmul.f32 %v1911_v3, %v1911_v3 }
 0x17e   : > { %v1886_v41 = vadd.f32 %v1882_v29, %v1878_v17  ;;  %v1887_v42 = vadd.f32 %v1883_v22, %v1879_v19  ;;  %v1888_v43 = vadd.f32 %v1884_v30, %v1880_v20  ;;  %v1889_v44 = vadd.f32 %v1885_v25, %v1881_v21  ;;  %v2003_v17 = vld [vmem:[%s3812_s23 + $0x228] sm:$0xff]  ;;  %v2006_v29 = vld [vmem:[%s3818_s19 + $0x200] sm:$0xff]  ;;  %v2008_v30 = vld [vmem:[%s3818_s19 + $0x210] sm:$0xff] }
 0x17f   : > { %v1920_v48 = vmul.f32 %v1912_v4, %v1912_v4  ;;  %v1921_v18 = vmul.f32 %v1913_v5, %v1913_v5  ;;  %v1923_v49 = vstv %s1922_s27  ;;  %v1960_v52 = vsub.f32 %v1944_v16, %v1952_v34  ;;  %v1998_v4 = vld [vmem:[%s3812_s23 + $0x200] sm:$0xff]  ;;  %v1999_v5 = vld [vmem:[%s3812_s23 + $0x208] sm:$0xff]  ;;  %s2894_s27 = sadd.s32 384, %s3826_s6 }
 0x180   : > { %v1924_v53 = vadd.s32 %v1923_v49, %v4356_v14  ;;  %v1925_v54 = vadd.s32 %v1923_v49, %v4369_v24  ;;  %v1961_v55 = vsub.f32 %v1945_v27, %v1953_v23  ;;  %v1962_v57 = vsub.f32 %v1946_v28, %v1954_v39  ;;  %v2002_v16 = vld [vmem:[%s3812_s23 + $0x220] sm:$0xff]  ;;  %v2004_v28 = vld [vmem:[%s3812_s23 + $0x230] sm:$0xff]  ;;  %v2007_v22 = vld [vmem:[%s3818_s19 + $0x208] sm:$0xff] }
 0x181   : > { %v1963_v58 = vsub.f32 %v1947_v26, %v1955_v40  ;;  %v1964_v59 = vsub.f32 %v1948_v31, %v1956_v45  ;;  %v1965_v60 = vsub.f32 %v1949_v32, %v1957_v46  ;;  %v1966_v61 = vsub.f32 %v1950_v33, %v1958_v47  ;;  %v2009_v33 = vld [vmem:[%s3818_s19 + $0x218] sm:$0xff]  ;;  %v2010_v34 = vld [vmem:[%s3818_s19 + $0x220] sm:$0xff]  ;;  %v2012_v40 = vld [vmem:[%s3818_s19 + $0x230] sm:$0xff] }
 0x182   : > { %vm1926_vm12 = vcmp.lt.s32.totalorder %v1924_v53, 768  ;;  %vm1927_vm13 = vcmp.lt.s32.totalorder %v1925_v54, 768  ;;  %v1967_v62 = vsub.f32 %v1951_v50, %v1959_v51  ;;  %v1968_v63 = vmul.f32 %v1960_v52, %v1960_v52  ;;  %v2005_v39 = vld [vmem:[%s3812_s23 + $0x238] sm:$0xff] }
 0x183   : > { %v1928_v56 = vsel %vm1926_vm12, %v1914_v9, 0.0  ;;  %v1929_v0 = vsel %vm1926_vm12, %v1915_v10, 0.0  ;;  %v1930_v1 = vsel %vm1926_vm12, %v1916_v35, 0.0  ;;  %v1931_v6 = vsel %vm1926_vm12, %v1917_v36, 0.0  ;;  %v2000_v10 = vld [vmem:[%s3812_s23 + $0x210] sm:$0xff]  ;;  %v2011_v35 = vld [vmem:[%s3818_s19 + $0x228] sm:$0xff] }
 0x184   : > { %v1932_v7 = vsel %vm1927_vm13, %v1918_v37, 0.0  ;;  %v1933_v8 = vsel %vm1927_vm13, %v1919_v38, 0.0  ;;  %v1934_v2 = vsel %vm1927_vm13, %v1920_v48, 0.0  ;;  %v1935_v3 = vsel %vm1927_vm13, %v1921_v18, 0.0 }
 0x185   : > { %v1936_v11 = vadd.f32 %v1928_v56, %v1886_v41  ;;  %v1937_v12 = vadd.f32 %v1929_v0, %v1887_v42  ;;  %v1938_v13 = vadd.f32 %v1930_v1, %v1888_v43  ;;  %v1939_v9 = vadd.f32 %v1931_v6, %v1889_v44  ;;  %v2013_v41 = vld [vmem:[%s3818_s19 + $0x238] sm:$0xff]  ;;  %v2054_v1 = vld [vmem:[%s3812_s23 + $0x250] sm:$0xff] }
 0x186   : > { %v1969_v19 = vmul.f32 %v1961_v55, %v1961_v55  ;;  %v1970_v20 = vmul.f32 %v1962_v57, %v1962_v57  ;;  %v1971_v21 = vmul.f32 %v1963_v58, %v1963_v58  ;;  %v1972_v27 = vmul.f32 %v1964_v59, %v1964_v59  ;;  %v2055_v6 = vld [vmem:[%s3812_s23 + $0x258] sm:$0xff] }
 0x187   : > { %v1940_v25 = vadd.f32 %v1936_v11, %v1932_v7  ;;  %v1941_v26 = vadd.f32 %v1937_v12, %v1933_v8  ;;  %v1942_v31 = vadd.f32 %v1938_v13, %v1934_v2  ;;  %v1943_v32 = vadd.f32 %v1939_v9, %v1935_v3  ;;  %v2056_v7 = vld [vmem:[%s3812_s23 + $0x260] sm:$0xff]  ;;  %v2058_v11 = vld [vmem:[%s3812_s23 + $0x270] sm:$0xff]  ;;  %v2061_v13 = vld [vmem:[%s3818_s19 + $0x248] sm:$0xff] }
 0x188   : > { %v1973_v36 = vmul.f32 %v1965_v60, %v1965_v60  ;;  %v1974_v37 = vmul.f32 %v1966_v61, %v1966_v61  ;;  %v1975_v38 = vmul.f32 %v1967_v62, %v1967_v62  ;;  %v1977_v23 = vstv %s1976_s29  ;;  %v2052_v60 = vld [vmem:[%s3812_s23 + $0x240] sm:$0xff]  ;;  %v2053_v61 = vld [vmem:[%s3812_s23 + $0x248] sm:$0xff]  ;;  %v2062_v9 = vld [vmem:[%s3818_s19 + $0x250] sm:$0xff]  ;;  %s2948_s29 = sadd.s32 400, %s3826_s6 }
 0x189   : > { %v1978_v42 = vadd.s32 %v1977_v23, %v4356_v14  ;;  %v1979_v43 = vadd.s32 %v1977_v23, %v4369_v24  ;;  %v2014_v44 = vsub.f32 %v1998_v4, %v2006_v29  ;;  %v2015_v45 = vsub.f32 %v1999_v5, %v2007_v22  ;;  %v2057_v5 = vld [vmem:[%s3812_s23 + $0x268] sm:$0xff]  ;;  %v2060_v12 = vld [vmem:[%s3818_s19 + $0x240] sm:$0xff] }
 0x18a   : > { %v2016_v46 = vsub.f32 %v2000_v10, %v2008_v30  ;;  %v2017_v47 = vsub.f32 %v2001_v15, %v2009_v33  ;;  %v2018_v48 = vsub.f32 %v2002_v16, %v2010_v34  ;;  %v2019_v18 = vsub.f32 %v2003_v17, %v2011_v35  ;;  %v2065_v30 = vld [vmem:[%s3818_s19 + $0x268] sm:$0xff] }
 0x18b   : > { %vm1980_vm14 = vcmp.lt.s32.totalorder %v1978_v42, 768  ;;  %vm1981_vm15 = vcmp.lt.s32.totalorder %v1979_v43, 768  ;;  %v2020_v49 = vsub.f32 %v2004_v28, %v2012_v40  ;;  %v2021_v50 = vsub.f32 %v2005_v39, %v2013_v41 }
 0x18c   : > { %v1982_v51 = vsel %vm1980_vm14, %v1968_v63, 0.0  ;;  %v1983_v52 = vsel %vm1980_vm14, %v1969_v19, 0.0  ;;  %v1984_v53 = vsel %vm1980_vm14, %v1970_v20, 0.0  ;;  %v1985_v54 = vsel %vm1980_vm14, %v1971_v21, 0.0  ;;  %v2059_v19 = vld [vmem:[%s3812_s23 + $0x278] sm:$0xff]  ;;  %v2064_v21 = vld [vmem:[%s3818_s19 + $0x260] sm:$0xff] }
 0x18d   : > { %v1986_v55 = vsel %vm1981_vm15, %v1972_v27, 0.0  ;;  %v1987_v57 = vsel %vm1981_vm15, %v1973_v36, 0.0  ;;  %v1988_v58 = vsel %vm1981_vm15, %v1974_v37, 0.0  ;;  %v1989_v59 = vsel %vm1981_vm15, %v1975_v38, 0.0  ;;  %v2063_v20 = vld [vmem:[%s3818_s19 + $0x258] sm:$0xff] }
 0x18e   : > { %v1990_v62 = vadd.f32 %v1982_v51, %v1940_v25  ;;  %v1991_v56 = vadd.f32 %v1983_v52, %v1941_v26  ;;  %v1992_v0 = vadd.f32 %v1984_v53, %v1942_v31  ;;  %v1993_v63 = vadd.f32 %v1985_v54, %v1943_v32  ;;  %v2066_v25 = vld [vmem:[%s3818_s19 + $0x270] sm:$0xff]  ;;  %v2067_v26 = vld [vmem:[%s3818_s19 + $0x278] sm:$0xff] }
 0x18f   : > { %v2022_v8 = vmul.f32 %v2014_v44, %v2014_v44  ;;  %v2023_v2 = vmul.f32 %v2015_v45, %v2015_v45  ;;  %v2024_v3 = vmul.f32 %v2016_v46, %v2016_v46  ;;  %v2025_v4 = vmul.f32 %v2017_v47, %v2017_v47  ;;  %v2108_v53 = vld [vmem:[%s3812_s23 + $0x290] sm:$0xff]  ;;  %v2109_v54 = vld [vmem:[%s3812_s23 + $0x298] sm:$0xff] }
 0x190   : > { %v1994_v10 = vadd.f32 %v1990_v62, %v1986_v55  ;;  %v1995_v15 = vadd.f32 %v1991_v56, %v1987_v57  ;;  %v1996_v16 = vadd.f32 %v1992_v0, %v1988_v58  ;;  %v1997_v17 = vadd.f32 %v1993_v63, %v1989_v59  ;;  %v2112_v62 = vld [vmem:[%s3812_s23 + $0x2b0] sm:$0xff]  ;;  %v2113_v56 = vld [vmem:[%s3812_s23 + $0x2b8] sm:$0xff]  ;;  %v2114_v0 = vld [vmem:[%s3818_s19 + $0x280] sm:$0xff] }
 0x191   : > { %v2026_v27 = vmul.f32 %v2018_v48, %v2018_v48  ;;  %v2027_v28 = vmul.f32 %v2019_v18, %v2019_v18  ;;  %v2028_v29 = vmul.f32 %v2020_v49, %v2020_v49  ;;  %v2029_v22 = vmul.f32 %v2021_v50, %v2021_v50  ;;  %v2106_v48 = vld [vmem:[%s3812_s23 + $0x280] sm:$0xff]  ;;  %v2107_v18 = vld [vmem:[%s3812_s23 + $0x288] sm:$0xff] }
 0x192   : > { %v2031_v31 = vstv %s2030_s30  ;;  %v2068_v32 = vsub.f32 %v2052_v60, %v2060_v12  ;;  %v2069_v33 = vsub.f32 %v2053_v61, %v2061_v13  ;;  %v2070_v34 = vsub.f32 %v2054_v1, %v2062_v9  ;;  %v2110_v60 = vld [vmem:[%s3812_s23 + $0x2a0] sm:$0xff]  ;;  %v2111_v61 = vld [vmem:[%s3812_s23 + $0x2a8] sm:$0xff]  ;;  %s3002_s30 = sadd.s32 416, %s3826_s6 }
 0x193   : > { %v2032_v35 = vadd.s32 %v2031_v31, %v4356_v14  ;;  %v2033_v36 = vadd.s32 %v2031_v31, %v4369_v24  ;;  %v2071_v37 = vsub.f32 %v2055_v6, %v2063_v20  ;;  %v2072_v38 = vsub.f32 %v2056_v7, %v2064_v21  ;;  %v2115_v63 = vld [vmem:[%s3818_s19 + $0x288] sm:$0xff] }
 0x194   : > { %v2073_v23 = vsub.f32 %v2057_v5, %v2065_v30  ;;  %v2074_v39 = vsub.f32 %v2058_v11, %v2066_v25  ;;  %v2075_v40 = vsub.f32 %v2059_v19, %v2067_v26  ;;  %v2076_v41 = vmul.f32 %v2068_v32, %v2068_v32  ;;  %v2119_v9 = vld [vmem:[%s3818_s19 + $0x2a8] sm:$0xff] }
 0x195   : > { %vm2034_vm0 = vcmp.lt.s32.totalorder %v2032_v35, 768  ;;  %vm2035_vm1 = vcmp.lt.s32.totalorder %v2033_v36, 768  ;;  %v2077_v42 = vmul.f32 %v2069_v33, %v2069_v33  ;;  %v2078_v43 = vmul.f32 %v2070_v34, %v2070_v34 }
 0x196   : > { %v2036_v44 = vsel %vm2034_vm0, %v2022_v8, 0.0  ;;  %v2037_v45 = vsel %vm2034_vm0, %v2023_v2, 0.0  ;;  %v2038_v46 = vsel %vm2034_vm0, %v2024_v3, 0.0  ;;  %v2039_v47 = vsel %vm2034_vm0, %v2025_v4, 0.0  ;;  %v2116_v2 = vld [vmem:[%s3818_s19 + $0x290] sm:$0xff]  ;;  %v2117_v3 = vld [vmem:[%s3818_s19 + $0x298] sm:$0xff] }
 0x197   : > { %v2040_v49 = vsel %vm2035_vm1, %v2026_v27, 0.0  ;;  %v2041_v50 = vsel %vm2035_vm1, %v2027_v28, 0.0  ;;  %v2042_v51 = vsel %vm2035_vm1, %v2028_v29, 0.0  ;;  %v2043_v52 = vsel %vm2035_vm1, %v2029_v22, 0.0  ;;  %v2118_v4 = vld [vmem:[%s3818_s19 + $0x2a0] sm:$0xff] }
 0x198   : > { %v2044_v55 = vadd.f32 %v2036_v44, %v1994_v10  ;;  %v2045_v57 = vadd.f32 %v2037_v45, %v1995_v15  ;;  %v2046_v58 = vadd.f32 %v2038_v46, %v1996_v16  ;;  %v2047_v59 = vadd.f32 %v2039_v47, %v1997_v17  ;;  %v2120_v10 = vld [vmem:[%s3818_s19 + $0x2b0] sm:$0xff]  ;;  %v2121_v15 = vld [vmem:[%s3818_s19 + $0x2b8] sm:$0xff]  ;;  %v2161_v44 = vld [vmem:[%s3812_s23 + $0x2c8] sm:$0xff] }
 0x199   : > { %v2079_v1 = vmul.f32 %v2071_v37, %v2071_v37  ;;  %v2080_v6 = vmul.f32 %v2072_v38, %v2072_v38  ;;  %v2081_v7 = vmul.f32 %v2073_v23, %v2073_v23  ;;  %v2082_v8 = vmul.f32 %v2074_v39, %v2074_v39  ;;  %v2160_v37 = vld [vmem:[%s3812_s23 + $0x2c0] sm:$0xff]  ;;  %v2162_v45 = vld [vmem:[%s3812_s23 + $0x2d0] sm:$0xff] }
 0x19a   : > { %v2048_v5 = vadd.f32 %v2044_v55, %v2040_v49  ;;  %v2049_v11 = vadd.f32 %v2045_v57, %v2041_v50  ;;  %v2050_v12 = vadd.f32 %v2046_v58, %v2042_v51  ;;  %v2051_v13 = vadd.f32 %v2047_v59, %v2043_v52  ;;  %v2166_v49 = vld [vmem:[%s3812_s23 + $0x2f0] sm:$0xff]  ;;  %v2168_v50 = vld [vmem:[%s3818_s19 + $0x2c0] sm:$0xff]  ;;  %v2169_v55 = vld [vmem:[%s3818_s19 + $0x2c8] sm:$0xff] }
 0x19b   : > { %v2083_v16 = vmul.f32 %v2075_v40, %v2075_v40  ;;  %v2085_v17 = vstv %s2084_s3  ;;  %v2122_v19 = vsub.f32 %v2106_v48, %v2114_v0  ;;  %v2123_v20 = vsub.f32 %v2107_v18, %v2115_v63  ;;  %v2164_v48 = vld [vmem:[%s3812_s23 + $0x2e0] sm:$0xff]  ;;  %v2165_v18 = vld [vmem:[%s3812_s23 + $0x2e8] sm:$0xff]  ;;  %v2170_v57 = vld [vmem:[%s3818_s19 + $0x2d0] sm:$0xff]  ;;  %s3056_s3 = sadd.s32 432, %s3826_s6 }
 0x19c   : > { %v2086_v21 = vadd.s32 %v2085_v17, %v4356_v14  ;;  %v2087_v27 = vadd.s32 %v2085_v17, %v4369_v24  ;;  %v2124_v28 = vsub.f32 %v2108_v53, %v2116_v2  ;;  %v2125_v29 = vsub.f32 %v2109_v54, %v2117_v3  ;;  %v2171_v58 = vld [vmem:[%s3818_s19 + $0x2d8] sm:$0xff]  ;;  %v2173_v0 = vld [vmem:[%s3818_s19 + $0x2e8] sm:$0xff]  ;;  %v2174_v63 = vld [vmem:[%s3818_s19 + $0x2f0] sm:$0xff] }
 0x19d   : > { %v2126_v22 = vsub.f32 %v2110_v60, %v2118_v4  ;;  %v2127_v30 = vsub.f32 %v2111_v61, %v2119_v9  ;;  %v2128_v25 = vsub.f32 %v2112_v62, %v2120_v10  ;;  %v2129_v26 = vsub.f32 %v2113_v56, %v2121_v15  ;;  %v2172_v56 = vld [vmem:[%s3818_s19 + $0x2e0] sm:$0xff]  ;;  %v2175_v2 = vld [vmem:[%s3818_s19 + $0x2f8] sm:$0xff] }
 0x19e   : > { %vm2088_vm2 = vcmp.lt.s32.totalorder %v2086_v21, 768  ;;  %vm2089_vm3 = vcmp.lt.s32.totalorder %v2087_v27, 768  ;;  %v2130_v31 = vmul.f32 %v2122_v19, %v2122_v19  ;;  %v2131_v32 = vmul.f32 %v2123_v20, %v2123_v20 }
 0x19f   : > { %v2090_v33 = vsel %vm2088_vm2, %v2076_v41, 0.0  ;;  %v2091_v34 = vsel %vm2088_vm2, %v2077_v42, 0.0  ;;  %v2092_v35 = vsel %vm2088_vm2, %v2078_v43, 0.0  ;;  %v2093_v36 = vsel %vm2088_vm2, %v2079_v1, 0.0  ;;  %v2163_v43 = vld [vmem:[%s3812_s23 + $0x2d8] sm:$0xff] }
 0x1a0   : > { %v2094_v38 = vsel %vm2089_vm3, %v2080_v6, 0.0  ;;  %v2095_v23 = vsel %vm2089_vm3, %v2081_v7, 0.0  ;;  %v2096_v39 = vsel %vm2089_vm3, %v2082_v8, 0.0  ;;  %v2097_v40 = vsel %vm2089_vm3, %v2083_v16, 0.0  ;;  %v2167_v8 = vld [vmem:[%s3812_s23 + $0x2f8] sm:$0xff] }
 0x1a1   : > { %v2098_v46 = vadd.f32 %v2090_v33, %v2048_v5  ;;  %v2099_v41 = vadd.f32 %v2091_v34, %v2049_v11  ;;  %v2100_v47 = vadd.f32 %v2092_v35, %v2050_v12  ;;  %v2101_v42 = vadd.f32 %v2093_v36, %v2051_v13  ;;  %v2217_v36 = vld [vmem:[%s3812_s23 + $0x318] sm:$0xff] }
 0x1a2   : > { %v2132_v51 = vmul.f32 %v2124_v28, %v2124_v28  ;;  %v2133_v52 = vmul.f32 %v2125_v29, %v2125_v29  ;;  %v2134_v53 = vmul.f32 %v2126_v22, %v2126_v22  ;;  %v2135_v54 = vmul.f32 %v2127_v30, %v2127_v30 }
 0x1a3   : > { %v2102_v59 = vadd.f32 %v2098_v46, %v2094_v38  ;;  %v2103_v60 = vadd.f32 %v2099_v41, %v2095_v23  ;;  %v2104_v61 = vadd.f32 %v2100_v47, %v2096_v39  ;;  %v2105_v62 = vadd.f32 %v2101_v42, %v2097_v40  ;;  %v2219_v38 = vld [vmem:[%s3812_s23 + $0x328] sm:$0xff]  ;;  %v2222_v46 = vld [vmem:[%s3818_s19 + $0x300] sm:$0xff]  ;;  %v2224_v47 = vld [vmem:[%s3818_s19 + $0x310] sm:$0xff] }
 0x1a4   : > { %v2136_v1 = vmul.f32 %v2128_v25, %v2128_v25  ;;  %v2137_v6 = vmul.f32 %v2129_v26, %v2129_v26  ;;  %v2139_v7 = vstv %s2138_s4  ;;  %v2176_v3 = vsub.f32 %v2160_v37, %v2168_v50  ;;  %v2214_v25 = vld [vmem:[%s3812_s23 + $0x300] sm:$0xff]  ;;  %v2215_v26 = vld [vmem:[%s3812_s23 + $0x308] sm:$0xff]  ;;  %s3110_s4 = sadd.s32 448, %s3826_s6 }
 0x1a5   : > { %v2140_v4 = vadd.s32 %v2139_v7, %v4356_v14  ;;  %v2141_v5 = vadd.s32 %v2139_v7, %v4369_v24  ;;  %v2177_v11 = vsub.f32 %v2161_v44, %v2169_v55  ;;  %v2178_v12 = vsub.f32 %v2162_v45, %v2170_v57  ;;  %v2218_v37 = vld [vmem:[%s3812_s23 + $0x320] sm:$0xff]  ;;  %v2220_v45 = vld [vmem:[%s3812_s23 + $0x330] sm:$0xff]  ;;  %v2223_v41 = vld [vmem:[%s3818_s19 + $0x308] sm:$0xff] }
 0x1a6   : > { %v2179_v13 = vsub.f32 %v2163_v43, %v2171_v58  ;;  %v2180_v9 = vsub.f32 %v2164_v48, %v2172_v56  ;;  %v2181_v10 = vsub.f32 %v2165_v18, %v2173_v0  ;;  %v2182_v15 = vsub.f32 %v2166_v49, %v2174_v63  ;;  %v2225_v49 = vld [vmem:[%s3818_s19 + $0x318] sm:$0xff]  ;;  %v2226_v50 = vld [vmem:[%s3818_s19 + $0x320] sm:$0xff]  ;;  %v2228_v58 = vld [vmem:[%s3818_s19 + $0x330] sm:$0xff] }
 0x1a7   : > { %vm2142_vm4 = vcmp.lt.s32.totalorder %v2140_v4, 768  ;;  %vm2143_vm5 = vcmp.lt.s32.totalorder %v2141_v5, 768  ;;  %v2183_v16 = vsub.f32 %v2167_v8, %v2175_v2  ;;  %v2184_v17 = vmul.f32 %v2176_v3, %v2176_v3  ;;  %v2221_v57 = vld [vmem:[%s3812_s23 + $0x338] sm:$0xff] }
 0x1a8   : > { %v2144_v19 = vsel %vm2142_vm4, %v2130_v31, 0.0  ;;  %v2145_v20 = vsel %vm2142_vm4, %v2131_v32, 0.0  ;;  %v2146_v21 = vsel %vm2142_vm4, %v2132_v51, 0.0  ;;  %v2147_v27 = vsel %vm2142_vm4, %v2133_v52, 0.0  ;;  %v2216_v32 = vld [vmem:[%s3812_s23 + $0x310] sm:$0xff]  ;;  %v2227_v51 = vld [vmem:[%s3818_s19 + $0x328] sm:$0xff] }
 0x1a9   : > { %v2148_v28 = vsel %vm2143_vm5, %v2134_v53, 0.0  ;;  %v2149_v29 = vsel %vm2143_vm5, %v2135_v54, 0.0  ;;  %v2150_v22 = vsel %vm2143_vm5, %v2136_v1, 0.0  ;;  %v2151_v30 = vsel %vm2143_vm5, %v2137_v6, 0.0 }
 0x1aa   : > { %v2152_v33 = vadd.f32 %v2144_v19, %v2102_v59  ;;  %v2153_v34 = vadd.f32 %v2145_v20, %v2103_v60  ;;  %v2154_v35 = vadd.f32 %v2146_v21, %v2104_v61  ;;  %v2155_v31 = vadd.f32 %v2147_v27, %v2105_v62  ;;  %v2229_v59 = vld [vmem:[%s3818_s19 + $0x338] sm:$0xff]  ;;  %v2270_v21 = vld [vmem:[%s3812_s23 + $0x350] sm:$0xff] }
 0x1ab   : > { %v2185_v23 = vmul.f32 %v2177_v11, %v2177_v11  ;;  %v2186_v39 = vmul.f32 %v2178_v12, %v2178_v12  ;;  %v2187_v40 = vmul.f32 %v2179_v13, %v2179_v13  ;;  %v2188_v44 = vmul.f32 %v2180_v9, %v2180_v9  ;;  %v2271_v27 = vld [vmem:[%s3812_s23 + $0x358] sm:$0xff] }
 0x1ac   : > { %v2156_v42 = vadd.f32 %v2152_v33, %v2148_v28  ;;  %v2157_v43 = vadd.f32 %v2153_v34, %v2149_v29  ;;  %v2158_v48 = vadd.f32 %v2154_v35, %v2150_v22  ;;  %v2159_v18 = vadd.f32 %v2155_v31, %v2151_v30  ;;  %v2272_v28 = vld [vmem:[%s3812_s23 + $0x360] sm:$0xff]  ;;  %v2274_v33 = vld [vmem:[%s3812_s23 + $0x370] sm:$0xff]  ;;  %v2277_v35 = vld [vmem:[%s3818_s19 + $0x348] sm:$0xff] }
 0x1ad   : > { %v2189_v52 = vmul.f32 %v2181_v10, %v2181_v10  ;;  %v2190_v53 = vmul.f32 %v2182_v15, %v2182_v15  ;;  %v2191_v54 = vmul.f32 %v2183_v16, %v2183_v16  ;;  %v2193_v55 = vstv %s2192_s7  ;;  %v2268_v10 = vld [vmem:[%s3812_s23 + $0x340] sm:$0xff]  ;;  %v2269_v15 = vld [vmem:[%s3812_s23 + $0x348] sm:$0xff]  ;;  %v2278_v31 = vld [vmem:[%s3818_s19 + $0x350] sm:$0xff]  ;;  %s3164_s7 = sadd.s32 464, %s3826_s6 }
 0x1ae   : > { %v2194_v60 = vadd.s32 %v2193_v55, %v4356_v14  ;;  %v2195_v61 = vadd.s32 %v2193_v55, %v4369_v24  ;;  %v2230_v62 = vsub.f32 %v2214_v25, %v2222_v46  ;;  %v2231_v56 = vsub.f32 %v2215_v26, %v2223_v41  ;;  %v2273_v26 = vld [vmem:[%s3812_s23 + $0x368] sm:$0xff]  ;;  %v2276_v34 = vld [vmem:[%s3818_s19 + $0x340] sm:$0xff] }
 0x1af   : > { %v2232_v0 = vsub.f32 %v2216_v32, %v2224_v47  ;;  %v2233_v63 = vsub.f32 %v2217_v36, %v2225_v49  ;;  %v2234_v1 = vsub.f32 %v2218_v37, %v2226_v50  ;;  %v2235_v6 = vsub.f32 %v2219_v38, %v2227_v51  ;;  %v2281_v47 = vld [vmem:[%s3818_s19 + $0x368] sm:$0xff] }
 0x1b0   : > { %vm2196_vm6 = vcmp.lt.s32.totalorder %v2194_v60, 768  ;;  %vm2197_vm7 = vcmp.lt.s32.totalorder %v2195_v61, 768  ;;  %v2236_v7 = vsub.f32 %v2220_v45, %v2228_v58  ;;  %v2237_v8 = vsub.f32 %v2221_v57, %v2229_v59 }
 0x1b1   : > { %v2198_v2 = vsel %vm2196_vm6, %v2184_v17, 0.0  ;;  %v2199_v3 = vsel %vm2196_vm6, %v2185_v23, 0.0  ;;  %v2200_v4 = vsel %vm2196_vm6, %v2186_v39, 0.0  ;;  %v2201_v5 = vsel %vm2196_vm6, %v2187_v40, 0.0  ;;  %v2275_v23 = vld [vmem:[%s3812_s23 + $0x378] sm:$0xff]  ;;  %v2280_v40 = vld [vmem:[%s3818_s19 + $0x360] sm:$0xff] }
 0x1b2   : > { %v2202_v11 = vsel %vm2197_vm7, %v2188_v44, 0.0  ;;  %v2203_v12 = vsel %vm2197_vm7, %v2189_v52, 0.0  ;;  %v2204_v13 = vsel %vm2197_vm7, %v2190_v53, 0.0  ;;  %v2205_v9 = vsel %vm2197_vm7, %v2191_v54, 0.0  ;;  %v2279_v39 = vld [vmem:[%s3818_s19 + $0x358] sm:$0xff] }
 0x1b3   : > { %v2206_v16 = vadd.f32 %v2198_v2, %v2156_v42  ;;  %v2207_v19 = vadd.f32 %v2199_v3, %v2157_v43  ;;  %v2208_v20 = vadd.f32 %v2200_v4, %v2158_v48  ;;  %v2209_v17 = vadd.f32 %v2201_v5, %v2159_v18  ;;  %v2282_v42 = vld [vmem:[%s3818_s19 + $0x370] sm:$0xff]  ;;  %v2283_v43 = vld [vmem:[%s3818_s19 + $0x378] sm:$0xff] }
 0x1b4   : > { %v2238_v29 = vmul.f32 %v2230_v62, %v2230_v62  ;;  %v2239_v22 = vmul.f32 %v2231_v56, %v2231_v56  ;;  %v2240_v30 = vmul.f32 %v2232_v0, %v2232_v0  ;;  %v2241_v25 = vmul.f32 %v2233_v63, %v2233_v63  ;;  %v2324_v4 = vld [vmem:[%s3812_s23 + $0x390] sm:$0xff]  ;;  %v2325_v5 = vld [vmem:[%s3812_s23 + $0x398] sm:$0xff] }
 0x1b5   : > { %v2210_v32 = vadd.f32 %v2206_v16, %v2202_v11  ;;  %v2211_v36 = vadd.f32 %v2207_v19, %v2203_v12  ;;  %v2212_v37 = vadd.f32 %v2208_v20, %v2204_v13  ;;  %v2213_v38 = vadd.f32 %v2209_v17, %v2205_v9  ;;  %v2328_v16 = vld [vmem:[%s3812_s23 + $0x3b0] sm:$0xff]  ;;  %v2329_v19 = vld [vmem:[%s3812_s23 + $0x3b8] sm:$0xff]  ;;  %v2330_v20 = vld [vmem:[%s3818_s19 + $0x380] sm:$0xff] }
 0x1b6   : > { %v2242_v44 = vmul.f32 %v2234_v1, %v2234_v1  ;;  %v2243_v45 = vmul.f32 %v2235_v6, %v2235_v6  ;;  %v2244_v46 = vmul.f32 %v2236_v7, %v2236_v7  ;;  %v2245_v41 = vmul.f32 %v2237_v8, %v2237_v8  ;;  %v2322_v1 = vld [vmem:[%s3812_s23 + $0x380] sm:$0xff]  ;;  %v2323_v6 = vld [vmem:[%s3812_s23 + $0x388] sm:$0xff] }
 0x1b7   : > { %v2247_v48 = vstv %s2246_s8  ;;  %v2284_v18 = vsub.f32 %v2268_v10, %v2276_v34  ;;  %v2285_v49 = vsub.f32 %v2269_v15, %v2277_v35  ;;  %v2286_v50 = vsub.f32 %v2270_v21, %v2278_v31  ;;  %v2326_v10 = vld [vmem:[%s3812_s23 + $0x3a0] sm:$0xff]  ;;  %v2327_v15 = vld [vmem:[%s3812_s23 + $0x3a8] sm:$0xff]  ;;  %s3218_s8 = sadd.s32 480, %s3826_s6 }
 0x1b8   : > { %v2248_v51 = vadd.s32 %v2247_v48, %v4356_v14  ;;  %v2249_v52 = vadd.s32 %v2247_v48, %v4369_v24  ;;  %v2287_v53 = vsub.f32 %v2271_v27, %v2279_v39  ;;  %v2288_v54 = vsub.f32 %v2272_v28, %v2280_v40  ;;  %v2331_v17 = vld [vmem:[%s3818_s19 + $0x388] sm:$0xff] }
 0x1b9   : > { %v2289_v55 = vsub.f32 %v2273_v26, %v2281_v47  ;;  %v2290_v57 = vsub.f32 %v2274_v33, %v2282_v42  ;;  %v2291_v58 = vsub.f32 %v2275_v23, %v2283_v43  ;;  %v2292_v59 = vmul.f32 %v2284_v18, %v2284_v18  ;;  %v2335_v31 = vld [vmem:[%s3818_s19 + $0x3a8] sm:$0xff] }
 0x1ba   : > { %vm2250_vm8 = vcmp.lt.s32.totalorder %v2248_v51, 768  ;;  %vm2251_vm9 = vcmp.lt.s32.totalorder %v2249_v52, 768  ;;  %v2293_v60 = vmul.f32 %v2285_v49, %v2285_v49  ;;  %v2294_v61 = vmul.f32 %v2286_v50, %v2286_v50 }
 0x1bb   : > { %v2252_v62 = vsel %vm2250_vm8, %v2238_v29, 0.0  ;;  %v2253_v56 = vsel %vm2250_vm8, %v2239_v22, 0.0  ;;  %v2254_v0 = vsel %vm2250_vm8, %v2240_v30, 0.0  ;;  %v2255_v63 = vsel %vm2250_vm8, %v2241_v25, 0.0  ;;  %v2332_v22 = vld [vmem:[%s3818_s19 + $0x390] sm:$0xff]  ;;  %v2333_v30 = vld [vmem:[%s3818_s19 + $0x398] sm:$0xff] }
 0x1bc   : > { %v2256_v7 = vsel %vm2251_vm9, %v2242_v44, 0.0  ;;  %v2257_v8 = vsel %vm2251_vm9, %v2243_v45, 0.0  ;;  %v2258_v2 = vsel %vm2251_vm9, %v2244_v46, 0.0  ;;  %v2259_v3 = vsel %vm2251_vm9, %v2245_v41, 0.0  ;;  %v2334_v25 = vld [vmem:[%s3818_s19 + $0x3a0] sm:$0xff] }
 0x1bd   : > { %v2260_v11 = vadd.f32 %v2252_v62, %v2210_v32  ;;  %v2261_v12 = vadd.f32 %v2253_v56, %v2211_v36  ;;  %v2262_v13 = vadd.f32 %v2254_v0, %v2212_v37  ;;  %v2263_v9 = vadd.f32 %v2255_v63, %v2213_v38  ;;  %v2336_v32 = vld [vmem:[%s3818_s19 + $0x3b0] sm:$0xff]  ;;  %v2337_v36 = vld [vmem:[%s3818_s19 + $0x3b8] sm:$0xff]  ;;  %v2377_v62 = vld [vmem:[%s3812_s23 + $0x3c8] sm:$0xff] }
 0x1be   : > { %v2295_v21 = vmul.f32 %v2287_v53, %v2287_v53  ;;  %v2296_v27 = vmul.f32 %v2288_v54, %v2288_v54  ;;  %v2297_v28 = vmul.f32 %v2289_v55, %v2289_v55  ;;  %v2298_v29 = vmul.f32 %v2290_v57, %v2290_v57  ;;  %v2376_v53 = vld [vmem:[%s3812_s23 + $0x3c0] sm:$0xff]  ;;  %v2378_v56 = vld [vmem:[%s3812_s23 + $0x3d0] sm:$0xff] }
 0x1bf   : > { %v2264_v26 = vadd.f32 %v2260_v11, %v2256_v7  ;;  %v2265_v33 = vadd.f32 %v2261_v12, %v2257_v8  ;;  %v2266_v34 = vadd.f32 %v2262_v13, %v2258_v2  ;;  %v2267_v35 = vadd.f32 %v2263_v9, %v2259_v3  ;;  %v2382_v7 = vld [vmem:[%s3812_s23 + $0x3f0] sm:$0xff]  ;;  %v2384_v8 = vld [vmem:[%s3818_s19 + $0x3c0] sm:$0xff]  ;;  %v2385_v11 = vld [vmem:[%s3818_s19 + $0x3c8] sm:$0xff] }
 0x1c0   : > { %v2299_v37 = vmul.f32 %v2291_v58, %v2291_v58  ;;  %v2301_v38 = vstv %s2300_s17  ;;  %v2338_v23 = vsub.f32 %v2322_v1, %v2330_v20  ;;  %v2339_v39 = vsub.f32 %v2323_v6, %v2331_v17  ;;  %v2380_v1 = vld [vmem:[%s3812_s23 + $0x3e0] sm:$0xff]  ;;  %v2381_v6 = vld [vmem:[%s3812_s23 + $0x3e8] sm:$0xff]  ;;  %v2386_v12 = vld [vmem:[%s3818_s19 + $0x3d0] sm:$0xff]  ;;  %s3272_s17 = sadd.s32 496, %s3826_s6 }
 0x1c1   : > { %v2302_v40 = vadd.s32 %v2301_v38, %v4356_v14  ;;  %v2303_v44 = vadd.s32 %v2301_v38, %v4369_v24  ;;  %v2340_v45 = vsub.f32 %v2324_v4, %v2332_v22  ;;  %v2341_v46 = vsub.f32 %v2325_v5, %v2333_v30  ;;  %v2387_v13 = vld [vmem:[%s3818_s19 + $0x3d8] sm:$0xff]  ;;  %v2389_v20 = vld [vmem:[%s3818_s19 + $0x3e8] sm:$0xff]  ;;  %v2390_v17 = vld [vmem:[%s3818_s19 + $0x3f0] sm:$0xff] }
 0x1c2   : > { %v2342_v41 = vsub.f32 %v2326_v10, %v2334_v25  ;;  %v2343_v47 = vsub.f32 %v2327_v15, %v2335_v31  ;;  %v2344_v42 = vsub.f32 %v2328_v16, %v2336_v32  ;;  %v2345_v43 = vsub.f32 %v2329_v19, %v2337_v36  ;;  %v2388_v19 = vld [vmem:[%s3818_s19 + $0x3e0] sm:$0xff]  ;;  %v2391_v22 = vld [vmem:[%s3818_s19 + $0x3f8] sm:$0xff] }
 0x1c3   : > { %vm2304_vm10 = vcmp.lt.s32.totalorder %v2302_v40, 768  ;;  %vm2305_vm11 = vcmp.lt.s32.totalorder %v2303_v44, 768  ;;  %v2346_v48 = vmul.f32 %v2338_v23, %v2338_v23  ;;  %v2347_v18 = vmul.f32 %v2339_v39, %v2339_v39 }
 0x1c4   : > { %v2306_v49 = vsel %vm2304_vm10, %v2292_v59, 0.0  ;;  %v2307_v50 = vsel %vm2304_vm10, %v2293_v60, 0.0  ;;  %v2308_v51 = vsel %vm2304_vm10, %v2294_v61, 0.0  ;;  %v2309_v52 = vsel %vm2304_vm10, %v2295_v21, 0.0  ;;  %v2379_v61 = vld [vmem:[%s3812_s23 + $0x3d8] sm:$0xff] }
 0x1c5   : > { %v2310_v54 = vsel %vm2305_vm11, %v2296_v27, 0.0  ;;  %v2311_v55 = vsel %vm2305_vm11, %v2297_v28, 0.0  ;;  %v2312_v57 = vsel %vm2305_vm11, %v2298_v29, 0.0  ;;  %v2313_v58 = vsel %vm2305_vm11, %v2299_v37, 0.0  ;;  %v2383_v29 = vld [vmem:[%s3812_s23 + $0x3f8] sm:$0xff] }
 0x1c6   : > { %v2314_v0 = vadd.f32 %v2306_v49, %v2264_v26  ;;  %v2315_v59 = vadd.f32 %v2307_v50, %v2265_v33  ;;  %v2316_v63 = vadd.f32 %v2308_v51, %v2266_v34  ;;  %v2317_v60 = vadd.f32 %v2309_v52, %v2267_v35  ;;  %v2433_v52 = vld [vmem:[%s3812_s23 + $0x418] sm:$0xff] }
 0x1c7   : > { %v2348_v2 = vmul.f32 %v2340_v45, %v2340_v45  ;;  %v2349_v3 = vmul.f32 %v2341_v46, %v2341_v46  ;;  %v2350_v4 = vmul.f32 %v2342_v41, %v2342_v41  ;;  %v2351_v5 = vmul.f32 %v2343_v47, %v2343_v47 }
 0x1c8   : > { %v2318_v9 = vadd.f32 %v2314_v0, %v2310_v54  ;;  %v2319_v10 = vadd.f32 %v2315_v59, %v2311_v55  ;;  %v2320_v15 = vadd.f32 %v2316_v63, %v2312_v57  ;;  %v2321_v16 = vadd.f32 %v2317_v60, %v2313_v58  ;;  %v2435_v54 = vld [vmem:[%s3812_s23 + $0x428] sm:$0xff]  ;;  %v2438_v0 = vld [vmem:[%s3818_s19 + $0x400] sm:$0xff]  ;;  %v2440_v63 = vld [vmem:[%s3818_s19 + $0x410] sm:$0xff] }
 0x1c9   : > { %v2352_v21 = vmul.f32 %v2344_v42, %v2344_v42  ;;  %v2353_v27 = vmul.f32 %v2345_v43, %v2345_v43  ;;  %v2355_v28 = vstv %s2354_s26  ;;  %v2392_v30 = vsub.f32 %v2376_v53, %v2384_v8  ;;  %v2430_v42 = vld [vmem:[%s3812_s23 + $0x400] sm:$0xff]  ;;  %v2431_v43 = vld [vmem:[%s3812_s23 + $0x408] sm:$0xff] }
 0x1ca   : > { %v2356_v25 = vadd.s32 %v2355_v28, %v4356_v14  ;;  %v2357_v26 = vadd.s32 %v2355_v28, %v4369_v24  ;;  %v2393_v33 = vsub.f32 %v2377_v62, %v2385_v11  ;;  %v2394_v34 = vsub.f32 %v2378_v56, %v2386_v12  ;;  %v2434_v53 = vld [vmem:[%s3812_s23 + $0x420] sm:$0xff]  ;;  %v2436_v56 = vld [vmem:[%s3812_s23 + $0x430] sm:$0xff]  ;;  %v2439_v59 = vld [vmem:[%s3818_s19 + $0x408] sm:$0xff] }
 0x1cb   : > { %v2395_v35 = vsub.f32 %v2379_v61, %v2387_v13  ;;  %v2396_v31 = vsub.f32 %v2380_v1, %v2388_v19  ;;  %v2397_v32 = vsub.f32 %v2381_v6, %v2389_v20  ;;  %v2398_v36 = vsub.f32 %v2382_v7, %v2390_v17  ;;  %v2441_v7 = vld [vmem:[%s3818_s19 + $0x418] sm:$0xff]  ;;  %v2442_v8 = vld [vmem:[%s3818_s19 + $0x420] sm:$0xff]  ;;  %v2444_v13 = vld [vmem:[%s3818_s19 + $0x430] sm:$0xff] }
 0x1cc   : > { %vm2358_vm12 = vcmp.lt.s32.totalorder %v2356_v25, 768  ;;  %vm2359_vm13 = vcmp.lt.s32.totalorder %v2357_v26, 768  ;;  %v2399_v37 = vsub.f32 %v2383_v29, %v2391_v22  ;;  %v2400_v38 = vmul.f32 %v2392_v30, %v2392_v30  ;;  %v2437_v12 = vld [vmem:[%s3812_s23 + $0x438] sm:$0xff] }
 0x1cd   : > { %v2360_v23 = vsel %vm2358_vm12, %v2346_v48, 0.0  ;;  %v2361_v39 = vsel %vm2358_vm12, %v2347_v18, 0.0  ;;  %v2362_v40 = vsel %vm2358_vm12, %v2348_v2, 0.0  ;;  %v2363_v44 = vsel %vm2358_vm12, %v2349_v3, 0.0  ;;  %v2432_v18 = vld [vmem:[%s3812_s23 + $0x410] sm:$0xff]  ;;  %v2443_v2 = vld [vmem:[%s3818_s19 + $0x428] sm:$0xff] }
 0x1ce   : > { %v2364_v45 = vsel %vm2359_vm13, %v2350_v4, 0.0  ;;  %v2365_v46 = vsel %vm2359_vm13, %v2351_v5, 0.0  ;;  %v2366_v41 = vsel %vm2359_vm13, %v2352_v21, 0.0  ;;  %v2367_v47 = vsel %vm2359_vm13, %v2353_v27, 0.0 }
 0x1cf   : > { %v2368_v49 = vadd.f32 %v2360_v23, %v2318_v9  ;;  %v2369_v50 = vadd.f32 %v2361_v39, %v2319_v10  ;;  %v2370_v51 = vadd.f32 %v2362_v40, %v2320_v15  ;;  %v2371_v48 = vadd.f32 %v2363_v44, %v2321_v16  ;;  %v2445_v9 = vld [vmem:[%s3818_s19 + $0x438] sm:$0xff]  ;;  %v2486_v40 = vld [vmem:[%s3812_s23 + $0x450] sm:$0xff] }
 0x1d0   : > { %v2401_v55 = vmul.f32 %v2393_v33, %v2393_v33  ;;  %v2402_v57 = vmul.f32 %v2394_v34, %v2394_v34  ;;  %v2403_v58 = vmul.f32 %v2395_v35, %v2395_v35  ;;  %v2404_v62 = vmul.f32 %v2396_v31, %v2396_v31  ;;  %v2487_v44 = vld [vmem:[%s3812_s23 + $0x458] sm:$0xff] }
 0x1d1   : > { %v2372_v60 = vadd.f32 %v2368_v49, %v2364_v45  ;;  %v2373_v61 = vadd.f32 %v2369_v50, %v2365_v46  ;;  %v2374_v1 = vadd.f32 %v2370_v51, %v2366_v41  ;;  %v2375_v6 = vadd.f32 %v2371_v48, %v2367_v47  ;;  %v2488_v45 = vld [vmem:[%s3812_s23 + $0x460] sm:$0xff]  ;;  %v2490_v49 = vld [vmem:[%s3812_s23 + $0x470] sm:$0xff]  ;;  %v2493_v51 = vld [vmem:[%s3818_s19 + $0x448] sm:$0xff] }
 0x1d2   : > { %v2405_v3 = vmul.f32 %v2397_v32, %v2397_v32  ;;  %v2406_v4 = vmul.f32 %v2398_v36, %v2398_v36  ;;  %v2407_v5 = vmul.f32 %v2399_v37, %v2399_v37  ;;  %v2409_v11 = vstv %s2408_s18  ;;  %v2484_v32 = vld [vmem:[%s3812_s23 + $0x440] sm:$0xff]  ;;  %v2485_v36 = vld [vmem:[%s3812_s23 + $0x448] sm:$0xff]  ;;  %v2494_v48 = vld [vmem:[%s3818_s19 + $0x450] sm:$0xff] }
 0x1d3   : > { %v2410_v10 = vadd.s32 %v2409_v11, %v4356_v14  ;;  %v2411_v15 = vadd.s32 %v2409_v11, %v4369_v24  ;;  %v2446_v16 = vsub.f32 %v2430_v42, %v2438_v0  ;;  %v2447_v19 = vsub.f32 %v2431_v43, %v2439_v59  ;;  %v2489_v43 = vld [vmem:[%s3812_s23 + $0x468] sm:$0xff]  ;;  %v2492_v50 = vld [vmem:[%s3818_s19 + $0x440] sm:$0xff] }
 0x1d4   : > { %v2448_v20 = vsub.f32 %v2432_v18, %v2440_v63  ;;  %v2449_v17 = vsub.f32 %v2433_v52, %v2441_v7  ;;  %v2450_v21 = vsub.f32 %v2434_v53, %v2442_v8  ;;  %v2451_v27 = vsub.f32 %v2435_v54, %v2443_v2  ;;  %v2497_v63 = vld [vmem:[%s3818_s19 + $0x468] sm:$0xff] }
 0x1d5   : > { %vm2412_vm14 = vcmp.lt.s32.totalorder %v2410_v10, 768  ;;  %vm2413_vm15 = vcmp.lt.s32.totalorder %v2411_v15, 768  ;;  %v2452_v28 = vsub.f32 %v2436_v56, %v2444_v13  ;;  %v2453_v29 = vsub.f32 %v2437_v12, %v2445_v9 }
 0x1d6   : > { %v2414_v22 = vsel %vm2412_vm14, %v2400_v38, 0.0  ;;  %v2415_v30 = vsel %vm2412_vm14, %v2401_v55, 0.0  ;;  %v2416_v25 = vsel %vm2412_vm14, %v2402_v57, 0.0  ;;  %v2417_v26 = vsel %vm2412_vm14, %v2403_v58, 0.0  ;;  %v2491_v55 = vld [vmem:[%s3812_s23 + $0x478] sm:$0xff]  ;;  %v2496_v58 = vld [vmem:[%s3818_s19 + $0x460] sm:$0xff] }
 0x1d7   : > { %v2418_v33 = vsel %vm2413_vm15, %v2404_v62, 0.0  ;;  %v2419_v34 = vsel %vm2413_vm15, %v2405_v3, 0.0  ;;  %v2420_v35 = vsel %vm2413_vm15, %v2406_v4, 0.0  ;;  %v2421_v31 = vsel %vm2413_vm15, %v2407_v5, 0.0  ;;  %v2495_v57 = vld [vmem:[%s3818_s19 + $0x458] sm:$0xff] }
 0x1d8   : > { %v2422_v37 = vadd.f32 %v2414_v22, %v2372_v60  ;;  %v2423_v23 = vadd.f32 %v2415_v30, %v2373_v61  ;;  %v2424_v39 = vadd.f32 %v2416_v25, %v2374_v1  ;;  %v2425_v38 = vadd.f32 %v2417_v26, %v2375_v6  ;;  %v2498_v60 = vld [vmem:[%s3818_s19 + $0x470] sm:$0xff]  ;;  %v2499_v61 = vld [vmem:[%s3818_s19 + $0x478] sm:$0xff] }
 0x1d9   : > { %v2454_v46 = vmul.f32 %v2446_v16, %v2446_v16  ;;  %v2455_v41 = vmul.f32 %v2447_v19, %v2447_v19  ;;  %v2456_v47 = vmul.f32 %v2448_v20, %v2448_v20  ;;  %v2457_v42 = vmul.f32 %v2449_v17, %v2449_v17  ;;  %v2540_v25 = vld [vmem:[%s3812_s23 + $0x490] sm:$0xff]  ;;  %v2541_v26 = vld [vmem:[%s3812_s23 + $0x498] sm:$0xff] }
 0x1da   : > { %v2426_v18 = vadd.f32 %v2422_v37, %v2418_v33  ;;  %v2427_v52 = vadd.f32 %v2423_v23, %v2419_v34  ;;  %v2428_v53 = vadd.f32 %v2424_v39, %v2420_v35  ;;  %v2429_v54 = vadd.f32 %v2425_v38, %v2421_v31  ;;  %v2544_v37 = vld [vmem:[%s3812_s23 + $0x4b0] sm:$0xff]  ;;  %v2545_v23 = vld [vmem:[%s3812_s23 + $0x4b8] sm:$0xff]  ;;  %v2546_v39 = vld [vmem:[%s3818_s19 + $0x480] sm:$0xff] }
 0x1db   : > { %v2458_v62 = vmul.f32 %v2450_v21, %v2450_v21  ;;  %v2459_v56 = vmul.f32 %v2451_v27, %v2451_v27  ;;  %v2460_v0 = vmul.f32 %v2452_v28, %v2452_v28  ;;  %v2461_v59 = vmul.f32 %v2453_v29, %v2453_v29  ;;  %v2538_v21 = vld [vmem:[%s3812_s23 + $0x480] sm:$0xff]  ;;  %v2539_v27 = vld [vmem:[%s3812_s23 + $0x488] sm:$0xff] }
 0x1dc   : > { %v2463_v1 = vstv %s2462_s28  ;;  %v2500_v6 = vsub.f32 %v2484_v32, %v2492_v50  ;;  %v2501_v7 = vsub.f32 %v2485_v36, %v2493_v51  ;;  %v2502_v8 = vsub.f32 %v2486_v40, %v2494_v48  ;;  %v2542_v32 = vld [vmem:[%s3812_s23 + $0x4a0] sm:$0xff]  ;;  %v2543_v36 = vld [vmem:[%s3812_s23 + $0x4a8] sm:$0xff] }
 0x1dd   : > { %v2464_v2 = vadd.s32 %v2463_v1, %v4356_v14  ;;  %v2465_v3 = vadd.s32 %v2463_v1, %v4369_v24  ;;  %v2503_v4 = vsub.f32 %v2487_v44, %v2495_v57  ;;  %v2504_v5 = vsub.f32 %v2488_v45, %v2496_v58  ;;  %v2547_v38 = vld [vmem:[%s3818_s19 + $0x488] sm:$0xff] }
 0x1de   : > { %v2505_v11 = vsub.f32 %v2489_v43, %v2497_v63  ;;  %v2506_v12 = vsub.f32 %v2490_v49, %v2498_v60  ;;  %v2507_v13 = vsub.f32 %v2491_v55, %v2499_v61  ;;  %v2508_v9 = vmul.f32 %v2500_v6, %v2500_v6  ;;  %v2551_v48 = vld [vmem:[%s3818_s19 + $0x4a8] sm:$0xff] }
 0x1df   : > { %vm2466_vm0 = vcmp.lt.s32.totalorder %v2464_v2, 768  ;;  %vm2467_vm1 = vcmp.lt.s32.totalorder %v2465_v3, 768  ;;  %v2509_v10 = vmul.f32 %v2501_v7, %v2501_v7  ;;  %v2510_v15 = vmul.f32 %v2502_v8, %v2502_v8 }
 0x1e0   : > { %v2468_v16 = vsel %vm2466_vm0, %v2454_v46, 0.0  ;;  %v2469_v19 = vsel %vm2466_vm0, %v2455_v41, 0.0  ;;  %v2470_v20 = vsel %vm2466_vm0, %v2456_v47, 0.0  ;;  %v2471_v17 = vsel %vm2466_vm0, %v2457_v42, 0.0  ;;  %v2548_v41 = vld [vmem:[%s3818_s19 + $0x490] sm:$0xff]  ;;  %v2549_v47 = vld [vmem:[%s3818_s19 + $0x498] sm:$0xff] }
 0x1e1   : > { %v2472_v28 = vsel %vm2467_vm1, %v2458_v62, 0.0  ;;  %v2473_v29 = vsel %vm2467_vm1, %v2459_v56, 0.0  ;;  %v2474_v22 = vsel %vm2467_vm1, %v2460_v0, 0.0  ;;  %v2475_v30 = vsel %vm2467_vm1, %v2461_v59, 0.0  ;;  %v2550_v42 = vld [vmem:[%s3818_s19 + $0x4a0] sm:$0xff] }
 0x1e2   : > { %v2476_v33 = vadd.f32 %v2468_v16, %v2426_v18  ;;  %v2477_v34 = vadd.f32 %v2469_v19, %v2427_v52  ;;  %v2478_v35 = vadd.f32 %v2470_v20, %v2428_v53  ;;  %v2479_v31 = vadd.f32 %v2471_v17, %v2429_v54  ;;  %v2552_v18 = vld [vmem:[%s3818_s19 + $0x4b0] sm:$0xff]  ;;  %v2553_v52 = vld [vmem:[%s3818_s19 + $0x4b8] sm:$0xff]  ;;  %v2593_v16 = vld [vmem:[%s3812_s23 + $0x4c8] sm:$0xff] }
 0x1e3   : > { %v2511_v40 = vmul.f32 %v2503_v4, %v2503_v4  ;;  %v2512_v44 = vmul.f32 %v2504_v5, %v2504_v5  ;;  %v2513_v45 = vmul.f32 %v2505_v11, %v2505_v11  ;;  %v2514_v46 = vmul.f32 %v2506_v12, %v2506_v12  ;;  %v2592_v4 = vld [vmem:[%s3812_s23 + $0x4c0] sm:$0xff]  ;;  %v2594_v19 = vld [vmem:[%s3812_s23 + $0x4d0] sm:$0xff] }
 0x1e4   : > { %v2480_v43 = vadd.f32 %v2476_v33, %v2472_v28  ;;  %v2481_v49 = vadd.f32 %v2477_v34, %v2473_v29  ;;  %v2482_v50 = vadd.f32 %v2478_v35, %v2474_v22  ;;  %v2483_v51 = vadd.f32 %v2479_v31, %v2475_v30  ;;  %v2598_v28 = vld [vmem:[%s3812_s23 + $0x4f0] sm:$0xff]  ;;  %v2600_v29 = vld [vmem:[%s3818_s19 + $0x4c0] sm:$0xff]  ;;  %v2601_v33 = vld [vmem:[%s3818_s19 + $0x4c8] sm:$0xff] }
 0x1e5   : > { %v2515_v53 = vmul.f32 %v2507_v13, %v2507_v13  ;;  %v2517_v54 = vstv %s2516_s5  ;;  %v2554_v55 = vsub.f32 %v2538_v21, %v2546_v39  ;;  %v2555_v57 = vsub.f32 %v2539_v27, %v2547_v38  ;;  %v2596_v21 = vld [vmem:[%s3812_s23 + $0x4e0] sm:$0xff]  ;;  %v2597_v27 = vld [vmem:[%s3812_s23 + $0x4e8] sm:$0xff]  ;;  %v2602_v34 = vld [vmem:[%s3818_s19 + $0x4d0] sm:$0xff] }
 0x1e6   : > { %v2518_v58 = vadd.s32 %v2517_v54, %v4356_v14  ;;  %v2519_v62 = vadd.s32 %v2517_v54, %v4369_v24  ;;  %v2556_v56 = vsub.f32 %v2540_v25, %v2548_v41  ;;  %v2557_v0 = vsub.f32 %v2541_v26, %v2549_v47  ;;  %v2603_v35 = vld [vmem:[%s3818_s19 + $0x4d8] sm:$0xff]  ;;  %v2605_v39 = vld [vmem:[%s3818_s19 + $0x4e8] sm:$0xff]  ;;  %v2606_v38 = vld [vmem:[%s3818_s19 + $0x4f0] sm:$0xff] }
 0x1e7   : > { %v2558_v59 = vsub.f32 %v2542_v32, %v2550_v42  ;;  %v2559_v63 = vsub.f32 %v2543_v36, %v2551_v48  ;;  %v2560_v60 = vsub.f32 %v2544_v37, %v2552_v18  ;;  %v2561_v61 = vsub.f32 %v2545_v23, %v2553_v52  ;;  %v2604_v23 = vld [vmem:[%s3818_s19 + $0x4e0] sm:$0xff]  ;;  %v2607_v41 = vld [vmem:[%s3818_s19 + $0x4f8] sm:$0xff] }
 0x1e8   : > { %vm2520_vm2 = vcmp.lt.s32.totalorder %v2518_v58, 768  ;;  %vm2521_vm3 = vcmp.lt.s32.totalorder %v2519_v62, 768  ;;  %v2562_v1 = vmul.f32 %v2554_v55, %v2554_v55  ;;  %v2563_v6 = vmul.f32 %v2555_v57, %v2555_v57 }
 0x1e9   : > { %v2522_v7 = vsel %vm2520_vm2, %v2508_v9, 0.0  ;;  %v2523_v8 = vsel %vm2520_vm2, %v2509_v10, 0.0  ;;  %v2524_v2 = vsel %vm2520_vm2, %v2510_v15, 0.0  ;;  %v2525_v3 = vsel %vm2520_vm2, %v2511_v40, 0.0  ;;  %v2595_v15 = vld [vmem:[%s3812_s23 + $0x4d8] sm:$0xff] }
 0x1ea   : > { %v2526_v5 = vsel %vm2521_vm3, %v2512_v44, 0.0  ;;  %v2527_v11 = vsel %vm2521_vm3, %v2513_v45, 0.0  ;;  %v2528_v12 = vsel %vm2521_vm3, %v2514_v46, 0.0  ;;  %v2529_v13 = vsel %vm2521_vm3, %v2515_v53, 0.0  ;;  %v2599_v46 = vld [vmem:[%s3812_s23 + $0x4f8] sm:$0xff] }
 0x1eb   : > { %v2530_v20 = vadd.f32 %v2522_v7, %v2480_v43  ;;  %v2531_v9 = vadd.f32 %v2523_v8, %v2481_v49  ;;  %v2532_v17 = vadd.f32 %v2524_v2, %v2482_v50  ;;  %v2533_v10 = vadd.f32 %v2525_v3, %v2483_v51  ;;  %v2649_v3 = vld [vmem:[%s3812_s23 + $0x518] sm:$0xff] }
 0x1ec   : > { %v2564_v22 = vmul.f32 %v2556_v56, %v2556_v56  ;;  %v2565_v30 = vmul.f32 %v2557_v0, %v2557_v0  ;;  %v2566_v25 = vmul.f32 %v2558_v59, %v2558_v59  ;;  %v2567_v26 = vmul.f32 %v2559_v63, %v2559_v63 }
 0x1ed   : > { %v2534_v31 = vadd.f32 %v2530_v20, %v2526_v5  ;;  %v2535_v32 = vadd.f32 %v2531_v9, %v2527_v11  ;;  %v2536_v36 = vadd.f32 %v2532_v17, %v2528_v12  ;;  %v2537_v37 = vadd.f32 %v2533_v10, %v2529_v13  ;;  %v2651_v5 = vld [vmem:[%s3812_s23 + $0x528] sm:$0xff]  ;;  %v2654_v20 = vld [vmem:[%s3818_s19 + $0x500] sm:$0xff]  ;;  %v2656_v17 = vld [vmem:[%s3818_s19 + $0x510] sm:$0xff] }
 0x1ee   : > { %v2568_v40 = vmul.f32 %v2560_v60, %v2560_v60  ;;  %v2569_v44 = vmul.f32 %v2561_v61, %v2561_v61  ;;  %v2571_v45 = vstv %s2570_s9  ;;  %v2608_v47 = vsub.f32 %v2592_v4, %v2600_v29  ;;  %v2646_v60 = vld [vmem:[%s3812_s23 + $0x500] sm:$0xff]  ;;  %v2647_v61 = vld [vmem:[%s3812_s23 + $0x508] sm:$0xff] }
 0x1ef   : > { %v2572_v42 = vadd.s32 %v2571_v45, %v4356_v14  ;;  %v2573_v43 = vadd.s32 %v2571_v45, %v4369_v24  ;;  %v2609_v49 = vsub.f32 %v2593_v16, %v2601_v33  ;;  %v2610_v50 = vsub.f32 %v2594_v19, %v2602_v34  ;;  %v2650_v4 = vld [vmem:[%s3812_s23 + $0x520] sm:$0xff]  ;;  %v2652_v19 = vld [vmem:[%s3812_s23 + $0x530] sm:$0xff]  ;;  %v2655_v9 = vld [vmem:[%s3818_s19 + $0x508] sm:$0xff] }
 0x1f0   : > { %v2611_v51 = vsub.f32 %v2595_v15, %v2603_v35  ;;  %v2612_v48 = vsub.f32 %v2596_v21, %v2604_v23  ;;  %v2613_v18 = vsub.f32 %v2597_v27, %v2605_v39  ;;  %v2614_v52 = vsub.f32 %v2598_v28, %v2606_v38  ;;  %v2657_v28 = vld [vmem:[%s3818_s19 + $0x518] sm:$0xff]  ;;  %v2658_v29 = vld [vmem:[%s3818_s19 + $0x520] sm:$0xff]  ;;  %v2660_v35 = vld [vmem:[%s3818_s19 + $0x530] sm:$0xff] }
 0x1f1   : > { %vm2574_vm4 = vcmp.lt.s32.totalorder %v2572_v42, 768  ;;  %vm2575_vm5 = vcmp.lt.s32.totalorder %v2573_v43, 768  ;;  %v2615_v53 = vsub.f32 %v2599_v46, %v2607_v41  ;;  %v2616_v54 = vmul.f32 %v2608_v47, %v2608_v47  ;;  %v2653_v34 = vld [vmem:[%s3812_s23 + $0x538] sm:$0xff] }
 0x1f2   : > { %v2576_v55 = vsel %vm2574_vm4, %v2562_v1, 0.0  ;;  %v2577_v57 = vsel %vm2574_vm4, %v2563_v6, 0.0  ;;  %v2578_v58 = vsel %vm2574_vm4, %v2564_v22, 0.0  ;;  %v2579_v62 = vsel %vm2574_vm4, %v2565_v30, 0.0  ;;  %v2648_v6 = vld [vmem:[%s3812_s23 + $0x510] sm:$0xff]  ;;  %v2659_v22 = vld [vmem:[%s3818_s19 + $0x528] sm:$0xff] }
 0x1f3   : > { %v2580_v56 = vsel %vm2575_vm5, %v2566_v25, 0.0  ;;  %v2581_v0 = vsel %vm2575_vm5, %v2567_v26, 0.0  ;;  %v2582_v59 = vsel %vm2575_vm5, %v2568_v40, 0.0  ;;  %v2583_v63 = vsel %vm2575_vm5, %v2569_v44, 0.0 }
 0x1f4   : > { %v2584_v7 = vadd.f32 %v2576_v55, %v2534_v31  ;;  %v2585_v8 = vadd.f32 %v2577_v57, %v2535_v32  ;;  %v2586_v2 = vadd.f32 %v2578_v58, %v2536_v36  ;;  %v2587_v1 = vadd.f32 %v2579_v62, %v2537_v37  ;;  %v2661_v31 = vld [vmem:[%s3818_s19 + $0x538] sm:$0xff]  ;;  %v2700_v57 = vld [vmem:[%s3812_s23 + $0x540] sm:$0xff]  ;;  %v2702_v58 = vld [vmem:[%s3812_s23 + $0x550] sm:$0xff] }
 0x1f5   : > { %v2617_v11 = vmul.f32 %v2609_v49, %v2609_v49  ;;  %v2618_v12 = vmul.f32 %v2610_v50, %v2610_v50  ;;  %v2619_v13 = vmul.f32 %v2611_v51, %v2611_v51  ;;  %v2620_v16 = vmul.f32 %v2612_v48, %v2612_v48 }
 0x1f6   : > { %v2588_v10 = vadd.f32 %v2584_v7, %v2580_v56  ;;  %v2589_v15 = vadd.f32 %v2585_v8, %v2581_v0  ;;  %v2590_v21 = vadd.f32 %v2586_v2, %v2582_v59  ;;  %v2591_v27 = vadd.f32 %v2587_v1, %v2583_v63  ;;  %v2703_v0 = vld [vmem:[%s3812_s23 + $0x558] sm:$0xff]  ;;  %v2704_v59 = vld [vmem:[%s3812_s23 + $0x560] sm:$0xff]  ;;  %v2705_v63 = vld [vmem:[%s3812_s23 + $0x568] sm:$0xff] }
 0x1f7   : > { %v2621_v30 = vmul.f32 %v2613_v18, %v2613_v18  ;;  %v2622_v25 = vmul.f32 %v2614_v52, %v2614_v52  ;;  %v2623_v26 = vmul.f32 %v2615_v53, %v2615_v53  ;;  %v2625_v33 = vstv %s2624_s12 }
 0x1f8   : > { %v2626_v32 = vadd.s32 %v2625_v33, %v4356_v14  ;;  %v2627_v36 = vadd.s32 %v2625_v33, %v4369_v24  ;;  %v2662_v37 = vsub.f32 %v2646_v60, %v2654_v20  ;;  %v2663_v23 = vsub.f32 %v2647_v61, %v2655_v9  ;;  %v2706_v60 = vld [vmem:[%s3812_s23 + $0x570] sm:$0xff]  ;;  %v2708_v61 = vld [vmem:[%s3818_s19 + $0x540] sm:$0xff] }
 0x1f9   : > { %v2664_v39 = vsub.f32 %v2648_v6, %v2656_v17  ;;  %v2665_v38 = vsub.f32 %v2649_v3, %v2657_v28  ;;  %v2666_v40 = vsub.f32 %v2650_v4, %v2658_v29  ;;  %v2667_v44 = vsub.f32 %v2651_v5, %v2659_v22  ;;  %v2709_v6 = vld [vmem:[%s3818_s19 + $0x548] sm:$0xff]  ;;  %v2710_v3 = vld [vmem:[%s3818_s19 + $0x550] sm:$0xff]  ;;  %v2711_v4 = vld [vmem:[%s3818_s19 + $0x558] sm:$0xff] }
 0x1fa   : > { %vm2628_vm6 = vcmp.lt.s32.totalorder %v2626_v32, 768  ;;  %vm2629_vm7 = vcmp.lt.s32.totalorder %v2627_v36, 768  ;;  %v2668_v45 = vsub.f32 %v2652_v19, %v2660_v35  ;;  %v2669_v46 = vsub.f32 %v2653_v34, %v2661_v31  ;;  %v2713_v19 = vld [vmem:[%s3818_s19 + $0x568] sm:$0xff]  ;;  %v2714_v20 = vld [vmem:[%s3818_s19 + $0x570] sm:$0xff] }
 0x1fb   : > { %v2630_v41 = vsel %vm2628_vm6, %v2616_v54, 0.0  ;;  %v2631_v47 = vsel %vm2628_vm6, %v2617_v11, 0.0  ;;  %v2632_v42 = vsel %vm2628_vm6, %v2618_v12, 0.0  ;;  %v2633_v43 = vsel %vm2628_vm6, %v2619_v13, 0.0  ;;  %v2701_v54 = vld [vmem:[%s3812_s23 + $0x548] sm:$0xff] }
 0x1fc   : > { %v2634_v49 = vsel %vm2629_vm7, %v2620_v16, 0.0  ;;  %v2635_v50 = vsel %vm2629_vm7, %v2621_v30, 0.0  ;;  %v2636_v51 = vsel %vm2629_vm7, %v2622_v25, 0.0  ;;  %v2637_v48 = vsel %vm2629_vm7, %v2623_v26, 0.0  ;;  %v2712_v16 = vld [vmem:[%s3818_s19 + $0x560] sm:$0xff] }
 0x1fd   : > { %v2638_v18 = vadd.f32 %v2630_v41, %v2588_v10  ;;  %v2639_v52 = vadd.f32 %v2631_v47, %v2589_v15  ;;  %v2640_v53 = vadd.f32 %v2632_v42, %v2590_v21  ;;  %v2641_v55 = vadd.f32 %v2633_v43, %v2591_v27  ;;  %v2707_v15 = vld [vmem:[%s3812_s23 + $0x578] sm:$0xff] }
 0x1fe   : > { %v2670_v62 = vmul.f32 %v2662_v37, %v2662_v37  ;;  %v2671_v56 = vmul.f32 %v2663_v23, %v2663_v23  ;;  %v2672_v2 = vmul.f32 %v2664_v39, %v2664_v39  ;;  %v2673_v1 = vmul.f32 %v2665_v38, %v2665_v38  ;;  %v2715_v21 = vld [vmem:[%s3818_s19 + $0x578] sm:$0xff] }
 0x1ff   : > { %v2642_v7 = vadd.f32 %v2638_v18, %v2634_v49  ;;  %v2643_v8 = vadd.f32 %v2639_v52, %v2635_v50  ;;  %v2644_v5 = vadd.f32 %v2640_v53, %v2636_v51  ;;  %v2645_v11 = vadd.f32 %v2641_v55, %v2637_v48  ;;  %v2756_v49 = vld [vmem:[%s3812_s23 + $0x590] sm:$0xff]  ;;  %v2757_v50 = vld [vmem:[%s3812_s23 + $0x598] sm:$0xff]  ;;  %v2758_v51 = vld [vmem:[%s3812_s23 + $0x5a0] sm:$0xff] }
 0x200   : > { %v2674_v12 = vmul.f32 %v2666_v40, %v2666_v40  ;;  %v2675_v13 = vmul.f32 %v2667_v44, %v2667_v44  ;;  %v2676_v9 = vmul.f32 %v2668_v45, %v2668_v45  ;;  %v2677_v17 = vmul.f32 %v2669_v46, %v2669_v46  ;;  %v2754_v45 = vld [vmem:[%s3812_s23 + $0x580] sm:$0xff]  ;;  %v2755_v46 = vld [vmem:[%s3812_s23 + $0x588] sm:$0xff] }
 0x201   : > { %v2679_v10 = vstv %s2678_s20  ;;  %v2716_v27 = vsub.f32 %v2700_v57, %v2708_v61  ;;  %v2717_v22 = vsub.f32 %v2701_v54, %v2709_v6  ;;  %v2718_v30 = vsub.f32 %v2702_v58, %v2710_v3  ;;  %v2759_v48 = vld [vmem:[%s3812_s23 + $0x5a8] sm:$0xff]  ;;  %v2760_v57 = vld [vmem:[%s3812_s23 + $0x5b0] sm:$0xff]  ;;  %v2762_v54 = vld [vmem:[%s3818_s19 + $0x580] sm:$0xff] }
 0x202   : > { %v2680_v28 = vadd.s32 %v2679_v10, %v4356_v14  ;;  %v2681_v29 = vadd.s32 %v2679_v10, %v4369_v24  ;;  %v2719_v25 = vsub.f32 %v2703_v0, %v2711_v4  ;;  %v2720_v26 = vsub.f32 %v2704_v59, %v2712_v16  ;;  %v2763_v58 = vld [vmem:[%s3818_s19 + $0x588] sm:$0xff]  ;;  %v2766_v61 = vld [vmem:[%s3818_s19 + $0x5a0] sm:$0xff]  ;;  %v2761_v3 = vld [vmem:[%s3812_s23 + $0x5b8] sm:$0xff] }
 0x203   : > { %v2721_v33 = vsub.f32 %v2705_v63, %v2713_v19  ;;  %v2722_v34 = vsub.f32 %v2706_v60, %v2714_v20  ;;  %v2723_v35 = vsub.f32 %v2707_v15, %v2715_v21  ;;  %v2724_v31 = vmul.f32 %v2716_v27, %v2716_v27  ;;  %v2765_v60 = vld [vmem:[%s3818_s19 + $0x598] sm:$0xff]  ;;  %v2768_v4 = vld [vmem:[%s3818_s19 + $0x5b0] sm:$0xff] }
 0x204   : > { %vm2682_vm8 = vcmp.lt.s32.totalorder %v2680_v28, 768  ;;  %vm2683_vm9 = vcmp.lt.s32.totalorder %v2681_v29, 768  ;;  %v2725_v18 = vmul.f32 %v2717_v22, %v2717_v22  ;;  %v2726_v52 = vmul.f32 %v2718_v30, %v2718_v30 }
 0x205   : > { %v2684_v32 = vsel %vm2682_vm8, %v2670_v62, 0.0  ;;  %v2685_v36 = vsel %vm2682_vm8, %v2671_v56, 0.0  ;;  %v2686_v37 = vsel %vm2682_vm8, %v2672_v2, 0.0  ;;  %v2687_v23 = vsel %vm2682_vm8, %v2673_v1, 0.0  ;;  %v2764_v62 = vld [vmem:[%s3818_s19 + $0x590] sm:$0xff] }
 0x206   : > { %v2688_v39 = vsel %vm2683_vm9, %v2674_v12, 0.0  ;;  %v2689_v38 = vsel %vm2683_vm9, %v2675_v13, 0.0  ;;  %v2690_v40 = vsel %vm2683_vm9, %v2676_v9, 0.0  ;;  %v2691_v44 = vsel %vm2683_vm9, %v2677_v17, 0.0 }
 0x207   : > { %v2692_v41 = vadd.f32 %v2684_v32, %v2642_v7  ;;  %v2693_v47 = vadd.f32 %v2685_v36, %v2643_v8  ;;  %v2694_v42 = vadd.f32 %v2686_v37, %v2644_v5  ;;  %v2695_v43 = vadd.f32 %v2687_v23, %v2645_v11  ;;  %v2767_v7 = vld [vmem:[%s3818_s19 + $0x5a8] sm:$0xff]  ;;  %v2769_v5 = vld [vmem:[%s3818_s19 + $0x5b8] sm:$0xff]  ;;  %v2810_v37 = vld [vmem:[%s3812_s23 + $0x5d0] sm:$0xff] }
 0x208   : > { %v2727_v53 = vmul.f32 %v2719_v25, %v2719_v25  ;;  %v2728_v55 = vmul.f32 %v2720_v26, %v2720_v26  ;;  %v2729_v59 = vmul.f32 %v2721_v33, %v2721_v33  ;;  %v2730_v63 = vmul.f32 %v2722_v34, %v2722_v34  ;;  %v2808_v33 = vld [vmem:[%s3812_s23 + $0x5c0] sm:$0xff]  ;;  %v2811_v23 = vld [vmem:[%s3812_s23 + $0x5d8] sm:$0xff] }
 0x209   : > { %v2696_v56 = vadd.f32 %v2692_v41, %v2688_v39  ;;  %v2697_v0 = vadd.f32 %v2693_v47, %v2689_v38  ;;  %v2698_v8 = vadd.f32 %v2694_v42, %v2690_v40  ;;  %v2699_v2 = vadd.f32 %v2695_v43, %v2691_v44  ;;  %v2812_v39 = vld [vmem:[%s3812_s23 + $0x5e0] sm:$0xff]  ;;  %v2817_v47 = vld [vmem:[%s3818_s19 + $0x5c8] sm:$0xff] }
 0x20a   : > { %v2731_v1 = vmul.f32 %v2723_v35, %v2723_v35  ;;  %v2733_v6 = vstv %s2732_s22  ;;  %v2770_v13 = vsub.f32 %v2754_v45, %v2762_v54  ;;  %v2771_v16 = vsub.f32 %v2755_v46, %v2763_v58  ;;  %v2813_v46 = vld [vmem:[%s3812_s23 + $0x5e8] sm:$0xff]  ;;  %v2816_v41 = vld [vmem:[%s3818_s19 + $0x5c0] sm:$0xff]  ;;  %v2814_v54 = vld [vmem:[%s3812_s23 + $0x5f0] sm:$0xff] }
 0x20b   : > { %v2734_v11 = vadd.s32 %v2733_v6, %v4356_v14  ;;  %v2735_v12 = vadd.s32 %v2733_v6, %v4369_v24  ;;  %v2772_v19 = vsub.f32 %v2756_v49, %v2764_v62  ;;  %v2773_v20 = vsub.f32 %v2757_v50, %v2765_v60  ;;  %v2821_v58 = vld [vmem:[%s3818_s19 + $0x5e8] sm:$0xff]  ;;  %v2822_v62 = vld [vmem:[%s3818_s19 + $0x5f0] sm:$0xff] }
 0x20c   : > { %v2774_v9 = vsub.f32 %v2758_v51, %v2766_v61  ;;  %v2775_v17 = vsub.f32 %v2759_v48, %v2767_v7  ;;  %v2776_v10 = vsub.f32 %v2760_v57, %v2768_v4  ;;  %v2777_v15 = vsub.f32 %v2761_v3, %v2769_v5  ;;  %v2818_v51 = vld [vmem:[%s3818_s19 + $0x5d0] sm:$0xff]  ;;  %v2819_v48 = vld [vmem:[%s3818_s19 + $0x5d8] sm:$0xff] }
 0x20d   : > { %vm2736_vm10 = vcmp.lt.s32.totalorder %v2734_v11, 768  ;;  %vm2737_vm11 = vcmp.lt.s32.totalorder %v2735_v12, 768  ;;  %v2778_v38 = vmul.f32 %v2770_v13, %v2770_v13  ;;  %v2779_v40 = vmul.f32 %v2771_v16, %v2771_v16  ;;  %v2815_v11 = vld [vmem:[%s3812_s23 + $0x5f8] sm:$0xff] }
 0x20e   : > { %v2738_v21 = vsel %vm2736_vm10, %v2724_v31, 0.0  ;;  %v2739_v27 = vsel %vm2736_vm10, %v2725_v18, 0.0  ;;  %v2740_v28 = vsel %vm2736_vm10, %v2726_v52, 0.0  ;;  %v2741_v29 = vsel %vm2736_vm10, %v2727_v53, 0.0  ;;  %v2809_v31 = vld [vmem:[%s3812_s23 + $0x5c8] sm:$0xff]  ;;  %v2820_v18 = vld [vmem:[%s3818_s19 + $0x5e0] sm:$0xff] }
 0x20f   : > { %v2742_v22 = vsel %vm2737_vm11, %v2728_v55, 0.0  ;;  %v2743_v30 = vsel %vm2737_vm11, %v2729_v59, 0.0  ;;  %v2744_v25 = vsel %vm2737_vm11, %v2730_v63, 0.0  ;;  %v2745_v26 = vsel %vm2737_vm11, %v2731_v1, 0.0  ;;  %v2823_v12 = vld [vmem:[%s3818_s19 + $0x5f8] sm:$0xff] }
 0x210   : > { %v2746_v34 = vadd.f32 %v2738_v21, %v2696_v56  ;;  %v2747_v35 = vadd.f32 %v2739_v27, %v2697_v0  ;;  %v2748_v32 = vadd.f32 %v2740_v28, %v2698_v8  ;;  %v2749_v36 = vadd.f32 %v2741_v29, %v2699_v2  ;;  %v2862_v21 = vld [vmem:[%s3812_s23 + $0x600] sm:$0xff] }
 0x211   : > { %v2780_v44 = vmul.f32 %v2772_v19, %v2772_v19  ;;  %v2781_v45 = vmul.f32 %v2773_v20, %v2773_v20  ;;  %v2782_v49 = vmul.f32 %v2774_v9, %v2774_v9  ;;  %v2783_v50 = vmul.f32 %v2775_v17, %v2775_v17 }
 0x212   : > { %v2750_v42 = vadd.f32 %v2746_v34, %v2742_v22  ;;  %v2751_v43 = vadd.f32 %v2747_v35, %v2743_v30  ;;  %v2752_v52 = vadd.f32 %v2748_v32, %v2744_v25  ;;  %v2753_v53 = vadd.f32 %v2749_v36, %v2745_v26  ;;  %v2863_v22 = vld [vmem:[%s3812_s23 + $0x608] sm:$0xff]  ;;  %v2864_v30 = vld [vmem:[%s3812_s23 + $0x610] sm:$0xff]  ;;  %v2865_v25 = vld [vmem:[%s3812_s23 + $0x618] sm:$0xff] }
 0x213   : > { %v2784_v55 = vmul.f32 %v2776_v10, %v2776_v10  ;;  %v2787_v57 = vstv %s2786_s24  ;;  %v2785_v56 = vmul.f32 %v2777_v15, %v2777_v15  ;;  %v2824_v63 = vsub.f32 %v2808_v33, %v2816_v41  ;;  %v2870_v32 = vld [vmem:[%s3818_s19 + $0x600] sm:$0xff]  ;;  %v2871_v36 = vld [vmem:[%s3818_s19 + $0x608] sm:$0xff] }
 0x214   : > { %v2788_v0 = vadd.s32 %v2787_v57, %v4356_v14  ;;  %v2789_v59 = vadd.s32 %v2787_v57, %v4369_v24  ;;  %v2825_v60 = vsub.f32 %v2809_v31, %v2817_v47  ;;  %v2826_v61 = vsub.f32 %v2810_v37, %v2818_v51  ;;  %v2872_v31 = vld [vmem:[%s3818_s19 + $0x610] sm:$0xff] }
 0x215   : > { %v2827_v7 = vsub.f32 %v2811_v23, %v2819_v48  ;;  %v2828_v8 = vsub.f32 %v2812_v39, %v2820_v18  ;;  %v2829_v2 = vsub.f32 %v2813_v46, %v2821_v58  ;;  %v2830_v1 = vsub.f32 %v2814_v54, %v2822_v62 }
 0x216   : > { %vm2790_vm12 = vcmp.lt.s32.totalorder %v2788_v0, 768  ;;  %vm2791_vm13 = vcmp.lt.s32.totalorder %v2789_v59, 768  ;;  %v2831_v27 = vsub.f32 %v2815_v11, %v2823_v12  ;;  %v2832_v28 = vmul.f32 %v2824_v63, %v2824_v63  ;;  %v2876_v0 = vld [vmem:[%s3818_s19 + $0x630] sm:$0xff]  ;;  %v2877_v59 = vld [vmem:[%s3818_s19 + $0x638] sm:$0xff]  ;;  %v2916_v11 = vld [vmem:[%s3812_s23 + $0x640] sm:$0xff] }
 0x217   : > { %v2792_v6 = vsel %vm2790_vm12, %v2778_v38, 0.0  ;;  %v2793_v3 = vsel %vm2790_vm12, %v2779_v40, 0.0  ;;  %v2794_v4 = vsel %vm2790_vm12, %v2780_v44, 0.0  ;;  %v2795_v5 = vsel %vm2790_vm12, %v2781_v45, 0.0  ;;  %v2866_v40 = vld [vmem:[%s3812_s23 + $0x620] sm:$0xff]  ;;  %v2873_v44 = vld [vmem:[%s3818_s19 + $0x618] sm:$0xff] }
 0x218   : > { %v2796_v13 = vsel %vm2791_vm13, %v2782_v49, 0.0  ;;  %v2797_v16 = vsel %vm2791_vm13, %v2783_v50, 0.0  ;;  %v2798_v19 = vsel %vm2791_vm13, %v2784_v55, 0.0  ;;  %v2799_v20 = vsel %vm2791_vm13, %v2785_v56, 0.0  ;;  %v2874_v45 = vld [vmem:[%s3818_s19 + $0x620] sm:$0xff]  ;;  %v2867_v49 = vld [vmem:[%s3812_s23 + $0x628] sm:$0xff] }
 0x219   : > { %v2800_v9 = vadd.f32 %v2792_v6, %v2750_v42  ;;  %v2801_v17 = vadd.f32 %v2793_v3, %v2751_v43  ;;  %v2802_v10 = vadd.f32 %v2794_v4, %v2752_v52  ;;  %v2803_v15 = vadd.f32 %v2795_v5, %v2753_v53  ;;  %v2875_v50 = vld [vmem:[%s3818_s19 + $0x628] sm:$0xff]  ;;  %v2868_v52 = vld [vmem:[%s3812_s23 + $0x630] sm:$0xff]  ;;  %v2869_v53 = vld [vmem:[%s3812_s23 + $0x638] sm:$0xff] }
 0x21a   : > { %v2833_v29 = vmul.f32 %v2825_v60, %v2825_v60  ;;  %v2834_v33 = vmul.f32 %v2826_v61, %v2826_v61  ;;  %v2835_v34 = vmul.f32 %v2827_v7, %v2827_v7  ;;  %v2836_v35 = vmul.f32 %v2828_v8, %v2828_v8  ;;  %v2917_v12 = vld [vmem:[%s3812_s23 + $0x648] sm:$0xff] }
 0x21b   : > { %v2804_v26 = vadd.f32 %v2800_v9, %v2796_v13  ;;  %v2805_v37 = vadd.f32 %v2801_v17, %v2797_v16  ;;  %v2806_v23 = vadd.f32 %v2802_v10, %v2798_v19  ;;  %v2807_v39 = vadd.f32 %v2803_v15, %v2799_v20  ;;  %v2918_v13 = vld [vmem:[%s3812_s23 + $0x650] sm:$0xff]  ;;  %v2919_v9 = vld [vmem:[%s3812_s23 + $0x658] sm:$0xff]  ;;  %v2920_v17 = vld [vmem:[%s3812_s23 + $0x660] sm:$0xff] }
 0x21c   : > { %v2841_v38 = vstv %s2840_s25  ;;  %v2837_v46 = vmul.f32 %v2829_v2, %v2829_v2  ;;  %v2838_v41 = vmul.f32 %v2830_v1, %v2830_v1  ;;  %v2839_v43 = vmul.f32 %v2831_v27, %v2831_v27  ;;  %v2924_v10 = vld [vmem:[%s3818_s19 + $0x640] sm:$0xff] }
 0x21d   : > { %v2842_v47 = vadd.s32 %v2841_v38, %v4356_v14  ;;  %v2843_v42 = vadd.s32 %v2841_v38, %v4369_v24  ;;  %v2878_v51 = vsub.f32 %v2862_v21, %v2870_v32  ;;  %v2879_v48 = vsub.f32 %v2863_v22, %v2871_v36  ;;  %v2926_v22 = vld [vmem:[%s3818_s19 + $0x650] sm:$0xff]  ;;  %v2928_v32 = vld [vmem:[%s3818_s19 + $0x660] sm:$0xff]  ;;  %v2929_v36 = vld [vmem:[%s3818_s19 + $0x668] sm:$0xff] }
 0x21e   : > { %v2880_v18 = vsub.f32 %v2864_v30, %v2872_v31  ;;  %v2881_v55 = vsub.f32 %v2865_v25, %v2873_v44  ;;  %v2882_v57 = vsub.f32 %v2866_v40, %v2874_v45  ;;  %v2883_v7 = vsub.f32 %v2867_v49, %v2875_v50  ;;  %v2927_v30 = vld [vmem:[%s3818_s19 + $0x658] sm:$0xff]  ;;  %v2922_v38 = vld [vmem:[%s3812_s23 + $0x670] sm:$0xff] }
 0x21f   : > { %vm2844_vm14 = vcmp.lt.s32.totalorder %v2842_v47, 768  ;;  %vm2845_vm15 = vcmp.lt.s32.totalorder %v2843_v42, 768  ;;  %v2884_v4 = vsub.f32 %v2868_v52, %v2876_v0  ;;  %v2885_v5 = vsub.f32 %v2869_v53, %v2877_v59  ;;  %v2923_v40 = vld [vmem:[%s3812_s23 + $0x678] sm:$0xff]  ;;  %v2930_v44 = vld [vmem:[%s3818_s19 + $0x670] sm:$0xff]  ;;  %v2970_v0 = vld [vmem:[%s3812_s23 + $0x680] sm:$0xff] }
 0x220   : > { %v2846_v54 = vsel %vm2844_vm14, %v2832_v28, 0.0  ;;  %v2847_v58 = vsel %vm2844_vm14, %v2833_v29, 0.0  ;;  %v2848_v62 = vsel %vm2844_vm14, %v2834_v33, 0.0  ;;  %v2849_v56 = vsel %vm2844_vm14, %v2835_v34, 0.0  ;;  %v2925_v29 = vld [vmem:[%s3818_s19 + $0x648] sm:$0xff]  ;;  %v2931_v45 = vld [vmem:[%s3818_s19 + $0x678] sm:$0xff] }
 0x221   : > { %v2850_v63 = vsel %vm2845_vm15, %v2836_v35, 0.0  ;;  %v2851_v60 = vsel %vm2845_vm15, %v2837_v46, 0.0  ;;  %v2852_v61 = vsel %vm2845_vm15, %v2838_v41, 0.0  ;;  %v2854_v8 = vadd.f32 %v2846_v54, %v2804_v26  ;;  %v2921_v35 = vld [vmem:[%s3812_s23 + $0x668] sm:$0xff] }
 0x222   : > { %v2855_v2 = vadd.f32 %v2847_v58, %v2805_v37  ;;  %v2856_v1 = vadd.f32 %v2848_v62, %v2806_v23  ;;  %v2857_v6 = vadd.f32 %v2849_v56, %v2807_v39  ;;  %v2853_v3 = vsel %vm2845_vm15, %v2839_v43, 0.0 }
 0x223   : > { %v2886_v16 = vmul.f32 %v2878_v51, %v2878_v51  ;;  %v2887_v19 = vmul.f32 %v2879_v48, %v2879_v48  ;;  %v2888_v20 = vmul.f32 %v2880_v18, %v2880_v18  ;;  %v2858_v15 = vadd.f32 %v2854_v8, %v2850_v63  ;;  %v2972_v8 = vld [vmem:[%s3812_s23 + $0x690] sm:$0xff] }
 0x224   : > { %v2859_v21 = vadd.f32 %v2855_v2, %v2851_v60  ;;  %v2860_v27 = vadd.f32 %v2856_v1, %v2852_v61  ;;  %v2889_v28 = vmul.f32 %v2881_v55, %v2881_v55  ;;  %v2861_v25 = vadd.f32 %v2857_v6, %v2853_v3  ;;  %v2973_v2 = vld [vmem:[%s3812_s23 + $0x698] sm:$0xff] }
 0x225   : > { %v2890_v26 = vmul.f32 %v2882_v57, %v2882_v57  ;;  %v2891_v33 = vmul.f32 %v2883_v7, %v2883_v7  ;;  %v2895_v34 = vstv %s2894_s27  ;;  %v2892_v31 = vmul.f32 %v2884_v4, %v2884_v4  ;;  %v2971_v7 = vld [vmem:[%s3812_s23 + $0x688] sm:$0xff] }
 0x226   : > { %v2893_v37 = vmul.f32 %v2885_v5, %v2885_v5  ;;  %v2896_v23 = vadd.s32 %v2895_v34, %v4356_v14  ;;  %v2897_v39 = vadd.s32 %v2895_v34, %v4369_v24  ;;  %v2932_v46 = vsub.f32 %v2916_v11, %v2924_v10  ;;  %v2978_v5 = vld [vmem:[%s3818_s19 + $0x680] sm:$0xff]  ;;  %v2979_v11 = vld [vmem:[%s3818_s19 + $0x688] sm:$0xff] }
 0x227   : > { %v2933_v41 = vsub.f32 %v2917_v12, %v2925_v29  ;;  %v2934_v47 = vsub.f32 %v2918_v13, %v2926_v22  ;;  %v2935_v42 = vsub.f32 %v2919_v9, %v2927_v30  ;;  %v2936_v43 = vsub.f32 %v2920_v17, %v2928_v32  ;;  %v2980_v12 = vld [vmem:[%s3818_s19 + $0x690] sm:$0xff]  ;;  %v2974_v9 = vld [vmem:[%s3812_s23 + $0x6a0] sm:$0xff]  ;;  %v2981_v17 = vld [vmem:[%s3818_s19 + $0x698] sm:$0xff] }
 0x228   : > { %vm2898_vm0 = vcmp.lt.s32.totalorder %v2896_v23, 768  ;;  %vm2899_vm1 = vcmp.lt.s32.totalorder %v2897_v39, 768  ;;  %v2937_v49 = vsub.f32 %v2921_v35, %v2929_v36  ;;  %v2938_v55 = vsub.f32 %v2922_v38, %v2930_v44  ;;  %v2982_v10 = vld [vmem:[%s3818_s19 + $0x6a0] sm:$0xff]  ;;  %v2975_v29 = vld [vmem:[%s3812_s23 + $0x6a8] sm:$0xff]  ;;  %v2976_v30 = vld [vmem:[%s3812_s23 + $0x6b0] sm:$0xff] }
 0x229   : > { %v2900_v50 = vsel %vm2898_vm0, %v2886_v16, 0.0  ;;  %v2901_v51 = vsel %vm2898_vm0, %v2887_v19, 0.0  ;;  %v2902_v48 = vsel %vm2898_vm0, %v2888_v20, 0.0  ;;  %v2903_v18 = vsel %vm2898_vm0, %v2889_v28, 0.0  ;;  %v2977_v38 = vld [vmem:[%s3812_s23 + $0x6b8] sm:$0xff] }
 0x22a   : > { %v2904_v52 = vsel %vm2899_vm1, %v2890_v26, 0.0  ;;  %v2905_v53 = vsel %vm2899_vm1, %v2891_v33, 0.0  ;;  %v2939_v57 = vsub.f32 %v2923_v40, %v2931_v45  ;;  %v2908_v54 = vadd.f32 %v2900_v50, %v2858_v15  ;;  %v2984_v26 = vld [vmem:[%s3818_s19 + $0x6b0] sm:$0xff]  ;;  %v2985_v40 = vld [vmem:[%s3818_s19 + $0x6b8] sm:$0xff] }
 0x22b   : > { %v2909_v58 = vadd.f32 %v2901_v51, %v2859_v21  ;;  %v2910_v62 = vadd.f32 %v2902_v48, %v2860_v27  ;;  %v2911_v56 = vadd.f32 %v2903_v18, %v2861_v25  ;;  %v2906_v59 = vsel %vm2899_vm1, %v2892_v31, 0.0  ;;  %v2983_v25 = vld [vmem:[%s3818_s19 + $0x6a8] sm:$0xff] }
 0x22c   : > { %v2907_v63 = vsel %vm2899_vm1, %v2893_v37, 0.0  ;;  %v2940_v60 = vmul.f32 %v2932_v46, %v2932_v46  ;;  %v2941_v61 = vmul.f32 %v2933_v41, %v2933_v41  ;;  %v2942_v1 = vmul.f32 %v2934_v47, %v2934_v47 }
 0x22d   : > { %v2943_v6 = vmul.f32 %v2935_v42, %v2935_v42  ;;  %v2944_v3 = vmul.f32 %v2936_v43, %v2936_v43  ;;  %v2945_v4 = vmul.f32 %v2937_v49, %v2937_v49  ;;  %v2912_v13 = vadd.f32 %v2908_v54, %v2904_v52  ;;  %v3024_v52 = vld [vmem:[%s3812_s23 + $0x6c0] sm:$0xff] }
 0x22e   : > { %v2913_v16 = vadd.f32 %v2909_v58, %v2905_v53  ;;  %v2946_v19 = vmul.f32 %v2938_v55, %v2938_v55  ;;  %v2949_v20 = vstv %s2948_s29  ;;  %v2914_v15 = vadd.f32 %v2910_v62, %v2906_v59  ;;  %v3025_v53 = vld [vmem:[%s3812_s23 + $0x6c8] sm:$0xff]  ;;  %v3026_v62 = vld [vmem:[%s3812_s23 + $0x6d0] sm:$0xff] }
 0x22f   : > { %v2915_v21 = vadd.f32 %v2911_v56, %v2907_v63  ;;  %v2950_v27 = vadd.s32 %v2949_v20, %v4356_v14  ;;  %v2951_v28 = vadd.s32 %v2949_v20, %v4369_v24  ;;  %v2947_v22 = vmul.f32 %v2939_v57, %v2939_v57  ;;  %v3032_v56 = vld [vmem:[%s3818_s19 + $0x6c0] sm:$0xff]  ;;  %v3037_v20 = vld [vmem:[%s3818_s19 + $0x6e8] sm:$0xff] }
 0x230   : > { %v2986_v33 = vsub.f32 %v2970_v0, %v2978_v5  ;;  %v2987_v34 = vsub.f32 %v2971_v7, %v2979_v11  ;;  %v2988_v35 = vsub.f32 %v2972_v8, %v2980_v12  ;;  %v2989_v32 = vsub.f32 %v2973_v2, %v2981_v17  ;;  %v3033_v0 = vld [vmem:[%s3818_s19 + $0x6c8] sm:$0xff]  ;;  %v3027_v7 = vld [vmem:[%s3812_s23 + $0x6d8] sm:$0xff]  ;;  %v3034_v8 = vld [vmem:[%s3818_s19 + $0x6d0] sm:$0xff] }
 0x231   : > { %vm2952_vm2 = vcmp.lt.s32.totalorder %v2950_v27, 768  ;;  %vm2953_vm3 = vcmp.lt.s32.totalorder %v2951_v28, 768  ;;  %v2990_v36 = vsub.f32 %v2974_v9, %v2982_v10  ;;  %v2991_v46 = vsub.f32 %v2975_v29, %v2983_v25  ;;  %v3035_v2 = vld [vmem:[%s3818_s19 + $0x6d8] sm:$0xff]  ;;  %v3028_v5 = vld [vmem:[%s3812_s23 + $0x6e0] sm:$0xff]  ;;  %v3029_v11 = vld [vmem:[%s3812_s23 + $0x6e8] sm:$0xff] }
 0x232   : > { %v2954_v31 = vsel %vm2952_vm2, %v2940_v60, 0.0  ;;  %v2955_v37 = vsel %vm2952_vm2, %v2941_v61, 0.0  ;;  %v2956_v23 = vsel %vm2952_vm2, %v2942_v1, 0.0  ;;  %v2957_v39 = vsel %vm2952_vm2, %v2943_v6, 0.0  ;;  %v3030_v12 = vld [vmem:[%s3812_s23 + $0x6f0] sm:$0xff]  ;;  %v3039_v25 = vld [vmem:[%s3818_s19 + $0x6f8] sm:$0xff] }
 0x233   : > { %v2958_v44 = vsel %vm2953_vm3, %v2944_v3, 0.0  ;;  %v2959_v45 = vsel %vm2953_vm3, %v2945_v4, 0.0  ;;  %v2992_v41 = vsub.f32 %v2976_v30, %v2984_v26  ;;  %v2962_v47 = vadd.f32 %v2954_v31, %v2912_v13  ;;  %v3038_v9 = vld [vmem:[%s3818_s19 + $0x6f0] sm:$0xff]  ;;  %v3031_v30 = vld [vmem:[%s3812_s23 + $0x6f8] sm:$0xff] }
 0x234   : > { %v2963_v42 = vadd.f32 %v2955_v37, %v2913_v16  ;;  %v2964_v43 = vadd.f32 %v2956_v23, %v2914_v15  ;;  %v2965_v49 = vadd.f32 %v2957_v39, %v2915_v21  ;;  %v2960_v50 = vsel %vm2953_vm3, %v2946_v19, 0.0  ;;  %v3036_v19 = vld [vmem:[%s3818_s19 + $0x6e0] sm:$0xff] }
 0x235   : > { %v2961_v51 = vsel %vm2953_vm3, %v2947_v22, 0.0  ;;  %v2993_v48 = vsub.f32 %v2977_v38, %v2985_v40  ;;  %v2994_v18 = vmul.f32 %v2986_v33, %v2986_v33  ;;  %v2995_v55 = vmul.f32 %v2987_v34, %v2987_v34 }
 0x236   : > { %v2996_v57 = vmul.f32 %v2988_v35, %v2988_v35  ;;  %v2997_v54 = vmul.f32 %v2989_v32, %v2989_v32  ;;  %v2998_v58 = vmul.f32 %v2990_v36, %v2990_v36  ;;  %v2966_v59 = vadd.f32 %v2962_v47, %v2958_v44  ;;  %v3078_v47 = vld [vmem:[%s3812_s23 + $0x700] sm:$0xff] }
 0x237   : > { %v2967_v63 = vadd.f32 %v2963_v42, %v2959_v45  ;;  %v2999_v60 = vmul.f32 %v2991_v46, %v2991_v46  ;;  %v3003_v61 = vstv %s3002_s30  ;;  %v2968_v1 = vadd.f32 %v2964_v43, %v2960_v50  ;;  %v3079_v42 = vld [vmem:[%s3812_s23 + $0x708] sm:$0xff]  ;;  %v3086_v43 = vld [vmem:[%s3818_s19 + $0x700] sm:$0xff] }
 0x238   : > { %v2969_v6 = vadd.f32 %v2965_v49, %v2961_v51  ;;  %v3004_v3 = vadd.s32 %v3003_v61, %v4356_v14  ;;  %v3005_v4 = vadd.s32 %v3003_v61, %v4369_v24  ;;  %v3000_v13 = vmul.f32 %v2992_v41, %v2992_v41  ;;  %v3090_v61 = vld [vmem:[%s3818_s19 + $0x720] sm:$0xff] }
 0x239   : > { %v3001_v16 = vmul.f32 %v2993_v48, %v2993_v48  ;;  %v3040_v17 = vsub.f32 %v3024_v52, %v3032_v56  ;;  %v3041_v10 = vsub.f32 %v3025_v53, %v3033_v0  ;;  %v3042_v15 = vsub.f32 %v3026_v62, %v3034_v8  ;;  %v3087_v52 = vld [vmem:[%s3818_s19 + $0x708] sm:$0xff]  ;;  %v3088_v53 = vld [vmem:[%s3818_s19 + $0x710] sm:$0xff]  ;;  %v3081_v62 = vld [vmem:[%s3812_s23 + $0x718] sm:$0xff] }
 0x23a   : > { %vm3006_vm4 = vcmp.lt.s32.totalorder %v3004_v3, 768  ;;  %vm3007_vm5 = vcmp.lt.s32.totalorder %v3005_v4, 768  ;;  %v3043_v21 = vsub.f32 %v3027_v7, %v3035_v2  ;;  %v3044_v33 = vsub.f32 %v3028_v5, %v3036_v19  ;;  %v3083_v8 = vld [vmem:[%s3812_s23 + $0x728] sm:$0xff]  ;;  %v3085_v19 = vld [vmem:[%s3812_s23 + $0x738] sm:$0xff] }
 0x23b   : > { %v3008_v27 = vsel %vm3006_vm4, %v2994_v18, 0.0  ;;  %v3009_v28 = vsel %vm3006_vm4, %v2995_v55, 0.0  ;;  %v3010_v29 = vsel %vm3006_vm4, %v2996_v57, 0.0  ;;  %v3011_v22 = vsel %vm3006_vm4, %v2997_v54, 0.0  ;;  %v3080_v18 = vld [vmem:[%s3812_s23 + $0x710] sm:$0xff] }
 0x23c   : > { %v3012_v26 = vsel %vm3007_vm5, %v2998_v58, 0.0  ;;  %v3045_v34 = vsub.f32 %v3029_v11, %v3037_v20  ;;  %v3046_v35 = vsub.f32 %v3030_v12, %v3038_v9  ;;  %v3013_v32 = vsel %vm3007_vm5, %v2999_v60, 0.0  ;;  %v3089_v60 = vld [vmem:[%s3818_s19 + $0x718] sm:$0xff]  ;;  %v3084_v11 = vld [vmem:[%s3812_s23 + $0x730] sm:$0xff]  ;;  %v3091_v12 = vld [vmem:[%s3818_s19 + $0x728] sm:$0xff] }
 0x23d   : > { %v3016_v36 = vadd.f32 %v3008_v27, %v2966_v59  ;;  %v3017_v31 = vadd.f32 %v3009_v28, %v2967_v63  ;;  %v3018_v37 = vadd.f32 %v3010_v29, %v2968_v1  ;;  %v3014_v23 = vsel %vm3007_vm5, %v3000_v13, 0.0  ;;  %v3082_v63 = vld [vmem:[%s3812_s23 + $0x720] sm:$0xff]  ;;  %v3092_v20 = vld [vmem:[%s3818_s19 + $0x730] sm:$0xff]  ;;  %v3093_v9 = vld [vmem:[%s3818_s19 + $0x738] sm:$0xff] }
 0x23e   : > { %v3019_v39 = vadd.f32 %v3011_v22, %v2969_v6  ;;  %v3047_v38 = vsub.f32 %v3031_v30, %v3039_v25  ;;  %v3048_v40 = vmul.f32 %v3040_v17, %v3040_v17  ;;  %v3015_v44 = vsel %vm3007_vm5, %v3001_v16, 0.0  ;;  %v3132_v25 = vld [vmem:[%s3812_s23 + $0x740] sm:$0xff] }
 0x23f   : > { %v3049_v45 = vmul.f32 %v3041_v10, %v3041_v10  ;;  %v3050_v46 = vmul.f32 %v3042_v15, %v3042_v15  ;;  %v3051_v41 = vmul.f32 %v3043_v21, %v3043_v21  ;;  %v3020_v49 = vadd.f32 %v3016_v36, %v3012_v26  ;;  %v3134_v36 = vld [vmem:[%s3812_s23 + $0x750] sm:$0xff] }
 0x240   : > { %v3021_v50 = vadd.f32 %v3017_v31, %v3013_v32  ;;  %v3052_v51 = vmul.f32 %v3044_v33, %v3044_v33  ;;  %v3057_v48 = vstv %s3056_s3  ;;  %v3022_v55 = vadd.f32 %v3018_v37, %v3014_v23  ;;  %v3133_v32 = vld [vmem:[%s3812_s23 + $0x748] sm:$0xff]  ;;  %v3140_v31 = vld [vmem:[%s3818_s19 + $0x740] sm:$0xff] }
 0x241   : > { %v3053_v57 = vmul.f32 %v3045_v34, %v3045_v34  ;;  %v3058_v54 = vadd.s32 %v3057_v48, %v4356_v14  ;;  %v3059_v58 = vadd.s32 %v3057_v48, %v4369_v24  ;;  %v3023_v56 = vadd.f32 %v3019_v39, %v3015_v44  ;;  %v3141_v44 = vld [vmem:[%s3818_s19 + $0x748] sm:$0xff] }
 0x242   : > { %v3054_v0 = vmul.f32 %v3046_v35, %v3046_v35  ;;  %v3055_v59 = vmul.f32 %v3047_v38, %v3047_v38  ;;  %v3094_v7 = vsub.f32 %v3078_v47, %v3086_v43  ;;  %v3095_v2 = vsub.f32 %v3079_v42, %v3087_v52  ;;  %v3136_v43 = vld [vmem:[%s3812_s23 + $0x760] sm:$0xff]  ;;  %v3137_v52 = vld [vmem:[%s3812_s23 + $0x768] sm:$0xff] }
 0x243   : > { %vm3060_vm6 = vcmp.lt.s32.totalorder %v3058_v54, 768  ;;  %vm3061_vm7 = vcmp.lt.s32.totalorder %v3059_v58, 768  ;;  %v3096_v1 = vsub.f32 %v3080_v18, %v3088_v53  ;;  %v3097_v17 = vsub.f32 %v3081_v62, %v3089_v60  ;;  %v3138_v53 = vld [vmem:[%s3812_s23 + $0x770] sm:$0xff]  ;;  %v3145_v62 = vld [vmem:[%s3818_s19 + $0x768] sm:$0xff] }
 0x244   : > { %v3062_v6 = vsel %vm3060_vm6, %v3048_v40, 0.0  ;;  %v3063_v3 = vsel %vm3060_vm6, %v3049_v45, 0.0  ;;  %v3064_v4 = vsel %vm3060_vm6, %v3050_v46, 0.0  ;;  %v3065_v5 = vsel %vm3060_vm6, %v3051_v41, 0.0  ;;  %v3135_v40 = vld [vmem:[%s3812_s23 + $0x758] sm:$0xff]  ;;  %v3142_v45 = vld [vmem:[%s3818_s19 + $0x750] sm:$0xff] }
 0x245   : > { %v3066_v13 = vsel %vm3061_vm7, %v3052_v51, 0.0  ;;  %v3067_v16 = vsel %vm3061_vm7, %v3053_v57, 0.0  ;;  %v3098_v10 = vsub.f32 %v3082_v63, %v3090_v61  ;;  %v3070_v15 = vadd.f32 %v3062_v6, %v3020_v49  ;;  %v3143_v49 = vld [vmem:[%s3818_s19 + $0x758] sm:$0xff] }
 0x246   : > { %v3071_v21 = vadd.f32 %v3063_v3, %v3021_v50  ;;  %v3072_v27 = vadd.f32 %v3064_v4, %v3022_v55  ;;  %v3073_v28 = vadd.f32 %v3065_v5, %v3023_v56  ;;  %v3068_v29 = vsel %vm3061_vm7, %v3054_v0, 0.0  ;;  %v3144_v50 = vld [vmem:[%s3818_s19 + $0x760] sm:$0xff]  ;;  %v3139_v55 = vld [vmem:[%s3812_s23 + $0x778] sm:$0xff]  ;;  %v3146_v56 = vld [vmem:[%s3818_s19 + $0x770] sm:$0xff] }
 0x247   : > { %v3069_v22 = vsel %vm3061_vm7, %v3055_v59, 0.0  ;;  %v3099_v30 = vsub.f32 %v3083_v8, %v3091_v12  ;;  %v3100_v26 = vsub.f32 %v3084_v11, %v3092_v20  ;;  %v3101_v33 = vsub.f32 %v3085_v19, %v3093_v9  ;;  %v3147_v0 = vld [vmem:[%s3818_s19 + $0x778] sm:$0xff] }
 0x248   : > { %v3102_v34 = vmul.f32 %v3094_v7, %v3094_v7  ;;  %v3103_v35 = vmul.f32 %v3095_v2, %v3095_v2  ;;  %v3074_v37 = vadd.f32 %v3070_v15, %v3066_v13  ;;  %v3075_v23 = vadd.f32 %v3071_v21, %v3067_v16  ;;  %v3187_v15 = vld [vmem:[%s3812_s23 + $0x788] sm:$0xff]  ;;  %v3188_v21 = vld [vmem:[%s3812_s23 + $0x790] sm:$0xff] }
 0x249   : > { %v3104_v39 = vmul.f32 %v3096_v1, %v3096_v1  ;;  %v3105_v38 = vmul.f32 %v3097_v17, %v3097_v17  ;;  %v3076_v46 = vadd.f32 %v3072_v27, %v3068_v29  ;;  %v3077_v41 = vadd.f32 %v3073_v28, %v3069_v22 }
 0x24a   : > { %v3106_v47 = vmul.f32 %v3098_v10, %v3098_v10  ;;  %v3111_v42 = vstv %s3110_s4  ;;  %v3107_v51 = vmul.f32 %v3099_v30, %v3099_v30  ;;  %v3148_v57 = vsub.f32 %v3132_v25, %v3140_v31  ;;  %v3186_v10 = vld [vmem:[%s3812_s23 + $0x780] sm:$0xff]  ;;  %v3189_v30 = vld [vmem:[%s3812_s23 + $0x798] sm:$0xff]  ;;  %v3191_v31 = vld [vmem:[%s3812_s23 + $0x7a8] sm:$0xff] }
 0x24b   : > { %v3112_v48 = vadd.s32 %v3111_v42, %v4356_v14  ;;  %v3113_v18 = vadd.s32 %v3111_v42, %v4369_v24  ;;  %v3108_v54 = vmul.f32 %v3100_v26, %v3100_v26  ;;  %v3109_v58 = vmul.f32 %v3101_v33, %v3101_v33  ;;  %v3194_v25 = vld [vmem:[%s3818_s19 + $0x780] sm:$0xff]  ;;  %v3195_v26 = vld [vmem:[%s3818_s19 + $0x788] sm:$0xff] }
 0x24c   : > { %v3149_v59 = vsub.f32 %v3133_v32, %v3141_v44  ;;  %v3150_v63 = vsub.f32 %v3134_v36, %v3142_v45  ;;  %v3151_v60 = vsub.f32 %v3135_v40, %v3143_v49  ;;  %v3152_v61 = vsub.f32 %v3136_v43, %v3144_v50  ;;  %v3190_v36 = vld [vmem:[%s3812_s23 + $0x7a0] sm:$0xff]  ;;  %v3192_v45 = vld [vmem:[%s3812_s23 + $0x7b0] sm:$0xff]  ;;  %v3199_v43 = vld [vmem:[%s3818_s19 + $0x7a8] sm:$0xff] }
 0x24d   : > { %vm3114_vm8 = vcmp.lt.s32.totalorder %v3112_v48, 768  ;;  %vm3115_vm9 = vcmp.lt.s32.totalorder %v3113_v18, 768  ;;  %v3153_v6 = vsub.f32 %v3137_v52, %v3145_v62  ;;  %v3154_v3 = vsub.f32 %v3138_v53, %v3146_v56  ;;  %v3200_v49 = vld [vmem:[%s3818_s19 + $0x7b0] sm:$0xff]  ;;  %v3201_v50 = vld [vmem:[%s3818_s19 + $0x7b8] sm:$0xff] }
 0x24e   : > { %v3116_v7 = vsel %vm3114_vm8, %v3102_v34, 0.0  ;;  %v3117_v8 = vsel %vm3114_vm8, %v3103_v35, 0.0  ;;  %v3118_v2 = vsel %vm3114_vm8, %v3104_v39, 0.0  ;;  %v3119_v1 = vsel %vm3114_vm8, %v3105_v38, 0.0 }
 0x24f   : > { %v3155_v4 = vsub.f32 %v3139_v55, %v3147_v0  ;;  %v3156_v5 = vmul.f32 %v3148_v57, %v3148_v57  ;;  %v3120_v11 = vsel %vm3115_vm9, %v3106_v47, 0.0  ;;  %v3124_v12 = vadd.f32 %v3116_v7, %v3074_v37  ;;  %v3196_v37 = vld [vmem:[%s3818_s19 + $0x790] sm:$0xff] }
 0x250   : > { %v3125_v13 = vadd.f32 %v3117_v8, %v3075_v23  ;;  %v3126_v16 = vadd.f32 %v3118_v2, %v3076_v46  ;;  %v3121_v19 = vsel %vm3115_vm9, %v3107_v51, 0.0  ;;  %v3122_v20 = vsel %vm3115_vm9, %v3108_v54, 0.0  ;;  %v3197_v23 = vld [vmem:[%s3818_s19 + $0x798] sm:$0xff] }
 0x251   : > { %v3127_v9 = vadd.f32 %v3119_v1, %v3077_v41  ;;  %v3157_v17 = vmul.f32 %v3149_v59, %v3149_v59  ;;  %v3123_v27 = vsel %vm3115_vm9, %v3109_v58, 0.0  ;;  %v3158_v28 = vmul.f32 %v3150_v63, %v3150_v63  ;;  %v3193_v46 = vld [vmem:[%s3812_s23 + $0x7b8] sm:$0xff]  ;;  %v3198_v41 = vld [vmem:[%s3818_s19 + $0x7a0] sm:$0xff] }
 0x252   : > { %v3159_v29 = vmul.f32 %v3151_v60, %v3151_v60  ;;  %v3160_v22 = vmul.f32 %v3152_v61, %v3152_v61  ;;  %v3128_v33 = vadd.f32 %v3124_v12, %v3120_v11  ;;  %v3161_v34 = vmul.f32 %v3153_v6, %v3153_v6  ;;  %v3240_v6 = vld [vmem:[%s3812_s23 + $0x7c0] sm:$0xff]  ;;  %v3241_v12 = vld [vmem:[%s3812_s23 + $0x7c8] sm:$0xff] }
 0x253   : > { %v3162_v35 = vmul.f32 %v3154_v3, %v3154_v3  ;;  %v3165_v32 = vstv %s3164_s7  ;;  %v3129_v39 = vadd.f32 %v3125_v13, %v3121_v19  ;;  %v3130_v38 = vadd.f32 %v3126_v16, %v3122_v20  ;;  %v3242_v13 = vld [vmem:[%s3812_s23 + $0x7d0] sm:$0xff]  ;;  %v3248_v16 = vld [vmem:[%s3818_s19 + $0x7c0] sm:$0xff] }
 0x254   : > { %v3166_v40 = vadd.s32 %v3165_v32, %v4356_v14  ;;  %v3167_v44 = vadd.s32 %v3165_v32, %v4369_v24  ;;  %v3131_v47 = vadd.f32 %v3127_v9, %v3123_v27  ;;  %v3163_v42 = vmul.f32 %v3155_v4, %v3155_v4  ;;  %v3250_v27 = vld [vmem:[%s3818_s19 + $0x7d0] sm:$0xff] }
 0x255   : > { %v3202_v51 = vsub.f32 %v3186_v10, %v3194_v25  ;;  %v3203_v48 = vsub.f32 %v3187_v15, %v3195_v26  ;;  %v3204_v18 = vsub.f32 %v3188_v21, %v3196_v37  ;;  %v3205_v52 = vsub.f32 %v3189_v30, %v3197_v23  ;;  %v3243_v10 = vld [vmem:[%s3812_s23 + $0x7d8] sm:$0xff]  ;;  %v3244_v15 = vld [vmem:[%s3812_s23 + $0x7e0] sm:$0xff]  ;;  %v3249_v21 = vld [vmem:[%s3818_s19 + $0x7c8] sm:$0xff] }
 0x256   : > { %vm3168_vm10 = vcmp.lt.s32.totalorder %v3166_v40, 768  ;;  %vm3169_vm11 = vcmp.lt.s32.totalorder %v3167_v44, 768  ;;  %v3206_v58 = vsub.f32 %v3190_v36, %v3198_v41  ;;  %v3207_v62 = vsub.f32 %v3191_v31, %v3199_v43  ;;  %v3245_v25 = vld [vmem:[%s3812_s23 + $0x7e8] sm:$0xff]  ;;  %v3246_v26 = vld [vmem:[%s3812_s23 + $0x7f0] sm:$0xff]  ;;  %v3252_v36 = vld [vmem:[%s3818_s19 + $0x7e0] sm:$0xff] }
 0x257   : > { %v3170_v53 = vsel %vm3168_vm10, %v3156_v5, 0.0  ;;  %v3171_v55 = vsel %vm3168_vm10, %v3157_v17, 0.0  ;;  %v3172_v57 = vsel %vm3168_vm10, %v3158_v28, 0.0  ;;  %v3173_v54 = vsel %vm3168_vm10, %v3159_v29, 0.0  ;;  %v3253_v31 = vld [vmem:[%s3818_s19 + $0x7e8] sm:$0xff]  ;;  %v3254_v37 = vld [vmem:[%s3818_s19 + $0x7f0] sm:$0xff] }
 0x258   : > { %v3208_v56 = vsub.f32 %v3192_v45, %v3200_v49  ;;  %v3209_v0 = vsub.f32 %v3193_v46, %v3201_v50  ;;  %v3174_v59 = vsel %vm3169_vm11, %v3160_v22, 0.0  ;;  %v3178_v63 = vadd.f32 %v3170_v53, %v3128_v33  ;;  %v3251_v33 = vld [vmem:[%s3818_s19 + $0x7d8] sm:$0xff] }
 0x259   : > { %v3179_v60 = vadd.f32 %v3171_v55, %v3129_v39  ;;  %v3180_v61 = vadd.f32 %v3172_v57, %v3130_v38  ;;  %v3175_v7 = vsel %vm3169_vm11, %v3161_v34, 0.0  ;;  %v3176_v8 = vsel %vm3169_vm11, %v3162_v35, 0.0  ;;  %v3247_v39 = vld [vmem:[%s3812_s23 + $0x7f8] sm:$0xff] }
 0x25a   : > { %v3181_v2 = vadd.f32 %v3173_v54, %v3131_v47  ;;  %v3210_v1 = vmul.f32 %v3202_v51, %v3202_v51  ;;  %v3177_v3 = vsel %vm3169_vm11, %v3163_v42, 0.0  ;;  %v3211_v4 = vmul.f32 %v3203_v48, %v3203_v48  ;;  %v3255_v38 = vld [vmem:[%s3818_s19 + $0x7f8] sm:$0xff] }
 0x25b   : > { %v3212_v5 = vmul.f32 %v3204_v18, %v3204_v18  ;;  %v3213_v11 = vmul.f32 %v3205_v52, %v3205_v52  ;;  %v3182_v19 = vadd.f32 %v3178_v63, %v3174_v59  ;;  %v3214_v20 = vmul.f32 %v3206_v58, %v3206_v58 }
 0x25c   : > { %v3215_v9 = vmul.f32 %v3207_v62, %v3207_v62  ;;  %v3219_v17 = vstv %s3218_s8  ;;  %v3183_v28 = vadd.f32 %v3179_v60, %v3175_v7  ;;  %v3184_v29 = vadd.f32 %v3180_v61, %v3176_v8 }
 0x25d   : > { %v3220_v22 = vadd.s32 %v3219_v17, %v4356_v14  ;;  %v3221_v30 = vadd.s32 %v3219_v17, %v4369_v24  ;;  %v3185_v34 = vadd.f32 %v3181_v2, %v3177_v3  ;;  %v3216_v35 = vmul.f32 %v3208_v56, %v3208_v56 }
 0x25e   : > { %v3217_v32 = vmul.f32 %v3209_v0, %v3209_v0  ;;  %v3256_v23 = vsub.f32 %v3240_v6, %v3248_v16  ;;  %v3257_v40 = vsub.f32 %v3241_v12, %v3249_v21  ;;  %v3258_v44 = vsub.f32 %v3242_v13, %v3250_v27  ;;  %v3294_v27 = vld [vmem:[#allocation7] sm:$0xff] }
 0x25f   : > { %vm3222_vm12 = vcmp.lt.s32.totalorder %v3220_v22, 768  ;;  %vm3223_vm13 = vcmp.lt.s32.totalorder %v3221_v30, 768  ;;  %v3259_v42 = vsub.f32 %v3243_v10, %v3251_v33  ;;  %v3260_v43 = vsub.f32 %v3244_v15, %v3252_v36 }
 0x260   : > { %v3224_v45 = vsel %vm3222_vm12, %v3210_v1, 0.0  ;;  %v3225_v46 = vsel %vm3222_vm12, %v3211_v4, 0.0  ;;  %v3226_v41 = vsel %vm3222_vm12, %v3212_v5, 0.0  ;;  %v3227_v47 = vsel %vm3222_vm12, %v3213_v11, 0.0 }
 0x261   : > { %v3261_v49 = vsub.f32 %v3245_v25, %v3253_v31  ;;  %v3262_v50 = vsub.f32 %v3246_v26, %v3254_v37  ;;  %v3228_v51 = vsel %vm3223_vm13, %v3214_v20, 0.0  ;;  %v3229_v48 = vsel %vm3223_vm13, %v3215_v9, 0.0 }
 0x262   : > { %v3263_v18 = vsub.f32 %v3247_v39, %v3255_v38  ;;  %v3264_v52 = vmul.f32 %v3256_v23, %v3256_v23  ;;  %v3232_v53 = vadd.f32 %v3224_v45, %v3182_v19  ;;  %v3233_v55 = vadd.f32 %v3225_v46, %v3183_v28  ;;  %v3296_v28 = vld [vmem:[#allocation7 + $0x10] sm:$0xff] }
 0x263   : > { %v3234_v57 = vadd.f32 %v3226_v41, %v3184_v29  ;;  %v3235_v54 = vadd.f32 %v3227_v47, %v3185_v34  ;;  %v3230_v58 = vsel %vm3223_vm13, %v3216_v35, 0.0  ;;  %v3231_v62 = vsel %vm3223_vm13, %v3217_v32, 0.0  ;;  %v3297_v29 = vld [vmem:[#allocation7 + $0x18] sm:$0xff] }
 0x264   : > { %v3265_v56 = vmul.f32 %v3257_v40, %v3257_v40  ;;  %v3266_v0 = vmul.f32 %v3258_v44, %v3258_v44  ;;  %v3267_v59 = vmul.f32 %v3259_v42, %v3259_v42  ;;  %v3268_v63 = vmul.f32 %v3260_v43, %v3260_v43 }
 0x265   : > { %v3269_v60 = vmul.f32 %v3261_v49, %v3261_v49  ;;  %v3273_v61 = vstv %s3272_s17  ;;  %v3270_v7 = vmul.f32 %v3262_v50, %v3262_v50  ;;  %v3271_v8 = vmul.f32 %v3263_v18, %v3263_v18 }
 0x266   : > { %v3274_v2 = vadd.s32 %v3273_v61, %v4356_v14  ;;  %v3275_v1 = vadd.s32 %v3273_v61, %v4369_v24  ;;  %v3236_v6 = vadd.f32 %v3232_v53, %v3228_v51  ;;  %v3237_v3 = vadd.f32 %v3233_v55, %v3229_v48  ;;  %v3295_v24 = vld [vmem:[#allocation7 + $0x8] sm:$0xff] }
 0x267   : > { %v3238_v4 = vadd.f32 %v3234_v57, %v3230_v58  ;;  %v3239_v5 = vadd.f32 %v3235_v54, %v3231_v62 }
 0x268   : > { %vm3276_vm14 = vcmp.lt.s32.totalorder %v3274_v2, 768  ;;  %vm3277_vm15 = vcmp.lt.s32.totalorder %v3275_v1, 768 }
 0x269   : > { %v3278_v11 = vsel %vm3276_vm14, %v3264_v52, 0.0  ;;  %v3279_v12 = vsel %vm3276_vm14, %v3265_v56, 0.0  ;;  %v3280_v13 = vsel %vm3276_vm14, %v3266_v0, 0.0  ;;  %v3281_v16 = vsel %vm3276_vm14, %v3267_v59, 0.0 }
 0x26a   : > { %v3282_v19 = vsel %vm3277_vm15, %v3268_v63, 0.0  ;;  %v3283_v20 = vsel %vm3277_vm15, %v3269_v60, 0.0  ;;  %v3284_v9 = vsel %vm3277_vm15, %v3270_v7, 0.0  ;;  %v3285_v17 = vsel %vm3277_vm15, %v3271_v8, 0.0 }
 0x26b   : > { %v3286_v10 = vadd.f32 %v3278_v11, %v3236_v6  ;;  %v3287_v15 = vadd.f32 %v3279_v12, %v3237_v3  ;;  %v3288_v21 = vadd.f32 %v3280_v13, %v3238_v4  ;;  %v3289_v14 = vadd.f32 %v3281_v16, %v3239_v5 }
 0x26d   : > { %v3290_v22 = vadd.f32 %v3286_v10, %v3282_v19  ;;  %v3291_v30 = vadd.f32 %v3287_v15, %v3283_v20  ;;  %v3292_v25 = vadd.f32 %v3288_v21, %v3284_v9  ;;  %v3293_v26 = vadd.f32 %v3289_v14, %v3285_v17 }
 0x26f   : > { %v3298_v33 = vadd.f32 %v3294_v27, %v3290_v22  ;;  %v3299_v34 = vadd.f32 %v3295_v24, %v3291_v30  ;;  %v3300_v35 = vadd.f32 %v3296_v28, %v3292_v25  ;;  %v3301_v32 = vadd.f32 %v3297_v29, %v3293_v26 }
 0x271   : > { %3302 = vst [vmem:[#allocation7] sm:$0xff] %v3298_v33  ;;  %3303 = vst [vmem:[#allocation7 + $0x8] sm:$0xff] %v3299_v34 }
 0x272   : > { %3304 = vst [vmem:[#allocation7 + $0x10] sm:$0xff] %v3300_v35  ;;  %3305 = vst [vmem:[#allocation7 + $0x18] sm:$0xff] %v3301_v32 }
 0x273 PF: > { %p5005_p1 = scmp.eq.s32.totalorder %s3404_s15, 1  ;;  %s3652_s19 = smov [#allocation7]  }
 0x274   : > { %s3316_s6 = sshll.u32 %s3652_s19, 4  ;;  %s3317_s6 = int_to_ptr.vmem [resolvable:$true] %s3316_s6 }
 0x275   : > { %s3559_s26 = scalar_lea.vmem %s3317_s6, 512  ;;  %p3566_p4 = scmp.lt.s32.totalorder %s3317_s6, %s3317_s6 }
 0x276   : > { %p3560_p2 = scmp.ne.s32.totalorder %s3317_s6, %s3559_s26  ;;  %p3567_p6 = scmp.lt.s32.totalorder %s3559_s26, %s3559_s26 }
 0x278   : > { %p3561_p13 = pnand %p3560_p2, %p5005_p1  ;;  %p3568_p8 = por %p3567_p6, %p3566_p4 }
 0x27a   : > { %p3562_p10 = pneg %p3561_p13 }
 0x27c   : > { %p3569_p5 = pnand %p3568_p8, %p3562_p10 }
 0x27e   : > { %3572 = shalt.err (!%p3569_p5)
}
 0x27f   : > { %s3573_s15 = scalar_lea.hbm %s5051_s2, 512 }
 0x280   : > { %p3574_p9 = scmp.ne.s32.totalorder %s5051_s2, %s3573_s15  ;;  %p3579_p12 = scmp.lt.u32.totalorder %s3573_s15, %s5051_s2 }
 0x282   : > { %p3575_p11 = pnand %p3574_p9, %p5005_p1 }
 0x284   : > { %p3576_p3 = pneg %p3575_p11 }
 0x286   : > { %p3581_p7 = pnand %p3579_p12, %p3576_p3 }
 0x288   : > { %3584 = shalt.err (!%p3581_p7)
}
 0x289   : > { %3444 = dma.vmem_to_hbm [thread:$0]  (%p5005_p1), %s3317_s6, 512, %s5051_s2, [#allocation4]  }
 0x28a   : > { %3618 = dma.done.wait (%p5005_p1), [#allocation4], 512  }
 0x28b   : > { %3620 = vsyncadd (%p5005_p1), [#allocation4], 4294966784 }
 0x28c PF: > { %s19_s14 = sadd.s32 1, %s3643_s14   ;;  %s5055_s9 = smov %s3627_s10 }
 0x28d   : > { %p16_p0 = scmp.ge.s32.totalorder %s19_s14, 4   ;;  %s5056_s10 = smov %s3631_s11 }
 0x28e   : > { %s5057_s11 = smov %s3718_s21  ;;  %s5058_s12 = smov %s3639_s13 }
 0x28f   : > { %s5059_s13 = smov %s5061_s16  ;;  %18 = sbr.rel (!%p16_p0) target bundleno = 7 (0x7), region = 91 }
 0x296   :  { %3329 = vsyncpa [#allocation3], 1 }
 0x297   :  { %3331 = vsyncpa [#allocation3 + $0x1], 1 }
 0x298   :  { %3332 = vsyncpa [#allocation6], 1 }
 0x299   :  { %3334 = vsyncpa [#allocation6 + $0x1], 1 }
 0x29a   :  { %3335 = vsyncpa [#allocation4], 1 }
 0x29b   :  { %3337 = vsyncpa [#allocation4 + $0x1], 1 }

</bundles_post_ra>
